<compile_context>
chip_gen: v5e
topology: v5e:2x2
jax: 0.10.0
libtpu: 0.0.40
codegen_flags: <defaults>
</compile_context>

<pallas_src>
import functools

import jax
import jax.numpy as jnp
from jax.experimental import pallas as pl
from jax.experimental.pallas import tpu as pltpu

_LN_EPS = 1e-5
_NEG_INF = -1e9


# ----------------------------------------------------------------------------
# In-kernel helpers (plain functions on arrays, traced inside Pallas kernels)
# ----------------------------------------------------------------------------
def _relu(x):
    return jnp.maximum(x, 0.0)


def _layer_norm(x, gamma, beta, eps=_LN_EPS):
    mu = jnp.mean(x, axis=-1, keepdims=True)
    d = x - mu
    var = jnp.mean(d * d, axis=-1, keepdims=True)
    return d * jax.lax.rsqrt(var + eps) * gamma + beta


def _mha_accumulate(qm, km, vm, key_mask_row, sa_mul, w_block, acc, *, num_head, inv_scale):
    """Masked multi-head attention for one (query-set, key-set) direction.

    qm:[Lq,O] km,vm:[Lk,O] key_mask_row:[1,Lk] sa_mul:[Lq,Lk] or None.
    Each head's [Lq,dh] context is pushed directly through the matching rows of the
    output-projection weight block w_block[h*dh:(h+1)*dh, :] and accumulated into acc.
    Mask/scale order matches torch: (scores * sa).masked_fill(-1e9) / sqrt(dh).
    """
    dh = qm.shape[-1] // num_head
    for h in range(num_head):
        lo = h * dh
        s = jnp.dot(qm[:, lo:lo + dh], km[:, lo:lo + dh].T,
                    preferred_element_type=jnp.float32)
        if sa_mul is not None:
            s = s * sa_mul
        s = jnp.where(key_mask_row == 0.0, _NEG_INF, s) * inv_scale
        s = s - jnp.max(s, axis=-1, keepdims=True)
        p = jnp.exp(s)
        p = p * pl.reciprocal(jnp.sum(p, axis=-1, keepdims=True), approx=True)
        ctx = jnp.dot(p, vm[:, lo:lo + dh], preferred_element_type=jnp.float32)
        acc = acc + jnp.dot(ctx, w_block[lo:lo + dh, :],
                            preferred_element_type=jnp.float32)
    return acc


# ----------------------------------------------------------------------------
# Pallas kernels
# ----------------------------------------------------------------------------
def _init_proj_kernel(v_ref, q_ref, c_ref, wv_ref, bv_ref, wq_ref, bq_ref,
                      wc_ref, bc_ref, vo_ref, qo_ref, co_ref):
    vo_ref[...] = (jnp.dot(v_ref[...], wv_ref[...], preferred_element_type=jnp.float32)
                   + bv_ref[...]).astype(vo_ref.dtype)
    qo_ref[...] = (jnp.dot(q_ref[...], wq_ref[...], preferred_element_type=jnp.float32)
                   + bq_ref[...]).astype(qo_ref.dtype)
    co_ref[...] = (jnp.dot(c_ref[...], wc_ref[...], preferred_element_type=jnp.float32)
                   + bc_ref[...]).astype(co_ref.dtype)


def _spatial_kernel(xT_ref, w1t_ref, b1_ref, w2t_ref, b2_ref, o_ref):
    # xT: [17, P] (pair features in lanes). Hidden [512, P] stays in VMEM; output is a
    # lane-dense [1, P] row (sigmoid(...) + 1), never a lane-width-1 column.
    h = _relu(jnp.dot(w1t_ref[...], xT_ref[0], preferred_element_type=jnp.float32)
              + b1_ref[...])
    s = jnp.dot(w2t_ref[...], h, preferred_element_type=jnp.float32) + b2_ref[...]
    o_ref[0] = (jax.nn.sigmoid(s) + 1.0).astype(o_ref.dtype)


def _inter_block_kernel(
        v_ref, q_ref, c_ref,
        vmask_c_ref, qmask_c_ref, cmask_c_ref,          # [1,L,1] column masks
        vmask_e_ref, qmask_r_ref, cmask_e_ref,          # [1,1,L(+1)] row masks (v,c extended)
        sa_ref, saT_ref,                                # [1,Nv+1,Lc+1], [1,Lc+1,Nv+1]
        wqkv_ref, bqkv_ref, mem_ref,                    # [3,O,3O], [3,1,3O], [4,1,O]
        wout_ref, bout_ref, lng_ref, lnb_ref,           # [3,3O,O], [3,1,O], [3,1,O], [3,1,O]
        vo_ref, qo_ref, co_ref,
        vke_ref, vve_ref, cke_ref, cve_ref,             # VMEM scratch for extended K/V
        *, num_head):
    v = v_ref[0]
    q = q_ref[0]
    c = c_ref[0]
    n_v, O = v.shape
    n_c = c.shape[0]
    dh = O // num_head
    inv_scale = 1.0 / float(dh) ** 0.5

    # fused ReLU -> QKV projection -> key-padding mask (torch order)
    vt = (jnp.dot(_relu(v), wqkv_ref[0], preferred_element_type=jnp.float32)
          + bqkv_ref[0]) * vmask_c_ref[0]
    qt = (jnp.dot(_relu(q), wqkv_ref[1], preferred_element_type=jnp.float32)
          + bqkv_ref[1]) * qmask_c_ref[0]
    ct = (jnp.dot(_relu(c), wqkv_ref[2], preferred_element_type=jnp.float32)
          + bqkv_ref[2]) * cmask_c_ref[0]

    v_q = vt[:, O:2 * O]
    q_k, q_q, q_v = qt[:, :O], qt[:, O:2 * O], qt[:, 2 * O:]
    c_q = ct[:, O:2 * O]

    # extended keys / values: learned memory token appended as the LAST row
    vke_ref[:n_v, :] = vt[:, :O]
    vke_ref[n_v:, :] = mem_ref[0]
    vve_ref[:n_v, :] = vt[:, 2 * O:]
    vve_ref[n_v:, :] = mem_ref[1]
    cke_ref[:n_c, :] = ct[:, :O]
    cke_ref[n_c:, :] = mem_ref[2]
    cve_ref[:n_c, :] = ct[:, 2 * O:]
    cve_ref[n_c:, :] = mem_ref[3]
    v_k_e, v_v_e = vke_ref[...], vve_ref[...]
    c_k_e, c_v_e = cke_ref[...], cve_ref[...]

    vmask_e = vmask_e_ref[0]
    qmask_r = qmask_r_ref[0]
    cmask_e = cmask_e_ref[0]
    sa_c2v = sa_ref[0][:n_v, :]      # (v object, c key incl. memory) pairs
    sa_v2c = saT_ref[0][:n_c, :]     # (c object, v key incl. memory) pairs

    w_vo, w_qo, w_co = wout_ref[0], wout_ref[1], wout_ref[2]

    # updated_v = cat([v, q2v, c2v]) @ Wv + bv   (weight rows selected per segment/head)
    acc_v = jnp.dot(v, w_vo[:O, :], preferred_element_type=jnp.float32) + bout_ref[0]
    acc_v = _mha_accumulate(v_q, q_k, q_v, qmask_r, None, w_vo[O:2 * O, :], acc_v,
                            num_head=num_head, inv_scale=inv_scale)            # q2v
    acc_v = _mha_accumulate(v_q, c_k_e, c_v_e, cmask_e, sa_c2v, w_vo[2 * O:, :], acc_v,
                            num_head=num_head, inv_scale=inv_scale)            # c2v

    acc_q = jnp.dot(q, w_qo[:O, :], preferred_element_type=jnp.float32) + bout_ref[1]
    acc_q = _mha_accumulate(q_q, v_k_e, v_v_e, vmask_e, None, w_qo[O:2 * O, :], acc_q,
                            num_head=num_head, inv_scale=inv_scale)            # v2q
    acc_q = _mha_accumulate(q_q, c_k_e, c_v_e, cmask_e, None, w_qo[2 * O:, :], acc_q,
                            num_head=num_head, inv_scale=inv_scale)            # c2q

    acc_c = jnp.dot(c, w_co[:O, :], preferred_element_type=jnp.float32) + bout_ref[2]
    acc_c = _mha_accumulate(c_q, v_k_e, v_v_e, vmask_e, sa_v2c, w_co[O:2 * O, :], acc_c,
                            num_head=num_head, inv_scale=inv_scale)            # v2c
    acc_c = _mha_accumulate(c_q, q_k, q_v, qmask_r, None, w_co[2 * O:, :], acc_c,
                            num_head=num_head, inv_scale=inv_scale)            # q2c

    # fused residual + LayerNorm1
    vo_ref[0] = _layer_norm(v + acc_v, lng_ref[0], lnb_ref[0]).astype(vo_ref.dtype)
    qo_ref[0] = _layer_norm(q + acc_q, lng_ref[1], lnb_ref[1]).astype(qo_ref.dtype)
    co_ref[0] = _layer_norm(c + acc_c, lng_ref[2], lnb_ref[2]).astype(co_ref.dtype)


def _intra_block_kernel(
        v_ref, q_ref, c_ref,
        vmask_c_ref, qmask_c_ref, cmask_c_ref,
        vmask_e_ref, qmask_r_ref, cmask_e_ref,
        wgate_ref, bgate_ref,                           # [2,O,O], [2,1,O]  (0: v4q, 1: q4v)
        wqkv_ref, bqkv_ref, mem_ref,
        wout_ref, bout_ref, lng_ref, lnb_ref,           # wout [3,O,O]
        vo_ref, qo_ref, co_ref,
        vke_ref, vve_ref, cke_ref, cve_ref,
        *, num_head):
    v = v_ref[0]
    q = q_ref[0]
    c = c_ref[0]
    n_v, O = v.shape
    n_c = c.shape[0]
    dh = O // num_head
    inv_scale = 1.0 / float(dh) ** 0.5

    vmask_e = vmask_e_ref[0]                 # [1, n_v+1]  (memory slot last)
    qmask_r = qmask_r_ref[0]                 # [1, Lq]
    cmask_e = cmask_e_ref[0]                 # [1, n_c+1]
    vmask_r = vmask_e[:, :n_v]               # plain mask

    # masked means -> dynamic gates (fused, no separate kernels)
    v_mean = jnp.dot(vmask_r, v, preferred_element_type=jnp.float32) * pl.reciprocal(
        jnp.sum(vmask_r, axis=-1, keepdims=True), approx=True)
    q_mean = jnp.dot(qmask_r, q, preferred_element_type=jnp.float32) * pl.reciprocal(
        jnp.sum(qmask_r, axis=-1, keepdims=True), approx=True)
    v4q_gate = jax.nn.sigmoid(
        jnp.dot(_relu(v_mean), wgate_ref[0], preferred_element_type=jnp.float32)
        + bgate_ref[0])
    q4v_gate = jax.nn.sigmoid(
        jnp.dot(_relu(q_mean), wgate_ref[1], preferred_element_type=jnp.float32)
        + bgate_ref[1])
    gate_v = 1.0 + q4v_gate                  # scales v queries / keys
    gate_q = 1.0 + v4q_gate                  # scales q queries / keys

    vt = (jnp.dot(_relu(v), wqkv_ref[0], preferred_element_type=jnp.float32)
          + bqkv_ref[0]) * vmask_c_ref[0]
    qt = (jnp.dot(_relu(q), wqkv_ref[1], preferred_element_type=jnp.float32)
          + bqkv_ref[1]) * qmask_c_ref[0]
    ct = (jnp.dot(_relu(c), wqkv_ref[2], preferred_element_type=jnp.float32)
          + bqkv_ref[2]) * cmask_c_ref[0]

    vke_ref[:n_v, :] = vt[:, :O]
    vke_ref[n_v:, :] = mem_ref[0]
    vve_ref[:n_v, :] = vt[:, 2 * O:]
    vve_ref[n_v:, :] = mem_ref[1]
    cke_ref[:n_c, :] = ct[:, :O]
    cke_ref[n_c:, :] = mem_ref[2]
    cve_ref[:n_c, :] = ct[:, 2 * O:]
    cve_ref[n_c:, :] = mem_ref[3]

    new_vq = gate_v * vt[:, O:2 * O]
    new_vk = gate_v * vke_ref[...]           # gate also scales the memory key (torch order)
    v_v_e = vve_ref[...]
    new_qq = gate_q * qt[:, O:2 * O]
    new_qk = gate_q * qt[:, :O]
    q_v = qt[:, 2 * O:]
    c_q = ct[:, O:2 * O]
    c_k_e, c_v_e = cke_ref[...], cve_ref[...]

    w_vo, w_qo, w_co = wout_ref[0], wout_ref[1], wout_ref[2]

    # updated_x = (x + x_update) @ Wo + bo
    acc_v = jnp.dot(v, w_vo, preferred_element_type=jnp.float32) + bout_ref[0]
    acc_v = _mha_accumulate(new_vq, new_vk, v_v_e, vmask_e, None, w_vo, acc_v,
                            num_head=num_head, inv_scale=inv_scale)            # v2v
    acc_q = jnp.dot(q, w_qo, preferred_element_type=jnp.float32) + bout_ref[1]
    acc_q = _mha_accumulate(new_qq, new_qk, q_v, qmask_r, None, w_qo, acc_q,
                            num_head=num_head, inv_scale=inv_scale)            # q2q
    acc_c = jnp.dot(c, w_co, preferred_element_type=jnp.float32) + bout_ref[2]
    acc_c = _mha_accumulate(c_q, c_k_e, c_v_e, cmask_e, None, w_co, acc_c,
                            num_head=num_head, inv_scale=inv_scale)            # c2c

    # fused residual + LayerNorm2
    vo_ref[0] = _layer_norm(v + acc_v, lng_ref[0], lnb_ref[0]).astype(vo_ref.dtype)
    qo_ref[0] = _layer_norm(q + acc_q, lng_ref[1], lnb_ref[1]).astype(qo_ref.dtype)
    co_ref[0] = _layer_norm(c + acc_c, lng_ref[2], lnb_ref[2]).astype(co_ref.dtype)


# ----------------------------------------------------------------------------
# BlockSpec helpers and pallas_call wrappers
# ----------------------------------------------------------------------------
def _data_spec(shape):
    nd = len(shape)
    return pl.BlockSpec((1,) + tuple(shape[1:]), lambda b: (b,) + (0,) * (nd - 1))


def _param_spec(shape):
    nd = len(shape)
    return pl.BlockSpec(tuple(shape), lambda b: (0,) * nd)


def _init_proj(v, q, c, p):
    B, n_v, dv = v.shape
    n_q, n_c = q.shape[1], c.shape[1]
    O = p["v_lin"]["w"].shape[1]
    args = (v.reshape(B * n_v, dv), q.reshape(B * n_q, -1), c.reshape(B * n_c, -1),
            p["v_lin"]["w"], p["v_lin"]["b"].reshape(1, O),
            p["q_lin"]["w"], p["q_lin"]["b"].reshape(1, O),
            p["c_lin"]["w"], p["c_lin"]["b"].reshape(1, O))
    out_shape = (jax.ShapeDtypeStruct((B * n_v, O), v.dtype),
                 jax.ShapeDtypeStruct((B * n_q, O), q.dtype),
                 jax.ShapeDtypeStruct((B * n_c, O), c.dtype))
    vo, qo, co = pl.pallas_call(
        _init_proj_kernel,
        out_shape=out_shape,
        grid=(1,),
        in_specs=[_param_spec(a.shape) for a in args],
        out_specs=tuple(_param_spec(s.shape) for s in out_shape),
    )(*args)
    return vo.reshape(B, n_v, O), qo.reshape(B, n_q, O), co.reshape(B, n_c, O)


def _spatial_attention(p_inter, prep, vbbox, cbbox):
    """IoU / box-feature glue in XLA, fused 2-layer MLP (+sigmoid, +1) in one kernel.

    Memory box is appended as the LAST row (consistent with key ordering elsewhere).
    Returns sa [B, Nv+1, Lc+1] and its transpose.
    """
    B, n_v, _ = vbbox.shape
    n_c = cbbox.shape[1]
    b1 = jnp.concatenate([vbbox, jnp.broadcast_to(p_inter["m_v_b"], (B, 1, 4))], axis=1)
    b2 = jnp.concatenate([cbbox, jnp.broadcast_to(p_inter["m_c_b"], (B, 1, 4))], axis=1)
    ne, me = n_v + 1, n_c + 1

    def feat(b):
        w = b[..., 2] - b[..., 0]
        h = b[..., 3] - b[..., 1]
        cx = (b[..., 0] + b[..., 2]) * 0.5
        cy = (b[..., 1] + b[..., 3]) * 0.5
        return jnp.concatenate(
            [b, w[..., None], h[..., None], cx[..., None], cy[..., None]], axis=-1)

    area_a = jnp.maximum(b1[..., 2] - b1[..., 0], 0.0) * jnp.maximum(b1[..., 3] - b1[..., 1], 0.0)
    area_b = jnp.maximum(b2[..., 2] - b2[..., 0], 0.0) * jnp.maximum(b2[..., 3] - b2[..., 1], 0.0)
    min_pt = jnp.maximum(b1[:, :, None, :2], b2[:, None, :, :2])
    max_pt = jnp.minimum(b1[:, :, None, 2:], b2[:, None, :, 2:])
    inter_wh = jnp.maximum(max_pt - min_pt, 0.0)
    inter = inter_wh[..., 0] * inter_wh[..., 1]
    iou = inter / (area_a[:, :, None] + area_b[:, None, :] - inter + 1e-12)

    f1, f2 = feat(b1), feat(b2)
    s_i = jnp.concatenate(
        [jnp.broadcast_to(f1[:, :, None, :], (B, ne, me, 8)),
         jnp.broadcast_to(f2[:, None, :, :], (B, ne, me, 8)),
         iou[..., None]], axis=-1)                         # [B, ne, me, 17]
    P = ne * me
    xT = jnp.transpose(s_i.reshape(B, P, 17), (0, 2, 1))   # [B, 17, P]  (pairs in lanes)

    args = (xT, prep["sa_w1t"], prep["sa_b1"], prep["sa_w2t"], prep["sa_b2"])
    out = pl.pallas_call(
        _spatial_kernel,
        out_shape=jax.ShapeDtypeStruct((B, 1, P), xT.dtype),
        grid=(B,),
        in_specs=[_data_spec(xT.shape)] + [_param_spec(a.shape) for a in args[1:]],
        out_specs=_data_spec((B, 1, P)),
        compiler_params=pltpu.CompilerParams(dimension_semantics=("parallel",)),
    )(*args)
    sa = out.reshape(B, ne, me)
    return sa, jnp.swapaxes(sa, 1, 2)


def _run_inter(prep, v, q, c, masks, sa, saT, num_head):
    B, n_v, O = v.shape
    n_q, n_c = q.shape[1], c.shape[1]
    out_shape = (jax.ShapeDtypeStruct((B, n_v, O), v.dtype),
                 jax.ShapeDtypeStruct((B, n_q, O), q.dtype),
                 jax.ShapeDtypeStruct((B, n_c, O), c.dtype))
    args = (v, q, c,
            masks["v_col"], masks["q_col"], masks["c_col"],
            masks["v_e_row"], masks["q_row"], masks["c_e_row"],
            sa, saT,
            prep["inter_wqkv"], prep["inter_bqkv"], prep["inter_mem"],
            prep["inter_wout"], prep["inter_bout"], prep["ln1_g"], prep["ln1_b"])
    in_specs = ([_data_spec(a.shape) for a in args[:11]] +
                [_param_spec(a.shape) for a in args[11:]])
    scratch = [pltpu.VMEM((n_v + 1, O), jnp.float32), pltpu.VMEM((n_v + 1, O), jnp.float32),
               pltpu.VMEM((n_c + 1, O), jnp.float32), pltpu.VMEM((n_c + 1, O), jnp.float32)]
    return pl.pallas_call(
        functools.partial(_inter_block_kernel, num_head=num_head),
        out_shape=out_shape,
        grid=(B,),
        in_specs=in_specs,
        out_specs=tuple(_data_spec(s.shape) for s in out_shape),
        scratch_shapes=scratch,
        compiler_params=pltpu.CompilerParams(dimension_semantics=("parallel",)),
    )(*args)


def _run_intra(prep, v, q, c, masks, num_head):
    B, n_v, O = v.shape
    n_q, n_c = q.shape[1], c.shape[1]
    out_shape = (jax.ShapeDtypeStruct((B, n_v, O), v.dtype),
                 jax.ShapeDtypeStruct((B, n_q, O), q.dtype),
                 jax.ShapeDtypeStruct((B, n_c, O), c.dtype))
    args = (v, q, c,
            masks["v_col"], masks["q_col"], masks["c_col"],
            masks["v_e_row"], masks["q_row"], masks["c_e_row"],
            prep["intra_wgate"], prep["intra_bgate"],
            prep["intra_wqkv"], prep["intra_bqkv"], prep["intra_mem"],
            prep["intra_wout"], prep["intra_bout"], prep["ln2_g"], prep["ln2_b"])
    in_specs = ([_data_spec(a.shape) for a in args[:9]] +
                [_param_spec(a.shape) for a in args[9:]])
    scratch = [pltpu.VMEM((n_v + 1, O), jnp.float32), pltpu.VMEM((n_v + 1, O), jnp.float32),
               pltpu.VMEM((n_c + 1, O), jnp.float32), pltpu.VMEM((n_c + 1, O), jnp.float32)]
    return pl.pallas_call(
        functools.partial(_intra_block_kernel, num_head=num_head),
        out_shape=out_shape,
        grid=(B,),
        in_specs=in_specs,
        out_specs=tuple(_data_spec(s.shape) for s in out_shape),
        scratch_shapes=scratch,
        compiler_params=pltpu.CompilerParams(dimension_semantics=("parallel",)),
    )(*args)


# ----------------------------------------------------------------------------
# Parameter staging (stack per-modality weights once per forward; tiny tensors)
# ----------------------------------------------------------------------------
def _prepare_params(p, O):
    sqrt_o = float(O) ** 0.5
    it, ia = p["inter"], p["intra"]

    def sw(mods):
        return jnp.stack([m["w"] for m in mods])

    def sb(mods):
        return jnp.stack([m["b"].reshape(1, -1) for m in mods])

    return {
        "inter_wqkv": sw([it["v_lin"], it["q_lin"], it["c_lin"]]),
        "inter_bqkv": sb([it["v_lin"], it["q_lin"], it["c_lin"]]),
        "inter_mem": jnp.stack([sqrt_o * it["m_v_k"][0], it["m_v_v"][0],
                                sqrt_o * it["m_c_k"][0], it["m_c_v"][0]]),
        "inter_wout": sw([it["v_out"], it["q_out"], it["c_out"]]),
        "inter_bout": sb([it["v_out"], it["q_out"], it["c_out"]]),
        "ln1_g": jnp.stack([p["ln1v"]["g"], p["ln1q"]["g"], p["ln1c"]["g"]]),
        "ln1_b": jnp.stack([p["ln1v"]["b"], p["ln1q"]["b"], p["ln1c"]["b"]]),
        "intra_wgate": jnp.stack([ia["v4q"]["w"], ia["q4v"]["w"]]),
        "intra_bgate": sb([ia["v4q"], ia["q4v"]]),
        "intra_wqkv": sw([ia["v_lin"], ia["q_lin"], ia["c_lin"]]),
        "intra_bqkv": sb([ia["v_lin"], ia["q_lin"], ia["c_lin"]]),
        "intra_mem": jnp.stack([sqrt_o * ia["m_v_k"][0], ia["m_v_v"][0],
                                sqrt_o * ia["m_c_k"][0], ia["m_c_v"][0]]),
        "intra_wout": sw([ia["v_out"], ia["q_out"], ia["c_out"]]),
        "intra_bout": sb([ia["v_out"], ia["q_out"], ia["c_out"]]),
        "ln2_g": jnp.stack([p["ln2v"]["g"], p["ln2q"]["g"], p["ln2c"]["g"]]),
        "ln2_b": jnp.stack([p["ln2v"]["b"], p["ln2q"]["b"], p["ln2c"]["b"]]),
        "sa_w1t": it["sa_l1"]["w"].T,
        "sa_b1": it["sa_l1"]["b"].reshape(-1, 1),
        "sa_w2t": it["sa_l2"]["w"].T,
        "sa_b2": it["sa_l2"]["b"].reshape(1, 1),
    }


# ----------------------------------------------------------------------------
# SingleBlock forward
# ----------------------------------------------------------------------------
def single_block_forward(p, v, q, c, v_mask, q_mask, c_mask, vbbox, cbbox,
                         num_block, num_inter_head, num_intra_head):
    B = v.shape[0]
    O = p["v_lin"]["w"].shape[1]
    prep = _prepare_params(p, O)

    # initial projections (one fused kernel, no activation — matches torch)
    vv, qq, cc = _init_proj(v, q, c, p)

    # masks in both layouts; memory slot (always unmasked) appended at the END
    ones = jnp.ones((B, 1), v_mask.dtype)
    masks = {
        "v_col": v_mask[:, :, None],
        "q_col": q_mask[:, :, None],
        "c_col": c_mask[:, :, None],
        "v_e_row": jnp.concatenate([v_mask, ones], axis=1)[:, None, :],
        "q_row": q_mask[:, None, :],
        "c_e_row": jnp.concatenate([c_mask, ones], axis=1)[:, None, :],
    }

    # spatial attention depends only on bboxes + its own params -> compute once
    sa, saT = _spatial_attention(p["inter"], prep, vbbox, cbbox)

    for _ in range(num_block):
        vv, qq, cc = _run_inter(prep, vv, qq, cc, masks, sa, saT, num_inter_head)
        vv, qq, cc = _run_intra(prep, vv, qq, cc, masks, num_intra_head)
    return vv, qq, cc


# ----------------------------------------------------------------------------
# Deterministic parameter initialization (shapes from the module's __init__)
# ----------------------------------------------------------------------------
def init_params(key, v_size, q_size, c_size, O, sa_hidden=512):
    keys = iter(jax.random.split(key, 64))

    def lin(din, dout, scale=0.05):
        kw, kb = jax.random.split(next(keys))
        return {"w": jax.random.normal(kw, (din, dout), jnp.float32) * scale,
                "b": jax.random.normal(kb, (dout,), jnp.float32) * scale}

    def mem(shape, scale=0.1):
        return jax.random.normal(next(keys), shape, jnp.float32) * scale

    def ln(D):
        return {"g": jnp.ones((1, D), jnp.float32), "b": jnp.zeros((1, D), jnp.float32)}

    return {
        "v_lin": lin(v_size, O), "q_lin": lin(q_size, O), "c_lin": lin(c_size, O),
        "inter": {
            "v_lin": lin(O, 3 * O), "q_lin": lin(O, 3 * O), "c_lin": lin(O, 3 * O),
            "m_v_k": mem((1, 1, O)), "m_v_v": mem((1, 1, O)), "m_v_b": mem((1, 1, 4)),
            "m_c_k": mem((1, 1, O)), "m_c_v": mem((1, 1, O)), "m_c_b": mem((1, 1, 4)),
            "v_out": lin(3 * O, O), "q_out": lin(3 * O, O), "c_out": lin(3 * O, O),
            "sa_l1": lin(17, sa_hidden), "sa_l2": lin(sa_hidden, 1),
        },
        "intra": {
            "v4q": lin(O, O), "q4v": lin(O, O),
            "v_lin": lin(O, 3 * O), "q_lin": lin(O, 3 * O), "c_lin": lin(O, 3 * O),
            "m_v_k": mem((1, 1, O)), "m_v_v": mem((1, 1, O)),
            "m_c_k": mem((1, 1, O)), "m_c_v": mem((1, 1, O)),
            "v_out": lin(O, O), "q_out": lin(O, O), "c_out": lin(O, O),
        },
        "ln1v": ln(O), "ln1q": ln(O), "ln1c": ln(O),
        "ln2v": ln(O), "ln2q": ln(O), "ln2c": ln(O),
    }


# ----------------------------------------------------------------------------
# Example run
# ----------------------------------------------------------------------------
if __name__ == "__main__":
    B, num_obj, max_len, max_len_c = 2, 16, 8, 12
    v_size, q_size, c_size, O = 20, 24, 28, 32
    num_inter_head = num_intra_head = 4
    num_block = 1

    key = jax.random.PRNGKey(0)
    ks = jax.random.split(key, 9)

    v = jax.random.normal(ks[0], (B, num_obj, v_size), jnp.float32)
    q = jax.random.normal(ks[1], (B, max_len, q_size), jnp.float32)
    c = jax.random.normal(ks[2], (B, max_len_c, c_size), jnp.float32)

    def make_mask(k, L):
        lens = jax.random.randint(k, (B,), minval=L // 2, maxval=L + 1)
        return (jnp.arange(L)[None, :] < lens[:, None]).astype(jnp.float32)

    v_mask = make_mask(ks[3], num_obj)
    q_mask = make_mask(ks[4], max_len)
    c_mask = make_mask(ks[5], max_len_c)

    def make_boxes(k, N):
        pts = jax.random.uniform(k, (B, N, 4), jnp.float32)
        x1 = jnp.minimum(pts[..., 0], pts[..., 2])
        x2 = jnp.maximum(pts[..., 0], pts[..., 2])
        y1 = jnp.minimum(pts[..., 1], pts[..., 3])
        y2 = jnp.maximum(pts[..., 1], pts[..., 3])
        return jnp.stack([x1, y1, x2, y2], axis=-1)

    vbbox = make_boxes(ks[6], num_obj)
    cbbox = make_boxes(ks[7], max_len_c)

    params = init_params(ks[8], v_size, q_size, c_size, O)

    fwd = jax.jit(functools.partial(
        single_block_forward,
        num_block=num_block,
        num_inter_head=num_inter_head,
        num_intra_head=num_intra_head))

    out_v, out_q, out_c = fwd(params, v, q, c, v_mask, q_mask, c_mask, vbbox, cbbox)
    jax.block_until_ready((out_v, out_q, out_c))

    assert out_v.shape == (B, num_obj, O)
    assert out_q.shape == (B, max_len, O)
    assert out_c.shape == (B, max_len_c, O)
    assert bool(jnp.all(jnp.isfinite(out_v)) & jnp.all(jnp.isfinite(out_q)) &
                jnp.all(jnp.isfinite(out_c)))
    print("KERNEL_OK")
</pallas_src>

<mosaic_0001>
module attributes {stable_mosaic.version = 11 : i64} {
  func.func @_spatial_kernel(%arg0: i32, %arg1: memref<1x17x221xf32, #tpu.memory_space<vmem>>, %arg2: memref<512x17xf32, #tpu.memory_space<vmem>>, %arg3: memref<512x1xf32, #tpu.memory_space<vmem>>, %arg4: memref<1x512xf32, #tpu.memory_space<vmem>>, %arg5: memref<1x1xf32, #tpu.memory_space<vmem>>, %arg6: memref<1x1x221xf32, #tpu.memory_space<vmem>>) attributes {dimension_semantics = [#tpu.dimension_semantics<parallel>], iteration_bounds = array<i64: 2>, scalar_prefetch = 0 : i64, scratch_operands = 0 : i64, tpu.core_type = #tpu.core_type<tc>, window_params = [{transform_indices = @transform_0, window_bounds = array<i64: 1, 17, 221>}, {pipeline_mode = #tpu.pipeline_mode<synchronous>, transform_indices = @transform_1, window_bounds = array<i64: 512, 17>}, {pipeline_mode = #tpu.pipeline_mode<synchronous>, transform_indices = @transform_2, window_bounds = array<i64: 512, 1>}, {pipeline_mode = #tpu.pipeline_mode<synchronous>, transform_indices = @transform_3, window_bounds = array<i64: 1, 512>}, {pipeline_mode = #tpu.pipeline_mode<synchronous>, transform_indices = @transform_4, window_bounds = array<i64: 1, 1>}, {transform_indices = @transform_5, window_bounds = array<i64: 1, 1, 221>}]} {
    %c0 = arith.constant 0 : index
    %c0_0 = arith.constant 0 : index
    %0 = vector.load %arg2[%c0, %c0_0] : memref<512x17xf32, #tpu.memory_space<vmem>>, vector<512x17xf32>
    %c0_1 = arith.constant 0 : index
    %c0_2 = arith.constant 0 : index
    %c0_3 = arith.constant 0 : index
    %1 = vector.load %arg1[%c0_1, %c0_2, %c0_3] : memref<1x17x221xf32, #tpu.memory_space<vmem>>, vector<1x17x221xf32>
    %2 = vector.shape_cast %1 : vector<1x17x221xf32> to vector<17x221xf32>
    %cst = arith.constant dense<0.000000e+00> : vector<512x221xf32>
    %3 = tpu.matmul %0, %2, %cst {dimension_numbers = #tpu.dot_dimension_numbers<[1], [0], [0], [1], [0, 0, 1, 1], [], []>} : vector<512x17xf32>, vector<17x221xf32>, vector<512x221xf32> -> vector<512x221xf32>
    %c0_4 = arith.constant 0 : index
    %c0_5 = arith.constant 0 : index
    %4 = vector.load %arg3[%c0_4, %c0_5] : memref<512x1xf32, #tpu.memory_space<vmem>>, vector<512x1xf32>
    %5 = vector.broadcast %4 : vector<512x1xf32> to vector<512x221xf32>
    %6 = arith.addf %3, %5 : vector<512x221xf32>
    %cst_6 = arith.constant 0.000000e+00 : f32
    %7 = vector.broadcast %cst_6 : f32 to vector<512x221xf32>
    %8 = arith.maximumf %6, %7 : vector<512x221xf32>
    %c0_7 = arith.constant 0 : index
    %c0_8 = arith.constant 0 : index
    %9 = vector.load %arg4[%c0_7, %c0_8] : memref<1x512xf32, #tpu.memory_space<vmem>>, vector<1x512xf32>
    %cst_9 = arith.constant dense<0.000000e+00> : vector<1x221xf32>
    %10 = tpu.matmul %9, %8, %cst_9 {dimension_numbers = #tpu.dot_dimension_numbers<[1], [0], [0], [1], [0, 0, 1, 1], [], []>} : vector<1x512xf32>, vector<512x221xf32>, vector<1x221xf32> -> vector<1x221xf32>
    %c0_10 = arith.constant 0 : index
    %c0_11 = arith.constant 0 : index
    %11 = vector.load %arg5[%c0_10, %c0_11] : memref<1x1xf32, #tpu.memory_space<vmem>>, vector<1x1xf32>
    %12 = vector.broadcast %11 : vector<1x1xf32> to vector<1x221xf32>
    %13 = arith.addf %10, %12 : vector<1x221xf32>
    %14 = arith.negf %13 : vector<1x221xf32>
    %15 = math.exp %14 : vector<1x221xf32>
    %cst_12 = arith.constant 1.000000e+00 : f32
    %16 = vector.broadcast %cst_12 : f32 to vector<1x221xf32>
    %17 = arith.addf %16, %15 : vector<1x221xf32>
    %18 = arith.divf %16, %17 : vector<1x221xf32>
    %cst_13 = arith.constant 1.000000e+00 : f32
    %19 = vector.broadcast %cst_13 : f32 to vector<1x221xf32>
    %20 = arith.addf %18, %19 : vector<1x221xf32>
    %c0_14 = arith.constant 0 : index
    %c0_15 = arith.constant 0 : index
    %c0_16 = arith.constant 0 : index
    %21 = vector.load %arg6[%c0_14, %c0_15, %c0_16] : memref<1x1x221xf32, #tpu.memory_space<vmem>>, vector<1x1x221xf32>
    %22 = vector.shape_cast %21 : vector<1x1x221xf32> to vector<1x221xf32>
    %23 = vector.shape_cast %20 : vector<1x221xf32> to vector<1x1x221xf32>
    tpu.vector_store %arg6[%c0_14, %c0_15, %c0_16], %23 {strides = array<i32>} : memref<1x1x221xf32, #tpu.memory_space<vmem>>, vector<1x1x221xf32>,
    return
  }
  func.func @transform_0(%arg0: i32) -> (i32, i32, i32) {
    %c0_i32 = arith.constant 0 : i32
    %c0_i32_0 = arith.constant 0 : i32
    %c0_i32_1 = arith.constant 0 : i32
    return %arg0, %c0_i32, %c0_i32_0 : i32, i32, i32
  }
  func.func @transform_1(%arg0: i32) -> (i32, i32) {
    %c0_i32 = arith.constant 0 : i32
    %c0_i32_0 = arith.constant 0 : i32
    %c0_i32_1 = arith.constant 0 : i32
    return %c0_i32, %c0_i32_0 : i32, i32
  }
  func.func @transform_2(%arg0: i32) -> (i32, i32) {
    %c0_i32 = arith.constant 0 : i32
    %c0_i32_0 = arith.constant 0 : i32
    %c0_i32_1 = arith.constant 0 : i32
    return %c0_i32, %c0_i32_0 : i32, i32
  }
  func.func @transform_3(%arg0: i32) -> (i32, i32) {
    %c0_i32 = arith.constant 0 : i32
    %c0_i32_0 = arith.constant 0 : i32
    %c0_i32_1 = arith.constant 0 : i32
    return %c0_i32, %c0_i32_0 : i32, i32
  }
  func.func @transform_4(%arg0: i32) -> (i32, i32) {
    %c0_i32 = arith.constant 0 : i32
    %c0_i32_0 = arith.constant 0 : i32
    %c0_i32_1 = arith.constant 0 : i32
    return %c0_i32, %c0_i32_0 : i32, i32
  }
  func.func @transform_5(%arg0: i32) -> (i32, i32, i32) {
    %c0_i32 = arith.constant 0 : i32
    %c0_i32_0 = arith.constant 0 : i32
    %c0_i32_1 = arith.constant 0 : i32
    return %arg0, %c0_i32, %c0_i32_0 : i32, i32, i32
  }
}

module attributes {stable_mosaic.version = 11 : i64} {
  func.func @_init_proj_kernel(%arg0: i32, %arg1: memref<32x20xf32, #tpu.memory_space<vmem>>, %arg2: memref<16x24xf32, #tpu.memory_space<vmem>>, %arg3: memref<24x28xf32, #tpu.memory_space<vmem>>, %arg4: memref<20x32xf32, #tpu.memory_space<vmem>>, %arg5: memref<1x32xf32, #tpu.memory_space<vmem>>, %arg6: memref<24x32xf32, #tpu.memory_space<vmem>>, %arg7: memref<1x32xf32, #tpu.memory_space<vmem>>, %arg8: memref<28x32xf32, #tpu.memory_space<vmem>>, %arg9: memref<1x32xf32, #tpu.memory_space<vmem>>, %arg10: memref<32x32xf32, #tpu.memory_space<vmem>>, %arg11: memref<16x32xf32, #tpu.memory_space<vmem>>, %arg12: memref<24x32xf32, #tpu.memory_space<vmem>>) attributes {dimension_semantics = [#tpu.dimension_semantics<arbitrary>], iteration_bounds = array<i64: 1>, scalar_prefetch = 0 : i64, scratch_operands = 0 : i64, tpu.core_type = #tpu.core_type<tc>, window_params = [{pipeline_mode = #tpu.pipeline_mode<synchronous>, transform_indices = @transform_0, window_bounds = array<i64: 32, 20>}, {pipeline_mode = #tpu.pipeline_mode<synchronous>, transform_indices = @transform_1, window_bounds = array<i64: 16, 24>}, {pipeline_mode = #tpu.pipeline_mode<synchronous>, transform_indices = @transform_2, window_bounds = array<i64: 24, 28>}, {pipeline_mode = #tpu.pipeline_mode<synchronous>, transform_indices = @transform_3, window_bounds = array<i64: 20, 32>}, {pipeline_mode = #tpu.pipeline_mode<synchronous>, transform_indices = @transform_4, window_bounds = array<i64: 1, 32>}, {pipeline_mode = #tpu.pipeline_mode<synchronous>, transform_indices = @transform_5, window_bounds = array<i64: 24, 32>}, {pipeline_mode = #tpu.pipeline_mode<synchronous>, transform_indices = @transform_6, window_bounds = array<i64: 1, 32>}, {pipeline_mode = #tpu.pipeline_mode<synchronous>, transform_indices = @transform_7, window_bounds = array<i64: 28, 32>}, {pipeline_mode = #tpu.pipeline_mode<synchronous>, transform_indices = @transform_8, window_bounds = array<i64: 1, 32>}, {pipeline_mode = #tpu.pipeline_mode<synchronous>, transform_indices = @transform_9, window_bounds = array<i64: 32, 32>}, {pipeline_mode = #tpu.pipeline_mode<synchronous>, transform_indices = @transform_10, window_bounds = array<i64: 16, 32>}, {pipeline_mode = #tpu.pipeline_mode<synchronous>, transform_indices = @transform_11, window_bounds = array<i64: 24, 32>}]} {
    %c0 = arith.constant 0 : index
    %c0_0 = arith.constant 0 : index
    %0 = vector.load %arg1[%c0, %c0_0] : memref<32x20xf32, #tpu.memory_space<vmem>>, vector<32x20xf32>
    %c0_1 = arith.constant 0 : index
    %c0_2 = arith.constant 0 : index
    %1 = vector.load %arg4[%c0_1, %c0_2] : memref<20x32xf32, #tpu.memory_space<vmem>>, vector<20x32xf32>
    %cst = arith.constant dense<0.000000e+00> : vector<32x32xf32>
    %2 = tpu.matmul %0, %1, %cst {dimension_numbers = #tpu.dot_dimension_numbers<[1], [0], [0], [1], [0, 0, 1, 1], [], []>} : vector<32x20xf32>, vector<20x32xf32>, vector<32x32xf32> -> vector<32x32xf32>
    %c0_3 = arith.constant 0 : index
    %c0_4 = arith.constant 0 : index
    %3 = vector.load %arg5[%c0_3, %c0_4] : memref<1x32xf32, #tpu.memory_space<vmem>>, vector<1x32xf32>
    %4 = vector.broadcast %3 : vector<1x32xf32> to vector<32x32xf32>
    %5 = arith.addf %2, %4 : vector<32x32xf32>
    %c0_5 = arith.constant 0 : index
    %c0_6 = arith.constant 0 : index
    %6 = vector.load %arg10[%c0_5, %c0_6] : memref<32x32xf32, #tpu.memory_space<vmem>>, vector<32x32xf32>
    tpu.vector_store %arg10[%c0_5, %c0_6], %5 {strides = array<i32>} : memref<32x32xf32, #tpu.memory_space<vmem>>, vector<32x32xf32>,
    %c0_7 = arith.constant 0 : index
    %c0_8 = arith.constant 0 : index
    %7 = vector.load %arg2[%c0_7, %c0_8] : memref<16x24xf32, #tpu.memory_space<vmem>>, vector<16x24xf32>
    %c0_9 = arith.constant 0 : index
    %c0_10 = arith.constant 0 : index
    %8 = vector.load %arg6[%c0_9, %c0_10] : memref<24x32xf32, #tpu.memory_space<vmem>>, vector<24x32xf32>
    %cst_11 = arith.constant dense<0.000000e+00> : vector<16x32xf32>
    %9 = tpu.matmul %7, %8, %cst_11 {dimension_numbers = #tpu.dot_dimension_numbers<[1], [0], [0], [1], [0, 0, 1, 1], [], []>} : vector<16x24xf32>, vector<24x32xf32>, vector<16x32xf32> -> vector<16x32xf32>
    %c0_12 = arith.constant 0 : index
    %c0_13 = arith.constant 0 : index
    %10 = vector.load %arg7[%c0_12, %c0_13] : memref<1x32xf32, #tpu.memory_space<vmem>>, vector<1x32xf32>
    %11 = vector.broadcast %10 : vector<1x32xf32> to vector<16x32xf32>
    %12 = arith.addf %9, %11 : vector<16x32xf32>
    %c0_14 = arith.constant 0 : index
    %c0_15 = arith.constant 0 : index
    %13 = vector.load %arg11[%c0_14, %c0_15] : memref<16x32xf32, #tpu.memory_space<vmem>>, vector<16x32xf32>
    tpu.vector_store %arg11[%c0_14, %c0_15], %12 {strides = array<i32>} : memref<16x32xf32, #tpu.memory_space<vmem>>, vector<16x32xf32>,
    %c0_16 = arith.constant 0 : index
    %c0_17 = arith.constant 0 : index
    %14 = vector.load %arg3[%c0_16, %c0_17] : memref<24x28xf32, #tpu.memory_space<vmem>>, vector<24x28xf32>
    %c0_18 = arith.constant 0 : index
    %c0_19 = arith.constant 0 : index
    %15 = vector.load %arg8[%c0_18, %c0_19] : memref<28x32xf32, #tpu.memory_space<vmem>>, vector<28x32xf32>
    %cst_20 = arith.constant dense<0.000000e+00> : vector<24x32xf32>
    %16 = tpu.matmul %14, %15, %cst_20 {dimension_numbers = #tpu.dot_dimension_numbers<[1], [0], [0], [1], [0, 0, 1, 1], [], []>} : vector<24x28xf32>, vector<28x32xf32>, vector<24x32xf32> -> vector<24x32xf32>
    %c0_21 = arith.constant 0 : index
    %c0_22 = arith.constant 0 : index
    %17 = vector.load %arg9[%c0_21, %c0_22] : memref<1x32xf32, #tpu.memory_space<vmem>>, vector<1x32xf32>
    %18 = vector.broadcast %17 : vector<1x32xf32> to vector<24x32xf32>
    %19 = arith.addf %16, %18 : vector<24x32xf32>
    %c0_23 = arith.constant 0 : index
    %c0_24 = arith.constant 0 : index
    %20 = vector.load %arg12[%c0_23, %c0_24] : memref<24x32xf32, #tpu.memory_space<vmem>>, vector<24x32xf32>
    tpu.vector_store %arg12[%c0_23, %c0_24], %19 {strides = array<i32>} : memref<24x32xf32, #tpu.memory_space<vmem>>, vector<24x32xf32>,
    return
  }
  func.func @transform_0(%arg0: i32) -> (i32, i32) {
    %c0_i32 = arith.constant 0 : i32
    %c0_i32_0 = arith.constant 0 : i32
    %c0_i32_1 = arith.constant 0 : i32
    return %c0_i32, %c0_i32_0 : i32, i32
  }
  func.func @transform_1(%arg0: i32) -> (i32, i32) {
    %c0_i32 = arith.constant 0 : i32
    %c0_i32_0 = arith.constant 0 : i32
    %c0_i32_1 = arith.constant 0 : i32
    return %c0_i32, %c0_i32_0 : i32, i32
  }
  func.func @transform_2(%arg0: i32) -> (i32, i32) {
    %c0_i32 = arith.constant 0 : i32
    %c0_i32_0 = arith.constant 0 : i32
    %c0_i32_1 = arith.constant 0 : i32
    return %c0_i32, %c0_i32_0 : i32, i32
  }
  func.func @transform_3(%arg0: i32) -> (i32, i32) {
    %c0_i32 = arith.constant 0 : i32
    %c0_i32_0 = arith.constant 0 : i32
    %c0_i32_1 = arith.constant 0 : i32
    return %c0_i32, %c0_i32_0 : i32, i32
  }
  func.func @transform_4(%arg0: i32) -> (i32, i32) {
    %c0_i32 = arith.constant 0 : i32
    %c0_i32_0 = arith.constant 0 : i32
    %c0_i32_1 = arith.constant 0 : i32
    return %c0_i32, %c0_i32_0 : i32, i32
  }
  func.func @transform_5(%arg0: i32) -> (i32, i32) {
    %c0_i32 = arith.constant 0 : i32
    %c0_i32_0 = arith.constant 0 : i32
    %c0_i32_1 = arith.constant 0 : i32
    return %c0_i32, %c0_i32_0 : i32, i32
  }
  func.func @transform_6(%arg0: i32) -> (i32, i32) {
    %c0_i32 = arith.constant 0 : i32
    %c0_i32_0 = arith.constant 0 : i32
    %c0_i32_1 = arith.constant 0 : i32
    return %c0_i32, %c0_i32_0 : i32, i32
  }
  func.func @transform_7(%arg0: i32) -> (i32, i32) {
    %c0_i32 = arith.constant 0 : i32
    %c0_i32_0 = arith.constant 0 : i32
    %c0_i32_1 = arith.constant 0 : i32
    return %c0_i32, %c0_i32_0 : i32, i32
  }
  func.func @transform_8(%arg0: i32) -> (i32, i32) {
    %c0_i32 = arith.constant 0 : i32
    %c0_i32_0 = arith.constant 0 : i32
    %c0_i32_1 = arith.constant 0 : i32
    return %c0_i32, %c0_i32_0 : i32, i32
  }
  func.func @transform_9(%arg0: i32) -> (i32, i32) {
    %c0_i32 = arith.constant 0 : i32
    %c0_i32_0 = arith.constant 0 : i32
    %c0_i32_1 = arith.constant 0 : i32
    return %c0_i32, %c0_i32_0 : i32, i32
  }
  func.func @transform_10(%arg0: i32) -> (i32, i32) {
    %c0_i32 = arith.constant 0 : i32
    %c0_i32_0 = arith.constant 0 : i32
    %c0_i32_1 = arith.constant 0 : i32
    return %c0_i32, %c0_i32_0 : i32, i32
  }
  func.func @transform_11(%arg0: i32) -> (i32, i32) {
    %c0_i32 = arith.constant 0 : i32
    %c0_i32_0 = arith.constant 0 : i32
    %c0_i32_1 = arith.constant 0 : i32
    return %c0_i32, %c0_i32_0 : i32, i32
  }
}

module attributes {stable_mosaic.version = 11 : i64} {
  func.func @_inter_block_kernel(%arg0: i32, %arg1: memref<1x16x32xf32, #tpu.memory_space<vmem>>, %arg2: memref<1x8x32xf32, #tpu.memory_space<vmem>>, %arg3: memref<1x12x32xf32, #tpu.memory_space<vmem>>, %arg4: memref<1x16x1xf32, #tpu.memory_space<vmem>>, %arg5: memref<1x8x1xf32, #tpu.memory_space<vmem>>, %arg6: memref<1x12x1xf32, #tpu.memory_space<vmem>>, %arg7: memref<1x1x17xf32, #tpu.memory_space<vmem>>, %arg8: memref<1x1x8xf32, #tpu.memory_space<vmem>>, %arg9: memref<1x1x13xf32, #tpu.memory_space<vmem>>, %arg10: memref<1x17x13xf32, #tpu.memory_space<vmem>>, %arg11: memref<1x13x17xf32, #tpu.memory_space<vmem>>, %arg12: memref<3x32x96xf32, #tpu.memory_space<vmem>>, %arg13: memref<3x1x96xf32, #tpu.memory_space<vmem>>, %arg14: memref<4x1x32xf32, #tpu.memory_space<vmem>>, %arg15: memref<3x96x32xf32, #tpu.memory_space<vmem>>, %arg16: memref<3x1x32xf32, #tpu.memory_space<vmem>>, %arg17: memref<3x1x32xf32, #tpu.memory_space<vmem>>, %arg18: memref<3x1x32xf32, #tpu.memory_space<vmem>>, %arg19: memref<1x16x32xf32, #tpu.memory_space<vmem>>, %arg20: memref<1x8x32xf32, #tpu.memory_space<vmem>>, %arg21: memref<1x12x32xf32, #tpu.memory_space<vmem>>, %arg22: memref<17x32xf32, #tpu.memory_space<vmem>>, %arg23: memref<17x32xf32, #tpu.memory_space<vmem>>, %arg24: memref<13x32xf32, #tpu.memory_space<vmem>>, %arg25: memref<13x32xf32, #tpu.memory_space<vmem>>) attributes {dimension_semantics = [#tpu.dimension_semantics<parallel>], iteration_bounds = array<i64: 2>, scalar_prefetch = 0 : i64, scratch_operands = 4 : i64, tpu.core_type = #tpu.core_type<tc>, window_params = [{transform_indices = @transform_0, window_bounds = array<i64: 1, 16, 32>}, {transform_indices = @transform_1, window_bounds = array<i64: 1, 8, 32>}, {transform_indices = @transform_2, window_bounds = array<i64: 1, 12, 32>}, {transform_indices = @transform_3, window_bounds = array<i64: 1, 16, 1>}, {transform_indices = @transform_4, window_bounds = array<i64: 1, 8, 1>}, {transform_indices = @transform_5, window_bounds = array<i64: 1, 12, 1>}, {transform_indices = @transform_6, window_bounds = array<i64: 1, 1, 17>}, {transform_indices = @transform_7, window_bounds = array<i64: 1, 1, 8>}, {transform_indices = @transform_8, window_bounds = array<i64: 1, 1, 13>}, {transform_indices = @transform_9, window_bounds = array<i64: 1, 17, 13>}, {transform_indices = @transform_10, window_bounds = array<i64: 1, 13, 17>}, {pipeline_mode = #tpu.pipeline_mode<synchronous>, transform_indices = @transform_11, window_bounds = array<i64: 3, 32, 96>}, {pipeline_mode = #tpu.pipeline_mode<synchronous>, transform_indices = @transform_12, window_bounds = array<i64: 3, 1, 96>}, {pipeline_mode = #tpu.pipeline_mode<synchronous>, transform_indices = @transform_13, window_bounds = array<i64: 4, 1, 32>}, {pipeline_mode = #tpu.pipeline_mode<synchronous>, transform_indices = @transform_14, window_bounds = array<i64: 3, 96, 32>}, {pipeline_mode = #tpu.pipeline_mode<synchronous>, transform_indices = @transform_15, window_bounds = array<i64: 3, 1, 32>}, {pipeline_mode = #tpu.pipeline_mode<synchronous>, transform_indices = @transform_16, window_bounds = array<i64: 3, 1, 32>}, {pipeline_mode = #tpu.pipeline_mode<synchronous>, transform_indices = @transform_17, window_bounds = array<i64: 3, 1, 32>}, {transform_indices = @transform_18, window_bounds = array<i64: 1, 16, 32>}, {transform_indices = @transform_19, window_bounds = array<i64: 1, 8, 32>}, {transform_indices = @transform_20, window_bounds = array<i64: 1, 12, 32>}]} {
    %c0 = arith.constant 0 : index
    %c0_0 = arith.constant 0 : index
    %c0_1 = arith.constant 0 : index
    %0 = vector.load %arg1[%c0, %c0_0, %c0_1] : memref<1x16x32xf32, #tpu.memory_space<vmem>>, vector<1x16x32xf32>
    %1 = vector.shape_cast %0 : vector<1x16x32xf32> to vector<16x32xf32>
    %c0_2 = arith.constant 0 : index
    %c0_3 = arith.constant 0 : index
    %c0_4 = arith.constant 0 : index
    %2 = vector.load %arg2[%c0_2, %c0_3, %c0_4] : memref<1x8x32xf32, #tpu.memory_space<vmem>>, vector<1x8x32xf32>
    %3 = vector.shape_cast %2 : vector<1x8x32xf32> to vector<8x32xf32>
    %c0_5 = arith.constant 0 : index
    %c0_6 = arith.constant 0 : index
    %c0_7 = arith.constant 0 : index
    %4 = vector.load %arg3[%c0_5, %c0_6, %c0_7] : memref<1x12x32xf32, #tpu.memory_space<vmem>>, vector<1x12x32xf32>
    %5 = vector.shape_cast %4 : vector<1x12x32xf32> to vector<12x32xf32>
    %cst = arith.constant 0.000000e+00 : f32
    %6 = vector.broadcast %cst : f32 to vector<16x32xf32>
    %7 = arith.maximumf %1, %6 : vector<16x32xf32>
    %c0_8 = arith.constant 0 : index
    %c0_9 = arith.constant 0 : index
    %c0_10 = arith.constant 0 : index
    %8 = vector.load %arg12[%c0_8, %c0_9, %c0_10] : memref<3x32x96xf32, #tpu.memory_space<vmem>>, vector<1x32x96xf32>
    %9 = vector.shape_cast %8 : vector<1x32x96xf32> to vector<32x96xf32>
    %cst_11 = arith.constant dense<0.000000e+00> : vector<16x96xf32>
    %10 = tpu.matmul %7, %9, %cst_11 {dimension_numbers = #tpu.dot_dimension_numbers<[1], [0], [0], [1], [0, 0, 1, 1], [], []>} : vector<16x32xf32>, vector<32x96xf32>, vector<16x96xf32> -> vector<16x96xf32>
    %c0_12 = arith.constant 0 : index
    %c0_13 = arith.constant 0 : index
    %c0_14 = arith.constant 0 : index
    %11 = vector.load %arg13[%c0_12, %c0_13, %c0_14] : memref<3x1x96xf32, #tpu.memory_space<vmem>>, vector<1x1x96xf32>
    %12 = vector.shape_cast %11 : vector<1x1x96xf32> to vector<1x96xf32>
    %13 = vector.broadcast %12 : vector<1x96xf32> to vector<16x96xf32>
    %14 = arith.addf %10, %13 : vector<16x96xf32>
    %c0_15 = arith.constant 0 : index
    %c0_16 = arith.constant 0 : index
    %c0_17 = arith.constant 0 : index
    %15 = vector.load %arg4[%c0_15, %c0_16, %c0_17] : memref<1x16x1xf32, #tpu.memory_space<vmem>>, vector<1x16x1xf32>
    %16 = vector.shape_cast %15 : vector<1x16x1xf32> to vector<16x1xf32>
    %17 = vector.broadcast %16 : vector<16x1xf32> to vector<16x96xf32>
    %18 = arith.mulf %14, %17 : vector<16x96xf32>
    %cst_18 = arith.constant 0.000000e+00 : f32
    %19 = vector.broadcast %cst_18 : f32 to vector<8x32xf32>
    %20 = arith.maximumf %3, %19 : vector<8x32xf32>
    %c1 = arith.constant 1 : index
    %c0_19 = arith.constant 0 : index
    %c0_20 = arith.constant 0 : index
    %21 = vector.load %arg12[%c1, %c0_19, %c0_20] : memref<3x32x96xf32, #tpu.memory_space<vmem>>, vector<1x32x96xf32>
    %22 = vector.shape_cast %21 : vector<1x32x96xf32> to vector<32x96xf32>
    %cst_21 = arith.constant dense<0.000000e+00> : vector<8x96xf32>
    %23 = tpu.matmul %20, %22, %cst_21 {dimension_numbers = #tpu.dot_dimension_numbers<[1], [0], [0], [1], [0, 0, 1, 1], [], []>} : vector<8x32xf32>, vector<32x96xf32>, vector<8x96xf32> -> vector<8x96xf32>
    %c1_22 = arith.constant 1 : index
    %c0_23 = arith.constant 0 : index
    %c0_24 = arith.constant 0 : index
    %24 = vector.load %arg13[%c1_22, %c0_23, %c0_24] : memref<3x1x96xf32, #tpu.memory_space<vmem>>, vector<1x1x96xf32>
    %25 = vector.shape_cast %24 : vector<1x1x96xf32> to vector<1x96xf32>
    %26 = vector.broadcast %25 : vector<1x96xf32> to vector<8x96xf32>
    %27 = arith.addf %23, %26 : vector<8x96xf32>
    %c0_25 = arith.constant 0 : index
    %c0_26 = arith.constant 0 : index
    %c0_27 = arith.constant 0 : index
    %28 = vector.load %arg5[%c0_25, %c0_26, %c0_27] : memref<1x8x1xf32, #tpu.memory_space<vmem>>, vector<1x8x1xf32>
    %29 = vector.shape_cast %28 : vector<1x8x1xf32> to vector<8x1xf32>
    %30 = vector.broadcast %29 : vector<8x1xf32> to vector<8x96xf32>
    %31 = arith.mulf %27, %30 : vector<8x96xf32>
    %cst_28 = arith.constant 0.000000e+00 : f32
    %32 = vector.broadcast %cst_28 : f32 to vector<12x32xf32>
    %33 = arith.maximumf %5, %32 : vector<12x32xf32>
    %c2 = arith.constant 2 : index
    %c0_29 = arith.constant 0 : index
    %c0_30 = arith.constant 0 : index
    %34 = vector.load %arg12[%c2, %c0_29, %c0_30] : memref<3x32x96xf32, #tpu.memory_space<vmem>>, vector<1x32x96xf32>
    %35 = vector.shape_cast %34 : vector<1x32x96xf32> to vector<32x96xf32>
    %cst_31 = arith.constant dense<0.000000e+00> : vector<12x96xf32>
    %36 = tpu.matmul %33, %35, %cst_31 {dimension_numbers = #tpu.dot_dimension_numbers<[1], [0], [0], [1], [0, 0, 1, 1], [], []>} : vector<12x32xf32>, vector<32x96xf32>, vector<12x96xf32> -> vector<12x96xf32>
    %c2_32 = arith.constant 2 : index
    %c0_33 = arith.constant 0 : index
    %c0_34 = arith.constant 0 : index
    %37 = vector.load %arg13[%c2_32, %c0_33, %c0_34] : memref<3x1x96xf32, #tpu.memory_space<vmem>>, vector<1x1x96xf32>
    %38 = vector.shape_cast %37 : vector<1x1x96xf32> to vector<1x96xf32>
    %39 = vector.broadcast %38 : vector<1x96xf32> to vector<12x96xf32>
    %40 = arith.addf %36, %39 : vector<12x96xf32>
    %c0_35 = arith.constant 0 : index
    %c0_36 = arith.constant 0 : index
    %c0_37 = arith.constant 0 : index
    %41 = vector.load %arg6[%c0_35, %c0_36, %c0_37] : memref<1x12x1xf32, #tpu.memory_space<vmem>>, vector<1x12x1xf32>
    %42 = vector.shape_cast %41 : vector<1x12x1xf32> to vector<12x1xf32>
    %43 = vector.broadcast %42 : vector<12x1xf32> to vector<12x96xf32>
    %44 = arith.mulf %40, %43 : vector<12x96xf32>
    %45 = vector.extract_strided_slice %18 {offsets = [0, 32], sizes = [16, 32], strides = [1, 1]} : vector<16x96xf32> to vector<16x32xf32>
    %46 = vector.extract_strided_slice %31 {offsets = [0, 0], sizes = [8, 32], strides = [1, 1]} : vector<8x96xf32> to vector<8x32xf32>
    %47 = vector.extract_strided_slice %31 {offsets = [0, 32], sizes = [8, 32], strides = [1, 1]} : vector<8x96xf32> to vector<8x32xf32>
    %48 = vector.extract_strided_slice %31 {offsets = [0, 64], sizes = [8, 32], strides = [1, 1]} : vector<8x96xf32> to vector<8x32xf32>
    %49 = vector.extract_strided_slice %44 {offsets = [0, 32], sizes = [12, 32], strides = [1, 1]} : vector<12x96xf32> to vector<12x32xf32>
    %50 = vector.extract_strided_slice %18 {offsets = [0, 0], sizes = [16, 32], strides = [1, 1]} : vector<16x96xf32> to vector<16x32xf32>
    %c0_38 = arith.constant 0 : index
    %c0_39 = arith.constant 0 : index
    %51 = vector.load %arg22[%c0_38, %c0_39] : memref<17x32xf32, #tpu.memory_space<vmem>>, vector<16x32xf32>
    tpu.vector_store %arg22[%c0_38, %c0_39], %50 {strides = array<i32>} : memref<17x32xf32, #tpu.memory_space<vmem>>, vector<16x32xf32>,
    %c0_40 = arith.constant 0 : index
    %c0_41 = arith.constant 0 : index
    %c0_42 = arith.constant 0 : index
    %52 = vector.load %arg14[%c0_40, %c0_41, %c0_42] : memref<4x1x32xf32, #tpu.memory_space<vmem>>, vector<1x1x32xf32>
    %53 = vector.shape_cast %52 : vector<1x1x32xf32> to vector<1x32xf32>
    %c16 = arith.constant 16 : index
    %c0_43 = arith.constant 0 : index
    %54 = vector.load %arg22[%c16, %c0_43] : memref<17x32xf32, #tpu.memory_space<vmem>>, vector<1x32xf32>
    tpu.vector_store %arg22[%c16, %c0_43], %53 {strides = array<i32>} : memref<17x32xf32, #tpu.memory_space<vmem>>, vector<1x32xf32>,
    %55 = vector.extract_strided_slice %18 {offsets = [0, 64], sizes = [16, 32], strides = [1, 1]} : vector<16x96xf32> to vector<16x32xf32>
    %c0_44 = arith.constant 0 : index
    %c0_45 = arith.constant 0 : index
    %56 = vector.load %arg23[%c0_44, %c0_45] : memref<17x32xf32, #tpu.memory_space<vmem>>, vector<16x32xf32>
    tpu.vector_store %arg23[%c0_44, %c0_45], %55 {strides = array<i32>} : memref<17x32xf32, #tpu.memory_space<vmem>>, vector<16x32xf32>,
    %c1_46 = arith.constant 1 : index
    %c0_47 = arith.constant 0 : index
    %c0_48 = arith.constant 0 : index
    %57 = vector.load %arg14[%c1_46, %c0_47, %c0_48] : memref<4x1x32xf32, #tpu.memory_space<vmem>>, vector<1x1x32xf32>
    %58 = vector.shape_cast %57 : vector<1x1x32xf32> to vector<1x32xf32>
    %c16_49 = arith.constant 16 : index
    %c0_50 = arith.constant 0 : index
    %59 = vector.load %arg23[%c16_49, %c0_50] : memref<17x32xf32, #tpu.memory_space<vmem>>, vector<1x32xf32>
    tpu.vector_store %arg23[%c16_49, %c0_50], %58 {strides = array<i32>} : memref<17x32xf32, #tpu.memory_space<vmem>>, vector<1x32xf32>,
    %60 = vector.extract_strided_slice %44 {offsets = [0, 0], sizes = [12, 32], strides = [1, 1]} : vector<12x96xf32> to vector<12x32xf32>
    %c0_51 = arith.constant 0 : index
    %c0_52 = arith.constant 0 : index
    %61 = vector.load %arg24[%c0_51, %c0_52] : memref<13x32xf32, #tpu.memory_space<vmem>>, vector<12x32xf32>
    tpu.vector_store %arg24[%c0_51, %c0_52], %60 {strides = array<i32>} : memref<13x32xf32, #tpu.memory_space<vmem>>, vector<12x32xf32>,
    %c2_53 = arith.constant 2 : index
    %c0_54 = arith.constant 0 : index
    %c0_55 = arith.constant 0 : index
    %62 = vector.load %arg14[%c2_53, %c0_54, %c0_55] : memref<4x1x32xf32, #tpu.memory_space<vmem>>, vector<1x1x32xf32>
    %63 = vector.shape_cast %62 : vector<1x1x32xf32> to vector<1x32xf32>
    %c12 = arith.constant 12 : index
    %c0_56 = arith.constant 0 : index
    %64 = vector.load %arg24[%c12, %c0_56] : memref<13x32xf32, #tpu.memory_space<vmem>>, vector<1x32xf32>
    tpu.vector_store %arg24[%c12, %c0_56], %63 {strides = array<i32>} : memref<13x32xf32, #tpu.memory_space<vmem>>, vector<1x32xf32>,
    %65 = vector.extract_strided_slice %44 {offsets = [0, 64], sizes = [12, 32], strides = [1, 1]} : vector<12x96xf32> to vector<12x32xf32>
    %c0_57 = arith.constant 0 : index
    %c0_58 = arith.constant 0 : index
    %66 = vector.load %arg25[%c0_57, %c0_58] : memref<13x32xf32, #tpu.memory_space<vmem>>, vector<12x32xf32>
    tpu.vector_store %arg25[%c0_57, %c0_58], %65 {strides = array<i32>} : memref<13x32xf32, #tpu.memory_space<vmem>>, vector<12x32xf32>,
    %c3 = arith.constant 3 : index
    %c0_59 = arith.constant 0 : index
    %c0_60 = arith.constant 0 : index
    %67 = vector.load %arg14[%c3, %c0_59, %c0_60] : memref<4x1x32xf32, #tpu.memory_space<vmem>>, vector<1x1x32xf32>
    %68 = vector.shape_cast %67 : vector<1x1x32xf32> to vector<1x32xf32>
    %c12_61 = arith.constant 12 : index
    %c0_62 = arith.constant 0 : index
    %69 = vector.load %arg25[%c12_61, %c0_62] : memref<13x32xf32, #tpu.memory_space<vmem>>, vector<1x32xf32>
    tpu.vector_store %arg25[%c12_61, %c0_62], %68 {strides = array<i32>} : memref<13x32xf32, #tpu.memory_space<vmem>>, vector<1x32xf32>,
    %c0_63 = arith.constant 0 : index
    %c0_64 = arith.constant 0 : index
    %70 = vector.load %arg22[%c0_63, %c0_64] : memref<17x32xf32, #tpu.memory_space<vmem>>, vector<17x32xf32>
    %c0_65 = arith.constant 0 : index
    %c0_66 = arith.constant 0 : index
    %71 = vector.load %arg23[%c0_65, %c0_66] : memref<17x32xf32, #tpu.memory_space<vmem>>, vector<17x32xf32>
    %c0_67 = arith.constant 0 : index
    %c0_68 = arith.constant 0 : index
    %72 = vector.load %arg24[%c0_67, %c0_68] : memref<13x32xf32, #tpu.memory_space<vmem>>, vector<13x32xf32>
    %c0_69 = arith.constant 0 : index
    %c0_70 = arith.constant 0 : index
    %73 = vector.load %arg25[%c0_69, %c0_70] : memref<13x32xf32, #tpu.memory_space<vmem>>, vector<13x32xf32>
    %c0_71 = arith.constant 0 : index
    %c0_72 = arith.constant 0 : index
    %c0_73 = arith.constant 0 : index
    %74 = vector.load %arg7[%c0_71, %c0_72, %c0_73] : memref<1x1x17xf32, #tpu.memory_space<vmem>>, vector<1x1x17xf32>
    %75 = vector.shape_cast %74 : vector<1x1x17xf32> to vector<1x17xf32>
    %c0_74 = arith.constant 0 : index
    %c0_75 = arith.constant 0 : index
    %c0_76 = arith.constant 0 : index
    %76 = vector.load %arg8[%c0_74, %c0_75, %c0_76] : memref<1x1x8xf32, #tpu.memory_space<vmem>>, vector<1x1x8xf32>
    %77 = vector.shape_cast %76 : vector<1x1x8xf32> to vector<1x8xf32>
    %c0_77 = arith.constant 0 : index
    %c0_78 = arith.constant 0 : index
    %c0_79 = arith.constant 0 : index
    %78 = vector.load %arg9[%c0_77, %c0_78, %c0_79] : memref<1x1x13xf32, #tpu.memory_space<vmem>>, vector<1x1x13xf32>
    %79 = vector.shape_cast %78 : vector<1x1x13xf32> to vector<1x13xf32>
    %c0_80 = arith.constant 0 : index
    %c0_81 = arith.constant 0 : index
    %c0_82 = arith.constant 0 : index
    %80 = vector.load %arg10[%c0_80, %c0_81, %c0_82] : memref<1x17x13xf32, #tpu.memory_space<vmem>>, vector<1x17x13xf32>
    %81 = vector.shape_cast %80 : vector<1x17x13xf32> to vector<17x13xf32>
    %82 = vector.extract_strided_slice %81 {offsets = [0, 0], sizes = [16, 13], strides = [1, 1]} : vector<17x13xf32> to vector<16x13xf32>
    %c0_83 = arith.constant 0 : index
    %c0_84 = arith.constant 0 : index
    %c0_85 = arith.constant 0 : index
    %83 = vector.load %arg11[%c0_83, %c0_84, %c0_85] : memref<1x13x17xf32, #tpu.memory_space<vmem>>, vector<1x13x17xf32>
    %84 = vector.shape_cast %83 : vector<1x13x17xf32> to vector<13x17xf32>
    %85 = vector.extract_strided_slice %84 {offsets = [0, 0], sizes = [12, 17], strides = [1, 1]} : vector<13x17xf32> to vector<12x17xf32>
    %c0_86 = arith.constant 0 : index
    %c0_87 = arith.constant 0 : index
    %c0_88 = arith.constant 0 : index
    %86 = vector.load %arg15[%c0_86, %c0_87, %c0_88] : memref<3x96x32xf32, #tpu.memory_space<vmem>>, vector<1x96x32xf32>
    %87 = vector.shape_cast %86 : vector<1x96x32xf32> to vector<96x32xf32>
    %c1_89 = arith.constant 1 : index
    %c0_90 = arith.constant 0 : index
    %c0_91 = arith.constant 0 : index
    %88 = vector.load %arg15[%c1_89, %c0_90, %c0_91] : memref<3x96x32xf32, #tpu.memory_space<vmem>>, vector<1x96x32xf32>
    %89 = vector.shape_cast %88 : vector<1x96x32xf32> to vector<96x32xf32>
    %c2_92 = arith.constant 2 : index
    %c0_93 = arith.constant 0 : index
    %c0_94 = arith.constant 0 : index
    %90 = vector.load %arg15[%c2_92, %c0_93, %c0_94] : memref<3x96x32xf32, #tpu.memory_space<vmem>>, vector<1x96x32xf32>
    %91 = vector.shape_cast %90 : vector<1x96x32xf32> to vector<96x32xf32>
    %92 = vector.extract_strided_slice %87 {offsets = [0, 0], sizes = [32, 32], strides = [1, 1]} : vector<96x32xf32> to vector<32x32xf32>
    %cst_95 = arith.constant dense<0.000000e+00> : vector<16x32xf32>
    %93 = tpu.matmul %1, %92, %cst_95 {dimension_numbers = #tpu.dot_dimension_numbers<[1], [0], [0], [1], [0, 0, 1, 1], [], []>} : vector<16x32xf32>, vector<32x32xf32>, vector<16x32xf32> -> vector<16x32xf32>
    %c0_96 = arith.constant 0 : index
    %c0_97 = arith.constant 0 : index
    %c0_98 = arith.constant 0 : index
    %94 = vector.load %arg16[%c0_96, %c0_97, %c0_98] : memref<3x1x32xf32, #tpu.memory_space<vmem>>, vector<1x1x32xf32>
    %95 = vector.shape_cast %94 : vector<1x1x32xf32> to vector<1x32xf32>
    %96 = vector.broadcast %95 : vector<1x32xf32> to vector<16x32xf32>
    %97 = arith.addf %93, %96 : vector<16x32xf32>
    %98 = vector.extract_strided_slice %87 {offsets = [32, 0], sizes = [32, 32], strides = [1, 1]} : vector<96x32xf32> to vector<32x32xf32>
    %99 = vector.extract_strided_slice %45 {offsets = [0, 0], sizes = [16, 8], strides = [1, 1]} : vector<16x32xf32> to vector<16x8xf32>
    %100 = vector.extract_strided_slice %46 {offsets = [0, 0], sizes = [8, 8], strides = [1, 1]} : vector<8x32xf32> to vector<8x8xf32>
    %101 = tpu.transpose %100, [1, 0] : vector<8x8xf32> -> vector<8x8xf32>
    %cst_99 = arith.constant dense<0.000000e+00> : vector<16x8xf32>
    %102 = tpu.matmul %99, %101, %cst_99 {dimension_numbers = #tpu.dot_dimension_numbers<[1], [0], [0], [1], [0, 0, 1, 1], [], []>} : vector<16x8xf32>, vector<8x8xf32>, vector<16x8xf32> -> vector<16x8xf32>
    %cst_100 = arith.constant 0.000000e+00 : f32
    %103 = vector.broadcast %cst_100 : f32 to vector<1x8xf32>
    %104 = arith.cmpf oeq, %77, %103 : vector<1x8xf32>
    %cst_101 = arith.constant -1.000000e+09 : f32
    %105 = vector.shape_cast %104 : vector<1x8xi1> to vector<1x8xi1>
    %106 = vector.broadcast %105 : vector<1x8xi1> to vector<16x8xi1>
    %107 = vector.broadcast %cst_101 : f32 to vector<16x8xf32>
    %108 = arith.select %106, %107, %102 : vector<16x8xi1>, vector<16x8xf32>
    %cst_102 = arith.constant 0.353553385 : f32
    %109 = vector.broadcast %cst_102 : f32 to vector<16x8xf32>
    %110 = arith.mulf %108, %109 : vector<16x8xf32>
    %cst_103 = arith.constant dense<0xFF800000> : vector<16xf32>
    %111 = vector.multi_reduction <maximumf>, %110, %cst_103 [1] : vector<16x8xf32> to vector<16xf32>
    %112 = vector.shape_cast %111 : vector<16xf32> to vector<16x1xf32>
    %113 = vector.broadcast %112 : vector<16x1xf32> to vector<16x8xf32>
    %114 = arith.subf %110, %113 : vector<16x8xf32>
    %115 = math.exp %114 : vector<16x8xf32>
    %cst_104 = arith.constant dense<0.000000e+00> : vector<16xf32>
    %116 = vector.multi_reduction <add>, %115, %cst_104 [1] : vector<16x8xf32> to vector<16xf32>
    %117 = vector.shape_cast %116 : vector<16xf32> to vector<16x1xf32>
    %118 = tpu.reciprocal %117 {approx = true} : vector<16x1xf32> -> vector<16x1xf32>
    %119 = vector.broadcast %118 : vector<16x1xf32> to vector<16x8xf32>
    %120 = arith.mulf %115, %119 : vector<16x8xf32>
    %121 = vector.extract_strided_slice %48 {offsets = [0, 0], sizes = [8, 8], strides = [1, 1]} : vector<8x32xf32> to vector<8x8xf32>
    %cst_105 = arith.constant dense<0.000000e+00> : vector<16x8xf32>
    %122 = tpu.matmul %120, %121, %cst_105 {dimension_numbers = #tpu.dot_dimension_numbers<[1], [0], [0], [1], [0, 0, 1, 1], [], []>} : vector<16x8xf32>, vector<8x8xf32>, vector<16x8xf32> -> vector<16x8xf32>
    %123 = vector.extract_strided_slice %98 {offsets = [0, 0], sizes = [8, 32], strides = [1, 1]} : vector<32x32xf32> to vector<8x32xf32>
    %cst_106 = arith.constant dense<0.000000e+00> : vector<16x32xf32>
    %124 = tpu.matmul %122, %123, %cst_106 {dimension_numbers = #tpu.dot_dimension_numbers<[1], [0], [0], [1], [0, 0, 1, 1], [], []>} : vector<16x8xf32>, vector<8x32xf32>, vector<16x32xf32> -> vector<16x32xf32>
    %125 = arith.addf %97, %124 : vector<16x32xf32>
    %126 = vector.extract_strided_slice %45 {offsets = [0, 8], sizes = [16, 8], strides = [1, 1]} : vector<16x32xf32> to vector<16x8xf32>
    %127 = vector.extract_strided_slice %46 {offsets = [0, 8], sizes = [8, 8], strides = [1, 1]} : vector<8x32xf32> to vector<8x8xf32>
    %128 = tpu.transpose %127, [1, 0] : vector<8x8xf32> -> vector<8x8xf32>
    %cst_107 = arith.constant dense<0.000000e+00> : vector<16x8xf32>
    %129 = tpu.matmul %126, %128, %cst_107 {dimension_numbers = #tpu.dot_dimension_numbers<[1], [0], [0], [1], [0, 0, 1, 1], [], []>} : vector<16x8xf32>, vector<8x8xf32>, vector<16x8xf32> -> vector<16x8xf32>
    %cst_108 = arith.constant 0.000000e+00 : f32
    %130 = vector.broadcast %cst_108 : f32 to vector<1x8xf32>
    %131 = arith.cmpf oeq, %77, %130 : vector<1x8xf32>
    %cst_109 = arith.constant -1.000000e+09 : f32
    %132 = vector.shape_cast %131 : vector<1x8xi1> to vector<1x8xi1>
    %133 = vector.broadcast %132 : vector<1x8xi1> to vector<16x8xi1>
    %134 = vector.broadcast %cst_109 : f32 to vector<16x8xf32>
    %135 = arith.select %133, %134, %129 : vector<16x8xi1>, vector<16x8xf32>
    %cst_110 = arith.constant 0.353553385 : f32
    %136 = vector.broadcast %cst_110 : f32 to vector<16x8xf32>
    %137 = arith.mulf %135, %136 : vector<16x8xf32>
    %cst_111 = arith.constant dense<0xFF800000> : vector<16xf32>
    %138 = vector.multi_reduction <maximumf>, %137, %cst_111 [1] : vector<16x8xf32> to vector<16xf32>
    %139 = vector.shape_cast %138 : vector<16xf32> to vector<16x1xf32>
    %140 = vector.broadcast %139 : vector<16x1xf32> to vector<16x8xf32>
    %141 = arith.subf %137, %140 : vector<16x8xf32>
    %142 = math.exp %141 : vector<16x8xf32>
    %cst_112 = arith.constant dense<0.000000e+00> : vector<16xf32>
    %143 = vector.multi_reduction <add>, %142, %cst_112 [1] : vector<16x8xf32> to vector<16xf32>
    %144 = vector.shape_cast %143 : vector<16xf32> to vector<16x1xf32>
    %145 = tpu.reciprocal %144 {approx = true} : vector<16x1xf32> -> vector<16x1xf32>
    %146 = vector.broadcast %145 : vector<16x1xf32> to vector<16x8xf32>
    %147 = arith.mulf %142, %146 : vector<16x8xf32>
    %148 = vector.extract_strided_slice %48 {offsets = [0, 8], sizes = [8, 8], strides = [1, 1]} : vector<8x32xf32> to vector<8x8xf32>
    %cst_113 = arith.constant dense<0.000000e+00> : vector<16x8xf32>
    %149 = tpu.matmul %147, %148, %cst_113 {dimension_numbers = #tpu.dot_dimension_numbers<[1], [0], [0], [1], [0, 0, 1, 1], [], []>} : vector<16x8xf32>, vector<8x8xf32>, vector<16x8xf32> -> vector<16x8xf32>
    %150 = vector.extract_strided_slice %98 {offsets = [8, 0], sizes = [8, 32], strides = [1, 1]} : vector<32x32xf32> to vector<8x32xf32>
    %cst_114 = arith.constant dense<0.000000e+00> : vector<16x32xf32>
    %151 = tpu.matmul %149, %150, %cst_114 {dimension_numbers = #tpu.dot_dimension_numbers<[1], [0], [0], [1], [0, 0, 1, 1], [], []>} : vector<16x8xf32>, vector<8x32xf32>, vector<16x32xf32> -> vector<16x32xf32>
    %152 = arith.addf %125, %151 : vector<16x32xf32>
    %153 = vector.extract_strided_slice %45 {offsets = [0, 16], sizes = [16, 8], strides = [1, 1]} : vector<16x32xf32> to vector<16x8xf32>
    %154 = vector.extract_strided_slice %46 {offsets = [0, 16], sizes = [8, 8], strides = [1, 1]} : vector<8x32xf32> to vector<8x8xf32>
    %155 = tpu.transpose %154, [1, 0] : vector<8x8xf32> -> vector<8x8xf32>
    %cst_115 = arith.constant dense<0.000000e+00> : vector<16x8xf32>
    %156 = tpu.matmul %153, %155, %cst_115 {dimension_numbers = #tpu.dot_dimension_numbers<[1], [0], [0], [1], [0, 0, 1, 1], [], []>} : vector<16x8xf32>, vector<8x8xf32>, vector<16x8xf32> -> vector<16x8xf32>
    %cst_116 = arith.constant 0.000000e+00 : f32
    %157 = vector.broadcast %cst_116 : f32 to vector<1x8xf32>
    %158 = arith.cmpf oeq, %77, %157 : vector<1x8xf32>
    %cst_117 = arith.constant -1.000000e+09 : f32
    %159 = vector.shape_cast %158 : vector<1x8xi1> to vector<1x8xi1>
    %160 = vector.broadcast %159 : vector<1x8xi1> to vector<16x8xi1>
    %161 = vector.broadcast %cst_117 : f32 to vector<16x8xf32>
    %162 = arith.select %160, %161, %156 : vector<16x8xi1>, vector<16x8xf32>
    %cst_118 = arith.constant 0.353553385 : f32
    %163 = vector.broadcast %cst_118 : f32 to vector<16x8xf32>
    %164 = arith.mulf %162, %163 : vector<16x8xf32>
    %cst_119 = arith.constant dense<0xFF800000> : vector<16xf32>
    %165 = vector.multi_reduction <maximumf>, %164, %cst_119 [1] : vector<16x8xf32> to vector<16xf32>
    %166 = vector.shape_cast %165 : vector<16xf32> to vector<16x1xf32>
    %167 = vector.broadcast %166 : vector<16x1xf32> to vector<16x8xf32>
    %168 = arith.subf %164, %167 : vector<16x8xf32>
    %169 = math.exp %168 : vector<16x8xf32>
    %cst_120 = arith.constant dense<0.000000e+00> : vector<16xf32>
    %170 = vector.multi_reduction <add>, %169, %cst_120 [1] : vector<16x8xf32> to vector<16xf32>
    %171 = vector.shape_cast %170 : vector<16xf32> to vector<16x1xf32>
    %172 = tpu.reciprocal %171 {approx = true} : vector<16x1xf32> -> vector<16x1xf32>
    %173 = vector.broadcast %172 : vector<16x1xf32> to vector<16x8xf32>
    %174 = arith.mulf %169, %173 : vector<16x8xf32>
    %175 = vector.extract_strided_slice %48 {offsets = [0, 16], sizes = [8, 8], strides = [1, 1]} : vector<8x32xf32> to vector<8x8xf32>
    %cst_121 = arith.constant dense<0.000000e+00> : vector<16x8xf32>
    %176 = tpu.matmul %174, %175, %cst_121 {dimension_numbers = #tpu.dot_dimension_numbers<[1], [0], [0], [1], [0, 0, 1, 1], [], []>} : vector<16x8xf32>, vector<8x8xf32>, vector<16x8xf32> -> vector<16x8xf32>
    %177 = vector.extract_strided_slice %98 {offsets = [16, 0], sizes = [8, 32], strides = [1, 1]} : vector<32x32xf32> to vector<8x32xf32>
    %cst_122 = arith.constant dense<0.000000e+00> : vector<16x32xf32>
    %178 = tpu.matmul %176, %177, %cst_122 {dimension_numbers = #tpu.dot_dimension_numbers<[1], [0], [0], [1], [0, 0, 1, 1], [], []>} : vector<16x8xf32>, vector<8x32xf32>, vector<16x32xf32> -> vector<16x32xf32>
    %179 = arith.addf %152, %178 : vector<16x32xf32>
    %180 = vector.extract_strided_slice %45 {offsets = [0, 24], sizes = [16, 8], strides = [1, 1]} : vector<16x32xf32> to vector<16x8xf32>
    %181 = vector.extract_strided_slice %46 {offsets = [0, 24], sizes = [8, 8], strides = [1, 1]} : vector<8x32xf32> to vector<8x8xf32>
    %182 = tpu.transpose %181, [1, 0] : vector<8x8xf32> -> vector<8x8xf32>
    %cst_123 = arith.constant dense<0.000000e+00> : vector<16x8xf32>
    %183 = tpu.matmul %180, %182, %cst_123 {dimension_numbers = #tpu.dot_dimension_numbers<[1], [0], [0], [1], [0, 0, 1, 1], [], []>} : vector<16x8xf32>, vector<8x8xf32>, vector<16x8xf32> -> vector<16x8xf32>
    %cst_124 = arith.constant 0.000000e+00 : f32
    %184 = vector.broadcast %cst_124 : f32 to vector<1x8xf32>
    %185 = arith.cmpf oeq, %77, %184 : vector<1x8xf32>
    %cst_125 = arith.constant -1.000000e+09 : f32
    %186 = vector.shape_cast %185 : vector<1x8xi1> to vector<1x8xi1>
    %187 = vector.broadcast %186 : vector<1x8xi1> to vector<16x8xi1>
    %188 = vector.broadcast %cst_125 : f32 to vector<16x8xf32>
    %189 = arith.select %187, %188, %183 : vector<16x8xi1>, vector<16x8xf32>
    %cst_126 = arith.constant 0.353553385 : f32
    %190 = vector.broadcast %cst_126 : f32 to vector<16x8xf32>
    %191 = arith.mulf %189, %190 : vector<16x8xf32>
    %cst_127 = arith.constant dense<0xFF800000> : vector<16xf32>
    %192 = vector.multi_reduction <maximumf>, %191, %cst_127 [1] : vector<16x8xf32> to vector<16xf32>
    %193 = vector.shape_cast %192 : vector<16xf32> to vector<16x1xf32>
    %194 = vector.broadcast %193 : vector<16x1xf32> to vector<16x8xf32>
    %195 = arith.subf %191, %194 : vector<16x8xf32>
    %196 = math.exp %195 : vector<16x8xf32>
    %cst_128 = arith.constant dense<0.000000e+00> : vector<16xf32>
    %197 = vector.multi_reduction <add>, %196, %cst_128 [1] : vector<16x8xf32> to vector<16xf32>
    %198 = vector.shape_cast %197 : vector<16xf32> to vector<16x1xf32>
    %199 = tpu.reciprocal %198 {approx = true} : vector<16x1xf32> -> vector<16x1xf32>
    %200 = vector.broadcast %199 : vector<16x1xf32> to vector<16x8xf32>
    %201 = arith.mulf %196, %200 : vector<16x8xf32>
    %202 = vector.extract_strided_slice %48 {offsets = [0, 24], sizes = [8, 8], strides = [1, 1]} : vector<8x32xf32> to vector<8x8xf32>
    %cst_129 = arith.constant dense<0.000000e+00> : vector<16x8xf32>
    %203 = tpu.matmul %201, %202, %cst_129 {dimension_numbers = #tpu.dot_dimension_numbers<[1], [0], [0], [1], [0, 0, 1, 1], [], []>} : vector<16x8xf32>, vector<8x8xf32>, vector<16x8xf32> -> vector<16x8xf32>
    %204 = vector.extract_strided_slice %98 {offsets = [24, 0], sizes = [8, 32], strides = [1, 1]} : vector<32x32xf32> to vector<8x32xf32>
    %cst_130 = arith.constant dense<0.000000e+00> : vector<16x32xf32>
    %205 = tpu.matmul %203, %204, %cst_130 {dimension_numbers = #tpu.dot_dimension_numbers<[1], [0], [0], [1], [0, 0, 1, 1], [], []>} : vector<16x8xf32>, vector<8x32xf32>, vector<16x32xf32> -> vector<16x32xf32>
    %206 = arith.addf %179, %205 : vector<16x32xf32>
    %207 = vector.extract_strided_slice %87 {offsets = [64, 0], sizes = [32, 32], strides = [1, 1]} : vector<96x32xf32> to vector<32x32xf32>
    %208 = vector.extract_strided_slice %45 {offsets = [0, 0], sizes = [16, 8], strides = [1, 1]} : vector<16x32xf32> to vector<16x8xf32>
    %209 = vector.extract_strided_slice %72 {offsets = [0, 0], sizes = [13, 8], strides = [1, 1]} : vector<13x32xf32> to vector<13x8xf32>
    %210 = tpu.transpose %209, [1, 0] : vector<13x8xf32> -> vector<8x13xf32>
    %cst_131 = arith.constant dense<0.000000e+00> : vector<16x13xf32>
    %211 = tpu.matmul %208, %210, %cst_131 {dimension_numbers = #tpu.dot_dimension_numbers<[1], [0], [0], [1], [0, 0, 1, 1], [], []>} : vector<16x8xf32>, vector<8x13xf32>, vector<16x13xf32> -> vector<16x13xf32>
    %212 = arith.mulf %211, %82 : vector<16x13xf32>
    %cst_132 = arith.constant 0.000000e+00 : f32
    %213 = vector.broadcast %cst_132 : f32 to vector<1x13xf32>
    %214 = arith.cmpf oeq, %79, %213 : vector<1x13xf32>
    %cst_133 = arith.constant -1.000000e+09 : f32
    %215 = vector.shape_cast %214 : vector<1x13xi1> to vector<1x13xi1>
    %216 = vector.broadcast %215 : vector<1x13xi1> to vector<16x13xi1>
    %217 = vector.broadcast %cst_133 : f32 to vector<16x13xf32>
    %218 = arith.select %216, %217, %212 : vector<16x13xi1>, vector<16x13xf32>
    %cst_134 = arith.constant 0.353553385 : f32
    %219 = vector.broadcast %cst_134 : f32 to vector<16x13xf32>
    %220 = arith.mulf %218, %219 : vector<16x13xf32>
    %cst_135 = arith.constant dense<0xFF800000> : vector<16xf32>
    %221 = vector.multi_reduction <maximumf>, %220, %cst_135 [1] : vector<16x13xf32> to vector<16xf32>
    %222 = vector.shape_cast %221 : vector<16xf32> to vector<16x1xf32>
    %223 = vector.broadcast %222 : vector<16x1xf32> to vector<16x13xf32>
    %224 = arith.subf %220, %223 : vector<16x13xf32>
    %225 = math.exp %224 : vector<16x13xf32>
    %cst_136 = arith.constant dense<0.000000e+00> : vector<16xf32>
    %226 = vector.multi_reduction <add>, %225, %cst_136 [1] : vector<16x13xf32> to vector<16xf32>
    %227 = vector.shape_cast %226 : vector<16xf32> to vector<16x1xf32>
    %228 = tpu.reciprocal %227 {approx = true} : vector<16x1xf32> -> vector<16x1xf32>
    %229 = vector.broadcast %228 : vector<16x1xf32> to vector<16x13xf32>
    %230 = arith.mulf %225, %229 : vector<16x13xf32>
    %231 = vector.extract_strided_slice %73 {offsets = [0, 0], sizes = [13, 8], strides = [1, 1]} : vector<13x32xf32> to vector<13x8xf32>
    %cst_137 = arith.constant dense<0.000000e+00> : vector<16x8xf32>
    %232 = tpu.matmul %230, %231, %cst_137 {dimension_numbers = #tpu.dot_dimension_numbers<[1], [0], [0], [1], [0, 0, 1, 1], [], []>} : vector<16x13xf32>, vector<13x8xf32>, vector<16x8xf32> -> vector<16x8xf32>
    %233 = vector.extract_strided_slice %207 {offsets = [0, 0], sizes = [8, 32], strides = [1, 1]} : vector<32x32xf32> to vector<8x32xf32>
    %cst_138 = arith.constant dense<0.000000e+00> : vector<16x32xf32>
    %234 = tpu.matmul %232, %233, %cst_138 {dimension_numbers = #tpu.dot_dimension_numbers<[1], [0], [0], [1], [0, 0, 1, 1], [], []>} : vector<16x8xf32>, vector<8x32xf32>, vector<16x32xf32> -> vector<16x32xf32>
    %235 = arith.addf %206, %234 : vector<16x32xf32>
    %236 = vector.extract_strided_slice %45 {offsets = [0, 8], sizes = [16, 8], strides = [1, 1]} : vector<16x32xf32> to vector<16x8xf32>
    %237 = vector.extract_strided_slice %72 {offsets = [0, 8], sizes = [13, 8], strides = [1, 1]} : vector<13x32xf32> to vector<13x8xf32>
    %238 = tpu.transpose %237, [1, 0] : vector<13x8xf32> -> vector<8x13xf32>
    %cst_139 = arith.constant dense<0.000000e+00> : vector<16x13xf32>
    %239 = tpu.matmul %236, %238, %cst_139 {dimension_numbers = #tpu.dot_dimension_numbers<[1], [0], [0], [1], [0, 0, 1, 1], [], []>} : vector<16x8xf32>, vector<8x13xf32>, vector<16x13xf32> -> vector<16x13xf32>
    %240 = arith.mulf %239, %82 : vector<16x13xf32>
    %cst_140 = arith.constant 0.000000e+00 : f32
    %241 = vector.broadcast %cst_140 : f32 to vector<1x13xf32>
    %242 = arith.cmpf oeq, %79, %241 : vector<1x13xf32>
    %cst_141 = arith.constant -1.000000e+09 : f32
    %243 = vector.shape_cast %242 : vector<1x13xi1> to vector<1x13xi1>
    %244 = vector.broadcast %243 : vector<1x13xi1> to vector<16x13xi1>
    %245 = vector.broadcast %cst_141 : f32 to vector<16x13xf32>
    %246 = arith.select %244, %245, %240 : vector<16x13xi1>, vector<16x13xf32>
    %cst_142 = arith.constant 0.353553385 : f32
    %247 = vector.broadcast %cst_142 : f32 to vector<16x13xf32>
    %248 = arith.mulf %246, %247 : vector<16x13xf32>
    %cst_143 = arith.constant dense<0xFF800000> : vector<16xf32>
    %249 = vector.multi_reduction <maximumf>, %248, %cst_143 [1] : vector<16x13xf32> to vector<16xf32>
    %250 = vector.shape_cast %249 : vector<16xf32> to vector<16x1xf32>
    %251 = vector.broadcast %250 : vector<16x1xf32> to vector<16x13xf32>
    %252 = arith.subf %248, %251 : vector<16x13xf32>
    %253 = math.exp %252 : vector<16x13xf32>
    %cst_144 = arith.constant dense<0.000000e+00> : vector<16xf32>
    %254 = vector.multi_reduction <add>, %253, %cst_144 [1] : vector<16x13xf32> to vector<16xf32>
    %255 = vector.shape_cast %254 : vector<16xf32> to vector<16x1xf32>
    %256 = tpu.reciprocal %255 {approx = true} : vector<16x1xf32> -> vector<16x1xf32>
    %257 = vector.broadcast %256 : vector<16x1xf32> to vector<16x13xf32>
    %258 = arith.mulf %253, %257 : vector<16x13xf32>
    %259 = vector.extract_strided_slice %73 {offsets = [0, 8], sizes = [13, 8], strides = [1, 1]} : vector<13x32xf32> to vector<13x8xf32>
    %cst_145 = arith.constant dense<0.000000e+00> : vector<16x8xf32>
    %260 = tpu.matmul %258, %259, %cst_145 {dimension_numbers = #tpu.dot_dimension_numbers<[1], [0], [0], [1], [0, 0, 1, 1], [], []>} : vector<16x13xf32>, vector<13x8xf32>, vector<16x8xf32> -> vector<16x8xf32>
    %261 = vector.extract_strided_slice %207 {offsets = [8, 0], sizes = [8, 32], strides = [1, 1]} : vector<32x32xf32> to vector<8x32xf32>
    %cst_146 = arith.constant dense<0.000000e+00> : vector<16x32xf32>
    %262 = tpu.matmul %260, %261, %cst_146 {dimension_numbers = #tpu.dot_dimension_numbers<[1], [0], [0], [1], [0, 0, 1, 1], [], []>} : vector<16x8xf32>, vector<8x32xf32>, vector<16x32xf32> -> vector<16x32xf32>
    %263 = arith.addf %235, %262 : vector<16x32xf32>
    %264 = vector.extract_strided_slice %45 {offsets = [0, 16], sizes = [16, 8], strides = [1, 1]} : vector<16x32xf32> to vector<16x8xf32>
    %265 = vector.extract_strided_slice %72 {offsets = [0, 16], sizes = [13, 8], strides = [1, 1]} : vector<13x32xf32> to vector<13x8xf32>
    %266 = tpu.transpose %265, [1, 0] : vector<13x8xf32> -> vector<8x13xf32>
    %cst_147 = arith.constant dense<0.000000e+00> : vector<16x13xf32>
    %267 = tpu.matmul %264, %266, %cst_147 {dimension_numbers = #tpu.dot_dimension_numbers<[1], [0], [0], [1], [0, 0, 1, 1], [], []>} : vector<16x8xf32>, vector<8x13xf32>, vector<16x13xf32> -> vector<16x13xf32>
    %268 = arith.mulf %267, %82 : vector<16x13xf32>
    %cst_148 = arith.constant 0.000000e+00 : f32
    %269 = vector.broadcast %cst_148 : f32 to vector<1x13xf32>
    %270 = arith.cmpf oeq, %79, %269 : vector<1x13xf32>
    %cst_149 = arith.constant -1.000000e+09 : f32
    %271 = vector.shape_cast %270 : vector<1x13xi1> to vector<1x13xi1>
    %272 = vector.broadcast %271 : vector<1x13xi1> to vector<16x13xi1>
    %273 = vector.broadcast %cst_149 : f32 to vector<16x13xf32>
    %274 = arith.select %272, %273, %268 : vector<16x13xi1>, vector<16x13xf32>
    %cst_150 = arith.constant 0.353553385 : f32
    %275 = vector.broadcast %cst_150 : f32 to vector<16x13xf32>
    %276 = arith.mulf %274, %275 : vector<16x13xf32>
    %cst_151 = arith.constant dense<0xFF800000> : vector<16xf32>
    %277 = vector.multi_reduction <maximumf>, %276, %cst_151 [1] : vector<16x13xf32> to vector<16xf32>
    %278 = vector.shape_cast %277 : vector<16xf32> to vector<16x1xf32>
    %279 = vector.broadcast %278 : vector<16x1xf32> to vector<16x13xf32>
    %280 = arith.subf %276, %279 : vector<16x13xf32>
    %281 = math.exp %280 : vector<16x13xf32>
    %cst_152 = arith.constant dense<0.000000e+00> : vector<16xf32>
    %282 = vector.multi_reduction <add>, %281, %cst_152 [1] : vector<16x13xf32> to vector<16xf32>
    %283 = vector.shape_cast %282 : vector<16xf32> to vector<16x1xf32>
    %284 = tpu.reciprocal %283 {approx = true} : vector<16x1xf32> -> vector<16x1xf32>
    %285 = vector.broadcast %284 : vector<16x1xf32> to vector<16x13xf32>
    %286 = arith.mulf %281, %285 : vector<16x13xf32>
    %287 = vector.extract_strided_slice %73 {offsets = [0, 16], sizes = [13, 8], strides = [1, 1]} : vector<13x32xf32> to vector<13x8xf32>
    %cst_153 = arith.constant dense<0.000000e+00> : vector<16x8xf32>
    %288 = tpu.matmul %286, %287, %cst_153 {dimension_numbers = #tpu.dot_dimension_numbers<[1], [0], [0], [1], [0, 0, 1, 1], [], []>} : vector<16x13xf32>, vector<13x8xf32>, vector<16x8xf32> -> vector<16x8xf32>
    %289 = vector.extract_strided_slice %207 {offsets = [16, 0], sizes = [8, 32], strides = [1, 1]} : vector<32x32xf32> to vector<8x32xf32>
    %cst_154 = arith.constant dense<0.000000e+00> : vector<16x32xf32>
    %290 = tpu.matmul %288, %289, %cst_154 {dimension_numbers = #tpu.dot_dimension_numbers<[1], [0], [0], [1], [0, 0, 1, 1], [], []>} : vector<16x8xf32>, vector<8x32xf32>, vector<16x32xf32> -> vector<16x32xf32>
    %291 = arith.addf %263, %290 : vector<16x32xf32>
    %292 = vector.extract_strided_slice %45 {offsets = [0, 24], sizes = [16, 8], strides = [1, 1]} : vector<16x32xf32> to vector<16x8xf32>
    %293 = vector.extract_strided_slice %72 {offsets = [0, 24], sizes = [13, 8], strides = [1, 1]} : vector<13x32xf32> to vector<13x8xf32>
    %294 = tpu.transpose %293, [1, 0] : vector<13x8xf32> -> vector<8x13xf32>
    %cst_155 = arith.constant dense<0.000000e+00> : vector<16x13xf32>
    %295 = tpu.matmul %292, %294, %cst_155 {dimension_numbers = #tpu.dot_dimension_numbers<[1], [0], [0], [1], [0, 0, 1, 1], [], []>} : vector<16x8xf32>, vector<8x13xf32>, vector<16x13xf32> -> vector<16x13xf32>
    %296 = arith.mulf %295, %82 : vector<16x13xf32>
    %cst_156 = arith.constant 0.000000e+00 : f32
    %297 = vector.broadcast %cst_156 : f32 to vector<1x13xf32>
    %298 = arith.cmpf oeq, %79, %297 : vector<1x13xf32>
    %cst_157 = arith.constant -1.000000e+09 : f32
    %299 = vector.shape_cast %298 : vector<1x13xi1> to vector<1x13xi1>
    %300 = vector.broadcast %299 : vector<1x13xi1> to vector<16x13xi1>
    %301 = vector.broadcast %cst_157 : f32 to vector<16x13xf32>
    %302 = arith.select %300, %301, %296 : vector<16x13xi1>, vector<16x13xf32>
    %cst_158 = arith.constant 0.353553385 : f32
    %303 = vector.broadcast %cst_158 : f32 to vector<16x13xf32>
    %304 = arith.mulf %302, %303 : vector<16x13xf32>
    %cst_159 = arith.constant dense<0xFF800000> : vector<16xf32>
    %305 = vector.multi_reduction <maximumf>, %304, %cst_159 [1] : vector<16x13xf32> to vector<16xf32>
    %306 = vector.shape_cast %305 : vector<16xf32> to vector<16x1xf32>
    %307 = vector.broadcast %306 : vector<16x1xf32> to vector<16x13xf32>
    %308 = arith.subf %304, %307 : vector<16x13xf32>
    %309 = math.exp %308 : vector<16x13xf32>
    %cst_160 = arith.constant dense<0.000000e+00> : vector<16xf32>
    %310 = vector.multi_reduction <add>, %309, %cst_160 [1] : vector<16x13xf32> to vector<16xf32>
    %311 = vector.shape_cast %310 : vector<16xf32> to vector<16x1xf32>
    %312 = tpu.reciprocal %311 {approx = true} : vector<16x1xf32> -> vector<16x1xf32>
    %313 = vector.broadcast %312 : vector<16x1xf32> to vector<16x13xf32>
    %314 = arith.mulf %309, %313 : vector<16x13xf32>
    %315 = vector.extract_strided_slice %73 {offsets = [0, 24], sizes = [13, 8], strides = [1, 1]} : vector<13x32xf32> to vector<13x8xf32>
    %cst_161 = arith.constant dense<0.000000e+00> : vector<16x8xf32>
    %316 = tpu.matmul %314, %315, %cst_161 {dimension_numbers = #tpu.dot_dimension_numbers<[1], [0], [0], [1], [0, 0, 1, 1], [], []>} : vector<16x13xf32>, vector<13x8xf32>, vector<16x8xf32> -> vector<16x8xf32>
    %317 = vector.extract_strided_slice %207 {offsets = [24, 0], sizes = [8, 32], strides = [1, 1]} : vector<32x32xf32> to vector<8x32xf32>
    %cst_162 = arith.constant dense<0.000000e+00> : vector<16x32xf32>
    %318 = tpu.matmul %316, %317, %cst_162 {dimension_numbers = #tpu.dot_dimension_numbers<[1], [0], [0], [1], [0, 0, 1, 1], [], []>} : vector<16x8xf32>, vector<8x32xf32>, vector<16x32xf32> -> vector<16x32xf32>
    %319 = arith.addf %291, %318 : vector<16x32xf32>
    %320 = vector.extract_strided_slice %89 {offsets = [0, 0], sizes = [32, 32], strides = [1, 1]} : vector<96x32xf32> to vector<32x32xf32>
    %cst_163 = arith.constant dense<0.000000e+00> : vector<8x32xf32>
    %321 = tpu.matmul %3, %320, %cst_163 {dimension_numbers = #tpu.dot_dimension_numbers<[1], [0], [0], [1], [0, 0, 1, 1], [], []>} : vector<8x32xf32>, vector<32x32xf32>, vector<8x32xf32> -> vector<8x32xf32>
    %c1_164 = arith.constant 1 : index
    %c0_165 = arith.constant 0 : index
    %c0_166 = arith.constant 0 : index
    %322 = vector.load %arg16[%c1_164, %c0_165, %c0_166] : memref<3x1x32xf32, #tpu.memory_space<vmem>>, vector<1x1x32xf32>
    %323 = vector.shape_cast %322 : vector<1x1x32xf32> to vector<1x32xf32>
    %324 = vector.broadcast %323 : vector<1x32xf32> to vector<8x32xf32>
    %325 = arith.addf %321, %324 : vector<8x32xf32>
    %326 = vector.extract_strided_slice %89 {offsets = [32, 0], sizes = [32, 32], strides = [1, 1]} : vector<96x32xf32> to vector<32x32xf32>
    %327 = vector.extract_strided_slice %47 {offsets = [0, 0], sizes = [8, 8], strides = [1, 1]} : vector<8x32xf32> to vector<8x8xf32>
    %328 = vector.extract_strided_slice %70 {offsets = [0, 0], sizes = [17, 8], strides = [1, 1]} : vector<17x32xf32> to vector<17x8xf32>
    %329 = tpu.transpose %328, [1, 0] : vector<17x8xf32> -> vector<8x17xf32>
    %cst_167 = arith.constant dense<0.000000e+00> : vector<8x17xf32>
    %330 = tpu.matmul %327, %329, %cst_167 {dimension_numbers = #tpu.dot_dimension_numbers<[1], [0], [0], [1], [0, 0, 1, 1], [], []>} : vector<8x8xf32>, vector<8x17xf32>, vector<8x17xf32> -> vector<8x17xf32>
    %cst_168 = arith.constant 0.000000e+00 : f32
    %331 = vector.broadcast %cst_168 : f32 to vector<1x17xf32>
    %332 = arith.cmpf oeq, %75, %331 : vector<1x17xf32>
    %cst_169 = arith.constant -1.000000e+09 : f32
    %333 = vector.shape_cast %332 : vector<1x17xi1> to vector<1x17xi1>
    %334 = vector.broadcast %333 : vector<1x17xi1> to vector<8x17xi1>
    %335 = vector.broadcast %cst_169 : f32 to vector<8x17xf32>
    %336 = arith.select %334, %335, %330 : vector<8x17xi1>, vector<8x17xf32>
    %cst_170 = arith.constant 0.353553385 : f32
    %337 = vector.broadcast %cst_170 : f32 to vector<8x17xf32>
    %338 = arith.mulf %336, %337 : vector<8x17xf32>
    %cst_171 = arith.constant dense<0xFF800000> : vector<8xf32>
    %339 = vector.multi_reduction <maximumf>, %338, %cst_171 [1] : vector<8x17xf32> to vector<8xf32>
    %340 = vector.shape_cast %339 : vector<8xf32> to vector<8x1xf32>
    %341 = vector.broadcast %340 : vector<8x1xf32> to vector<8x17xf32>
    %342 = arith.subf %338, %341 : vector<8x17xf32>
    %343 = math.exp %342 : vector<8x17xf32>
    %cst_172 = arith.constant dense<0.000000e+00> : vector<8xf32>
    %344 = vector.multi_reduction <add>, %343, %cst_172 [1] : vector<8x17xf32> to vector<8xf32>
    %345 = vector.shape_cast %344 : vector<8xf32> to vector<8x1xf32>
    %346 = tpu.reciprocal %345 {approx = true} : vector<8x1xf32> -> vector<8x1xf32>
    %347 = vector.broadcast %346 : vector<8x1xf32> to vector<8x17xf32>
    %348 = arith.mulf %343, %347 : vector<8x17xf32>
    %349 = vector.extract_strided_slice %71 {offsets = [0, 0], sizes = [17, 8], strides = [1, 1]} : vector<17x32xf32> to vector<17x8xf32>
    %cst_173 = arith.constant dense<0.000000e+00> : vector<8x8xf32>
    %350 = tpu.matmul %348, %349, %cst_173 {dimension_numbers = #tpu.dot_dimension_numbers<[1], [0], [0], [1], [0, 0, 1, 1], [], []>} : vector<8x17xf32>, vector<17x8xf32>, vector<8x8xf32> -> vector<8x8xf32>
    %351 = vector.extract_strided_slice %326 {offsets = [0, 0], sizes = [8, 32], strides = [1, 1]} : vector<32x32xf32> to vector<8x32xf32>
    %cst_174 = arith.constant dense<0.000000e+00> : vector<8x32xf32>
    %352 = tpu.matmul %350, %351, %cst_174 {dimension_numbers = #tpu.dot_dimension_numbers<[1], [0], [0], [1], [0, 0, 1, 1], [], []>} : vector<8x8xf32>, vector<8x32xf32>, vector<8x32xf32> -> vector<8x32xf32>
    %353 = arith.addf %325, %352 : vector<8x32xf32>
    %354 = vector.extract_strided_slice %47 {offsets = [0, 8], sizes = [8, 8], strides = [1, 1]} : vector<8x32xf32> to vector<8x8xf32>
    %355 = vector.extract_strided_slice %70 {offsets = [0, 8], sizes = [17, 8], strides = [1, 1]} : vector<17x32xf32> to vector<17x8xf32>
    %356 = tpu.transpose %355, [1, 0] : vector<17x8xf32> -> vector<8x17xf32>
    %cst_175 = arith.constant dense<0.000000e+00> : vector<8x17xf32>
    %357 = tpu.matmul %354, %356, %cst_175 {dimension_numbers = #tpu.dot_dimension_numbers<[1], [0], [0], [1], [0, 0, 1, 1], [], []>} : vector<8x8xf32>, vector<8x17xf32>, vector<8x17xf32> -> vector<8x17xf32>
    %cst_176 = arith.constant 0.000000e+00 : f32
    %358 = vector.broadcast %cst_176 : f32 to vector<1x17xf32>
    %359 = arith.cmpf oeq, %75, %358 : vector<1x17xf32>
    %cst_177 = arith.constant -1.000000e+09 : f32
    %360 = vector.shape_cast %359 : vector<1x17xi1> to vector<1x17xi1>
    %361 = vector.broadcast %360 : vector<1x17xi1> to vector<8x17xi1>
    %362 = vector.broadcast %cst_177 : f32 to vector<8x17xf32>
    %363 = arith.select %361, %362, %357 : vector<8x17xi1>, vector<8x17xf32>
    %cst_178 = arith.constant 0.353553385 : f32
    %364 = vector.broadcast %cst_178 : f32 to vector<8x17xf32>
    %365 = arith.mulf %363, %364 : vector<8x17xf32>
    %cst_179 = arith.constant dense<0xFF800000> : vector<8xf32>
    %366 = vector.multi_reduction <maximumf>, %365, %cst_179 [1] : vector<8x17xf32> to vector<8xf32>
    %367 = vector.shape_cast %366 : vector<8xf32> to vector<8x1xf32>
    %368 = vector.broadcast %367 : vector<8x1xf32> to vector<8x17xf32>
    %369 = arith.subf %365, %368 : vector<8x17xf32>
    %370 = math.exp %369 : vector<8x17xf32>
    %cst_180 = arith.constant dense<0.000000e+00> : vector<8xf32>
    %371 = vector.multi_reduction <add>, %370, %cst_180 [1] : vector<8x17xf32> to vector<8xf32>
    %372 = vector.shape_cast %371 : vector<8xf32> to vector<8x1xf32>
    %373 = tpu.reciprocal %372 {approx = true} : vector<8x1xf32> -> vector<8x1xf32>
    %374 = vector.broadcast %373 : vector<8x1xf32> to vector<8x17xf32>
    %375 = arith.mulf %370, %374 : vector<8x17xf32>
    %376 = vector.extract_strided_slice %71 {offsets = [0, 8], sizes = [17, 8], strides = [1, 1]} : vector<17x32xf32> to vector<17x8xf32>
    %cst_181 = arith.constant dense<0.000000e+00> : vector<8x8xf32>
    %377 = tpu.matmul %375, %376, %cst_181 {dimension_numbers = #tpu.dot_dimension_numbers<[1], [0], [0], [1], [0, 0, 1, 1], [], []>} : vector<8x17xf32>, vector<17x8xf32>, vector<8x8xf32> -> vector<8x8xf32>
    %378 = vector.extract_strided_slice %326 {offsets = [8, 0], sizes = [8, 32], strides = [1, 1]} : vector<32x32xf32> to vector<8x32xf32>
    %cst_182 = arith.constant dense<0.000000e+00> : vector<8x32xf32>
    %379 = tpu.matmul %377, %378, %cst_182 {dimension_numbers = #tpu.dot_dimension_numbers<[1], [0], [0], [1], [0, 0, 1, 1], [], []>} : vector<8x8xf32>, vector<8x32xf32>, vector<8x32xf32> -> vector<8x32xf32>
    %380 = arith.addf %353, %379 : vector<8x32xf32>
    %381 = vector.extract_strided_slice %47 {offsets = [0, 16], sizes = [8, 8], strides = [1, 1]} : vector<8x32xf32> to vector<8x8xf32>
    %382 = vector.extract_strided_slice %70 {offsets = [0, 16], sizes = [17, 8], strides = [1, 1]} : vector<17x32xf32> to vector<17x8xf32>
    %383 = tpu.transpose %382, [1, 0] : vector<17x8xf32> -> vector<8x17xf32>
    %cst_183 = arith.constant dense<0.000000e+00> : vector<8x17xf32>
    %384 = tpu.matmul %381, %383, %cst_183 {dimension_numbers = #tpu.dot_dimension_numbers<[1], [0], [0], [1], [0, 0, 1, 1], [], []>} : vector<8x8xf32>, vector<8x17xf32>, vector<8x17xf32> -> vector<8x17xf32>
    %cst_184 = arith.constant 0.000000e+00 : f32
    %385 = vector.broadcast %cst_184 : f32 to vector<1x17xf32>
    %386 = arith.cmpf oeq, %75, %385 : vector<1x17xf32>
    %cst_185 = arith.constant -1.000000e+09 : f32
    %387 = vector.shape_cast %386 : vector<1x17xi1> to vector<1x17xi1>
    %388 = vector.broadcast %387 : vector<1x17xi1> to vector<8x17xi1>
    %389 = vector.broadcast %cst_185 : f32 to vector<8x17xf32>
    %390 = arith.select %388, %389, %384 : vector<8x17xi1>, vector<8x17xf32>
    %cst_186 = arith.constant 0.353553385 : f32
    %391 = vector.broadcast %cst_186 : f32 to vector<8x17xf32>
    %392 = arith.mulf %390, %391 : vector<8x17xf32>
    %cst_187 = arith.constant dense<0xFF800000> : vector<8xf32>
    %393 = vector.multi_reduction <maximumf>, %392, %cst_187 [1] : vector<8x17xf32> to vector<8xf32>
    %394 = vector.shape_cast %393 : vector<8xf32> to vector<8x1xf32>
    %395 = vector.broadcast %394 : vector<8x1xf32> to vector<8x17xf32>
    %396 = arith.subf %392, %395 : vector<8x17xf32>
    %397 = math.exp %396 : vector<8x17xf32>
    %cst_188 = arith.constant dense<0.000000e+00> : vector<8xf32>
    %398 = vector.multi_reduction <add>, %397, %cst_188 [1] : vector<8x17xf32> to vector<8xf32>
    %399 = vector.shape_cast %398 : vector<8xf32> to vector<8x1xf32>
    %400 = tpu.reciprocal %399 {approx = true} : vector<8x1xf32> -> vector<8x1xf32>
    %401 = vector.broadcast %400 : vector<8x1xf32> to vector<8x17xf32>
    %402 = arith.mulf %397, %401 : vector<8x17xf32>
    %403 = vector.extract_strided_slice %71 {offsets = [0, 16], sizes = [17, 8], strides = [1, 1]} : vector<17x32xf32> to vector<17x8xf32>
    %cst_189 = arith.constant dense<0.000000e+00> : vector<8x8xf32>
    %404 = tpu.matmul %402, %403, %cst_189 {dimension_numbers = #tpu.dot_dimension_numbers<[1], [0], [0], [1], [0, 0, 1, 1], [], []>} : vector<8x17xf32>, vector<17x8xf32>, vector<8x8xf32> -> vector<8x8xf32>
    %405 = vector.extract_strided_slice %326 {offsets = [16, 0], sizes = [8, 32], strides = [1, 1]} : vector<32x32xf32> to vector<8x32xf32>
    %cst_190 = arith.constant dense<0.000000e+00> : vector<8x32xf32>
    %406 = tpu.matmul %404, %405, %cst_190 {dimension_numbers = #tpu.dot_dimension_numbers<[1], [0], [0], [1], [0, 0, 1, 1], [], []>} : vector<8x8xf32>, vector<8x32xf32>, vector<8x32xf32> -> vector<8x32xf32>
    %407 = arith.addf %380, %406 : vector<8x32xf32>
    %408 = vector.extract_strided_slice %47 {offsets = [0, 24], sizes = [8, 8], strides = [1, 1]} : vector<8x32xf32> to vector<8x8xf32>
    %409 = vector.extract_strided_slice %70 {offsets = [0, 24], sizes = [17, 8], strides = [1, 1]} : vector<17x32xf32> to vector<17x8xf32>
    %410 = tpu.transpose %409, [1, 0] : vector<17x8xf32> -> vector<8x17xf32>
    %cst_191 = arith.constant dense<0.000000e+00> : vector<8x17xf32>
    %411 = tpu.matmul %408, %410, %cst_191 {dimension_numbers = #tpu.dot_dimension_numbers<[1], [0], [0], [1], [0, 0, 1, 1], [], []>} : vector<8x8xf32>, vector<8x17xf32>, vector<8x17xf32> -> vector<8x17xf32>
    %cst_192 = arith.constant 0.000000e+00 : f32
    %412 = vector.broadcast %cst_192 : f32 to vector<1x17xf32>
    %413 = arith.cmpf oeq, %75, %412 : vector<1x17xf32>
    %cst_193 = arith.constant -1.000000e+09 : f32
    %414 = vector.shape_cast %413 : vector<1x17xi1> to vector<1x17xi1>
    %415 = vector.broadcast %414 : vector<1x17xi1> to vector<8x17xi1>
    %416 = vector.broadcast %cst_193 : f32 to vector<8x17xf32>
    %417 = arith.select %415, %416, %411 : vector<8x17xi1>, vector<8x17xf32>
    %cst_194 = arith.constant 0.353553385 : f32
    %418 = vector.broadcast %cst_194 : f32 to vector<8x17xf32>
    %419 = arith.mulf %417, %418 : vector<8x17xf32>
    %cst_195 = arith.constant dense<0xFF800000> : vector<8xf32>
    %420 = vector.multi_reduction <maximumf>, %419, %cst_195 [1] : vector<8x17xf32> to vector<8xf32>
    %421 = vector.shape_cast %420 : vector<8xf32> to vector<8x1xf32>
    %422 = vector.broadcast %421 : vector<8x1xf32> to vector<8x17xf32>
    %423 = arith.subf %419, %422 : vector<8x17xf32>
    %424 = math.exp %423 : vector<8x17xf32>
    %cst_196 = arith.constant dense<0.000000e+00> : vector<8xf32>
    %425 = vector.multi_reduction <add>, %424, %cst_196 [1] : vector<8x17xf32> to vector<8xf32>
    %426 = vector.shape_cast %425 : vector<8xf32> to vector<8x1xf32>
    %427 = tpu.reciprocal %426 {approx = true} : vector<8x1xf32> -> vector<8x1xf32>
    %428 = vector.broadcast %427 : vector<8x1xf32> to vector<8x17xf32>
    %429 = arith.mulf %424, %428 : vector<8x17xf32>
    %430 = vector.extract_strided_slice %71 {offsets = [0, 24], sizes = [17, 8], strides = [1, 1]} : vector<17x32xf32> to vector<17x8xf32>
    %cst_197 = arith.constant dense<0.000000e+00> : vector<8x8xf32>
    %431 = tpu.matmul %429, %430, %cst_197 {dimension_numbers = #tpu.dot_dimension_numbers<[1], [0], [0], [1], [0, 0, 1, 1], [], []>} : vector<8x17xf32>, vector<17x8xf32>, vector<8x8xf32> -> vector<8x8xf32>
    %432 = vector.extract_strided_slice %326 {offsets = [24, 0], sizes = [8, 32], strides = [1, 1]} : vector<32x32xf32> to vector<8x32xf32>
    %cst_198 = arith.constant dense<0.000000e+00> : vector<8x32xf32>
    %433 = tpu.matmul %431, %432, %cst_198 {dimension_numbers = #tpu.dot_dimension_numbers<[1], [0], [0], [1], [0, 0, 1, 1], [], []>} : vector<8x8xf32>, vector<8x32xf32>, vector<8x32xf32> -> vector<8x32xf32>
    %434 = arith.addf %407, %433 : vector<8x32xf32>
    %435 = vector.extract_strided_slice %89 {offsets = [64, 0], sizes = [32, 32], strides = [1, 1]} : vector<96x32xf32> to vector<32x32xf32>
    %436 = vector.extract_strided_slice %47 {offsets = [0, 0], sizes = [8, 8], strides = [1, 1]} : vector<8x32xf32> to vector<8x8xf32>
    %437 = vector.extract_strided_slice %72 {offsets = [0, 0], sizes = [13, 8], strides = [1, 1]} : vector<13x32xf32> to vector<13x8xf32>
    %438 = tpu.transpose %437, [1, 0] : vector<13x8xf32> -> vector<8x13xf32>
    %cst_199 = arith.constant dense<0.000000e+00> : vector<8x13xf32>
    %439 = tpu.matmul %436, %438, %cst_199 {dimension_numbers = #tpu.dot_dimension_numbers<[1], [0], [0], [1], [0, 0, 1, 1], [], []>} : vector<8x8xf32>, vector<8x13xf32>, vector<8x13xf32> -> vector<8x13xf32>
    %cst_200 = arith.constant 0.000000e+00 : f32
    %440 = vector.broadcast %cst_200 : f32 to vector<1x13xf32>
    %441 = arith.cmpf oeq, %79, %440 : vector<1x13xf32>
    %cst_201 = arith.constant -1.000000e+09 : f32
    %442 = vector.shape_cast %441 : vector<1x13xi1> to vector<1x13xi1>
    %443 = vector.broadcast %442 : vector<1x13xi1> to vector<8x13xi1>
    %444 = vector.broadcast %cst_201 : f32 to vector<8x13xf32>
    %445 = arith.select %443, %444, %439 : vector<8x13xi1>, vector<8x13xf32>
    %cst_202 = arith.constant 0.353553385 : f32
    %446 = vector.broadcast %cst_202 : f32 to vector<8x13xf32>
    %447 = arith.mulf %445, %446 : vector<8x13xf32>
    %cst_203 = arith.constant dense<0xFF800000> : vector<8xf32>
    %448 = vector.multi_reduction <maximumf>, %447, %cst_203 [1] : vector<8x13xf32> to vector<8xf32>
    %449 = vector.shape_cast %448 : vector<8xf32> to vector<8x1xf32>
    %450 = vector.broadcast %449 : vector<8x1xf32> to vector<8x13xf32>
    %451 = arith.subf %447, %450 : vector<8x13xf32>
    %452 = math.exp %451 : vector<8x13xf32>
    %cst_204 = arith.constant dense<0.000000e+00> : vector<8xf32>
    %453 = vector.multi_reduction <add>, %452, %cst_204 [1] : vector<8x13xf32> to vector<8xf32>
    %454 = vector.shape_cast %453 : vector<8xf32> to vector<8x1xf32>
    %455 = tpu.reciprocal %454 {approx = true} : vector<8x1xf32> -> vector<8x1xf32>
    %456 = vector.broadcast %455 : vector<8x1xf32> to vector<8x13xf32>
    %457 = arith.mulf %452, %456 : vector<8x13xf32>
    %458 = vector.extract_strided_slice %73 {offsets = [0, 0], sizes = [13, 8], strides = [1, 1]} : vector<13x32xf32> to vector<13x8xf32>
    %cst_205 = arith.constant dense<0.000000e+00> : vector<8x8xf32>
    %459 = tpu.matmul %457, %458, %cst_205 {dimension_numbers = #tpu.dot_dimension_numbers<[1], [0], [0], [1], [0, 0, 1, 1], [], []>} : vector<8x13xf32>, vector<13x8xf32>, vector<8x8xf32> -> vector<8x8xf32>
    %460 = vector.extract_strided_slice %435 {offsets = [0, 0], sizes = [8, 32], strides = [1, 1]} : vector<32x32xf32> to vector<8x32xf32>
    %cst_206 = arith.constant dense<0.000000e+00> : vector<8x32xf32>
    %461 = tpu.matmul %459, %460, %cst_206 {dimension_numbers = #tpu.dot_dimension_numbers<[1], [0], [0], [1], [0, 0, 1, 1], [], []>} : vector<8x8xf32>, vector<8x32xf32>, vector<8x32xf32> -> vector<8x32xf32>
    %462 = arith.addf %434, %461 : vector<8x32xf32>
    %463 = vector.extract_strided_slice %47 {offsets = [0, 8], sizes = [8, 8], strides = [1, 1]} : vector<8x32xf32> to vector<8x8xf32>
    %464 = vector.extract_strided_slice %72 {offsets = [0, 8], sizes = [13, 8], strides = [1, 1]} : vector<13x32xf32> to vector<13x8xf32>
    %465 = tpu.transpose %464, [1, 0] : vector<13x8xf32> -> vector<8x13xf32>
    %cst_207 = arith.constant dense<0.000000e+00> : vector<8x13xf32>
    %466 = tpu.matmul %463, %465, %cst_207 {dimension_numbers = #tpu.dot_dimension_numbers<[1], [0], [0], [1], [0, 0, 1, 1], [], []>} : vector<8x8xf32>, vector<8x13xf32>, vector<8x13xf32> -> vector<8x13xf32>
    %cst_208 = arith.constant 0.000000e+00 : f32
    %467 = vector.broadcast %cst_208 : f32 to vector<1x13xf32>
    %468 = arith.cmpf oeq, %79, %467 : vector<1x13xf32>
    %cst_209 = arith.constant -1.000000e+09 : f32
    %469 = vector.shape_cast %468 : vector<1x13xi1> to vector<1x13xi1>
    %470 = vector.broadcast %469 : vector<1x13xi1> to vector<8x13xi1>
    %471 = vector.broadcast %cst_209 : f32 to vector<8x13xf32>
    %472 = arith.select %470, %471, %466 : vector<8x13xi1>, vector<8x13xf32>
    %cst_210 = arith.constant 0.353553385 : f32
    %473 = vector.broadcast %cst_210 : f32 to vector<8x13xf32>
    %474 = arith.mulf %472, %473 : vector<8x13xf32>
    %cst_211 = arith.constant dense<0xFF800000> : vector<8xf32>
    %475 = vector.multi_reduction <maximumf>, %474, %cst_211 [1] : vector<8x13xf32> to vector<8xf32>
    %476 = vector.shape_cast %475 : vector<8xf32> to vector<8x1xf32>
    %477 = vector.broadcast %476 : vector<8x1xf32> to vector<8x13xf32>
    %478 = arith.subf %474, %477 : vector<8x13xf32>
    %479 = math.exp %478 : vector<8x13xf32>
    %cst_212 = arith.constant dense<0.000000e+00> : vector<8xf32>
    %480 = vector.multi_reduction <add>, %479, %cst_212 [1] : vector<8x13xf32> to vector<8xf32>
    %481 = vector.shape_cast %480 : vector<8xf32> to vector<8x1xf32>
    %482 = tpu.reciprocal %481 {approx = true} : vector<8x1xf32> -> vector<8x1xf32>
    %483 = vector.broadcast %482 : vector<8x1xf32> to vector<8x13xf32>
    %484 = arith.mulf %479, %483 : vector<8x13xf32>
    %485 = vector.extract_strided_slice %73 {offsets = [0, 8], sizes = [13, 8], strides = [1, 1]} : vector<13x32xf32> to vector<13x8xf32>
    %cst_213 = arith.constant dense<0.000000e+00> : vector<8x8xf32>
    %486 = tpu.matmul %484, %485, %cst_213 {dimension_numbers = #tpu.dot_dimension_numbers<[1], [0], [0], [1], [0, 0, 1, 1], [], []>} : vector<8x13xf32>, vector<13x8xf32>, vector<8x8xf32> -> vector<8x8xf32>
    %487 = vector.extract_strided_slice %435 {offsets = [8, 0], sizes = [8, 32], strides = [1, 1]} : vector<32x32xf32> to vector<8x32xf32>
    %cst_214 = arith.constant dense<0.000000e+00> : vector<8x32xf32>
    %488 = tpu.matmul %486, %487, %cst_214 {dimension_numbers = #tpu.dot_dimension_numbers<[1], [0], [0], [1], [0, 0, 1, 1], [], []>} : vector<8x8xf32>, vector<8x32xf32>, vector<8x32xf32> -> vector<8x32xf32>
    %489 = arith.addf %462, %488 : vector<8x32xf32>
    %490 = vector.extract_strided_slice %47 {offsets = [0, 16], sizes = [8, 8], strides = [1, 1]} : vector<8x32xf32> to vector<8x8xf32>
    %491 = vector.extract_strided_slice %72 {offsets = [0, 16], sizes = [13, 8], strides = [1, 1]} : vector<13x32xf32> to vector<13x8xf32>
    %492 = tpu.transpose %491, [1, 0] : vector<13x8xf32> -> vector<8x13xf32>
    %cst_215 = arith.constant dense<0.000000e+00> : vector<8x13xf32>
    %493 = tpu.matmul %490, %492, %cst_215 {dimension_numbers = #tpu.dot_dimension_numbers<[1], [0], [0], [1], [0, 0, 1, 1], [], []>} : vector<8x8xf32>, vector<8x13xf32>, vector<8x13xf32> -> vector<8x13xf32>
    %cst_216 = arith.constant 0.000000e+00 : f32
    %494 = vector.broadcast %cst_216 : f32 to vector<1x13xf32>
    %495 = arith.cmpf oeq, %79, %494 : vector<1x13xf32>
    %cst_217 = arith.constant -1.000000e+09 : f32
    %496 = vector.shape_cast %495 : vector<1x13xi1> to vector<1x13xi1>
    %497 = vector.broadcast %496 : vector<1x13xi1> to vector<8x13xi1>
    %498 = vector.broadcast %cst_217 : f32 to vector<8x13xf32>
    %499 = arith.select %497, %498, %493 : vector<8x13xi1>, vector<8x13xf32>
    %cst_218 = arith.constant 0.353553385 : f32
    %500 = vector.broadcast %cst_218 : f32 to vector<8x13xf32>
    %501 = arith.mulf %499, %500 : vector<8x13xf32>
    %cst_219 = arith.constant dense<0xFF800000> : vector<8xf32>
    %502 = vector.multi_reduction <maximumf>, %501, %cst_219 [1] : vector<8x13xf32> to vector<8xf32>
    %503 = vector.shape_cast %502 : vector<8xf32> to vector<8x1xf32>
    %504 = vector.broadcast %503 : vector<8x1xf32> to vector<8x13xf32>
    %505 = arith.subf %501, %504 : vector<8x13xf32>
    %506 = math.exp %505 : vector<8x13xf32>
    %cst_220 = arith.constant dense<0.000000e+00> : vector<8xf32>
    %507 = vector.multi_reduction <add>, %506, %cst_220 [1] : vector<8x13xf32> to vector<8xf32>
    %508 = vector.shape_cast %507 : vector<8xf32> to vector<8x1xf32>
    %509 = tpu.reciprocal %508 {approx = true} : vector<8x1xf32> -> vector<8x1xf32>
    %510 = vector.broadcast %509 : vector<8x1xf32> to vector<8x13xf32>
    %511 = arith.mulf %506, %510 : vector<8x13xf32>
    %512 = vector.extract_strided_slice %73 {offsets = [0, 16], sizes = [13, 8], strides = [1, 1]} : vector<13x32xf32> to vector<13x8xf32>
    %cst_221 = arith.constant dense<0.000000e+00> : vector<8x8xf32>
    %513 = tpu.matmul %511, %512, %cst_221 {dimension_numbers = #tpu.dot_dimension_numbers<[1], [0], [0], [1], [0, 0, 1, 1], [], []>} : vector<8x13xf32>, vector<13x8xf32>, vector<8x8xf32> -> vector<8x8xf32>
    %514 = vector.extract_strided_slice %435 {offsets = [16, 0], sizes = [8, 32], strides = [1, 1]} : vector<32x32xf32> to vector<8x32xf32>
    %cst_222 = arith.constant dense<0.000000e+00> : vector<8x32xf32>
    %515 = tpu.matmul %513, %514, %cst_222 {dimension_numbers = #tpu.dot_dimension_numbers<[1], [0], [0], [1], [0, 0, 1, 1], [], []>} : vector<8x8xf32>, vector<8x32xf32>, vector<8x32xf32> -> vector<8x32xf32>
    %516 = arith.addf %489, %515 : vector<8x32xf32>
    %517 = vector.extract_strided_slice %47 {offsets = [0, 24], sizes = [8, 8], strides = [1, 1]} : vector<8x32xf32> to vector<8x8xf32>
    %518 = vector.extract_strided_slice %72 {offsets = [0, 24], sizes = [13, 8], strides = [1, 1]} : vector<13x32xf32> to vector<13x8xf32>
    %519 = tpu.transpose %518, [1, 0] : vector<13x8xf32> -> vector<8x13xf32>
    %cst_223 = arith.constant dense<0.000000e+00> : vector<8x13xf32>
    %520 = tpu.matmul %517, %519, %cst_223 {dimension_numbers = #tpu.dot_dimension_numbers<[1], [0], [0], [1], [0, 0, 1, 1], [], []>} : vector<8x8xf32>, vector<8x13xf32>, vector<8x13xf32> -> vector<8x13xf32>
    %cst_224 = arith.constant 0.000000e+00 : f32
    %521 = vector.broadcast %cst_224 : f32 to vector<1x13xf32>
    %522 = arith.cmpf oeq, %79, %521 : vector<1x13xf32>
    %cst_225 = arith.constant -1.000000e+09 : f32
    %523 = vector.shape_cast %522 : vector<1x13xi1> to vector<1x13xi1>
    %524 = vector.broadcast %523 : vector<1x13xi1> to vector<8x13xi1>
    %525 = vector.broadcast %cst_225 : f32 to vector<8x13xf32>
    %526 = arith.select %524, %525, %520 : vector<8x13xi1>, vector<8x13xf32>
    %cst_226 = arith.constant 0.353553385 : f32
    %527 = vector.broadcast %cst_226 : f32 to vector<8x13xf32>
    %528 = arith.mulf %526, %527 : vector<8x13xf32>
    %cst_227 = arith.constant dense<0xFF800000> : vector<8xf32>
    %529 = vector.multi_reduction <maximumf>, %528, %cst_227 [1] : vector<8x13xf32> to vector<8xf32>
    %530 = vector.shape_cast %529 : vector<8xf32> to vector<8x1xf32>
    %531 = vector.broadcast %530 : vector<8x1xf32> to vector<8x13xf32>
    %532 = arith.subf %528, %531 : vector<8x13xf32>
    %533 = math.exp %532 : vector<8x13xf32>
    %cst_228 = arith.constant dense<0.000000e+00> : vector<8xf32>
    %534 = vector.multi_reduction <add>, %533, %cst_228 [1] : vector<8x13xf32> to vector<8xf32>
    %535 = vector.shape_cast %534 : vector<8xf32> to vector<8x1xf32>
    %536 = tpu.reciprocal %535 {approx = true} : vector<8x1xf32> -> vector<8x1xf32>
    %537 = vector.broadcast %536 : vector<8x1xf32> to vector<8x13xf32>
    %538 = arith.mulf %533, %537 : vector<8x13xf32>
    %539 = vector.extract_strided_slice %73 {offsets = [0, 24], sizes = [13, 8], strides = [1, 1]} : vector<13x32xf32> to vector<13x8xf32>
    %cst_229 = arith.constant dense<0.000000e+00> : vector<8x8xf32>
    %540 = tpu.matmul %538, %539, %cst_229 {dimension_numbers = #tpu.dot_dimension_numbers<[1], [0], [0], [1], [0, 0, 1, 1], [], []>} : vector<8x13xf32>, vector<13x8xf32>, vector<8x8xf32> -> vector<8x8xf32>
    %541 = vector.extract_strided_slice %435 {offsets = [24, 0], sizes = [8, 32], strides = [1, 1]} : vector<32x32xf32> to vector<8x32xf32>
    %cst_230 = arith.constant dense<0.000000e+00> : vector<8x32xf32>
    %542 = tpu.matmul %540, %541, %cst_230 {dimension_numbers = #tpu.dot_dimension_numbers<[1], [0], [0], [1], [0, 0, 1, 1], [], []>} : vector<8x8xf32>, vector<8x32xf32>, vector<8x32xf32> -> vector<8x32xf32>
    %543 = arith.addf %516, %542 : vector<8x32xf32>
    %544 = vector.extract_strided_slice %91 {offsets = [0, 0], sizes = [32, 32], strides = [1, 1]} : vector<96x32xf32> to vector<32x32xf32>
    %cst_231 = arith.constant dense<0.000000e+00> : vector<12x32xf32>
    %545 = tpu.matmul %5, %544, %cst_231 {dimension_numbers = #tpu.dot_dimension_numbers<[1], [0], [0], [1], [0, 0, 1, 1], [], []>} : vector<12x32xf32>, vector<32x32xf32>, vector<12x32xf32> -> vector<12x32xf32>
    %c2_232 = arith.constant 2 : index
    %c0_233 = arith.constant 0 : index
    %c0_234 = arith.constant 0 : index
    %546 = vector.load %arg16[%c2_232, %c0_233, %c0_234] : memref<3x1x32xf32, #tpu.memory_space<vmem>>, vector<1x1x32xf32>
    %547 = vector.shape_cast %546 : vector<1x1x32xf32> to vector<1x32xf32>
    %548 = vector.broadcast %547 : vector<1x32xf32> to vector<12x32xf32>
    %549 = arith.addf %545, %548 : vector<12x32xf32>
    %550 = vector.extract_strided_slice %91 {offsets = [32, 0], sizes = [32, 32], strides = [1, 1]} : vector<96x32xf32> to vector<32x32xf32>
    %551 = vector.extract_strided_slice %49 {offsets = [0, 0], sizes = [12, 8], strides = [1, 1]} : vector<12x32xf32> to vector<12x8xf32>
    %552 = vector.extract_strided_slice %70 {offsets = [0, 0], sizes = [17, 8], strides = [1, 1]} : vector<17x32xf32> to vector<17x8xf32>
    %553 = tpu.transpose %552, [1, 0] : vector<17x8xf32> -> vector<8x17xf32>
    %cst_235 = arith.constant dense<0.000000e+00> : vector<12x17xf32>
    %554 = tpu.matmul %551, %553, %cst_235 {dimension_numbers = #tpu.dot_dimension_numbers<[1], [0], [0], [1], [0, 0, 1, 1], [], []>} : vector<12x8xf32>, vector<8x17xf32>, vector<12x17xf32> -> vector<12x17xf32>
    %555 = arith.mulf %554, %85 : vector<12x17xf32>
    %cst_236 = arith.constant 0.000000e+00 : f32
    %556 = vector.broadcast %cst_236 : f32 to vector<1x17xf32>
    %557 = arith.cmpf oeq, %75, %556 : vector<1x17xf32>
    %cst_237 = arith.constant -1.000000e+09 : f32
    %558 = vector.shape_cast %557 : vector<1x17xi1> to vector<1x17xi1>
    %559 = vector.broadcast %558 : vector<1x17xi1> to vector<12x17xi1>
    %560 = vector.broadcast %cst_237 : f32 to vector<12x17xf32>
    %561 = arith.select %559, %560, %555 : vector<12x17xi1>, vector<12x17xf32>
    %cst_238 = arith.constant 0.353553385 : f32
    %562 = vector.broadcast %cst_238 : f32 to vector<12x17xf32>
    %563 = arith.mulf %561, %562 : vector<12x17xf32>
    %cst_239 = arith.constant dense<0xFF800000> : vector<12xf32>
    %564 = vector.multi_reduction <maximumf>, %563, %cst_239 [1] : vector<12x17xf32> to vector<12xf32>
    %565 = vector.shape_cast %564 : vector<12xf32> to vector<12x1xf32>
    %566 = vector.broadcast %565 : vector<12x1xf32> to vector<12x17xf32>
    %567 = arith.subf %563, %566 : vector<12x17xf32>
    %568 = math.exp %567 : vector<12x17xf32>
    %cst_240 = arith.constant dense<0.000000e+00> : vector<12xf32>
    %569 = vector.multi_reduction <add>, %568, %cst_240 [1] : vector<12x17xf32> to vector<12xf32>
    %570 = vector.shape_cast %569 : vector<12xf32> to vector<12x1xf32>
    %571 = tpu.reciprocal %570 {approx = true} : vector<12x1xf32> -> vector<12x1xf32>
    %572 = vector.broadcast %571 : vector<12x1xf32> to vector<12x17xf32>
    %573 = arith.mulf %568, %572 : vector<12x17xf32>
    %574 = vector.extract_strided_slice %71 {offsets = [0, 0], sizes = [17, 8], strides = [1, 1]} : vector<17x32xf32> to vector<17x8xf32>
    %cst_241 = arith.constant dense<0.000000e+00> : vector<12x8xf32>
    %575 = tpu.matmul %573, %574, %cst_241 {dimension_numbers = #tpu.dot_dimension_numbers<[1], [0], [0], [1], [0, 0, 1, 1], [], []>} : vector<12x17xf32>, vector<17x8xf32>, vector<12x8xf32> -> vector<12x8xf32>
    %576 = vector.extract_strided_slice %550 {offsets = [0, 0], sizes = [8, 32], strides = [1, 1]} : vector<32x32xf32> to vector<8x32xf32>
    %cst_242 = arith.constant dense<0.000000e+00> : vector<12x32xf32>
    %577 = tpu.matmul %575, %576, %cst_242 {dimension_numbers = #tpu.dot_dimension_numbers<[1], [0], [0], [1], [0, 0, 1, 1], [], []>} : vector<12x8xf32>, vector<8x32xf32>, vector<12x32xf32> -> vector<12x32xf32>
    %578 = arith.addf %549, %577 : vector<12x32xf32>
    %579 = vector.extract_strided_slice %49 {offsets = [0, 8], sizes = [12, 8], strides = [1, 1]} : vector<12x32xf32> to vector<12x8xf32>
    %580 = vector.extract_strided_slice %70 {offsets = [0, 8], sizes = [17, 8], strides = [1, 1]} : vector<17x32xf32> to vector<17x8xf32>
    %581 = tpu.transpose %580, [1, 0] : vector<17x8xf32> -> vector<8x17xf32>
    %cst_243 = arith.constant dense<0.000000e+00> : vector<12x17xf32>
    %582 = tpu.matmul %579, %581, %cst_243 {dimension_numbers = #tpu.dot_dimension_numbers<[1], [0], [0], [1], [0, 0, 1, 1], [], []>} : vector<12x8xf32>, vector<8x17xf32>, vector<12x17xf32> -> vector<12x17xf32>
    %583 = arith.mulf %582, %85 : vector<12x17xf32>
    %cst_244 = arith.constant 0.000000e+00 : f32
    %584 = vector.broadcast %cst_244 : f32 to vector<1x17xf32>
    %585 = arith.cmpf oeq, %75, %584 : vector<1x17xf32>
    %cst_245 = arith.constant -1.000000e+09 : f32
    %586 = vector.shape_cast %585 : vector<1x17xi1> to vector<1x17xi1>
    %587 = vector.broadcast %586 : vector<1x17xi1> to vector<12x17xi1>
    %588 = vector.broadcast %cst_245 : f32 to vector<12x17xf32>
    %589 = arith.select %587, %588, %583 : vector<12x17xi1>, vector<12x17xf32>
    %cst_246 = arith.constant 0.353553385 : f32
    %590 = vector.broadcast %cst_246 : f32 to vector<12x17xf32>
    %591 = arith.mulf %589, %590 : vector<12x17xf32>
    %cst_247 = arith.constant dense<0xFF800000> : vector<12xf32>
    %592 = vector.multi_reduction <maximumf>, %591, %cst_247 [1] : vector<12x17xf32> to vector<12xf32>
    %593 = vector.shape_cast %592 : vector<12xf32> to vector<12x1xf32>
    %594 = vector.broadcast %593 : vector<12x1xf32> to vector<12x17xf32>
    %595 = arith.subf %591, %594 : vector<12x17xf32>
    %596 = math.exp %595 : vector<12x17xf32>
    %cst_248 = arith.constant dense<0.000000e+00> : vector<12xf32>
    %597 = vector.multi_reduction <add>, %596, %cst_248 [1] : vector<12x17xf32> to vector<12xf32>
    %598 = vector.shape_cast %597 : vector<12xf32> to vector<12x1xf32>
    %599 = tpu.reciprocal %598 {approx = true} : vector<12x1xf32> -> vector<12x1xf32>
    %600 = vector.broadcast %599 : vector<12x1xf32> to vector<12x17xf32>
    %601 = arith.mulf %596, %600 : vector<12x17xf32>
    %602 = vector.extract_strided_slice %71 {offsets = [0, 8], sizes = [17, 8], strides = [1, 1]} : vector<17x32xf32> to vector<17x8xf32>
    %cst_249 = arith.constant dense<0.000000e+00> : vector<12x8xf32>
    %603 = tpu.matmul %601, %602, %cst_249 {dimension_numbers = #tpu.dot_dimension_numbers<[1], [0], [0], [1], [0, 0, 1, 1], [], []>} : vector<12x17xf32>, vector<17x8xf32>, vector<12x8xf32> -> vector<12x8xf32>
    %604 = vector.extract_strided_slice %550 {offsets = [8, 0], sizes = [8, 32], strides = [1, 1]} : vector<32x32xf32> to vector<8x32xf32>
    %cst_250 = arith.constant dense<0.000000e+00> : vector<12x32xf32>
    %605 = tpu.matmul %603, %604, %cst_250 {dimension_numbers = #tpu.dot_dimension_numbers<[1], [0], [0], [1], [0, 0, 1, 1], [], []>} : vector<12x8xf32>, vector<8x32xf32>, vector<12x32xf32> -> vector<12x32xf32>
    %606 = arith.addf %578, %605 : vector<12x32xf32>
    %607 = vector.extract_strided_slice %49 {offsets = [0, 16], sizes = [12, 8], strides = [1, 1]} : vector<12x32xf32> to vector<12x8xf32>
    %608 = vector.extract_strided_slice %70 {offsets = [0, 16], sizes = [17, 8], strides = [1, 1]} : vector<17x32xf32> to vector<17x8xf32>
    %609 = tpu.transpose %608, [1, 0] : vector<17x8xf32> -> vector<8x17xf32>
    %cst_251 = arith.constant dense<0.000000e+00> : vector<12x17xf32>
    %610 = tpu.matmul %607, %609, %cst_251 {dimension_numbers = #tpu.dot_dimension_numbers<[1], [0], [0], [1], [0, 0, 1, 1], [], []>} : vector<12x8xf32>, vector<8x17xf32>, vector<12x17xf32> -> vector<12x17xf32>
    %611 = arith.mulf %610, %85 : vector<12x17xf32>
    %cst_252 = arith.constant 0.000000e+00 : f32
    %612 = vector.broadcast %cst_252 : f32 to vector<1x17xf32>
    %613 = arith.cmpf oeq, %75, %612 : vector<1x17xf32>
    %cst_253 = arith.constant -1.000000e+09 : f32
    %614 = vector.shape_cast %613 : vector<1x17xi1> to vector<1x17xi1>
    %615 = vector.broadcast %614 : vector<1x17xi1> to vector<12x17xi1>
    %616 = vector.broadcast %cst_253 : f32 to vector<12x17xf32>
    %617 = arith.select %615, %616, %611 : vector<12x17xi1>, vector<12x17xf32>
    %cst_254 = arith.constant 0.353553385 : f32
    %618 = vector.broadcast %cst_254 : f32 to vector<12x17xf32>
    %619 = arith.mulf %617, %618 : vector<12x17xf32>
    %cst_255 = arith.constant dense<0xFF800000> : vector<12xf32>
    %620 = vector.multi_reduction <maximumf>, %619, %cst_255 [1] : vector<12x17xf32> to vector<12xf32>
    %621 = vector.shape_cast %620 : vector<12xf32> to vector<12x1xf32>
    %622 = vector.broadcast %621 : vector<12x1xf32> to vector<12x17xf32>
    %623 = arith.subf %619, %622 : vector<12x17xf32>
    %624 = math.exp %623 : vector<12x17xf32>
    %cst_256 = arith.constant dense<0.000000e+00> : vector<12xf32>
    %625 = vector.multi_reduction <add>, %624, %cst_256 [1] : vector<12x17xf32> to vector<12xf32>
    %626 = vector.shape_cast %625 : vector<12xf32> to vector<12x1xf32>
    %627 = tpu.reciprocal %626 {approx = true} : vector<12x1xf32> -> vector<12x1xf32>
    %628 = vector.broadcast %627 : vector<12x1xf32> to vector<12x17xf32>
    %629 = arith.mulf %624, %628 : vector<12x17xf32>
    %630 = vector.extract_strided_slice %71 {offsets = [0, 16], sizes = [17, 8], strides = [1, 1]} : vector<17x32xf32> to vector<17x8xf32>
    %cst_257 = arith.constant dense<0.000000e+00> : vector<12x8xf32>
    %631 = tpu.matmul %629, %630, %cst_257 {dimension_numbers = #tpu.dot_dimension_numbers<[1], [0], [0], [1], [0, 0, 1, 1], [], []>} : vector<12x17xf32>, vector<17x8xf32>, vector<12x8xf32> -> vector<12x8xf32>
    %632 = vector.extract_strided_slice %550 {offsets = [16, 0], sizes = [8, 32], strides = [1, 1]} : vector<32x32xf32> to vector<8x32xf32>
    %cst_258 = arith.constant dense<0.000000e+00> : vector<12x32xf32>
    %633 = tpu.matmul %631, %632, %cst_258 {dimension_numbers = #tpu.dot_dimension_numbers<[1], [0], [0], [1], [0, 0, 1, 1], [], []>} : vector<12x8xf32>, vector<8x32xf32>, vector<12x32xf32> -> vector<12x32xf32>
    %634 = arith.addf %606, %633 : vector<12x32xf32>
    %635 = vector.extract_strided_slice %49 {offsets = [0, 24], sizes = [12, 8], strides = [1, 1]} : vector<12x32xf32> to vector<12x8xf32>
    %636 = vector.extract_strided_slice %70 {offsets = [0, 24], sizes = [17, 8], strides = [1, 1]} : vector<17x32xf32> to vector<17x8xf32>
    %637 = tpu.transpose %636, [1, 0] : vector<17x8xf32> -> vector<8x17xf32>
    %cst_259 = arith.constant dense<0.000000e+00> : vector<12x17xf32>
    %638 = tpu.matmul %635, %637, %cst_259 {dimension_numbers = #tpu.dot_dimension_numbers<[1], [0], [0], [1], [0, 0, 1, 1], [], []>} : vector<12x8xf32>, vector<8x17xf32>, vector<12x17xf32> -> vector<12x17xf32>
    %639 = arith.mulf %638, %85 : vector<12x17xf32>
    %cst_260 = arith.constant 0.000000e+00 : f32
    %640 = vector.broadcast %cst_260 : f32 to vector<1x17xf32>
    %641 = arith.cmpf oeq, %75, %640 : vector<1x17xf32>
    %cst_261 = arith.constant -1.000000e+09 : f32
    %642 = vector.shape_cast %641 : vector<1x17xi1> to vector<1x17xi1>
    %643 = vector.broadcast %642 : vector<1x17xi1> to vector<12x17xi1>
    %644 = vector.broadcast %cst_261 : f32 to vector<12x17xf32>
    %645 = arith.select %643, %644, %639 : vector<12x17xi1>, vector<12x17xf32>
    %cst_262 = arith.constant 0.353553385 : f32
    %646 = vector.broadcast %cst_262 : f32 to vector<12x17xf32>
    %647 = arith.mulf %645, %646 : vector<12x17xf32>
    %cst_263 = arith.constant dense<0xFF800000> : vector<12xf32>
    %648 = vector.multi_reduction <maximumf>, %647, %cst_263 [1] : vector<12x17xf32> to vector<12xf32>
    %649 = vector.shape_cast %648 : vector<12xf32> to vector<12x1xf32>
    %650 = vector.broadcast %649 : vector<12x1xf32> to vector<12x17xf32>
    %651 = arith.subf %647, %650 : vector<12x17xf32>
    %652 = math.exp %651 : vector<12x17xf32>
    %cst_264 = arith.constant dense<0.000000e+00> : vector<12xf32>
    %653 = vector.multi_reduction <add>, %652, %cst_264 [1] : vector<12x17xf32> to vector<12xf32>
    %654 = vector.shape_cast %653 : vector<12xf32> to vector<12x1xf32>
    %655 = tpu.reciprocal %654 {approx = true} : vector<12x1xf32> -> vector<12x1xf32>
    %656 = vector.broadcast %655 : vector<12x1xf32> to vector<12x17xf32>
    %657 = arith.mulf %652, %656 : vector<12x17xf32>
    %658 = vector.extract_strided_slice %71 {offsets = [0, 24], sizes = [17, 8], strides = [1, 1]} : vector<17x32xf32> to vector<17x8xf32>
    %cst_265 = arith.constant dense<0.000000e+00> : vector<12x8xf32>
    %659 = tpu.matmul %657, %658, %cst_265 {dimension_numbers = #tpu.dot_dimension_numbers<[1], [0], [0], [1], [0, 0, 1, 1], [], []>} : vector<12x17xf32>, vector<17x8xf32>, vector<12x8xf32> -> vector<12x8xf32>
    %660 = vector.extract_strided_slice %550 {offsets = [24, 0], sizes = [8, 32], strides = [1, 1]} : vector<32x32xf32> to vector<8x32xf32>
    %cst_266 = arith.constant dense<0.000000e+00> : vector<12x32xf32>
    %661 = tpu.matmul %659, %660, %cst_266 {dimension_numbers = #tpu.dot_dimension_numbers<[1], [0], [0], [1], [0, 0, 1, 1], [], []>} : vector<12x8xf32>, vector<8x32xf32>, vector<12x32xf32> -> vector<12x32xf32>
    %662 = arith.addf %634, %661 : vector<12x32xf32>
    %663 = vector.extract_strided_slice %91 {offsets = [64, 0], sizes = [32, 32], strides = [1, 1]} : vector<96x32xf32> to vector<32x32xf32>
    %664 = vector.extract_strided_slice %49 {offsets = [0, 0], sizes = [12, 8], strides = [1, 1]} : vector<12x32xf32> to vector<12x8xf32>
    %665 = vector.extract_strided_slice %46 {offsets = [0, 0], sizes = [8, 8], strides = [1, 1]} : vector<8x32xf32> to vector<8x8xf32>
    %666 = tpu.transpose %665, [1, 0] : vector<8x8xf32> -> vector<8x8xf32>
    %cst_267 = arith.constant dense<0.000000e+00> : vector<12x8xf32>
    %667 = tpu.matmul %664, %666, %cst_267 {dimension_numbers = #tpu.dot_dimension_numbers<[1], [0], [0], [1], [0, 0, 1, 1], [], []>} : vector<12x8xf32>, vector<8x8xf32>, vector<12x8xf32> -> vector<12x8xf32>
    %cst_268 = arith.constant 0.000000e+00 : f32
    %668 = vector.broadcast %cst_268 : f32 to vector<1x8xf32>
    %669 = arith.cmpf oeq, %77, %668 : vector<1x8xf32>
    %cst_269 = arith.constant -1.000000e+09 : f32
    %670 = vector.shape_cast %669 : vector<1x8xi1> to vector<1x8xi1>
    %671 = vector.broadcast %670 : vector<1x8xi1> to vector<12x8xi1>
    %672 = vector.broadcast %cst_269 : f32 to vector<12x8xf32>
    %673 = arith.select %671, %672, %667 : vector<12x8xi1>, vector<12x8xf32>
    %cst_270 = arith.constant 0.353553385 : f32
    %674 = vector.broadcast %cst_270 : f32 to vector<12x8xf32>
    %675 = arith.mulf %673, %674 : vector<12x8xf32>
    %cst_271 = arith.constant dense<0xFF800000> : vector<12xf32>
    %676 = vector.multi_reduction <maximumf>, %675, %cst_271 [1] : vector<12x8xf32> to vector<12xf32>
    %677 = vector.shape_cast %676 : vector<12xf32> to vector<12x1xf32>
    %678 = vector.broadcast %677 : vector<12x1xf32> to vector<12x8xf32>
    %679 = arith.subf %675, %678 : vector<12x8xf32>
    %680 = math.exp %679 : vector<12x8xf32>
    %cst_272 = arith.constant dense<0.000000e+00> : vector<12xf32>
    %681 = vector.multi_reduction <add>, %680, %cst_272 [1] : vector<12x8xf32> to vector<12xf32>
    %682 = vector.shape_cast %681 : vector<12xf32> to vector<12x1xf32>
    %683 = tpu.reciprocal %682 {approx = true} : vector<12x1xf32> -> vector<12x1xf32>
    %684 = vector.broadcast %683 : vector<12x1xf32> to vector<12x8xf32>
    %685 = arith.mulf %680, %684 : vector<12x8xf32>
    %686 = vector.extract_strided_slice %48 {offsets = [0, 0], sizes = [8, 8], strides = [1, 1]} : vector<8x32xf32> to vector<8x8xf32>
    %cst_273 = arith.constant dense<0.000000e+00> : vector<12x8xf32>
    %687 = tpu.matmul %685, %686, %cst_273 {dimension_numbers = #tpu.dot_dimension_numbers<[1], [0], [0], [1], [0, 0, 1, 1], [], []>} : vector<12x8xf32>, vector<8x8xf32>, vector<12x8xf32> -> vector<12x8xf32>
    %688 = vector.extract_strided_slice %663 {offsets = [0, 0], sizes = [8, 32], strides = [1, 1]} : vector<32x32xf32> to vector<8x32xf32>
    %cst_274 = arith.constant dense<0.000000e+00> : vector<12x32xf32>
    %689 = tpu.matmul %687, %688, %cst_274 {dimension_numbers = #tpu.dot_dimension_numbers<[1], [0], [0], [1], [0, 0, 1, 1], [], []>} : vector<12x8xf32>, vector<8x32xf32>, vector<12x32xf32> -> vector<12x32xf32>
    %690 = arith.addf %662, %689 : vector<12x32xf32>
    %691 = vector.extract_strided_slice %49 {offsets = [0, 8], sizes = [12, 8], strides = [1, 1]} : vector<12x32xf32> to vector<12x8xf32>
    %692 = vector.extract_strided_slice %46 {offsets = [0, 8], sizes = [8, 8], strides = [1, 1]} : vector<8x32xf32> to vector<8x8xf32>
    %693 = tpu.transpose %692, [1, 0] : vector<8x8xf32> -> vector<8x8xf32>
    %cst_275 = arith.constant dense<0.000000e+00> : vector<12x8xf32>
    %694 = tpu.matmul %691, %693, %cst_275 {dimension_numbers = #tpu.dot_dimension_numbers<[1], [0], [0], [1], [0, 0, 1, 1], [], []>} : vector<12x8xf32>, vector<8x8xf32>, vector<12x8xf32> -> vector<12x8xf32>
    %cst_276 = arith.constant 0.000000e+00 : f32
    %695 = vector.broadcast %cst_276 : f32 to vector<1x8xf32>
    %696 = arith.cmpf oeq, %77, %695 : vector<1x8xf32>
    %cst_277 = arith.constant -1.000000e+09 : f32
    %697 = vector.shape_cast %696 : vector<1x8xi1> to vector<1x8xi1>
    %698 = vector.broadcast %697 : vector<1x8xi1> to vector<12x8xi1>
    %699 = vector.broadcast %cst_277 : f32 to vector<12x8xf32>
    %700 = arith.select %698, %699, %694 : vector<12x8xi1>, vector<12x8xf32>
    %cst_278 = arith.constant 0.353553385 : f32
    %701 = vector.broadcast %cst_278 : f32 to vector<12x8xf32>
    %702 = arith.mulf %700, %701 : vector<12x8xf32>
    %cst_279 = arith.constant dense<0xFF800000> : vector<12xf32>
    %703 = vector.multi_reduction <maximumf>, %702, %cst_279 [1] : vector<12x8xf32> to vector<12xf32>
    %704 = vector.shape_cast %703 : vector<12xf32> to vector<12x1xf32>
    %705 = vector.broadcast %704 : vector<12x1xf32> to vector<12x8xf32>
    %706 = arith.subf %702, %705 : vector<12x8xf32>
    %707 = math.exp %706 : vector<12x8xf32>
    %cst_280 = arith.constant dense<0.000000e+00> : vector<12xf32>
    %708 = vector.multi_reduction <add>, %707, %cst_280 [1] : vector<12x8xf32> to vector<12xf32>
    %709 = vector.shape_cast %708 : vector<12xf32> to vector<12x1xf32>
    %710 = tpu.reciprocal %709 {approx = true} : vector<12x1xf32> -> vector<12x1xf32>
    %711 = vector.broadcast %710 : vector<12x1xf32> to vector<12x8xf32>
    %712 = arith.mulf %707, %711 : vector<12x8xf32>
    %713 = vector.extract_strided_slice %48 {offsets = [0, 8], sizes = [8, 8], strides = [1, 1]} : vector<8x32xf32> to vector<8x8xf32>
    %cst_281 = arith.constant dense<0.000000e+00> : vector<12x8xf32>
    %714 = tpu.matmul %712, %713, %cst_281 {dimension_numbers = #tpu.dot_dimension_numbers<[1], [0], [0], [1], [0, 0, 1, 1], [], []>} : vector<12x8xf32>, vector<8x8xf32>, vector<12x8xf32> -> vector<12x8xf32>
    %715 = vector.extract_strided_slice %663 {offsets = [8, 0], sizes = [8, 32], strides = [1, 1]} : vector<32x32xf32> to vector<8x32xf32>
    %cst_282 = arith.constant dense<0.000000e+00> : vector<12x32xf32>
    %716 = tpu.matmul %714, %715, %cst_282 {dimension_numbers = #tpu.dot_dimension_numbers<[1], [0], [0], [1], [0, 0, 1, 1], [], []>} : vector<12x8xf32>, vector<8x32xf32>, vector<12x32xf32> -> vector<12x32xf32>
    %717 = arith.addf %690, %716 : vector<12x32xf32>
    %718 = vector.extract_strided_slice %49 {offsets = [0, 16], sizes = [12, 8], strides = [1, 1]} : vector<12x32xf32> to vector<12x8xf32>
    %719 = vector.extract_strided_slice %46 {offsets = [0, 16], sizes = [8, 8], strides = [1, 1]} : vector<8x32xf32> to vector<8x8xf32>
    %720 = tpu.transpose %719, [1, 0] : vector<8x8xf32> -> vector<8x8xf32>
    %cst_283 = arith.constant dense<0.000000e+00> : vector<12x8xf32>
    %721 = tpu.matmul %718, %720, %cst_283 {dimension_numbers = #tpu.dot_dimension_numbers<[1], [0], [0], [1], [0, 0, 1, 1], [], []>} : vector<12x8xf32>, vector<8x8xf32>, vector<12x8xf32> -> vector<12x8xf32>
    %cst_284 = arith.constant 0.000000e+00 : f32
    %722 = vector.broadcast %cst_284 : f32 to vector<1x8xf32>
    %723 = arith.cmpf oeq, %77, %722 : vector<1x8xf32>
    %cst_285 = arith.constant -1.000000e+09 : f32
    %724 = vector.shape_cast %723 : vector<1x8xi1> to vector<1x8xi1>
    %725 = vector.broadcast %724 : vector<1x8xi1> to vector<12x8xi1>
    %726 = vector.broadcast %cst_285 : f32 to vector<12x8xf32>
    %727 = arith.select %725, %726, %721 : vector<12x8xi1>, vector<12x8xf32>
    %cst_286 = arith.constant 0.353553385 : f32
    %728 = vector.broadcast %cst_286 : f32 to vector<12x8xf32>
    %729 = arith.mulf %727, %728 : vector<12x8xf32>
    %cst_287 = arith.constant dense<0xFF800000> : vector<12xf32>
    %730 = vector.multi_reduction <maximumf>, %729, %cst_287 [1] : vector<12x8xf32> to vector<12xf32>
    %731 = vector.shape_cast %730 : vector<12xf32> to vector<12x1xf32>
    %732 = vector.broadcast %731 : vector<12x1xf32> to vector<12x8xf32>
    %733 = arith.subf %729, %732 : vector<12x8xf32>
    %734 = math.exp %733 : vector<12x8xf32>
    %cst_288 = arith.constant dense<0.000000e+00> : vector<12xf32>
    %735 = vector.multi_reduction <add>, %734, %cst_288 [1] : vector<12x8xf32> to vector<12xf32>
    %736 = vector.shape_cast %735 : vector<12xf32> to vector<12x1xf32>
    %737 = tpu.reciprocal %736 {approx = true} : vector<12x1xf32> -> vector<12x1xf32>
    %738 = vector.broadcast %737 : vector<12x1xf32> to vector<12x8xf32>
    %739 = arith.mulf %734, %738 : vector<12x8xf32>
    %740 = vector.extract_strided_slice %48 {offsets = [0, 16], sizes = [8, 8], strides = [1, 1]} : vector<8x32xf32> to vector<8x8xf32>
    %cst_289 = arith.constant dense<0.000000e+00> : vector<12x8xf32>
    %741 = tpu.matmul %739, %740, %cst_289 {dimension_numbers = #tpu.dot_dimension_numbers<[1], [0], [0], [1], [0, 0, 1, 1], [], []>} : vector<12x8xf32>, vector<8x8xf32>, vector<12x8xf32> -> vector<12x8xf32>
    %742 = vector.extract_strided_slice %663 {offsets = [16, 0], sizes = [8, 32], strides = [1, 1]} : vector<32x32xf32> to vector<8x32xf32>
    %cst_290 = arith.constant dense<0.000000e+00> : vector<12x32xf32>
    %743 = tpu.matmul %741, %742, %cst_290 {dimension_numbers = #tpu.dot_dimension_numbers<[1], [0], [0], [1], [0, 0, 1, 1], [], []>} : vector<12x8xf32>, vector<8x32xf32>, vector<12x32xf32> -> vector<12x32xf32>
    %744 = arith.addf %717, %743 : vector<12x32xf32>
    %745 = vector.extract_strided_slice %49 {offsets = [0, 24], sizes = [12, 8], strides = [1, 1]} : vector<12x32xf32> to vector<12x8xf32>
    %746 = vector.extract_strided_slice %46 {offsets = [0, 24], sizes = [8, 8], strides = [1, 1]} : vector<8x32xf32> to vector<8x8xf32>
    %747 = tpu.transpose %746, [1, 0] : vector<8x8xf32> -> vector<8x8xf32>
    %cst_291 = arith.constant dense<0.000000e+00> : vector<12x8xf32>
    %748 = tpu.matmul %745, %747, %cst_291 {dimension_numbers = #tpu.dot_dimension_numbers<[1], [0], [0], [1], [0, 0, 1, 1], [], []>} : vector<12x8xf32>, vector<8x8xf32>, vector<12x8xf32> -> vector<12x8xf32>
    %cst_292 = arith.constant 0.000000e+00 : f32
    %749 = vector.broadcast %cst_292 : f32 to vector<1x8xf32>
    %750 = arith.cmpf oeq, %77, %749 : vector<1x8xf32>
    %cst_293 = arith.constant -1.000000e+09 : f32
    %751 = vector.shape_cast %750 : vector<1x8xi1> to vector<1x8xi1>
    %752 = vector.broadcast %751 : vector<1x8xi1> to vector<12x8xi1>
    %753 = vector.broadcast %cst_293 : f32 to vector<12x8xf32>
    %754 = arith.select %752, %753, %748 : vector<12x8xi1>, vector<12x8xf32>
    %cst_294 = arith.constant 0.353553385 : f32
    %755 = vector.broadcast %cst_294 : f32 to vector<12x8xf32>
    %756 = arith.mulf %754, %755 : vector<12x8xf32>
    %cst_295 = arith.constant dense<0xFF800000> : vector<12xf32>
    %757 = vector.multi_reduction <maximumf>, %756, %cst_295 [1] : vector<12x8xf32> to vector<12xf32>
    %758 = vector.shape_cast %757 : vector<12xf32> to vector<12x1xf32>
    %759 = vector.broadcast %758 : vector<12x1xf32> to vector<12x8xf32>
    %760 = arith.subf %756, %759 : vector<12x8xf32>
    %761 = math.exp %760 : vector<12x8xf32>
    %cst_296 = arith.constant dense<0.000000e+00> : vector<12xf32>
    %762 = vector.multi_reduction <add>, %761, %cst_296 [1] : vector<12x8xf32> to vector<12xf32>
    %763 = vector.shape_cast %762 : vector<12xf32> to vector<12x1xf32>
    %764 = tpu.reciprocal %763 {approx = true} : vector<12x1xf32> -> vector<12x1xf32>
    %765 = vector.broadcast %764 : vector<12x1xf32> to vector<12x8xf32>
    %766 = arith.mulf %761, %765 : vector<12x8xf32>
    %767 = vector.extract_strided_slice %48 {offsets = [0, 24], sizes = [8, 8], strides = [1, 1]} : vector<8x32xf32> to vector<8x8xf32>
    %cst_297 = arith.constant dense<0.000000e+00> : vector<12x8xf32>
    %768 = tpu.matmul %766, %767, %cst_297 {dimension_numbers = #tpu.dot_dimension_numbers<[1], [0], [0], [1], [0, 0, 1, 1], [], []>} : vector<12x8xf32>, vector<8x8xf32>, vector<12x8xf32> -> vector<12x8xf32>
    %769 = vector.extract_strided_slice %663 {offsets = [24, 0], sizes = [8, 32], strides = [1, 1]} : vector<32x32xf32> to vector<8x32xf32>
    %cst_298 = arith.constant dense<0.000000e+00> : vector<12x32xf32>
    %770 = tpu.matmul %768, %769, %cst_298 {dimension_numbers = #tpu.dot_dimension_numbers<[1], [0], [0], [1], [0, 0, 1, 1], [], []>} : vector<12x8xf32>, vector<8x32xf32>, vector<12x32xf32> -> vector<12x32xf32>
    %771 = arith.addf %744, %770 : vector<12x32xf32>
    %772 = arith.addf %1, %319 : vector<16x32xf32>
    %c0_299 = arith.constant 0 : index
    %c0_300 = arith.constant 0 : index
    %c0_301 = arith.constant 0 : index
    %773 = vector.load %arg17[%c0_299, %c0_300, %c0_301] : memref<3x1x32xf32, #tpu.memory_space<vmem>>, vector<1x1x32xf32>
    %774 = vector.shape_cast %773 : vector<1x1x32xf32> to vector<1x32xf32>
    %c0_302 = arith.constant 0 : index
    %c0_303 = arith.constant 0 : index
    %c0_304 = arith.constant 0 : index
    %775 = vector.load %arg18[%c0_302, %c0_303, %c0_304] : memref<3x1x32xf32, #tpu.memory_space<vmem>>, vector<1x1x32xf32>
    %776 = vector.shape_cast %775 : vector<1x1x32xf32> to vector<1x32xf32>
    %cst_305 = arith.constant dense<0.000000e+00> : vector<16xf32>
    %777 = vector.multi_reduction <add>, %772, %cst_305 [1] : vector<16x32xf32> to vector<16xf32>
    %778 = vector.shape_cast %777 : vector<16xf32> to vector<16x1xf32>
    %cst_306 = arith.constant 3.200000e+01 : f32
    %779 = vector.broadcast %cst_306 : f32 to vector<16x1xf32>
    %780 = arith.divf %778, %779 : vector<16x1xf32>
    %781 = vector.broadcast %780 : vector<16x1xf32> to vector<16x32xf32>
    %782 = arith.subf %772, %781 : vector<16x32xf32>
    %783 = arith.mulf %782, %782 : vector<16x32xf32>
    %cst_307 = arith.constant dense<0.000000e+00> : vector<16xf32>
    %784 = vector.multi_reduction <add>, %783, %cst_307 [1] : vector<16x32xf32> to vector<16xf32>
    %785 = vector.shape_cast %784 : vector<16xf32> to vector<16x1xf32>
    %cst_308 = arith.constant 3.200000e+01 : f32
    %786 = vector.broadcast %cst_308 : f32 to vector<16x1xf32>
    %787 = arith.divf %785, %786 : vector<16x1xf32>
    %cst_309 = arith.constant 9.99999974E-6 : f32
    %788 = vector.broadcast %cst_309 : f32 to vector<16x1xf32>
    %789 = arith.addf %787, %788 : vector<16x1xf32>
    %790 = math.rsqrt %789 : vector<16x1xf32>
    %791 = vector.broadcast %790 : vector<16x1xf32> to vector<16x32xf32>
    %792 = arith.mulf %782, %791 : vector<16x32xf32>
    %793 = vector.broadcast %774 : vector<1x32xf32> to vector<16x32xf32>
    %794 = arith.mulf %792, %793 : vector<16x32xf32>
    %795 = vector.broadcast %776 : vector<1x32xf32> to vector<16x32xf32>
    %796 = arith.addf %794, %795 : vector<16x32xf32>
    %c0_310 = arith.constant 0 : index
    %c0_311 = arith.constant 0 : index
    %c0_312 = arith.constant 0 : index
    %797 = vector.load %arg19[%c0_310, %c0_311, %c0_312] : memref<1x16x32xf32, #tpu.memory_space<vmem>>, vector<1x16x32xf32>
    %798 = vector.shape_cast %797 : vector<1x16x32xf32> to vector<16x32xf32>
    %799 = vector.shape_cast %796 : vector<16x32xf32> to vector<1x16x32xf32>
    tpu.vector_store %arg19[%c0_310, %c0_311, %c0_312], %799 {strides = array<i32>} : memref<1x16x32xf32, #tpu.memory_space<vmem>>, vector<1x16x32xf32>,
    %800 = arith.addf %3, %543 : vector<8x32xf32>
    %c1_313 = arith.constant 1 : index
    %c0_314 = arith.constant 0 : index
    %c0_315 = arith.constant 0 : index
    %801 = vector.load %arg17[%c1_313, %c0_314, %c0_315] : memref<3x1x32xf32, #tpu.memory_space<vmem>>, vector<1x1x32xf32>
    %802 = vector.shape_cast %801 : vector<1x1x32xf32> to vector<1x32xf32>
    %c1_316 = arith.constant 1 : index
    %c0_317 = arith.constant 0 : index
    %c0_318 = arith.constant 0 : index
    %803 = vector.load %arg18[%c1_316, %c0_317, %c0_318] : memref<3x1x32xf32, #tpu.memory_space<vmem>>, vector<1x1x32xf32>
    %804 = vector.shape_cast %803 : vector<1x1x32xf32> to vector<1x32xf32>
    %cst_319 = arith.constant dense<0.000000e+00> : vector<8xf32>
    %805 = vector.multi_reduction <add>, %800, %cst_319 [1] : vector<8x32xf32> to vector<8xf32>
    %806 = vector.shape_cast %805 : vector<8xf32> to vector<8x1xf32>
    %cst_320 = arith.constant 3.200000e+01 : f32
    %807 = vector.broadcast %cst_320 : f32 to vector<8x1xf32>
    %808 = arith.divf %806, %807 : vector<8x1xf32>
    %809 = vector.broadcast %808 : vector<8x1xf32> to vector<8x32xf32>
    %810 = arith.subf %800, %809 : vector<8x32xf32>
    %811 = arith.mulf %810, %810 : vector<8x32xf32>
    %cst_321 = arith.constant dense<0.000000e+00> : vector<8xf32>
    %812 = vector.multi_reduction <add>, %811, %cst_321 [1] : vector<8x32xf32> to vector<8xf32>
    %813 = vector.shape_cast %812 : vector<8xf32> to vector<8x1xf32>
    %cst_322 = arith.constant 3.200000e+01 : f32
    %814 = vector.broadcast %cst_322 : f32 to vector<8x1xf32>
    %815 = arith.divf %813, %814 : vector<8x1xf32>
    %cst_323 = arith.constant 9.99999974E-6 : f32
    %816 = vector.broadcast %cst_323 : f32 to vector<8x1xf32>
    %817 = arith.addf %815, %816 : vector<8x1xf32>
    %818 = math.rsqrt %817 : vector<8x1xf32>
    %819 = vector.broadcast %818 : vector<8x1xf32> to vector<8x32xf32>
    %820 = arith.mulf %810, %819 : vector<8x32xf32>
    %821 = vector.broadcast %802 : vector<1x32xf32> to vector<8x32xf32>
    %822 = arith.mulf %820, %821 : vector<8x32xf32>
    %823 = vector.broadcast %804 : vector<1x32xf32> to vector<8x32xf32>
    %824 = arith.addf %822, %823 : vector<8x32xf32>
    %c0_324 = arith.constant 0 : index
    %c0_325 = arith.constant 0 : index
    %c0_326 = arith.constant 0 : index
    %825 = vector.load %arg20[%c0_324, %c0_325, %c0_326] : memref<1x8x32xf32, #tpu.memory_space<vmem>>, vector<1x8x32xf32>
    %826 = vector.shape_cast %825 : vector<1x8x32xf32> to vector<8x32xf32>
    %827 = vector.shape_cast %824 : vector<8x32xf32> to vector<1x8x32xf32>
    tpu.vector_store %arg20[%c0_324, %c0_325, %c0_326], %827 {strides = array<i32>} : memref<1x8x32xf32, #tpu.memory_space<vmem>>, vector<1x8x32xf32>,
    %828 = arith.addf %5, %771 : vector<12x32xf32>
    %c2_327 = arith.constant 2 : index
    %c0_328 = arith.constant 0 : index
    %c0_329 = arith.constant 0 : index
    %829 = vector.load %arg17[%c2_327, %c0_328, %c0_329] : memref<3x1x32xf32, #tpu.memory_space<vmem>>, vector<1x1x32xf32>
    %830 = vector.shape_cast %829 : vector<1x1x32xf32> to vector<1x32xf32>
    %c2_330 = arith.constant 2 : index
    %c0_331 = arith.constant 0 : index
    %c0_332 = arith.constant 0 : index
    %831 = vector.load %arg18[%c2_330, %c0_331, %c0_332] : memref<3x1x32xf32, #tpu.memory_space<vmem>>, vector<1x1x32xf32>
    %832 = vector.shape_cast %831 : vector<1x1x32xf32> to vector<1x32xf32>
    %cst_333 = arith.constant dense<0.000000e+00> : vector<12xf32>
    %833 = vector.multi_reduction <add>, %828, %cst_333 [1] : vector<12x32xf32> to vector<12xf32>
    %834 = vector.shape_cast %833 : vector<12xf32> to vector<12x1xf32>
    %cst_334 = arith.constant 3.200000e+01 : f32
    %835 = vector.broadcast %cst_334 : f32 to vector<12x1xf32>
    %836 = arith.divf %834, %835 : vector<12x1xf32>
    %837 = vector.broadcast %836 : vector<12x1xf32> to vector<12x32xf32>
    %838 = arith.subf %828, %837 : vector<12x32xf32>
    %839 = arith.mulf %838, %838 : vector<12x32xf32>
    %cst_335 = arith.constant dense<0.000000e+00> : vector<12xf32>
    %840 = vector.multi_reduction <add>, %839, %cst_335 [1] : vector<12x32xf32> to vector<12xf32>
    %841 = vector.shape_cast %840 : vector<12xf32> to vector<12x1xf32>
    %cst_336 = arith.constant 3.200000e+01 : f32
    %842 = vector.broadcast %cst_336 : f32 to vector<12x1xf32>
    %843 = arith.divf %841, %842 : vector<12x1xf32>
    %cst_337 = arith.constant 9.99999974E-6 : f32
    %844 = vector.broadcast %cst_337 : f32 to vector<12x1xf32>
    %845 = arith.addf %843, %844 : vector<12x1xf32>
    %846 = math.rsqrt %845 : vector<12x1xf32>
    %847 = vector.broadcast %846 : vector<12x1xf32> to vector<12x32xf32>
    %848 = arith.mulf %838, %847 : vector<12x32xf32>
    %849 = vector.broadcast %830 : vector<1x32xf32> to vector<12x32xf32>
    %850 = arith.mulf %848, %849 : vector<12x32xf32>
    %851 = vector.broadcast %832 : vector<1x32xf32> to vector<12x32xf32>
    %852 = arith.addf %850, %851 : vector<12x32xf32>
    %c0_338 = arith.constant 0 : index
    %c0_339 = arith.constant 0 : index
    %c0_340 = arith.constant 0 : index
    %853 = vector.load %arg21[%c0_338, %c0_339, %c0_340] : memref<1x12x32xf32, #tpu.memory_space<vmem>>, vector<1x12x32xf32>
    %854 = vector.shape_cast %853 : vector<1x12x32xf32> to vector<12x32xf32>
    %855 = vector.shape_cast %852 : vector<12x32xf32> to vector<1x12x32xf32>
    tpu.vector_store %arg21[%c0_338, %c0_339, %c0_340], %855 {strides = array<i32>} : memref<1x12x32xf32, #tpu.memory_space<vmem>>, vector<1x12x32xf32>,
    return
  }
  func.func @transform_0(%arg0: i32) -> (i32, i32, i32) {
    %c0_i32 = arith.constant 0 : i32
    %c0_i32_0 = arith.constant 0 : i32
    %c0_i32_1 = arith.constant 0 : i32
    return %arg0, %c0_i32, %c0_i32_0 : i32, i32, i32
  }
  func.func @transform_1(%arg0: i32) -> (i32, i32, i32) {
    %c0_i32 = arith.constant 0 : i32
    %c0_i32_0 = arith.constant 0 : i32
    %c0_i32_1 = arith.constant 0 : i32
    return %arg0, %c0_i32, %c0_i32_0 : i32, i32, i32
  }
  func.func @transform_2(%arg0: i32) -> (i32, i32, i32) {
    %c0_i32 = arith.constant 0 : i32
    %c0_i32_0 = arith.constant 0 : i32
    %c0_i32_1 = arith.constant 0 : i32
    return %arg0, %c0_i32, %c0_i32_0 : i32, i32, i32
  }
  func.func @transform_3(%arg0: i32) -> (i32, i32, i32) {
    %c0_i32 = arith.constant 0 : i32
    %c0_i32_0 = arith.constant 0 : i32
    %c0_i32_1 = arith.constant 0 : i32
    return %arg0, %c0_i32, %c0_i32_0 : i32, i32, i32
  }
  func.func @transform_4(%arg0: i32) -> (i32, i32, i32) {
    %c0_i32 = arith.constant 0 : i32
    %c0_i32_0 = arith.constant 0 : i32
    %c0_i32_1 = arith.constant 0 : i32
    return %arg0, %c0_i32, %c0_i32_0 : i32, i32, i32
  }
  func.func @transform_5(%arg0: i32) -> (i32, i32, i32) {
    %c0_i32 = arith.constant 0 : i32
    %c0_i32_0 = arith.constant 0 : i32
    %c0_i32_1 = arith.constant 0 : i32
    return %arg0, %c0_i32, %c0_i32_0 : i32, i32, i32
  }
  func.func @transform_6(%arg0: i32) -> (i32, i32, i32) {
    %c0_i32 = arith.constant 0 : i32
    %c0_i32_0 = arith.constant 0 : i32
    %c0_i32_1 = arith.constant 0 : i32
    return %arg0, %c0_i32, %c0_i32_0 : i32, i32, i32
  }
  func.func @transform_7(%arg0: i32) -> (i32, i32, i32) {
    %c0_i32 = arith.constant 0 : i32
    %c0_i32_0 = arith.constant 0 : i32
    %c0_i32_1 = arith.constant 0 : i32
    return %arg0, %c0_i32, %c0_i32_0 : i32, i32, i32
  }
  func.func @transform_8(%arg0: i32) -> (i32, i32, i32) {
    %c0_i32 = arith.constant 0 : i32
    %c0_i32_0 = arith.constant 0 : i32
    %c0_i32_1 = arith.constant 0 : i32
    return %arg0, %c0_i32, %c0_i32_0 : i32, i32, i32
  }
  func.func @transform_9(%arg0: i32) -> (i32, i32, i32) {
    %c0_i32 = arith.constant 0 : i32
    %c0_i32_0 = arith.constant 0 : i32
    %c0_i32_1 = arith.constant 0 : i32
    return %arg0, %c0_i32, %c0_i32_0 : i32, i32, i32
  }
  func.func @transform_10(%arg0: i32) -> (i32, i32, i32) {
    %c0_i32 = arith.constant 0 : i32
    %c0_i32_0 = arith.constant 0 : i32
    %c0_i32_1 = arith.constant 0 : i32
    return %arg0, %c0_i32, %c0_i32_0 : i32, i32, i32
  }
  func.func @transform_11(%arg0: i32) -> (i32, i32, i32) {
    %c0_i32 = arith.constant 0 : i32
    %c0_i32_0 = arith.constant 0 : i32
    %c0_i32_1 = arith.constant 0 : i32
    %c0_i32_2 = arith.constant 0 : i32
    return %c0_i32, %c0_i32_0, %c0_i32_1 : i32, i32, i32
  }
  func.func @transform_12(%arg0: i32) -> (i32, i32, i32) {
    %c0_i32 = arith.constant 0 : i32
    %c0_i32_0 = arith.constant 0 : i32
    %c0_i32_1 = arith.constant 0 : i32
    %c0_i32_2 = arith.constant 0 : i32
    return %c0_i32, %c0_i32_0, %c0_i32_1 : i32, i32, i32
  }
  func.func @transform_13(%arg0: i32) -> (i32, i32, i32) {
    %c0_i32 = arith.constant 0 : i32
    %c0_i32_0 = arith.constant 0 : i32
    %c0_i32_1 = arith.constant 0 : i32
    %c0_i32_2 = arith.constant 0 : i32
    return %c0_i32, %c0_i32_0, %c0_i32_1 : i32, i32, i32
  }
  func.func @transform_14(%arg0: i32) -> (i32, i32, i32) {
    %c0_i32 = arith.constant 0 : i32
    %c0_i32_0 = arith.constant 0 : i32
    %c0_i32_1 = arith.constant 0 : i32
    %c0_i32_2 = arith.constant 0 : i32
    return %c0_i32, %c0_i32_0, %c0_i32_1 : i32, i32, i32
  }
  func.func @transform_15(%arg0: i32) -> (i32, i32, i32) {
    %c0_i32 = arith.constant 0 : i32
    %c0_i32_0 = arith.constant 0 : i32
    %c0_i32_1 = arith.constant 0 : i32
    %c0_i32_2 = arith.constant 0 : i32
    return %c0_i32, %c0_i32_0, %c0_i32_1 : i32, i32, i32
  }
  func.func @transform_16(%arg0: i32) -> (i32, i32, i32) {
    %c0_i32 = arith.constant 0 : i32
    %c0_i32_0 = arith.constant 0 : i32
    %c0_i32_1 = arith.constant 0 : i32
    %c0_i32_2 = arith.constant 0 : i32
    return %c0_i32, %c0_i32_0, %c0_i32_1 : i32, i32, i32
  }
  func.func @transform_17(%arg0: i32) -> (i32, i32, i32) {
    %c0_i32 = arith.constant 0 : i32
    %c0_i32_0 = arith.constant 0 : i32
    %c0_i32_1 = arith.constant 0 : i32
    %c0_i32_2 = arith.constant 0 : i32
    return %c0_i32, %c0_i32_0, %c0_i32_1 : i32, i32, i32
  }
  func.func @transform_18(%arg0: i32) -> (i32, i32, i32) {
    %c0_i32 = arith.constant 0 : i32
    %c0_i32_0 = arith.constant 0 : i32
    %c0_i32_1 = arith.constant 0 : i32
    return %arg0, %c0_i32, %c0_i32_0 : i32, i32, i32
  }
  func.func @transform_19(%arg0: i32) -> (i32, i32, i32) {
    %c0_i32 = arith.constant 0 : i32
    %c0_i32_0 = arith.constant 0 : i32
    %c0_i32_1 = arith.constant 0 : i32
    return %arg0, %c0_i32, %c0_i32_0 : i32, i32, i32
  }
  func.func @transform_20(%arg0: i32) -> (i32, i32, i32) {
    %c0_i32 = arith.constant 0 : i32
    %c0_i32_0 = arith.constant 0 : i32
    %c0_i32_1 = arith.constant 0 : i32
    return %arg0, %c0_i32, %c0_i32_0 : i32, i32, i32
  }
}

module attributes {stable_mosaic.version = 11 : i64} {
  func.func @_intra_block_kernel(%arg0: i32, %arg1: memref<1x16x32xf32, #tpu.memory_space<vmem>>, %arg2: memref<1x8x32xf32, #tpu.memory_space<vmem>>, %arg3: memref<1x12x32xf32, #tpu.memory_space<vmem>>, %arg4: memref<1x16x1xf32, #tpu.memory_space<vmem>>, %arg5: memref<1x8x1xf32, #tpu.memory_space<vmem>>, %arg6: memref<1x12x1xf32, #tpu.memory_space<vmem>>, %arg7: memref<1x1x17xf32, #tpu.memory_space<vmem>>, %arg8: memref<1x1x8xf32, #tpu.memory_space<vmem>>, %arg9: memref<1x1x13xf32, #tpu.memory_space<vmem>>, %arg10: memref<2x32x32xf32, #tpu.memory_space<vmem>>, %arg11: memref<2x1x32xf32, #tpu.memory_space<vmem>>, %arg12: memref<3x32x96xf32, #tpu.memory_space<vmem>>, %arg13: memref<3x1x96xf32, #tpu.memory_space<vmem>>, %arg14: memref<4x1x32xf32, #tpu.memory_space<vmem>>, %arg15: memref<3x32x32xf32, #tpu.memory_space<vmem>>, %arg16: memref<3x1x32xf32, #tpu.memory_space<vmem>>, %arg17: memref<3x1x32xf32, #tpu.memory_space<vmem>>, %arg18: memref<3x1x32xf32, #tpu.memory_space<vmem>>, %arg19: memref<1x16x32xf32, #tpu.memory_space<vmem>>, %arg20: memref<1x8x32xf32, #tpu.memory_space<vmem>>, %arg21: memref<1x12x32xf32, #tpu.memory_space<vmem>>, %arg22: memref<17x32xf32, #tpu.memory_space<vmem>>, %arg23: memref<17x32xf32, #tpu.memory_space<vmem>>, %arg24: memref<13x32xf32, #tpu.memory_space<vmem>>, %arg25: memref<13x32xf32, #tpu.memory_space<vmem>>) attributes {dimension_semantics = [#tpu.dimension_semantics<parallel>], iteration_bounds = array<i64: 2>, scalar_prefetch = 0 : i64, scratch_operands = 4 : i64, tpu.core_type = #tpu.core_type<tc>, window_params = [{transform_indices = @transform_0, window_bounds = array<i64: 1, 16, 32>}, {transform_indices = @transform_1, window_bounds = array<i64: 1, 8, 32>}, {transform_indices = @transform_2, window_bounds = array<i64: 1, 12, 32>}, {transform_indices = @transform_3, window_bounds = array<i64: 1, 16, 1>}, {transform_indices = @transform_4, window_bounds = array<i64: 1, 8, 1>}, {transform_indices = @transform_5, window_bounds = array<i64: 1, 12, 1>}, {transform_indices = @transform_6, window_bounds = array<i64: 1, 1, 17>}, {transform_indices = @transform_7, window_bounds = array<i64: 1, 1, 8>}, {transform_indices = @transform_8, window_bounds = array<i64: 1, 1, 13>}, {pipeline_mode = #tpu.pipeline_mode<synchronous>, transform_indices = @transform_9, window_bounds = array<i64: 2, 32, 32>}, {pipeline_mode = #tpu.pipeline_mode<synchronous>, transform_indices = @transform_10, window_bounds = array<i64: 2, 1, 32>}, {pipeline_mode = #tpu.pipeline_mode<synchronous>, transform_indices = @transform_11, window_bounds = array<i64: 3, 32, 96>}, {pipeline_mode = #tpu.pipeline_mode<synchronous>, transform_indices = @transform_12, window_bounds = array<i64: 3, 1, 96>}, {pipeline_mode = #tpu.pipeline_mode<synchronous>, transform_indices = @transform_13, window_bounds = array<i64: 4, 1, 32>}, {pipeline_mode = #tpu.pipeline_mode<synchronous>, transform_indices = @transform_14, window_bounds = array<i64: 3, 32, 32>}, {pipeline_mode = #tpu.pipeline_mode<synchronous>, transform_indices = @transform_15, window_bounds = array<i64: 3, 1, 32>}, {pipeline_mode = #tpu.pipeline_mode<synchronous>, transform_indices = @transform_16, window_bounds = array<i64: 3, 1, 32>}, {pipeline_mode = #tpu.pipeline_mode<synchronous>, transform_indices = @transform_17, window_bounds = array<i64: 3, 1, 32>}, {transform_indices = @transform_18, window_bounds = array<i64: 1, 16, 32>}, {transform_indices = @transform_19, window_bounds = array<i64: 1, 8, 32>}, {transform_indices = @transform_20, window_bounds = array<i64: 1, 12, 32>}]} {
    %c0 = arith.constant 0 : index
    %c0_0 = arith.constant 0 : index
    %c0_1 = arith.constant 0 : index
    %0 = vector.load %arg1[%c0, %c0_0, %c0_1] : memref<1x16x32xf32, #tpu.memory_space<vmem>>, vector<1x16x32xf32>
    %1 = vector.shape_cast %0 : vector<1x16x32xf32> to vector<16x32xf32>
    %c0_2 = arith.constant 0 : index
    %c0_3 = arith.constant 0 : index
    %c0_4 = arith.constant 0 : index
    %2 = vector.load %arg2[%c0_2, %c0_3, %c0_4] : memref<1x8x32xf32, #tpu.memory_space<vmem>>, vector<1x8x32xf32>
    %3 = vector.shape_cast %2 : vector<1x8x32xf32> to vector<8x32xf32>
    %c0_5 = arith.constant 0 : index
    %c0_6 = arith.constant 0 : index
    %c0_7 = arith.constant 0 : index
    %4 = vector.load %arg3[%c0_5, %c0_6, %c0_7] : memref<1x12x32xf32, #tpu.memory_space<vmem>>, vector<1x12x32xf32>
    %5 = vector.shape_cast %4 : vector<1x12x32xf32> to vector<12x32xf32>
    %c0_8 = arith.constant 0 : index
    %c0_9 = arith.constant 0 : index
    %c0_10 = arith.constant 0 : index
    %6 = vector.load %arg7[%c0_8, %c0_9, %c0_10] : memref<1x1x17xf32, #tpu.memory_space<vmem>>, vector<1x1x17xf32>
    %7 = vector.shape_cast %6 : vector<1x1x17xf32> to vector<1x17xf32>
    %c0_11 = arith.constant 0 : index
    %c0_12 = arith.constant 0 : index
    %c0_13 = arith.constant 0 : index
    %8 = vector.load %arg8[%c0_11, %c0_12, %c0_13] : memref<1x1x8xf32, #tpu.memory_space<vmem>>, vector<1x1x8xf32>
    %9 = vector.shape_cast %8 : vector<1x1x8xf32> to vector<1x8xf32>
    %c0_14 = arith.constant 0 : index
    %c0_15 = arith.constant 0 : index
    %c0_16 = arith.constant 0 : index
    %10 = vector.load %arg9[%c0_14, %c0_15, %c0_16] : memref<1x1x13xf32, #tpu.memory_space<vmem>>, vector<1x1x13xf32>
    %11 = vector.shape_cast %10 : vector<1x1x13xf32> to vector<1x13xf32>
    %12 = vector.extract_strided_slice %7 {offsets = [0, 0], sizes = [1, 16], strides = [1, 1]} : vector<1x17xf32> to vector<1x16xf32>
    %cst = arith.constant dense<0.000000e+00> : vector<1x32xf32>
    %13 = tpu.matmul %12, %1, %cst {dimension_numbers = #tpu.dot_dimension_numbers<[1], [0], [0], [1], [0, 0, 1, 1], [], []>} : vector<1x16xf32>, vector<16x32xf32>, vector<1x32xf32> -> vector<1x32xf32>
    %cst_17 = arith.constant dense<0.000000e+00> : vector<1xf32>
    %14 = vector.multi_reduction <add>, %12, %cst_17 [1] : vector<1x16xf32> to vector<1xf32>
    %15 = vector.shape_cast %14 : vector<1xf32> to vector<1x1xf32>
    %16 = tpu.reciprocal %15 {approx = true} : vector<1x1xf32> -> vector<1x1xf32>
    %17 = vector.broadcast %16 : vector<1x1xf32> to vector<1x32xf32>
    %18 = arith.mulf %13, %17 : vector<1x32xf32>
    %cst_18 = arith.constant dense<0.000000e+00> : vector<1x32xf32>
    %19 = tpu.matmul %9, %3, %cst_18 {dimension_numbers = #tpu.dot_dimension_numbers<[1], [0], [0], [1], [0, 0, 1, 1], [], []>} : vector<1x8xf32>, vector<8x32xf32>, vector<1x32xf32> -> vector<1x32xf32>
    %cst_19 = arith.constant dense<0.000000e+00> : vector<1xf32>
    %20 = vector.multi_reduction <add>, %9, %cst_19 [1] : vector<1x8xf32> to vector<1xf32>
    %21 = vector.shape_cast %20 : vector<1xf32> to vector<1x1xf32>
    %22 = tpu.reciprocal %21 {approx = true} : vector<1x1xf32> -> vector<1x1xf32>
    %23 = vector.broadcast %22 : vector<1x1xf32> to vector<1x32xf32>
    %24 = arith.mulf %19, %23 : vector<1x32xf32>
    %cst_20 = arith.constant 0.000000e+00 : f32
    %25 = vector.broadcast %cst_20 : f32 to vector<1x32xf32>
    %26 = arith.maximumf %18, %25 : vector<1x32xf32>
    %c0_21 = arith.constant 0 : index
    %c0_22 = arith.constant 0 : index
    %c0_23 = arith.constant 0 : index
    %27 = vector.load %arg10[%c0_21, %c0_22, %c0_23] : memref<2x32x32xf32, #tpu.memory_space<vmem>>, vector<1x32x32xf32>
    %28 = vector.shape_cast %27 : vector<1x32x32xf32> to vector<32x32xf32>
    %cst_24 = arith.constant dense<0.000000e+00> : vector<1x32xf32>
    %29 = tpu.matmul %26, %28, %cst_24 {dimension_numbers = #tpu.dot_dimension_numbers<[1], [0], [0], [1], [0, 0, 1, 1], [], []>} : vector<1x32xf32>, vector<32x32xf32>, vector<1x32xf32> -> vector<1x32xf32>
    %c0_25 = arith.constant 0 : index
    %c0_26 = arith.constant 0 : index
    %c0_27 = arith.constant 0 : index
    %30 = vector.load %arg11[%c0_25, %c0_26, %c0_27] : memref<2x1x32xf32, #tpu.memory_space<vmem>>, vector<1x1x32xf32>
    %31 = vector.shape_cast %30 : vector<1x1x32xf32> to vector<1x32xf32>
    %32 = arith.addf %29, %31 : vector<1x32xf32>
    %33 = arith.negf %32 : vector<1x32xf32>
    %34 = math.exp %33 : vector<1x32xf32>
    %cst_28 = arith.constant 1.000000e+00 : f32
    %35 = vector.broadcast %cst_28 : f32 to vector<1x32xf32>
    %36 = arith.addf %35, %34 : vector<1x32xf32>
    %37 = arith.divf %35, %36 : vector<1x32xf32>
    %cst_29 = arith.constant 0.000000e+00 : f32
    %38 = vector.broadcast %cst_29 : f32 to vector<1x32xf32>
    %39 = arith.maximumf %24, %38 : vector<1x32xf32>
    %c1 = arith.constant 1 : index
    %c0_30 = arith.constant 0 : index
    %c0_31 = arith.constant 0 : index
    %40 = vector.load %arg10[%c1, %c0_30, %c0_31] : memref<2x32x32xf32, #tpu.memory_space<vmem>>, vector<1x32x32xf32>
    %41 = vector.shape_cast %40 : vector<1x32x32xf32> to vector<32x32xf32>
    %cst_32 = arith.constant dense<0.000000e+00> : vector<1x32xf32>
    %42 = tpu.matmul %39, %41, %cst_32 {dimension_numbers = #tpu.dot_dimension_numbers<[1], [0], [0], [1], [0, 0, 1, 1], [], []>} : vector<1x32xf32>, vector<32x32xf32>, vector<1x32xf32> -> vector<1x32xf32>
    %c1_33 = arith.constant 1 : index
    %c0_34 = arith.constant 0 : index
    %c0_35 = arith.constant 0 : index
    %43 = vector.load %arg11[%c1_33, %c0_34, %c0_35] : memref<2x1x32xf32, #tpu.memory_space<vmem>>, vector<1x1x32xf32>
    %44 = vector.shape_cast %43 : vector<1x1x32xf32> to vector<1x32xf32>
    %45 = arith.addf %42, %44 : vector<1x32xf32>
    %46 = arith.negf %45 : vector<1x32xf32>
    %47 = math.exp %46 : vector<1x32xf32>
    %cst_36 = arith.constant 1.000000e+00 : f32
    %48 = vector.broadcast %cst_36 : f32 to vector<1x32xf32>
    %49 = arith.addf %48, %47 : vector<1x32xf32>
    %50 = arith.divf %48, %49 : vector<1x32xf32>
    %cst_37 = arith.constant 1.000000e+00 : f32
    %51 = vector.broadcast %cst_37 : f32 to vector<1x32xf32>
    %52 = arith.addf %51, %50 : vector<1x32xf32>
    %cst_38 = arith.constant 1.000000e+00 : f32
    %53 = vector.broadcast %cst_38 : f32 to vector<1x32xf32>
    %54 = arith.addf %53, %37 : vector<1x32xf32>
    %cst_39 = arith.constant 0.000000e+00 : f32
    %55 = vector.broadcast %cst_39 : f32 to vector<16x32xf32>
    %56 = arith.maximumf %1, %55 : vector<16x32xf32>
    %c0_40 = arith.constant 0 : index
    %c0_41 = arith.constant 0 : index
    %c0_42 = arith.constant 0 : index
    %57 = vector.load %arg12[%c0_40, %c0_41, %c0_42] : memref<3x32x96xf32, #tpu.memory_space<vmem>>, vector<1x32x96xf32>
    %58 = vector.shape_cast %57 : vector<1x32x96xf32> to vector<32x96xf32>
    %cst_43 = arith.constant dense<0.000000e+00> : vector<16x96xf32>
    %59 = tpu.matmul %56, %58, %cst_43 {dimension_numbers = #tpu.dot_dimension_numbers<[1], [0], [0], [1], [0, 0, 1, 1], [], []>} : vector<16x32xf32>, vector<32x96xf32>, vector<16x96xf32> -> vector<16x96xf32>
    %c0_44 = arith.constant 0 : index
    %c0_45 = arith.constant 0 : index
    %c0_46 = arith.constant 0 : index
    %60 = vector.load %arg13[%c0_44, %c0_45, %c0_46] : memref<3x1x96xf32, #tpu.memory_space<vmem>>, vector<1x1x96xf32>
    %61 = vector.shape_cast %60 : vector<1x1x96xf32> to vector<1x96xf32>
    %62 = vector.broadcast %61 : vector<1x96xf32> to vector<16x96xf32>
    %63 = arith.addf %59, %62 : vector<16x96xf32>
    %c0_47 = arith.constant 0 : index
    %c0_48 = arith.constant 0 : index
    %c0_49 = arith.constant 0 : index
    %64 = vector.load %arg4[%c0_47, %c0_48, %c0_49] : memref<1x16x1xf32, #tpu.memory_space<vmem>>, vector<1x16x1xf32>
    %65 = vector.shape_cast %64 : vector<1x16x1xf32> to vector<16x1xf32>
    %66 = vector.broadcast %65 : vector<16x1xf32> to vector<16x96xf32>
    %67 = arith.mulf %63, %66 : vector<16x96xf32>
    %cst_50 = arith.constant 0.000000e+00 : f32
    %68 = vector.broadcast %cst_50 : f32 to vector<8x32xf32>
    %69 = arith.maximumf %3, %68 : vector<8x32xf32>
    %c1_51 = arith.constant 1 : index
    %c0_52 = arith.constant 0 : index
    %c0_53 = arith.constant 0 : index
    %70 = vector.load %arg12[%c1_51, %c0_52, %c0_53] : memref<3x32x96xf32, #tpu.memory_space<vmem>>, vector<1x32x96xf32>
    %71 = vector.shape_cast %70 : vector<1x32x96xf32> to vector<32x96xf32>
    %cst_54 = arith.constant dense<0.000000e+00> : vector<8x96xf32>
    %72 = tpu.matmul %69, %71, %cst_54 {dimension_numbers = #tpu.dot_dimension_numbers<[1], [0], [0], [1], [0, 0, 1, 1], [], []>} : vector<8x32xf32>, vector<32x96xf32>, vector<8x96xf32> -> vector<8x96xf32>
    %c1_55 = arith.constant 1 : index
    %c0_56 = arith.constant 0 : index
    %c0_57 = arith.constant 0 : index
    %73 = vector.load %arg13[%c1_55, %c0_56, %c0_57] : memref<3x1x96xf32, #tpu.memory_space<vmem>>, vector<1x1x96xf32>
    %74 = vector.shape_cast %73 : vector<1x1x96xf32> to vector<1x96xf32>
    %75 = vector.broadcast %74 : vector<1x96xf32> to vector<8x96xf32>
    %76 = arith.addf %72, %75 : vector<8x96xf32>
    %c0_58 = arith.constant 0 : index
    %c0_59 = arith.constant 0 : index
    %c0_60 = arith.constant 0 : index
    %77 = vector.load %arg5[%c0_58, %c0_59, %c0_60] : memref<1x8x1xf32, #tpu.memory_space<vmem>>, vector<1x8x1xf32>
    %78 = vector.shape_cast %77 : vector<1x8x1xf32> to vector<8x1xf32>
    %79 = vector.broadcast %78 : vector<8x1xf32> to vector<8x96xf32>
    %80 = arith.mulf %76, %79 : vector<8x96xf32>
    %cst_61 = arith.constant 0.000000e+00 : f32
    %81 = vector.broadcast %cst_61 : f32 to vector<12x32xf32>
    %82 = arith.maximumf %5, %81 : vector<12x32xf32>
    %c2 = arith.constant 2 : index
    %c0_62 = arith.constant 0 : index
    %c0_63 = arith.constant 0 : index
    %83 = vector.load %arg12[%c2, %c0_62, %c0_63] : memref<3x32x96xf32, #tpu.memory_space<vmem>>, vector<1x32x96xf32>
    %84 = vector.shape_cast %83 : vector<1x32x96xf32> to vector<32x96xf32>
    %cst_64 = arith.constant dense<0.000000e+00> : vector<12x96xf32>
    %85 = tpu.matmul %82, %84, %cst_64 {dimension_numbers = #tpu.dot_dimension_numbers<[1], [0], [0], [1], [0, 0, 1, 1], [], []>} : vector<12x32xf32>, vector<32x96xf32>, vector<12x96xf32> -> vector<12x96xf32>
    %c2_65 = arith.constant 2 : index
    %c0_66 = arith.constant 0 : index
    %c0_67 = arith.constant 0 : index
    %86 = vector.load %arg13[%c2_65, %c0_66, %c0_67] : memref<3x1x96xf32, #tpu.memory_space<vmem>>, vector<1x1x96xf32>
    %87 = vector.shape_cast %86 : vector<1x1x96xf32> to vector<1x96xf32>
    %88 = vector.broadcast %87 : vector<1x96xf32> to vector<12x96xf32>
    %89 = arith.addf %85, %88 : vector<12x96xf32>
    %c0_68 = arith.constant 0 : index
    %c0_69 = arith.constant 0 : index
    %c0_70 = arith.constant 0 : index
    %90 = vector.load %arg6[%c0_68, %c0_69, %c0_70] : memref<1x12x1xf32, #tpu.memory_space<vmem>>, vector<1x12x1xf32>
    %91 = vector.shape_cast %90 : vector<1x12x1xf32> to vector<12x1xf32>
    %92 = vector.broadcast %91 : vector<12x1xf32> to vector<12x96xf32>
    %93 = arith.mulf %89, %92 : vector<12x96xf32>
    %94 = vector.extract_strided_slice %67 {offsets = [0, 0], sizes = [16, 32], strides = [1, 1]} : vector<16x96xf32> to vector<16x32xf32>
    %c0_71 = arith.constant 0 : index
    %c0_72 = arith.constant 0 : index
    %95 = vector.load %arg22[%c0_71, %c0_72] : memref<17x32xf32, #tpu.memory_space<vmem>>, vector<16x32xf32>
    tpu.vector_store %arg22[%c0_71, %c0_72], %94 {strides = array<i32>} : memref<17x32xf32, #tpu.memory_space<vmem>>, vector<16x32xf32>,
    %c0_73 = arith.constant 0 : index
    %c0_74 = arith.constant 0 : index
    %c0_75 = arith.constant 0 : index
    %96 = vector.load %arg14[%c0_73, %c0_74, %c0_75] : memref<4x1x32xf32, #tpu.memory_space<vmem>>, vector<1x1x32xf32>
    %97 = vector.shape_cast %96 : vector<1x1x32xf32> to vector<1x32xf32>
    %c16 = arith.constant 16 : index
    %c0_76 = arith.constant 0 : index
    %98 = vector.load %arg22[%c16, %c0_76] : memref<17x32xf32, #tpu.memory_space<vmem>>, vector<1x32xf32>
    tpu.vector_store %arg22[%c16, %c0_76], %97 {strides = array<i32>} : memref<17x32xf32, #tpu.memory_space<vmem>>, vector<1x32xf32>,
    %99 = vector.extract_strided_slice %67 {offsets = [0, 64], sizes = [16, 32], strides = [1, 1]} : vector<16x96xf32> to vector<16x32xf32>
    %c0_77 = arith.constant 0 : index
    %c0_78 = arith.constant 0 : index
    %100 = vector.load %arg23[%c0_77, %c0_78] : memref<17x32xf32, #tpu.memory_space<vmem>>, vector<16x32xf32>
    tpu.vector_store %arg23[%c0_77, %c0_78], %99 {strides = array<i32>} : memref<17x32xf32, #tpu.memory_space<vmem>>, vector<16x32xf32>,
    %c1_79 = arith.constant 1 : index
    %c0_80 = arith.constant 0 : index
    %c0_81 = arith.constant 0 : index
    %101 = vector.load %arg14[%c1_79, %c0_80, %c0_81] : memref<4x1x32xf32, #tpu.memory_space<vmem>>, vector<1x1x32xf32>
    %102 = vector.shape_cast %101 : vector<1x1x32xf32> to vector<1x32xf32>
    %c16_82 = arith.constant 16 : index
    %c0_83 = arith.constant 0 : index
    %103 = vector.load %arg23[%c16_82, %c0_83] : memref<17x32xf32, #tpu.memory_space<vmem>>, vector<1x32xf32>
    tpu.vector_store %arg23[%c16_82, %c0_83], %102 {strides = array<i32>} : memref<17x32xf32, #tpu.memory_space<vmem>>, vector<1x32xf32>,
    %104 = vector.extract_strided_slice %93 {offsets = [0, 0], sizes = [12, 32], strides = [1, 1]} : vector<12x96xf32> to vector<12x32xf32>
    %c0_84 = arith.constant 0 : index
    %c0_85 = arith.constant 0 : index
    %105 = vector.load %arg24[%c0_84, %c0_85] : memref<13x32xf32, #tpu.memory_space<vmem>>, vector<12x32xf32>
    tpu.vector_store %arg24[%c0_84, %c0_85], %104 {strides = array<i32>} : memref<13x32xf32, #tpu.memory_space<vmem>>, vector<12x32xf32>,
    %c2_86 = arith.constant 2 : index
    %c0_87 = arith.constant 0 : index
    %c0_88 = arith.constant 0 : index
    %106 = vector.load %arg14[%c2_86, %c0_87, %c0_88] : memref<4x1x32xf32, #tpu.memory_space<vmem>>, vector<1x1x32xf32>
    %107 = vector.shape_cast %106 : vector<1x1x32xf32> to vector<1x32xf32>
    %c12 = arith.constant 12 : index
    %c0_89 = arith.constant 0 : index
    %108 = vector.load %arg24[%c12, %c0_89] : memref<13x32xf32, #tpu.memory_space<vmem>>, vector<1x32xf32>
    tpu.vector_store %arg24[%c12, %c0_89], %107 {strides = array<i32>} : memref<13x32xf32, #tpu.memory_space<vmem>>, vector<1x32xf32>,
    %109 = vector.extract_strided_slice %93 {offsets = [0, 64], sizes = [12, 32], strides = [1, 1]} : vector<12x96xf32> to vector<12x32xf32>
    %c0_90 = arith.constant 0 : index
    %c0_91 = arith.constant 0 : index
    %110 = vector.load %arg25[%c0_90, %c0_91] : memref<13x32xf32, #tpu.memory_space<vmem>>, vector<12x32xf32>
    tpu.vector_store %arg25[%c0_90, %c0_91], %109 {strides = array<i32>} : memref<13x32xf32, #tpu.memory_space<vmem>>, vector<12x32xf32>,
    %c3 = arith.constant 3 : index
    %c0_92 = arith.constant 0 : index
    %c0_93 = arith.constant 0 : index
    %111 = vector.load %arg14[%c3, %c0_92, %c0_93] : memref<4x1x32xf32, #tpu.memory_space<vmem>>, vector<1x1x32xf32>
    %112 = vector.shape_cast %111 : vector<1x1x32xf32> to vector<1x32xf32>
    %c12_94 = arith.constant 12 : index
    %c0_95 = arith.constant 0 : index
    %113 = vector.load %arg25[%c12_94, %c0_95] : memref<13x32xf32, #tpu.memory_space<vmem>>, vector<1x32xf32>
    tpu.vector_store %arg25[%c12_94, %c0_95], %112 {strides = array<i32>} : memref<13x32xf32, #tpu.memory_space<vmem>>, vector<1x32xf32>,
    %114 = vector.extract_strided_slice %67 {offsets = [0, 32], sizes = [16, 32], strides = [1, 1]} : vector<16x96xf32> to vector<16x32xf32>
    %115 = vector.broadcast %52 : vector<1x32xf32> to vector<16x32xf32>
    %116 = arith.mulf %115, %114 : vector<16x32xf32>
    %c0_96 = arith.constant 0 : index
    %c0_97 = arith.constant 0 : index
    %117 = vector.load %arg22[%c0_96, %c0_97] : memref<17x32xf32, #tpu.memory_space<vmem>>, vector<17x32xf32>
    %118 = vector.broadcast %52 : vector<1x32xf32> to vector<17x32xf32>
    %119 = arith.mulf %118, %117 : vector<17x32xf32>
    %c0_98 = arith.constant 0 : index
    %c0_99 = arith.constant 0 : index
    %120 = vector.load %arg23[%c0_98, %c0_99] : memref<17x32xf32, #tpu.memory_space<vmem>>, vector<17x32xf32>
    %121 = vector.extract_strided_slice %80 {offsets = [0, 32], sizes = [8, 32], strides = [1, 1]} : vector<8x96xf32> to vector<8x32xf32>
    %122 = vector.broadcast %54 : vector<1x32xf32> to vector<8x32xf32>
    %123 = arith.mulf %122, %121 : vector<8x32xf32>
    %124 = vector.extract_strided_slice %80 {offsets = [0, 0], sizes = [8, 32], strides = [1, 1]} : vector<8x96xf32> to vector<8x32xf32>
    %125 = vector.broadcast %54 : vector<1x32xf32> to vector<8x32xf32>
    %126 = arith.mulf %125, %124 : vector<8x32xf32>
    %127 = vector.extract_strided_slice %80 {offsets = [0, 64], sizes = [8, 32], strides = [1, 1]} : vector<8x96xf32> to vector<8x32xf32>
    %128 = vector.extract_strided_slice %93 {offsets = [0, 32], sizes = [12, 32], strides = [1, 1]} : vector<12x96xf32> to vector<12x32xf32>
    %c0_100 = arith.constant 0 : index
    %c0_101 = arith.constant 0 : index
    %129 = vector.load %arg24[%c0_100, %c0_101] : memref<13x32xf32, #tpu.memory_space<vmem>>, vector<13x32xf32>
    %c0_102 = arith.constant 0 : index
    %c0_103 = arith.constant 0 : index
    %130 = vector.load %arg25[%c0_102, %c0_103] : memref<13x32xf32, #tpu.memory_space<vmem>>, vector<13x32xf32>
    %c0_104 = arith.constant 0 : index
    %c0_105 = arith.constant 0 : index
    %c0_106 = arith.constant 0 : index
    %131 = vector.load %arg15[%c0_104, %c0_105, %c0_106] : memref<3x32x32xf32, #tpu.memory_space<vmem>>, vector<1x32x32xf32>
    %132 = vector.shape_cast %131 : vector<1x32x32xf32> to vector<32x32xf32>
    %c1_107 = arith.constant 1 : index
    %c0_108 = arith.constant 0 : index
    %c0_109 = arith.constant 0 : index
    %133 = vector.load %arg15[%c1_107, %c0_108, %c0_109] : memref<3x32x32xf32, #tpu.memory_space<vmem>>, vector<1x32x32xf32>
    %134 = vector.shape_cast %133 : vector<1x32x32xf32> to vector<32x32xf32>
    %c2_110 = arith.constant 2 : index
    %c0_111 = arith.constant 0 : index
    %c0_112 = arith.constant 0 : index
    %135 = vector.load %arg15[%c2_110, %c0_111, %c0_112] : memref<3x32x32xf32, #tpu.memory_space<vmem>>, vector<1x32x32xf32>
    %136 = vector.shape_cast %135 : vector<1x32x32xf32> to vector<32x32xf32>
    %cst_113 = arith.constant dense<0.000000e+00> : vector<16x32xf32>
    %137 = tpu.matmul %1, %132, %cst_113 {dimension_numbers = #tpu.dot_dimension_numbers<[1], [0], [0], [1], [0, 0, 1, 1], [], []>} : vector<16x32xf32>, vector<32x32xf32>, vector<16x32xf32> -> vector<16x32xf32>
    %c0_114 = arith.constant 0 : index
    %c0_115 = arith.constant 0 : index
    %c0_116 = arith.constant 0 : index
    %138 = vector.load %arg16[%c0_114, %c0_115, %c0_116] : memref<3x1x32xf32, #tpu.memory_space<vmem>>, vector<1x1x32xf32>
    %139 = vector.shape_cast %138 : vector<1x1x32xf32> to vector<1x32xf32>
    %140 = vector.broadcast %139 : vector<1x32xf32> to vector<16x32xf32>
    %141 = arith.addf %137, %140 : vector<16x32xf32>
    %142 = vector.extract_strided_slice %116 {offsets = [0, 0], sizes = [16, 8], strides = [1, 1]} : vector<16x32xf32> to vector<16x8xf32>
    %143 = vector.extract_strided_slice %119 {offsets = [0, 0], sizes = [17, 8], strides = [1, 1]} : vector<17x32xf32> to vector<17x8xf32>
    %144 = tpu.transpose %143, [1, 0] : vector<17x8xf32> -> vector<8x17xf32>
    %cst_117 = arith.constant dense<0.000000e+00> : vector<16x17xf32>
    %145 = tpu.matmul %142, %144, %cst_117 {dimension_numbers = #tpu.dot_dimension_numbers<[1], [0], [0], [1], [0, 0, 1, 1], [], []>} : vector<16x8xf32>, vector<8x17xf32>, vector<16x17xf32> -> vector<16x17xf32>
    %cst_118 = arith.constant 0.000000e+00 : f32
    %146 = vector.broadcast %cst_118 : f32 to vector<1x17xf32>
    %147 = arith.cmpf oeq, %7, %146 : vector<1x17xf32>
    %cst_119 = arith.constant -1.000000e+09 : f32
    %148 = vector.shape_cast %147 : vector<1x17xi1> to vector<1x17xi1>
    %149 = vector.broadcast %148 : vector<1x17xi1> to vector<16x17xi1>
    %150 = vector.broadcast %cst_119 : f32 to vector<16x17xf32>
    %151 = arith.select %149, %150, %145 : vector<16x17xi1>, vector<16x17xf32>
    %cst_120 = arith.constant 0.353553385 : f32
    %152 = vector.broadcast %cst_120 : f32 to vector<16x17xf32>
    %153 = arith.mulf %151, %152 : vector<16x17xf32>
    %cst_121 = arith.constant dense<0xFF800000> : vector<16xf32>
    %154 = vector.multi_reduction <maximumf>, %153, %cst_121 [1] : vector<16x17xf32> to vector<16xf32>
    %155 = vector.shape_cast %154 : vector<16xf32> to vector<16x1xf32>
    %156 = vector.broadcast %155 : vector<16x1xf32> to vector<16x17xf32>
    %157 = arith.subf %153, %156 : vector<16x17xf32>
    %158 = math.exp %157 : vector<16x17xf32>
    %cst_122 = arith.constant dense<0.000000e+00> : vector<16xf32>
    %159 = vector.multi_reduction <add>, %158, %cst_122 [1] : vector<16x17xf32> to vector<16xf32>
    %160 = vector.shape_cast %159 : vector<16xf32> to vector<16x1xf32>
    %161 = tpu.reciprocal %160 {approx = true} : vector<16x1xf32> -> vector<16x1xf32>
    %162 = vector.broadcast %161 : vector<16x1xf32> to vector<16x17xf32>
    %163 = arith.mulf %158, %162 : vector<16x17xf32>
    %164 = vector.extract_strided_slice %120 {offsets = [0, 0], sizes = [17, 8], strides = [1, 1]} : vector<17x32xf32> to vector<17x8xf32>
    %cst_123 = arith.constant dense<0.000000e+00> : vector<16x8xf32>
    %165 = tpu.matmul %163, %164, %cst_123 {dimension_numbers = #tpu.dot_dimension_numbers<[1], [0], [0], [1], [0, 0, 1, 1], [], []>} : vector<16x17xf32>, vector<17x8xf32>, vector<16x8xf32> -> vector<16x8xf32>
    %166 = vector.extract_strided_slice %132 {offsets = [0, 0], sizes = [8, 32], strides = [1, 1]} : vector<32x32xf32> to vector<8x32xf32>
    %cst_124 = arith.constant dense<0.000000e+00> : vector<16x32xf32>
    %167 = tpu.matmul %165, %166, %cst_124 {dimension_numbers = #tpu.dot_dimension_numbers<[1], [0], [0], [1], [0, 0, 1, 1], [], []>} : vector<16x8xf32>, vector<8x32xf32>, vector<16x32xf32> -> vector<16x32xf32>
    %168 = arith.addf %141, %167 : vector<16x32xf32>
    %169 = vector.extract_strided_slice %116 {offsets = [0, 8], sizes = [16, 8], strides = [1, 1]} : vector<16x32xf32> to vector<16x8xf32>
    %170 = vector.extract_strided_slice %119 {offsets = [0, 8], sizes = [17, 8], strides = [1, 1]} : vector<17x32xf32> to vector<17x8xf32>
    %171 = tpu.transpose %170, [1, 0] : vector<17x8xf32> -> vector<8x17xf32>
    %cst_125 = arith.constant dense<0.000000e+00> : vector<16x17xf32>
    %172 = tpu.matmul %169, %171, %cst_125 {dimension_numbers = #tpu.dot_dimension_numbers<[1], [0], [0], [1], [0, 0, 1, 1], [], []>} : vector<16x8xf32>, vector<8x17xf32>, vector<16x17xf32> -> vector<16x17xf32>
    %cst_126 = arith.constant 0.000000e+00 : f32
    %173 = vector.broadcast %cst_126 : f32 to vector<1x17xf32>
    %174 = arith.cmpf oeq, %7, %173 : vector<1x17xf32>
    %cst_127 = arith.constant -1.000000e+09 : f32
    %175 = vector.shape_cast %174 : vector<1x17xi1> to vector<1x17xi1>
    %176 = vector.broadcast %175 : vector<1x17xi1> to vector<16x17xi1>
    %177 = vector.broadcast %cst_127 : f32 to vector<16x17xf32>
    %178 = arith.select %176, %177, %172 : vector<16x17xi1>, vector<16x17xf32>
    %cst_128 = arith.constant 0.353553385 : f32
    %179 = vector.broadcast %cst_128 : f32 to vector<16x17xf32>
    %180 = arith.mulf %178, %179 : vector<16x17xf32>
    %cst_129 = arith.constant dense<0xFF800000> : vector<16xf32>
    %181 = vector.multi_reduction <maximumf>, %180, %cst_129 [1] : vector<16x17xf32> to vector<16xf32>
    %182 = vector.shape_cast %181 : vector<16xf32> to vector<16x1xf32>
    %183 = vector.broadcast %182 : vector<16x1xf32> to vector<16x17xf32>
    %184 = arith.subf %180, %183 : vector<16x17xf32>
    %185 = math.exp %184 : vector<16x17xf32>
    %cst_130 = arith.constant dense<0.000000e+00> : vector<16xf32>
    %186 = vector.multi_reduction <add>, %185, %cst_130 [1] : vector<16x17xf32> to vector<16xf32>
    %187 = vector.shape_cast %186 : vector<16xf32> to vector<16x1xf32>
    %188 = tpu.reciprocal %187 {approx = true} : vector<16x1xf32> -> vector<16x1xf32>
    %189 = vector.broadcast %188 : vector<16x1xf32> to vector<16x17xf32>
    %190 = arith.mulf %185, %189 : vector<16x17xf32>
    %191 = vector.extract_strided_slice %120 {offsets = [0, 8], sizes = [17, 8], strides = [1, 1]} : vector<17x32xf32> to vector<17x8xf32>
    %cst_131 = arith.constant dense<0.000000e+00> : vector<16x8xf32>
    %192 = tpu.matmul %190, %191, %cst_131 {dimension_numbers = #tpu.dot_dimension_numbers<[1], [0], [0], [1], [0, 0, 1, 1], [], []>} : vector<16x17xf32>, vector<17x8xf32>, vector<16x8xf32> -> vector<16x8xf32>
    %193 = vector.extract_strided_slice %132 {offsets = [8, 0], sizes = [8, 32], strides = [1, 1]} : vector<32x32xf32> to vector<8x32xf32>
    %cst_132 = arith.constant dense<0.000000e+00> : vector<16x32xf32>
    %194 = tpu.matmul %192, %193, %cst_132 {dimension_numbers = #tpu.dot_dimension_numbers<[1], [0], [0], [1], [0, 0, 1, 1], [], []>} : vector<16x8xf32>, vector<8x32xf32>, vector<16x32xf32> -> vector<16x32xf32>
    %195 = arith.addf %168, %194 : vector<16x32xf32>
    %196 = vector.extract_strided_slice %116 {offsets = [0, 16], sizes = [16, 8], strides = [1, 1]} : vector<16x32xf32> to vector<16x8xf32>
    %197 = vector.extract_strided_slice %119 {offsets = [0, 16], sizes = [17, 8], strides = [1, 1]} : vector<17x32xf32> to vector<17x8xf32>
    %198 = tpu.transpose %197, [1, 0] : vector<17x8xf32> -> vector<8x17xf32>
    %cst_133 = arith.constant dense<0.000000e+00> : vector<16x17xf32>
    %199 = tpu.matmul %196, %198, %cst_133 {dimension_numbers = #tpu.dot_dimension_numbers<[1], [0], [0], [1], [0, 0, 1, 1], [], []>} : vector<16x8xf32>, vector<8x17xf32>, vector<16x17xf32> -> vector<16x17xf32>
    %cst_134 = arith.constant 0.000000e+00 : f32
    %200 = vector.broadcast %cst_134 : f32 to vector<1x17xf32>
    %201 = arith.cmpf oeq, %7, %200 : vector<1x17xf32>
    %cst_135 = arith.constant -1.000000e+09 : f32
    %202 = vector.shape_cast %201 : vector<1x17xi1> to vector<1x17xi1>
    %203 = vector.broadcast %202 : vector<1x17xi1> to vector<16x17xi1>
    %204 = vector.broadcast %cst_135 : f32 to vector<16x17xf32>
    %205 = arith.select %203, %204, %199 : vector<16x17xi1>, vector<16x17xf32>
    %cst_136 = arith.constant 0.353553385 : f32
    %206 = vector.broadcast %cst_136 : f32 to vector<16x17xf32>
    %207 = arith.mulf %205, %206 : vector<16x17xf32>
    %cst_137 = arith.constant dense<0xFF800000> : vector<16xf32>
    %208 = vector.multi_reduction <maximumf>, %207, %cst_137 [1] : vector<16x17xf32> to vector<16xf32>
    %209 = vector.shape_cast %208 : vector<16xf32> to vector<16x1xf32>
    %210 = vector.broadcast %209 : vector<16x1xf32> to vector<16x17xf32>
    %211 = arith.subf %207, %210 : vector<16x17xf32>
    %212 = math.exp %211 : vector<16x17xf32>
    %cst_138 = arith.constant dense<0.000000e+00> : vector<16xf32>
    %213 = vector.multi_reduction <add>, %212, %cst_138 [1] : vector<16x17xf32> to vector<16xf32>
    %214 = vector.shape_cast %213 : vector<16xf32> to vector<16x1xf32>
    %215 = tpu.reciprocal %214 {approx = true} : vector<16x1xf32> -> vector<16x1xf32>
    %216 = vector.broadcast %215 : vector<16x1xf32> to vector<16x17xf32>
    %217 = arith.mulf %212, %216 : vector<16x17xf32>
    %218 = vector.extract_strided_slice %120 {offsets = [0, 16], sizes = [17, 8], strides = [1, 1]} : vector<17x32xf32> to vector<17x8xf32>
    %cst_139 = arith.constant dense<0.000000e+00> : vector<16x8xf32>
    %219 = tpu.matmul %217, %218, %cst_139 {dimension_numbers = #tpu.dot_dimension_numbers<[1], [0], [0], [1], [0, 0, 1, 1], [], []>} : vector<16x17xf32>, vector<17x8xf32>, vector<16x8xf32> -> vector<16x8xf32>
    %220 = vector.extract_strided_slice %132 {offsets = [16, 0], sizes = [8, 32], strides = [1, 1]} : vector<32x32xf32> to vector<8x32xf32>
    %cst_140 = arith.constant dense<0.000000e+00> : vector<16x32xf32>
    %221 = tpu.matmul %219, %220, %cst_140 {dimension_numbers = #tpu.dot_dimension_numbers<[1], [0], [0], [1], [0, 0, 1, 1], [], []>} : vector<16x8xf32>, vector<8x32xf32>, vector<16x32xf32> -> vector<16x32xf32>
    %222 = arith.addf %195, %221 : vector<16x32xf32>
    %223 = vector.extract_strided_slice %116 {offsets = [0, 24], sizes = [16, 8], strides = [1, 1]} : vector<16x32xf32> to vector<16x8xf32>
    %224 = vector.extract_strided_slice %119 {offsets = [0, 24], sizes = [17, 8], strides = [1, 1]} : vector<17x32xf32> to vector<17x8xf32>
    %225 = tpu.transpose %224, [1, 0] : vector<17x8xf32> -> vector<8x17xf32>
    %cst_141 = arith.constant dense<0.000000e+00> : vector<16x17xf32>
    %226 = tpu.matmul %223, %225, %cst_141 {dimension_numbers = #tpu.dot_dimension_numbers<[1], [0], [0], [1], [0, 0, 1, 1], [], []>} : vector<16x8xf32>, vector<8x17xf32>, vector<16x17xf32> -> vector<16x17xf32>
    %cst_142 = arith.constant 0.000000e+00 : f32
    %227 = vector.broadcast %cst_142 : f32 to vector<1x17xf32>
    %228 = arith.cmpf oeq, %7, %227 : vector<1x17xf32>
    %cst_143 = arith.constant -1.000000e+09 : f32
    %229 = vector.shape_cast %228 : vector<1x17xi1> to vector<1x17xi1>
    %230 = vector.broadcast %229 : vector<1x17xi1> to vector<16x17xi1>
    %231 = vector.broadcast %cst_143 : f32 to vector<16x17xf32>
    %232 = arith.select %230, %231, %226 : vector<16x17xi1>, vector<16x17xf32>
    %cst_144 = arith.constant 0.353553385 : f32
    %233 = vector.broadcast %cst_144 : f32 to vector<16x17xf32>
    %234 = arith.mulf %232, %233 : vector<16x17xf32>
    %cst_145 = arith.constant dense<0xFF800000> : vector<16xf32>
    %235 = vector.multi_reduction <maximumf>, %234, %cst_145 [1] : vector<16x17xf32> to vector<16xf32>
    %236 = vector.shape_cast %235 : vector<16xf32> to vector<16x1xf32>
    %237 = vector.broadcast %236 : vector<16x1xf32> to vector<16x17xf32>
    %238 = arith.subf %234, %237 : vector<16x17xf32>
    %239 = math.exp %238 : vector<16x17xf32>
    %cst_146 = arith.constant dense<0.000000e+00> : vector<16xf32>
    %240 = vector.multi_reduction <add>, %239, %cst_146 [1] : vector<16x17xf32> to vector<16xf32>
    %241 = vector.shape_cast %240 : vector<16xf32> to vector<16x1xf32>
    %242 = tpu.reciprocal %241 {approx = true} : vector<16x1xf32> -> vector<16x1xf32>
    %243 = vector.broadcast %242 : vector<16x1xf32> to vector<16x17xf32>
    %244 = arith.mulf %239, %243 : vector<16x17xf32>
    %245 = vector.extract_strided_slice %120 {offsets = [0, 24], sizes = [17, 8], strides = [1, 1]} : vector<17x32xf32> to vector<17x8xf32>
    %cst_147 = arith.constant dense<0.000000e+00> : vector<16x8xf32>
    %246 = tpu.matmul %244, %245, %cst_147 {dimension_numbers = #tpu.dot_dimension_numbers<[1], [0], [0], [1], [0, 0, 1, 1], [], []>} : vector<16x17xf32>, vector<17x8xf32>, vector<16x8xf32> -> vector<16x8xf32>
    %247 = vector.extract_strided_slice %132 {offsets = [24, 0], sizes = [8, 32], strides = [1, 1]} : vector<32x32xf32> to vector<8x32xf32>
    %cst_148 = arith.constant dense<0.000000e+00> : vector<16x32xf32>
    %248 = tpu.matmul %246, %247, %cst_148 {dimension_numbers = #tpu.dot_dimension_numbers<[1], [0], [0], [1], [0, 0, 1, 1], [], []>} : vector<16x8xf32>, vector<8x32xf32>, vector<16x32xf32> -> vector<16x32xf32>
    %249 = arith.addf %222, %248 : vector<16x32xf32>
    %cst_149 = arith.constant dense<0.000000e+00> : vector<8x32xf32>
    %250 = tpu.matmul %3, %134, %cst_149 {dimension_numbers = #tpu.dot_dimension_numbers<[1], [0], [0], [1], [0, 0, 1, 1], [], []>} : vector<8x32xf32>, vector<32x32xf32>, vector<8x32xf32> -> vector<8x32xf32>
    %c1_150 = arith.constant 1 : index
    %c0_151 = arith.constant 0 : index
    %c0_152 = arith.constant 0 : index
    %251 = vector.load %arg16[%c1_150, %c0_151, %c0_152] : memref<3x1x32xf32, #tpu.memory_space<vmem>>, vector<1x1x32xf32>
    %252 = vector.shape_cast %251 : vector<1x1x32xf32> to vector<1x32xf32>
    %253 = vector.broadcast %252 : vector<1x32xf32> to vector<8x32xf32>
    %254 = arith.addf %250, %253 : vector<8x32xf32>
    %255 = vector.extract_strided_slice %123 {offsets = [0, 0], sizes = [8, 8], strides = [1, 1]} : vector<8x32xf32> to vector<8x8xf32>
    %256 = vector.extract_strided_slice %126 {offsets = [0, 0], sizes = [8, 8], strides = [1, 1]} : vector<8x32xf32> to vector<8x8xf32>
    %257 = tpu.transpose %256, [1, 0] : vector<8x8xf32> -> vector<8x8xf32>
    %cst_153 = arith.constant dense<0.000000e+00> : vector<8x8xf32>
    %258 = tpu.matmul %255, %257, %cst_153 {dimension_numbers = #tpu.dot_dimension_numbers<[1], [0], [0], [1], [0, 0, 1, 1], [], []>} : vector<8x8xf32>, vector<8x8xf32>, vector<8x8xf32> -> vector<8x8xf32>
    %cst_154 = arith.constant 0.000000e+00 : f32
    %259 = vector.broadcast %cst_154 : f32 to vector<1x8xf32>
    %260 = arith.cmpf oeq, %9, %259 : vector<1x8xf32>
    %cst_155 = arith.constant -1.000000e+09 : f32
    %261 = vector.shape_cast %260 : vector<1x8xi1> to vector<1x8xi1>
    %262 = vector.broadcast %261 : vector<1x8xi1> to vector<8x8xi1>
    %263 = vector.broadcast %cst_155 : f32 to vector<8x8xf32>
    %264 = arith.select %262, %263, %258 : vector<8x8xi1>, vector<8x8xf32>
    %cst_156 = arith.constant 0.353553385 : f32
    %265 = vector.broadcast %cst_156 : f32 to vector<8x8xf32>
    %266 = arith.mulf %264, %265 : vector<8x8xf32>
    %cst_157 = arith.constant dense<0xFF800000> : vector<8xf32>
    %267 = vector.multi_reduction <maximumf>, %266, %cst_157 [1] : vector<8x8xf32> to vector<8xf32>
    %268 = vector.shape_cast %267 : vector<8xf32> to vector<8x1xf32>
    %269 = vector.broadcast %268 : vector<8x1xf32> to vector<8x8xf32>
    %270 = arith.subf %266, %269 : vector<8x8xf32>
    %271 = math.exp %270 : vector<8x8xf32>
    %cst_158 = arith.constant dense<0.000000e+00> : vector<8xf32>
    %272 = vector.multi_reduction <add>, %271, %cst_158 [1] : vector<8x8xf32> to vector<8xf32>
    %273 = vector.shape_cast %272 : vector<8xf32> to vector<8x1xf32>
    %274 = tpu.reciprocal %273 {approx = true} : vector<8x1xf32> -> vector<8x1xf32>
    %275 = vector.broadcast %274 : vector<8x1xf32> to vector<8x8xf32>
    %276 = arith.mulf %271, %275 : vector<8x8xf32>
    %277 = vector.extract_strided_slice %127 {offsets = [0, 0], sizes = [8, 8], strides = [1, 1]} : vector<8x32xf32> to vector<8x8xf32>
    %cst_159 = arith.constant dense<0.000000e+00> : vector<8x8xf32>
    %278 = tpu.matmul %276, %277, %cst_159 {dimension_numbers = #tpu.dot_dimension_numbers<[1], [0], [0], [1], [0, 0, 1, 1], [], []>} : vector<8x8xf32>, vector<8x8xf32>, vector<8x8xf32> -> vector<8x8xf32>
    %279 = vector.extract_strided_slice %134 {offsets = [0, 0], sizes = [8, 32], strides = [1, 1]} : vector<32x32xf32> to vector<8x32xf32>
    %cst_160 = arith.constant dense<0.000000e+00> : vector<8x32xf32>
    %280 = tpu.matmul %278, %279, %cst_160 {dimension_numbers = #tpu.dot_dimension_numbers<[1], [0], [0], [1], [0, 0, 1, 1], [], []>} : vector<8x8xf32>, vector<8x32xf32>, vector<8x32xf32> -> vector<8x32xf32>
    %281 = arith.addf %254, %280 : vector<8x32xf32>
    %282 = vector.extract_strided_slice %123 {offsets = [0, 8], sizes = [8, 8], strides = [1, 1]} : vector<8x32xf32> to vector<8x8xf32>
    %283 = vector.extract_strided_slice %126 {offsets = [0, 8], sizes = [8, 8], strides = [1, 1]} : vector<8x32xf32> to vector<8x8xf32>
    %284 = tpu.transpose %283, [1, 0] : vector<8x8xf32> -> vector<8x8xf32>
    %cst_161 = arith.constant dense<0.000000e+00> : vector<8x8xf32>
    %285 = tpu.matmul %282, %284, %cst_161 {dimension_numbers = #tpu.dot_dimension_numbers<[1], [0], [0], [1], [0, 0, 1, 1], [], []>} : vector<8x8xf32>, vector<8x8xf32>, vector<8x8xf32> -> vector<8x8xf32>
    %cst_162 = arith.constant 0.000000e+00 : f32
    %286 = vector.broadcast %cst_162 : f32 to vector<1x8xf32>
    %287 = arith.cmpf oeq, %9, %286 : vector<1x8xf32>
    %cst_163 = arith.constant -1.000000e+09 : f32
    %288 = vector.shape_cast %287 : vector<1x8xi1> to vector<1x8xi1>
    %289 = vector.broadcast %288 : vector<1x8xi1> to vector<8x8xi1>
    %290 = vector.broadcast %cst_163 : f32 to vector<8x8xf32>
    %291 = arith.select %289, %290, %285 : vector<8x8xi1>, vector<8x8xf32>
    %cst_164 = arith.constant 0.353553385 : f32
    %292 = vector.broadcast %cst_164 : f32 to vector<8x8xf32>
    %293 = arith.mulf %291, %292 : vector<8x8xf32>
    %cst_165 = arith.constant dense<0xFF800000> : vector<8xf32>
    %294 = vector.multi_reduction <maximumf>, %293, %cst_165 [1] : vector<8x8xf32> to vector<8xf32>
    %295 = vector.shape_cast %294 : vector<8xf32> to vector<8x1xf32>
    %296 = vector.broadcast %295 : vector<8x1xf32> to vector<8x8xf32>
    %297 = arith.subf %293, %296 : vector<8x8xf32>
    %298 = math.exp %297 : vector<8x8xf32>
    %cst_166 = arith.constant dense<0.000000e+00> : vector<8xf32>
    %299 = vector.multi_reduction <add>, %298, %cst_166 [1] : vector<8x8xf32> to vector<8xf32>
    %300 = vector.shape_cast %299 : vector<8xf32> to vector<8x1xf32>
    %301 = tpu.reciprocal %300 {approx = true} : vector<8x1xf32> -> vector<8x1xf32>
    %302 = vector.broadcast %301 : vector<8x1xf32> to vector<8x8xf32>
    %303 = arith.mulf %298, %302 : vector<8x8xf32>
    %304 = vector.extract_strided_slice %127 {offsets = [0, 8], sizes = [8, 8], strides = [1, 1]} : vector<8x32xf32> to vector<8x8xf32>
    %cst_167 = arith.constant dense<0.000000e+00> : vector<8x8xf32>
    %305 = tpu.matmul %303, %304, %cst_167 {dimension_numbers = #tpu.dot_dimension_numbers<[1], [0], [0], [1], [0, 0, 1, 1], [], []>} : vector<8x8xf32>, vector<8x8xf32>, vector<8x8xf32> -> vector<8x8xf32>
    %306 = vector.extract_strided_slice %134 {offsets = [8, 0], sizes = [8, 32], strides = [1, 1]} : vector<32x32xf32> to vector<8x32xf32>
    %cst_168 = arith.constant dense<0.000000e+00> : vector<8x32xf32>
    %307 = tpu.matmul %305, %306, %cst_168 {dimension_numbers = #tpu.dot_dimension_numbers<[1], [0], [0], [1], [0, 0, 1, 1], [], []>} : vector<8x8xf32>, vector<8x32xf32>, vector<8x32xf32> -> vector<8x32xf32>
    %308 = arith.addf %281, %307 : vector<8x32xf32>
    %309 = vector.extract_strided_slice %123 {offsets = [0, 16], sizes = [8, 8], strides = [1, 1]} : vector<8x32xf32> to vector<8x8xf32>
    %310 = vector.extract_strided_slice %126 {offsets = [0, 16], sizes = [8, 8], strides = [1, 1]} : vector<8x32xf32> to vector<8x8xf32>
    %311 = tpu.transpose %310, [1, 0] : vector<8x8xf32> -> vector<8x8xf32>
    %cst_169 = arith.constant dense<0.000000e+00> : vector<8x8xf32>
    %312 = tpu.matmul %309, %311, %cst_169 {dimension_numbers = #tpu.dot_dimension_numbers<[1], [0], [0], [1], [0, 0, 1, 1], [], []>} : vector<8x8xf32>, vector<8x8xf32>, vector<8x8xf32> -> vector<8x8xf32>
    %cst_170 = arith.constant 0.000000e+00 : f32
    %313 = vector.broadcast %cst_170 : f32 to vector<1x8xf32>
    %314 = arith.cmpf oeq, %9, %313 : vector<1x8xf32>
    %cst_171 = arith.constant -1.000000e+09 : f32
    %315 = vector.shape_cast %314 : vector<1x8xi1> to vector<1x8xi1>
    %316 = vector.broadcast %315 : vector<1x8xi1> to vector<8x8xi1>
    %317 = vector.broadcast %cst_171 : f32 to vector<8x8xf32>
    %318 = arith.select %316, %317, %312 : vector<8x8xi1>, vector<8x8xf32>
    %cst_172 = arith.constant 0.353553385 : f32
    %319 = vector.broadcast %cst_172 : f32 to vector<8x8xf32>
    %320 = arith.mulf %318, %319 : vector<8x8xf32>
    %cst_173 = arith.constant dense<0xFF800000> : vector<8xf32>
    %321 = vector.multi_reduction <maximumf>, %320, %cst_173 [1] : vector<8x8xf32> to vector<8xf32>
    %322 = vector.shape_cast %321 : vector<8xf32> to vector<8x1xf32>
    %323 = vector.broadcast %322 : vector<8x1xf32> to vector<8x8xf32>
    %324 = arith.subf %320, %323 : vector<8x8xf32>
    %325 = math.exp %324 : vector<8x8xf32>
    %cst_174 = arith.constant dense<0.000000e+00> : vector<8xf32>
    %326 = vector.multi_reduction <add>, %325, %cst_174 [1] : vector<8x8xf32> to vector<8xf32>
    %327 = vector.shape_cast %326 : vector<8xf32> to vector<8x1xf32>
    %328 = tpu.reciprocal %327 {approx = true} : vector<8x1xf32> -> vector<8x1xf32>
    %329 = vector.broadcast %328 : vector<8x1xf32> to vector<8x8xf32>
    %330 = arith.mulf %325, %329 : vector<8x8xf32>
    %331 = vector.extract_strided_slice %127 {offsets = [0, 16], sizes = [8, 8], strides = [1, 1]} : vector<8x32xf32> to vector<8x8xf32>
    %cst_175 = arith.constant dense<0.000000e+00> : vector<8x8xf32>
    %332 = tpu.matmul %330, %331, %cst_175 {dimension_numbers = #tpu.dot_dimension_numbers<[1], [0], [0], [1], [0, 0, 1, 1], [], []>} : vector<8x8xf32>, vector<8x8xf32>, vector<8x8xf32> -> vector<8x8xf32>
    %333 = vector.extract_strided_slice %134 {offsets = [16, 0], sizes = [8, 32], strides = [1, 1]} : vector<32x32xf32> to vector<8x32xf32>
    %cst_176 = arith.constant dense<0.000000e+00> : vector<8x32xf32>
    %334 = tpu.matmul %332, %333, %cst_176 {dimension_numbers = #tpu.dot_dimension_numbers<[1], [0], [0], [1], [0, 0, 1, 1], [], []>} : vector<8x8xf32>, vector<8x32xf32>, vector<8x32xf32> -> vector<8x32xf32>
    %335 = arith.addf %308, %334 : vector<8x32xf32>
    %336 = vector.extract_strided_slice %123 {offsets = [0, 24], sizes = [8, 8], strides = [1, 1]} : vector<8x32xf32> to vector<8x8xf32>
    %337 = vector.extract_strided_slice %126 {offsets = [0, 24], sizes = [8, 8], strides = [1, 1]} : vector<8x32xf32> to vector<8x8xf32>
    %338 = tpu.transpose %337, [1, 0] : vector<8x8xf32> -> vector<8x8xf32>
    %cst_177 = arith.constant dense<0.000000e+00> : vector<8x8xf32>
    %339 = tpu.matmul %336, %338, %cst_177 {dimension_numbers = #tpu.dot_dimension_numbers<[1], [0], [0], [1], [0, 0, 1, 1], [], []>} : vector<8x8xf32>, vector<8x8xf32>, vector<8x8xf32> -> vector<8x8xf32>
    %cst_178 = arith.constant 0.000000e+00 : f32
    %340 = vector.broadcast %cst_178 : f32 to vector<1x8xf32>
    %341 = arith.cmpf oeq, %9, %340 : vector<1x8xf32>
    %cst_179 = arith.constant -1.000000e+09 : f32
    %342 = vector.shape_cast %341 : vector<1x8xi1> to vector<1x8xi1>
    %343 = vector.broadcast %342 : vector<1x8xi1> to vector<8x8xi1>
    %344 = vector.broadcast %cst_179 : f32 to vector<8x8xf32>
    %345 = arith.select %343, %344, %339 : vector<8x8xi1>, vector<8x8xf32>
    %cst_180 = arith.constant 0.353553385 : f32
    %346 = vector.broadcast %cst_180 : f32 to vector<8x8xf32>
    %347 = arith.mulf %345, %346 : vector<8x8xf32>
    %cst_181 = arith.constant dense<0xFF800000> : vector<8xf32>
    %348 = vector.multi_reduction <maximumf>, %347, %cst_181 [1] : vector<8x8xf32> to vector<8xf32>
    %349 = vector.shape_cast %348 : vector<8xf32> to vector<8x1xf32>
    %350 = vector.broadcast %349 : vector<8x1xf32> to vector<8x8xf32>
    %351 = arith.subf %347, %350 : vector<8x8xf32>
    %352 = math.exp %351 : vector<8x8xf32>
    %cst_182 = arith.constant dense<0.000000e+00> : vector<8xf32>
    %353 = vector.multi_reduction <add>, %352, %cst_182 [1] : vector<8x8xf32> to vector<8xf32>
    %354 = vector.shape_cast %353 : vector<8xf32> to vector<8x1xf32>
    %355 = tpu.reciprocal %354 {approx = true} : vector<8x1xf32> -> vector<8x1xf32>
    %356 = vector.broadcast %355 : vector<8x1xf32> to vector<8x8xf32>
    %357 = arith.mulf %352, %356 : vector<8x8xf32>
    %358 = vector.extract_strided_slice %127 {offsets = [0, 24], sizes = [8, 8], strides = [1, 1]} : vector<8x32xf32> to vector<8x8xf32>
    %cst_183 = arith.constant dense<0.000000e+00> : vector<8x8xf32>
    %359 = tpu.matmul %357, %358, %cst_183 {dimension_numbers = #tpu.dot_dimension_numbers<[1], [0], [0], [1], [0, 0, 1, 1], [], []>} : vector<8x8xf32>, vector<8x8xf32>, vector<8x8xf32> -> vector<8x8xf32>
    %360 = vector.extract_strided_slice %134 {offsets = [24, 0], sizes = [8, 32], strides = [1, 1]} : vector<32x32xf32> to vector<8x32xf32>
    %cst_184 = arith.constant dense<0.000000e+00> : vector<8x32xf32>
    %361 = tpu.matmul %359, %360, %cst_184 {dimension_numbers = #tpu.dot_dimension_numbers<[1], [0], [0], [1], [0, 0, 1, 1], [], []>} : vector<8x8xf32>, vector<8x32xf32>, vector<8x32xf32> -> vector<8x32xf32>
    %362 = arith.addf %335, %361 : vector<8x32xf32>
    %cst_185 = arith.constant dense<0.000000e+00> : vector<12x32xf32>
    %363 = tpu.matmul %5, %136, %cst_185 {dimension_numbers = #tpu.dot_dimension_numbers<[1], [0], [0], [1], [0, 0, 1, 1], [], []>} : vector<12x32xf32>, vector<32x32xf32>, vector<12x32xf32> -> vector<12x32xf32>
    %c2_186 = arith.constant 2 : index
    %c0_187 = arith.constant 0 : index
    %c0_188 = arith.constant 0 : index
    %364 = vector.load %arg16[%c2_186, %c0_187, %c0_188] : memref<3x1x32xf32, #tpu.memory_space<vmem>>, vector<1x1x32xf32>
    %365 = vector.shape_cast %364 : vector<1x1x32xf32> to vector<1x32xf32>
    %366 = vector.broadcast %365 : vector<1x32xf32> to vector<12x32xf32>
    %367 = arith.addf %363, %366 : vector<12x32xf32>
    %368 = vector.extract_strided_slice %128 {offsets = [0, 0], sizes = [12, 8], strides = [1, 1]} : vector<12x32xf32> to vector<12x8xf32>
    %369 = vector.extract_strided_slice %129 {offsets = [0, 0], sizes = [13, 8], strides = [1, 1]} : vector<13x32xf32> to vector<13x8xf32>
    %370 = tpu.transpose %369, [1, 0] : vector<13x8xf32> -> vector<8x13xf32>
    %cst_189 = arith.constant dense<0.000000e+00> : vector<12x13xf32>
    %371 = tpu.matmul %368, %370, %cst_189 {dimension_numbers = #tpu.dot_dimension_numbers<[1], [0], [0], [1], [0, 0, 1, 1], [], []>} : vector<12x8xf32>, vector<8x13xf32>, vector<12x13xf32> -> vector<12x13xf32>
    %cst_190 = arith.constant 0.000000e+00 : f32
    %372 = vector.broadcast %cst_190 : f32 to vector<1x13xf32>
    %373 = arith.cmpf oeq, %11, %372 : vector<1x13xf32>
    %cst_191 = arith.constant -1.000000e+09 : f32
    %374 = vector.shape_cast %373 : vector<1x13xi1> to vector<1x13xi1>
    %375 = vector.broadcast %374 : vector<1x13xi1> to vector<12x13xi1>
    %376 = vector.broadcast %cst_191 : f32 to vector<12x13xf32>
    %377 = arith.select %375, %376, %371 : vector<12x13xi1>, vector<12x13xf32>
    %cst_192 = arith.constant 0.353553385 : f32
    %378 = vector.broadcast %cst_192 : f32 to vector<12x13xf32>
    %379 = arith.mulf %377, %378 : vector<12x13xf32>
    %cst_193 = arith.constant dense<0xFF800000> : vector<12xf32>
    %380 = vector.multi_reduction <maximumf>, %379, %cst_193 [1] : vector<12x13xf32> to vector<12xf32>
    %381 = vector.shape_cast %380 : vector<12xf32> to vector<12x1xf32>
    %382 = vector.broadcast %381 : vector<12x1xf32> to vector<12x13xf32>
    %383 = arith.subf %379, %382 : vector<12x13xf32>
    %384 = math.exp %383 : vector<12x13xf32>
    %cst_194 = arith.constant dense<0.000000e+00> : vector<12xf32>
    %385 = vector.multi_reduction <add>, %384, %cst_194 [1] : vector<12x13xf32> to vector<12xf32>
    %386 = vector.shape_cast %385 : vector<12xf32> to vector<12x1xf32>
    %387 = tpu.reciprocal %386 {approx = true} : vector<12x1xf32> -> vector<12x1xf32>
    %388 = vector.broadcast %387 : vector<12x1xf32> to vector<12x13xf32>
    %389 = arith.mulf %384, %388 : vector<12x13xf32>
    %390 = vector.extract_strided_slice %130 {offsets = [0, 0], sizes = [13, 8], strides = [1, 1]} : vector<13x32xf32> to vector<13x8xf32>
    %cst_195 = arith.constant dense<0.000000e+00> : vector<12x8xf32>
    %391 = tpu.matmul %389, %390, %cst_195 {dimension_numbers = #tpu.dot_dimension_numbers<[1], [0], [0], [1], [0, 0, 1, 1], [], []>} : vector<12x13xf32>, vector<13x8xf32>, vector<12x8xf32> -> vector<12x8xf32>
    %392 = vector.extract_strided_slice %136 {offsets = [0, 0], sizes = [8, 32], strides = [1, 1]} : vector<32x32xf32> to vector<8x32xf32>
    %cst_196 = arith.constant dense<0.000000e+00> : vector<12x32xf32>
    %393 = tpu.matmul %391, %392, %cst_196 {dimension_numbers = #tpu.dot_dimension_numbers<[1], [0], [0], [1], [0, 0, 1, 1], [], []>} : vector<12x8xf32>, vector<8x32xf32>, vector<12x32xf32> -> vector<12x32xf32>
    %394 = arith.addf %367, %393 : vector<12x32xf32>
    %395 = vector.extract_strided_slice %128 {offsets = [0, 8], sizes = [12, 8], strides = [1, 1]} : vector<12x32xf32> to vector<12x8xf32>
    %396 = vector.extract_strided_slice %129 {offsets = [0, 8], sizes = [13, 8], strides = [1, 1]} : vector<13x32xf32> to vector<13x8xf32>
    %397 = tpu.transpose %396, [1, 0] : vector<13x8xf32> -> vector<8x13xf32>
    %cst_197 = arith.constant dense<0.000000e+00> : vector<12x13xf32>
    %398 = tpu.matmul %395, %397, %cst_197 {dimension_numbers = #tpu.dot_dimension_numbers<[1], [0], [0], [1], [0, 0, 1, 1], [], []>} : vector<12x8xf32>, vector<8x13xf32>, vector<12x13xf32> -> vector<12x13xf32>
    %cst_198 = arith.constant 0.000000e+00 : f32
    %399 = vector.broadcast %cst_198 : f32 to vector<1x13xf32>
    %400 = arith.cmpf oeq, %11, %399 : vector<1x13xf32>
    %cst_199 = arith.constant -1.000000e+09 : f32
    %401 = vector.shape_cast %400 : vector<1x13xi1> to vector<1x13xi1>
    %402 = vector.broadcast %401 : vector<1x13xi1> to vector<12x13xi1>
    %403 = vector.broadcast %cst_199 : f32 to vector<12x13xf32>
    %404 = arith.select %402, %403, %398 : vector<12x13xi1>, vector<12x13xf32>
    %cst_200 = arith.constant 0.353553385 : f32
    %405 = vector.broadcast %cst_200 : f32 to vector<12x13xf32>
    %406 = arith.mulf %404, %405 : vector<12x13xf32>
    %cst_201 = arith.constant dense<0xFF800000> : vector<12xf32>
    %407 = vector.multi_reduction <maximumf>, %406, %cst_201 [1] : vector<12x13xf32> to vector<12xf32>
    %408 = vector.shape_cast %407 : vector<12xf32> to vector<12x1xf32>
    %409 = vector.broadcast %408 : vector<12x1xf32> to vector<12x13xf32>
    %410 = arith.subf %406, %409 : vector<12x13xf32>
    %411 = math.exp %410 : vector<12x13xf32>
    %cst_202 = arith.constant dense<0.000000e+00> : vector<12xf32>
    %412 = vector.multi_reduction <add>, %411, %cst_202 [1] : vector<12x13xf32> to vector<12xf32>
    %413 = vector.shape_cast %412 : vector<12xf32> to vector<12x1xf32>
    %414 = tpu.reciprocal %413 {approx = true} : vector<12x1xf32> -> vector<12x1xf32>
    %415 = vector.broadcast %414 : vector<12x1xf32> to vector<12x13xf32>
    %416 = arith.mulf %411, %415 : vector<12x13xf32>
    %417 = vector.extract_strided_slice %130 {offsets = [0, 8], sizes = [13, 8], strides = [1, 1]} : vector<13x32xf32> to vector<13x8xf32>
    %cst_203 = arith.constant dense<0.000000e+00> : vector<12x8xf32>
    %418 = tpu.matmul %416, %417, %cst_203 {dimension_numbers = #tpu.dot_dimension_numbers<[1], [0], [0], [1], [0, 0, 1, 1], [], []>} : vector<12x13xf32>, vector<13x8xf32>, vector<12x8xf32> -> vector<12x8xf32>
    %419 = vector.extract_strided_slice %136 {offsets = [8, 0], sizes = [8, 32], strides = [1, 1]} : vector<32x32xf32> to vector<8x32xf32>
    %cst_204 = arith.constant dense<0.000000e+00> : vector<12x32xf32>
    %420 = tpu.matmul %418, %419, %cst_204 {dimension_numbers = #tpu.dot_dimension_numbers<[1], [0], [0], [1], [0, 0, 1, 1], [], []>} : vector<12x8xf32>, vector<8x32xf32>, vector<12x32xf32> -> vector<12x32xf32>
    %421 = arith.addf %394, %420 : vector<12x32xf32>
    %422 = vector.extract_strided_slice %128 {offsets = [0, 16], sizes = [12, 8], strides = [1, 1]} : vector<12x32xf32> to vector<12x8xf32>
    %423 = vector.extract_strided_slice %129 {offsets = [0, 16], sizes = [13, 8], strides = [1, 1]} : vector<13x32xf32> to vector<13x8xf32>
    %424 = tpu.transpose %423, [1, 0] : vector<13x8xf32> -> vector<8x13xf32>
    %cst_205 = arith.constant dense<0.000000e+00> : vector<12x13xf32>
    %425 = tpu.matmul %422, %424, %cst_205 {dimension_numbers = #tpu.dot_dimension_numbers<[1], [0], [0], [1], [0, 0, 1, 1], [], []>} : vector<12x8xf32>, vector<8x13xf32>, vector<12x13xf32> -> vector<12x13xf32>
    %cst_206 = arith.constant 0.000000e+00 : f32
    %426 = vector.broadcast %cst_206 : f32 to vector<1x13xf32>
    %427 = arith.cmpf oeq, %11, %426 : vector<1x13xf32>
    %cst_207 = arith.constant -1.000000e+09 : f32
    %428 = vector.shape_cast %427 : vector<1x13xi1> to vector<1x13xi1>
    %429 = vector.broadcast %428 : vector<1x13xi1> to vector<12x13xi1>
    %430 = vector.broadcast %cst_207 : f32 to vector<12x13xf32>
    %431 = arith.select %429, %430, %425 : vector<12x13xi1>, vector<12x13xf32>
    %cst_208 = arith.constant 0.353553385 : f32
    %432 = vector.broadcast %cst_208 : f32 to vector<12x13xf32>
    %433 = arith.mulf %431, %432 : vector<12x13xf32>
    %cst_209 = arith.constant dense<0xFF800000> : vector<12xf32>
    %434 = vector.multi_reduction <maximumf>, %433, %cst_209 [1] : vector<12x13xf32> to vector<12xf32>
    %435 = vector.shape_cast %434 : vector<12xf32> to vector<12x1xf32>
    %436 = vector.broadcast %435 : vector<12x1xf32> to vector<12x13xf32>
    %437 = arith.subf %433, %436 : vector<12x13xf32>
    %438 = math.exp %437 : vector<12x13xf32>
    %cst_210 = arith.constant dense<0.000000e+00> : vector<12xf32>
    %439 = vector.multi_reduction <add>, %438, %cst_210 [1] : vector<12x13xf32> to vector<12xf32>
    %440 = vector.shape_cast %439 : vector<12xf32> to vector<12x1xf32>
    %441 = tpu.reciprocal %440 {approx = true} : vector<12x1xf32> -> vector<12x1xf32>
    %442 = vector.broadcast %441 : vector<12x1xf32> to vector<12x13xf32>
    %443 = arith.mulf %438, %442 : vector<12x13xf32>
    %444 = vector.extract_strided_slice %130 {offsets = [0, 16], sizes = [13, 8], strides = [1, 1]} : vector<13x32xf32> to vector<13x8xf32>
    %cst_211 = arith.constant dense<0.000000e+00> : vector<12x8xf32>
    %445 = tpu.matmul %443, %444, %cst_211 {dimension_numbers = #tpu.dot_dimension_numbers<[1], [0], [0], [1], [0, 0, 1, 1], [], []>} : vector<12x13xf32>, vector<13x8xf32>, vector<12x8xf32> -> vector<12x8xf32>
    %446 = vector.extract_strided_slice %136 {offsets = [16, 0], sizes = [8, 32], strides = [1, 1]} : vector<32x32xf32> to vector<8x32xf32>
    %cst_212 = arith.constant dense<0.000000e+00> : vector<12x32xf32>
    %447 = tpu.matmul %445, %446, %cst_212 {dimension_numbers = #tpu.dot_dimension_numbers<[1], [0], [0], [1], [0, 0, 1, 1], [], []>} : vector<12x8xf32>, vector<8x32xf32>, vector<12x32xf32> -> vector<12x32xf32>
    %448 = arith.addf %421, %447 : vector<12x32xf32>
    %449 = vector.extract_strided_slice %128 {offsets = [0, 24], sizes = [12, 8], strides = [1, 1]} : vector<12x32xf32> to vector<12x8xf32>
    %450 = vector.extract_strided_slice %129 {offsets = [0, 24], sizes = [13, 8], strides = [1, 1]} : vector<13x32xf32> to vector<13x8xf32>
    %451 = tpu.transpose %450, [1, 0] : vector<13x8xf32> -> vector<8x13xf32>
    %cst_213 = arith.constant dense<0.000000e+00> : vector<12x13xf32>
    %452 = tpu.matmul %449, %451, %cst_213 {dimension_numbers = #tpu.dot_dimension_numbers<[1], [0], [0], [1], [0, 0, 1, 1], [], []>} : vector<12x8xf32>, vector<8x13xf32>, vector<12x13xf32> -> vector<12x13xf32>
    %cst_214 = arith.constant 0.000000e+00 : f32
    %453 = vector.broadcast %cst_214 : f32 to vector<1x13xf32>
    %454 = arith.cmpf oeq, %11, %453 : vector<1x13xf32>
    %cst_215 = arith.constant -1.000000e+09 : f32
    %455 = vector.shape_cast %454 : vector<1x13xi1> to vector<1x13xi1>
    %456 = vector.broadcast %455 : vector<1x13xi1> to vector<12x13xi1>
    %457 = vector.broadcast %cst_215 : f32 to vector<12x13xf32>
    %458 = arith.select %456, %457, %452 : vector<12x13xi1>, vector<12x13xf32>
    %cst_216 = arith.constant 0.353553385 : f32
    %459 = vector.broadcast %cst_216 : f32 to vector<12x13xf32>
    %460 = arith.mulf %458, %459 : vector<12x13xf32>
    %cst_217 = arith.constant dense<0xFF800000> : vector<12xf32>
    %461 = vector.multi_reduction <maximumf>, %460, %cst_217 [1] : vector<12x13xf32> to vector<12xf32>
    %462 = vector.shape_cast %461 : vector<12xf32> to vector<12x1xf32>
    %463 = vector.broadcast %462 : vector<12x1xf32> to vector<12x13xf32>
    %464 = arith.subf %460, %463 : vector<12x13xf32>
    %465 = math.exp %464 : vector<12x13xf32>
    %cst_218 = arith.constant dense<0.000000e+00> : vector<12xf32>
    %466 = vector.multi_reduction <add>, %465, %cst_218 [1] : vector<12x13xf32> to vector<12xf32>
    %467 = vector.shape_cast %466 : vector<12xf32> to vector<12x1xf32>
    %468 = tpu.reciprocal %467 {approx = true} : vector<12x1xf32> -> vector<12x1xf32>
    %469 = vector.broadcast %468 : vector<12x1xf32> to vector<12x13xf32>
    %470 = arith.mulf %465, %469 : vector<12x13xf32>
    %471 = vector.extract_strided_slice %130 {offsets = [0, 24], sizes = [13, 8], strides = [1, 1]} : vector<13x32xf32> to vector<13x8xf32>
    %cst_219 = arith.constant dense<0.000000e+00> : vector<12x8xf32>
    %472 = tpu.matmul %470, %471, %cst_219 {dimension_numbers = #tpu.dot_dimension_numbers<[1], [0], [0], [1], [0, 0, 1, 1], [], []>} : vector<12x13xf32>, vector<13x8xf32>, vector<12x8xf32> -> vector<12x8xf32>
    %473 = vector.extract_strided_slice %136 {offsets = [24, 0], sizes = [8, 32], strides = [1, 1]} : vector<32x32xf32> to vector<8x32xf32>
    %cst_220 = arith.constant dense<0.000000e+00> : vector<12x32xf32>
    %474 = tpu.matmul %472, %473, %cst_220 {dimension_numbers = #tpu.dot_dimension_numbers<[1], [0], [0], [1], [0, 0, 1, 1], [], []>} : vector<12x8xf32>, vector<8x32xf32>, vector<12x32xf32> -> vector<12x32xf32>
    %475 = arith.addf %448, %474 : vector<12x32xf32>
    %476 = arith.addf %1, %249 : vector<16x32xf32>
    %c0_221 = arith.constant 0 : index
    %c0_222 = arith.constant 0 : index
    %c0_223 = arith.constant 0 : index
    %477 = vector.load %arg17[%c0_221, %c0_222, %c0_223] : memref<3x1x32xf32, #tpu.memory_space<vmem>>, vector<1x1x32xf32>
    %478 = vector.shape_cast %477 : vector<1x1x32xf32> to vector<1x32xf32>
    %c0_224 = arith.constant 0 : index
    %c0_225 = arith.constant 0 : index
    %c0_226 = arith.constant 0 : index
    %479 = vector.load %arg18[%c0_224, %c0_225, %c0_226] : memref<3x1x32xf32, #tpu.memory_space<vmem>>, vector<1x1x32xf32>
    %480 = vector.shape_cast %479 : vector<1x1x32xf32> to vector<1x32xf32>
    %cst_227 = arith.constant dense<0.000000e+00> : vector<16xf32>
    %481 = vector.multi_reduction <add>, %476, %cst_227 [1] : vector<16x32xf32> to vector<16xf32>
    %482 = vector.shape_cast %481 : vector<16xf32> to vector<16x1xf32>
    %cst_228 = arith.constant 3.200000e+01 : f32
    %483 = vector.broadcast %cst_228 : f32 to vector<16x1xf32>
    %484 = arith.divf %482, %483 : vector<16x1xf32>
    %485 = vector.broadcast %484 : vector<16x1xf32> to vector<16x32xf32>
    %486 = arith.subf %476, %485 : vector<16x32xf32>
    %487 = arith.mulf %486, %486 : vector<16x32xf32>
    %cst_229 = arith.constant dense<0.000000e+00> : vector<16xf32>
    %488 = vector.multi_reduction <add>, %487, %cst_229 [1] : vector<16x32xf32> to vector<16xf32>
    %489 = vector.shape_cast %488 : vector<16xf32> to vector<16x1xf32>
    %cst_230 = arith.constant 3.200000e+01 : f32
    %490 = vector.broadcast %cst_230 : f32 to vector<16x1xf32>
    %491 = arith.divf %489, %490 : vector<16x1xf32>
    %cst_231 = arith.constant 9.99999974E-6 : f32
    %492 = vector.broadcast %cst_231 : f32 to vector<16x1xf32>
    %493 = arith.addf %491, %492 : vector<16x1xf32>
    %494 = math.rsqrt %493 : vector<16x1xf32>
    %495 = vector.broadcast %494 : vector<16x1xf32> to vector<16x32xf32>
    %496 = arith.mulf %486, %495 : vector<16x32xf32>
    %497 = vector.broadcast %478 : vector<1x32xf32> to vector<16x32xf32>
    %498 = arith.mulf %496, %497 : vector<16x32xf32>
    %499 = vector.broadcast %480 : vector<1x32xf32> to vector<16x32xf32>
    %500 = arith.addf %498, %499 : vector<16x32xf32>
    %c0_232 = arith.constant 0 : index
    %c0_233 = arith.constant 0 : index
    %c0_234 = arith.constant 0 : index
    %501 = vector.load %arg19[%c0_232, %c0_233, %c0_234] : memref<1x16x32xf32, #tpu.memory_space<vmem>>, vector<1x16x32xf32>
    %502 = vector.shape_cast %501 : vector<1x16x32xf32> to vector<16x32xf32>
    %503 = vector.shape_cast %500 : vector<16x32xf32> to vector<1x16x32xf32>
    tpu.vector_store %arg19[%c0_232, %c0_233, %c0_234], %503 {strides = array<i32>} : memref<1x16x32xf32, #tpu.memory_space<vmem>>, vector<1x16x32xf32>,
    %504 = arith.addf %3, %362 : vector<8x32xf32>
    %c1_235 = arith.constant 1 : index
    %c0_236 = arith.constant 0 : index
    %c0_237 = arith.constant 0 : index
    %505 = vector.load %arg17[%c1_235, %c0_236, %c0_237] : memref<3x1x32xf32, #tpu.memory_space<vmem>>, vector<1x1x32xf32>
    %506 = vector.shape_cast %505 : vector<1x1x32xf32> to vector<1x32xf32>
    %c1_238 = arith.constant 1 : index
    %c0_239 = arith.constant 0 : index
    %c0_240 = arith.constant 0 : index
    %507 = vector.load %arg18[%c1_238, %c0_239, %c0_240] : memref<3x1x32xf32, #tpu.memory_space<vmem>>, vector<1x1x32xf32>
    %508 = vector.shape_cast %507 : vector<1x1x32xf32> to vector<1x32xf32>
    %cst_241 = arith.constant dense<0.000000e+00> : vector<8xf32>
    %509 = vector.multi_reduction <add>, %504, %cst_241 [1] : vector<8x32xf32> to vector<8xf32>
    %510 = vector.shape_cast %509 : vector<8xf32> to vector<8x1xf32>
    %cst_242 = arith.constant 3.200000e+01 : f32
    %511 = vector.broadcast %cst_242 : f32 to vector<8x1xf32>
    %512 = arith.divf %510, %511 : vector<8x1xf32>
    %513 = vector.broadcast %512 : vector<8x1xf32> to vector<8x32xf32>
    %514 = arith.subf %504, %513 : vector<8x32xf32>
    %515 = arith.mulf %514, %514 : vector<8x32xf32>
    %cst_243 = arith.constant dense<0.000000e+00> : vector<8xf32>
    %516 = vector.multi_reduction <add>, %515, %cst_243 [1] : vector<8x32xf32> to vector<8xf32>
    %517 = vector.shape_cast %516 : vector<8xf32> to vector<8x1xf32>
    %cst_244 = arith.constant 3.200000e+01 : f32
    %518 = vector.broadcast %cst_244 : f32 to vector<8x1xf32>
    %519 = arith.divf %517, %518 : vector<8x1xf32>
    %cst_245 = arith.constant 9.99999974E-6 : f32
    %520 = vector.broadcast %cst_245 : f32 to vector<8x1xf32>
    %521 = arith.addf %519, %520 : vector<8x1xf32>
    %522 = math.rsqrt %521 : vector<8x1xf32>
    %523 = vector.broadcast %522 : vector<8x1xf32> to vector<8x32xf32>
    %524 = arith.mulf %514, %523 : vector<8x32xf32>
    %525 = vector.broadcast %506 : vector<1x32xf32> to vector<8x32xf32>
    %526 = arith.mulf %524, %525 : vector<8x32xf32>
    %527 = vector.broadcast %508 : vector<1x32xf32> to vector<8x32xf32>
    %528 = arith.addf %526, %527 : vector<8x32xf32>
    %c0_246 = arith.constant 0 : index
    %c0_247 = arith.constant 0 : index
    %c0_248 = arith.constant 0 : index
    %529 = vector.load %arg20[%c0_246, %c0_247, %c0_248] : memref<1x8x32xf32, #tpu.memory_space<vmem>>, vector<1x8x32xf32>
    %530 = vector.shape_cast %529 : vector<1x8x32xf32> to vector<8x32xf32>
    %531 = vector.shape_cast %528 : vector<8x32xf32> to vector<1x8x32xf32>
    tpu.vector_store %arg20[%c0_246, %c0_247, %c0_248], %531 {strides = array<i32>} : memref<1x8x32xf32, #tpu.memory_space<vmem>>, vector<1x8x32xf32>,
    %532 = arith.addf %5, %475 : vector<12x32xf32>
    %c2_249 = arith.constant 2 : index
    %c0_250 = arith.constant 0 : index
    %c0_251 = arith.constant 0 : index
    %533 = vector.load %arg17[%c2_249, %c0_250, %c0_251] : memref<3x1x32xf32, #tpu.memory_space<vmem>>, vector<1x1x32xf32>
    %534 = vector.shape_cast %533 : vector<1x1x32xf32> to vector<1x32xf32>
    %c2_252 = arith.constant 2 : index
    %c0_253 = arith.constant 0 : index
    %c0_254 = arith.constant 0 : index
    %535 = vector.load %arg18[%c2_252, %c0_253, %c0_254] : memref<3x1x32xf32, #tpu.memory_space<vmem>>, vector<1x1x32xf32>
    %536 = vector.shape_cast %535 : vector<1x1x32xf32> to vector<1x32xf32>
    %cst_255 = arith.constant dense<0.000000e+00> : vector<12xf32>
    %537 = vector.multi_reduction <add>, %532, %cst_255 [1] : vector<12x32xf32> to vector<12xf32>
    %538 = vector.shape_cast %537 : vector<12xf32> to vector<12x1xf32>
    %cst_256 = arith.constant 3.200000e+01 : f32
    %539 = vector.broadcast %cst_256 : f32 to vector<12x1xf32>
    %540 = arith.divf %538, %539 : vector<12x1xf32>
    %541 = vector.broadcast %540 : vector<12x1xf32> to vector<12x32xf32>
    %542 = arith.subf %532, %541 : vector<12x32xf32>
    %543 = arith.mulf %542, %542 : vector<12x32xf32>
    %cst_257 = arith.constant dense<0.000000e+00> : vector<12xf32>
    %544 = vector.multi_reduction <add>, %543, %cst_257 [1] : vector<12x32xf32> to vector<12xf32>
    %545 = vector.shape_cast %544 : vector<12xf32> to vector<12x1xf32>
    %cst_258 = arith.constant 3.200000e+01 : f32
    %546 = vector.broadcast %cst_258 : f32 to vector<12x1xf32>
    %547 = arith.divf %545, %546 : vector<12x1xf32>
    %cst_259 = arith.constant 9.99999974E-6 : f32
    %548 = vector.broadcast %cst_259 : f32 to vector<12x1xf32>
    %549 = arith.addf %547, %548 : vector<12x1xf32>
    %550 = math.rsqrt %549 : vector<12x1xf32>
    %551 = vector.broadcast %550 : vector<12x1xf32> to vector<12x32xf32>
    %552 = arith.mulf %542, %551 : vector<12x32xf32>
    %553 = vector.broadcast %534 : vector<1x32xf32> to vector<12x32xf32>
    %554 = arith.mulf %552, %553 : vector<12x32xf32>
    %555 = vector.broadcast %536 : vector<1x32xf32> to vector<12x32xf32>
    %556 = arith.addf %554, %555 : vector<12x32xf32>
    %c0_260 = arith.constant 0 : index
    %c0_261 = arith.constant 0 : index
    %c0_262 = arith.constant 0 : index
    %557 = vector.load %arg21[%c0_260, %c0_261, %c0_262] : memref<1x12x32xf32, #tpu.memory_space<vmem>>, vector<1x12x32xf32>
    %558 = vector.shape_cast %557 : vector<1x12x32xf32> to vector<12x32xf32>
    %559 = vector.shape_cast %556 : vector<12x32xf32> to vector<1x12x32xf32>
    tpu.vector_store %arg21[%c0_260, %c0_261, %c0_262], %559 {strides = array<i32>} : memref<1x12x32xf32, #tpu.memory_space<vmem>>, vector<1x12x32xf32>,
    return
  }
  func.func @transform_0(%arg0: i32) -> (i32, i32, i32) {
    %c0_i32 = arith.constant 0 : i32
    %c0_i32_0 = arith.constant 0 : i32
    %c0_i32_1 = arith.constant 0 : i32
    return %arg0, %c0_i32, %c0_i32_0 : i32, i32, i32
  }
  func.func @transform_1(%arg0: i32) -> (i32, i32, i32) {
    %c0_i32 = arith.constant 0 : i32
    %c0_i32_0 = arith.constant 0 : i32
    %c0_i32_1 = arith.constant 0 : i32
    return %arg0, %c0_i32, %c0_i32_0 : i32, i32, i32
  }
  func.func @transform_2(%arg0: i32) -> (i32, i32, i32) {
    %c0_i32 = arith.constant 0 : i32
    %c0_i32_0 = arith.constant 0 : i32
    %c0_i32_1 = arith.constant 0 : i32
    return %arg0, %c0_i32, %c0_i32_0 : i32, i32, i32
  }
  func.func @transform_3(%arg0: i32) -> (i32, i32, i32) {
    %c0_i32 = arith.constant 0 : i32
    %c0_i32_0 = arith.constant 0 : i32
    %c0_i32_1 = arith.constant 0 : i32
    return %arg0, %c0_i32, %c0_i32_0 : i32, i32, i32
  }
  func.func @transform_4(%arg0: i32) -> (i32, i32, i32) {
    %c0_i32 = arith.constant 0 : i32
    %c0_i32_0 = arith.constant 0 : i32
    %c0_i32_1 = arith.constant 0 : i32
    return %arg0, %c0_i32, %c0_i32_0 : i32, i32, i32
  }
  func.func @transform_5(%arg0: i32) -> (i32, i32, i32) {
    %c0_i32 = arith.constant 0 : i32
    %c0_i32_0 = arith.constant 0 : i32
    %c0_i32_1 = arith.constant 0 : i32
    return %arg0, %c0_i32, %c0_i32_0 : i32, i32, i32
  }
  func.func @transform_6(%arg0: i32) -> (i32, i32, i32) {
    %c0_i32 = arith.constant 0 : i32
    %c0_i32_0 = arith.constant 0 : i32
    %c0_i32_1 = arith.constant 0 : i32
    return %arg0, %c0_i32, %c0_i32_0 : i32, i32, i32
  }
  func.func @transform_7(%arg0: i32) -> (i32, i32, i32) {
    %c0_i32 = arith.constant 0 : i32
    %c0_i32_0 = arith.constant 0 : i32
    %c0_i32_1 = arith.constant 0 : i32
    return %arg0, %c0_i32, %c0_i32_0 : i32, i32, i32
  }
  func.func @transform_8(%arg0: i32) -> (i32, i32, i32) {
    %c0_i32 = arith.constant 0 : i32
    %c0_i32_0 = arith.constant 0 : i32
    %c0_i32_1 = arith.constant 0 : i32
    return %arg0, %c0_i32, %c0_i32_0 : i32, i32, i32
  }
  func.func @transform_9(%arg0: i32) -> (i32, i32, i32) {
    %c0_i32 = arith.constant 0 : i32
    %c0_i32_0 = arith.constant 0 : i32
    %c0_i32_1 = arith.constant 0 : i32
    %c0_i32_2 = arith.constant 0 : i32
    return %c0_i32, %c0_i32_0, %c0_i32_1 : i32, i32, i32
  }
  func.func @transform_10(%arg0: i32) -> (i32, i32, i32) {
    %c0_i32 = arith.constant 0 : i32
    %c0_i32_0 = arith.constant 0 : i32
    %c0_i32_1 = arith.constant 0 : i32
    %c0_i32_2 = arith.constant 0 : i32
    return %c0_i32, %c0_i32_0, %c0_i32_1 : i32, i32, i32
  }
  func.func @transform_11(%arg0: i32) -> (i32, i32, i32) {
    %c0_i32 = arith.constant 0 : i32
    %c0_i32_0 = arith.constant 0 : i32
    %c0_i32_1 = arith.constant 0 : i32
    %c0_i32_2 = arith.constant 0 : i32
    return %c0_i32, %c0_i32_0, %c0_i32_1 : i32, i32, i32
  }
  func.func @transform_12(%arg0: i32) -> (i32, i32, i32) {
    %c0_i32 = arith.constant 0 : i32
    %c0_i32_0 = arith.constant 0 : i32
    %c0_i32_1 = arith.constant 0 : i32
    %c0_i32_2 = arith.constant 0 : i32
    return %c0_i32, %c0_i32_0, %c0_i32_1 : i32, i32, i32
  }
  func.func @transform_13(%arg0: i32) -> (i32, i32, i32) {
    %c0_i32 = arith.constant 0 : i32
    %c0_i32_0 = arith.constant 0 : i32
    %c0_i32_1 = arith.constant 0 : i32
    %c0_i32_2 = arith.constant 0 : i32
    return %c0_i32, %c0_i32_0, %c0_i32_1 : i32, i32, i32
  }
  func.func @transform_14(%arg0: i32) -> (i32, i32, i32) {
    %c0_i32 = arith.constant 0 : i32
    %c0_i32_0 = arith.constant 0 : i32
    %c0_i32_1 = arith.constant 0 : i32
    %c0_i32_2 = arith.constant 0 : i32
    return %c0_i32, %c0_i32_0, %c0_i32_1 : i32, i32, i32
  }
  func.func @transform_15(%arg0: i32) -> (i32, i32, i32) {
    %c0_i32 = arith.constant 0 : i32
    %c0_i32_0 = arith.constant 0 : i32
    %c0_i32_1 = arith.constant 0 : i32
    %c0_i32_2 = arith.constant 0 : i32
    return %c0_i32, %c0_i32_0, %c0_i32_1 : i32, i32, i32
  }
  func.func @transform_16(%arg0: i32) -> (i32, i32, i32) {
    %c0_i32 = arith.constant 0 : i32
    %c0_i32_0 = arith.constant 0 : i32
    %c0_i32_1 = arith.constant 0 : i32
    %c0_i32_2 = arith.constant 0 : i32
    return %c0_i32, %c0_i32_0, %c0_i32_1 : i32, i32, i32
  }
  func.func @transform_17(%arg0: i32) -> (i32, i32, i32) {
    %c0_i32 = arith.constant 0 : i32
    %c0_i32_0 = arith.constant 0 : i32
    %c0_i32_1 = arith.constant 0 : i32
    %c0_i32_2 = arith.constant 0 : i32
    return %c0_i32, %c0_i32_0, %c0_i32_1 : i32, i32, i32
  }
  func.func @transform_18(%arg0: i32) -> (i32, i32, i32) {
    %c0_i32 = arith.constant 0 : i32
    %c0_i32_0 = arith.constant 0 : i32
    %c0_i32_1 = arith.constant 0 : i32
    return %arg0, %c0_i32, %c0_i32_0 : i32, i32, i32
  }
  func.func @transform_19(%arg0: i32) -> (i32, i32, i32) {
    %c0_i32 = arith.constant 0 : i32
    %c0_i32_0 = arith.constant 0 : i32
    %c0_i32_1 = arith.constant 0 : i32
    return %arg0, %c0_i32, %c0_i32_0 : i32, i32, i32
  }
  func.func @transform_20(%arg0: i32) -> (i32, i32, i32) {
    %c0_i32 = arith.constant 0 : i32
    %c0_i32_0 = arith.constant 0 : i32
    %c0_i32_1 = arith.constant 0 : i32
    return %arg0, %c0_i32, %c0_i32_0 : i32, i32, i32
  }
}

</mosaic_0001>

<bundles_post_ra>
// kernel: single_block_forward.4
= control target key start
LH: loop header
LB: loop body
LE: loop exit
PB: predicated region body
PF: predicated region fallthrough
CT: control target
= control target key end

     0   :  { %vm59_vm0 = vcmask 1043456   ;;  %vm46_vm1 = vcmask 162816   ;;  %vm149_vm2 = vcmask 228352   ;;  %vm106_vm3 = vcmask 195584   ;;  %s399_s3 = inlined_call_operand.vmem [shape: f32[20,32], index: 3, kind: input, shape index: {}]   ;;  %s400_s7 = inlined_call_operand.vmem [shape: f32[28,32], index: 7, kind: input, shape index: {}]   ;;  %s401_s0 = inlined_call_operand.vmem [shape: f32[32,20], index: 0, kind: input, shape index: {}]   ;;  %s402_s5 = inlined_call_operand.vmem [shape: f32[24,32], index: 5, kind: input, shape index: {}]   ;;  %s403_s2 = inlined_call_operand.vmem [shape: f32[24,28], index: 2, kind: input, shape index: {}]   ;;  %s404_s1 = inlined_call_operand.vmem [shape: f32[16,24], index: 1, kind: input, shape index: {}]   ;;  %s405_s4 = inlined_call_operand.vmem [shape: f32[1,32], index: 4, kind: input, shape index: {}]   ;;  %s406_s6 = inlined_call_operand.vmem [shape: f32[1,32], index: 6, kind: input, shape index: {}]   ;;  %s407_s8 = inlined_call_operand.vmem [shape: f32[1,32], index: 8, kind: input, shape index: {}]   ;;  %s408_s9 = inlined_call_operand.vmem [shape: f32[32,32], index: 9, kind: output, shape index: {0}]   ;;  %s409_s10 = inlined_call_operand.vmem [shape: f32[16,32], index: 10, kind: output, shape index: {1}]   ;;  %s410_s11 = inlined_call_operand.vmem [shape: f32[24,32], index: 11, kind: output, shape index: {2}]  }
   0x1   :  { %v41_v0 = vld [vmem:[%s399_s3 + $0x10] sm:$0xf]  ;;  %v40_v1 = vld [vmem:[%s399_s3 + $0x8] sm:$0xff]  ;;  %v144_v2 = vld [vmem:[%s400_s7 + $0x18] sm:$0xf]  ;;  %vm92_vm4 = vcmask 261120  }
   0x2   :  { %214 = vmatpush.msk.msra.mxu3 %vm59_vm0, %v41_v0  ;;  %v143_v3 = vld [vmem:[%s400_s7 + $0x10] sm:$0xff]  ;;  %203 = vmatpush.msk.msra.mxu0 %vm59_vm0, %v41_v0  ;;  %v39_v4 = vld [vmem:[%s399_s3] sm:$0xff]  ;;  %v36_v5 = vld [vmem:[%s401_s0 + $0x8] sm:$0xff] }
   0x3   :  { %217 = vmatpush.msk.msra.mxu2 %vm59_vm0, %v144_v2  ;;  %v142_v6 = vld [vmem:[%s400_s7 + $0x8] sm:$0xff]  ;;  %v101_v7 = vld [vmem:[%s402_s5 + $0x10] sm:$0xff]  ;;  %v35_v9 = vld [vmem:[%s401_s0] sm:$0xff] }
   0x4   :  { %215 = vmatpush.msra.mxu3 %v40_v1  ;;  %77 = vmatpush.msra.mxu0 %v40_v1  ;;  %v100_v8 = vld [vmem:[%s402_s5 + $0x8] sm:$0xff]  ;;  %v141_v10 = vld [vmem:[%s400_s7] sm:$0xff]  ;;  %v37_v14 = vld [vmem:[%s401_s0 + $0x10] sm:$0xff] }
   0x5   :  { %218 = vmatpush.msra.mxu2 %v143_v3  ;;  %126 = vmatpush.msra.mxu1 %v101_v7  ;;  %v139_v11 = vld [vmem:[%s403_s2 + $0x8] sm:$0xff]  ;;  %v99_v12 = vld [vmem:[%s402_s5] sm:$0xff]  ;;  %v140_v16 = vld [vmem:[%s403_s2 + $0x10] sm:$0xff] }
   0x6   :  { %216 = vmatpush.msra.mxu3 %v39_v4  ;;  %78 = vmatpush.msra.mxu0 %v39_v4  ;;  %v97_v13 = vld [vmem:[%s404_s1] sm:$0xff]  ;;  %v98_v17 = vld [vmem:[%s404_s1 + $0x8] sm:$0xff]  ;;  %v38_v18 = vld [vmem:[%s401_s0 + $0x18] sm:$0xff] }
   0x7   :  { %205 = vmatmul.msk.f32.vlgmr.msra.gmra.mxu3 %vm46_vm1, %v36_v5  ;;  %219 = vmatpush.msra.mxu2 %v142_v6  ;;  %v138_v15 = vld [vmem:[%s403_s2] sm:$0xff] }
   0x8   :  { %127 = vmatpush.msra.mxu1 %v100_v8  ;;  %204 = vmatmul.msk.f32.vlgmr.msra.gmra.mxu0 %vm46_vm1, %v35_v9  ;;  %v221_v19 = vld [vmem:[%s405_s4] ss:$0 sm:$0xff] }
   0x9   :  { %220 = vmatpush.msra.mxu2 %v141_v10  ;;  %210 = vmatpush.msk.msrb.mxu0 %vm59_vm0, %v144_v2  ;;  %v222_v21 = vld [vmem:[%s406_s6] ss:$0 sm:$0xff] }
   0xa   :  { %212 = vmatmul.msk.f32.vlgmr.msra.gmra.mxu2 %vm149_vm2, %v139_v11  ;;  %128 = vmatpush.msra.mxu1 %v99_v12  ;;  %v223_v26 = vld [vmem:[%s407_s8] ss:$0 sm:$0xff] }
   0xb   :  { %208 = vmatmul.msk.f32.vlgmr.msra.gmra.mxu1 %vm106_vm3, %v97_v13  ;;  %175 = vmatpush.msrb.mxu0 %v143_v3 }
   0xd   :  { %176 = vmatpush.msrb.mxu0 %v142_v6 }
   0xf   :  { %206 = vmatmul.msk.f32.gmra.mxu3 %vm46_vm1, %v37_v14  ;;  %177 = vmatpush.msrb.mxu0 %v141_v10 }
  0x10   :  { %211 = vmatmul.msk.f32.vlgmr.msrb.gmra.mxu0 %vm149_vm2, %v138_v15 }
  0x12   :  { %213 = vmatmul.msk.f32.gmra.mxu2 %vm149_vm2, %v140_v16 }
  0x13   :  { %209 = vmatmul.msk.f32.gmra.mxu1 %vm106_vm3, %v98_v17 }
  0x17   :  { %207 = vmatmul.msk.f32.gmra.mxu3 %vm46_vm1, %v38_v18 }
  0x85   :  { %v80_v20 = vpop.f32.mrf.mxu0 }
  0x86   :  { %v81_v22 = vadd.f32 %v221_v19, %v80_v20 }
  0x88   :  { %93 = vst.msk [vmem:[%s408_s9] sm:$0xff] %vm92_vm4, %v81_v22  ;;  %v130_v23 = vpop.f32.mrf.mxu1 }
  0x89   :  { %v131_v24 = vadd.f32 %v222_v21, %v130_v23 }
  0x8a   :  { %v83_v25 = vpop.f32.mrf.mxu3 }
  0x8b   :  { %v84_v27 = vadd.f32 %v221_v19, %v83_v25  ;;  %136 = vst.msk [vmem:[%s409_s10] sm:$0xff] %vm92_vm4, %v131_v24 }
  0x8d   :  { %94 = vst.msk [vmem:[%s408_s9 + $0x8] sm:$0xff] %vm92_vm4, %v84_v27  ;;  %v182_v28 = vpop.f32.mrf.mxu2  ;;  %v179_v29 = vpop.f32.mrf.mxu0 }
  0x8e   :  { %v183_v30 = vadd.f32 %v223_v26, %v182_v28  ;;  %v180_v31 = vadd.f32 %v223_v26, %v179_v29 }
  0x90   :  { %189 = vst.msk [vmem:[%s410_s11 + $0x8] sm:$0xff] %vm92_vm4, %v183_v30  ;;  %v133_v32 = vpop.f32.mrf.mxu1 }
  0x91   :  { %v134_v33 = vadd.f32 %v222_v21, %v133_v32  ;;  %188 = vst.msk [vmem:[%s410_s11] sm:$0xff] %vm92_vm4, %v180_v31 }
  0x92   :  { %v86_v34 = vpop.f32.mrf.mxu3 }
  0x93   :  { %v87_v35 = vadd.f32 %v221_v19, %v86_v34  ;;  %137 = vst.msk [vmem:[%s409_s10 + $0x8] sm:$0xff] %vm92_vm4, %v134_v33 }
  0x95   :  { %95 = vst.msk [vmem:[%s408_s9 + $0x10] sm:$0xff] %vm92_vm4, %v87_v35  ;;  %v185_v36 = vpop.f32.mrf.mxu2 }
  0x96   :  { %v186_v37 = vadd.f32 %v223_v26, %v185_v36 }
  0x98   :  { %190 = vst.msk [vmem:[%s410_s11 + $0x10] sm:$0xff] %vm92_vm4, %v186_v37 }
  0x9a   :  { %v89_v38 = vpop.f32.mrf.mxu3 }
  0x9b   :  { %v90_v39 = vadd.f32 %v221_v19, %v89_v38 }
  0x9d   :  { %96 = vst.msk [vmem:[%s408_s9 + $0x18] sm:$0xff] %vm92_vm4, %v90_v39 }

// kernel: single_block_forward.5
= control target key start
LH: loop header
LB: loop body
LE: loop exit
PB: predicated region body
PF: predicated region fallthrough
CT: control target
= control target key end

     0   :  { %s1916_s20 = smov 0   ;;  %s3047_s0 = inlined_call_operand.vmem [shape: f32[2,17,221], index: 0, kind: input, shape index: {}]   ;;  %s3048_s1 = inlined_call_operand.vmem [shape: f32[512,17], index: 1, kind: input, shape index: {}]   ;;  %s3049_s2 = inlined_call_operand.vmem [shape: f32[512,1], index: 2, kind: input, shape index: {}]   ;;  %s3050_s3 = inlined_call_operand.vmem [shape: f32[1,512], index: 3, kind: input, shape index: {}]   ;;  %s3051_s4 = inlined_call_operand.<no memory space> [shape: f32[1,1], index: 4, kind: input, shape index: {}]   ;;  %s3052_s5 = inlined_call_operand.vmem [shape: f32[2,1,221], index: 5, kind: output, shape index: {}]  }
   0x1   :  { %v10_v0 = vstv %s3051_s4 }
   0x2   :  { %11 = vst [vmem:[#allocation2] sm:$0x1] %v10_v0 }
   0x3 LB: > { %s1705_s21 = sadd.s32 4294967295, %s1880_s20   ;;  %p1709_p0 = scmp.ge.s32.totalorder %s1880_s20, 1  ;;  %s1880_s20 = sphi %s1916_s20, %s17_s20  }
   0x4   : > { %p189_p1 = scmp.lt.s32.totalorder %s1880_s20, 3 }
   0x6   : > { %p190_p2 = pnand %p1709_p0, %p189_p1 }
   0x8   : > { %193 = sbr.rel (%p190_p2) target bundleno = 716 (0x2cc), region = 40 }
   0xd   : > { %p216_p3 = scmp.lt.s32.totalorder %s1705_s21, 1  ;;  %v1882_v1 = vmov 0   ;;  %v295_v2 = vld [vmem:[%s3049_s2] sm:$0xff]  ;;  %v297_v3 = vld [vmem:[%s3049_s2 + $0x10] sm:$0xff]  ;;  %vm872_vm0 = vcmask 1040384   ;;  %v296_v8 = vld [vmem:[%s3049_s2 + $0x8] sm:$0xff] }
   0xe   : > { %1862 = vset.pattern.permute.xlu0 %v1882_v1  ;;  %1863 = vset.pattern.permute.xlu1 %v1882_v1  ;;  %v225_v11 = vld [vmem:[%s3048_s1] sm:$0xff]  ;;  %vm679_vm1 = vcmask 138240   ;;  %v264_v12 = vld [vmem:[%s3048_s1 + $0x138] sm:$0xff]  ;;  %v301_v15 = vld [vmem:[%s3049_s2 + $0x30] sm:$0xff] }
   0xf   : > { %s3278_s21 = smov (!%p216_p3, %s1705_s21), 1  ;;  %361 = vperm.xlu0 %1862, %v295_v2   ;;  %1864 = vset.pattern.permute.xlu2 %v1882_v1  ;;  %v298_v13 = vld [vmem:[%s3049_s2 + $0x18] sm:$0xff]  ;;  %v265_v14 = vld [vmem:[%s3048_s1 + $0x140] sm:$0xff]  ;;  %v226_v16 = vld [vmem:[%s3048_s1 + $0x8] sm:$0xff] }
  0x10   : > { %s1852_s25 = smul.u32 48, %s3278_s21  ;;  %371 = vperm.xlu1 %1863, %v297_v3   ;;  %v302_v17 = vld [vmem:[%s3049_s2 + $0x38] sm:$0xff]  ;;  %v266_v18 = vld [vmem:[%s3048_s1 + $0x148] sm:$0xff]  ;;  %v299_v20 = vld [vmem:[%s3049_s2 + $0x20] sm:$0xff]  ;;  %s1711_s4 = sshll.u32 %s3278_s21, 1 }
  0x11   : > { %v304_v19 = vld [vmem:[%s3049_s2 + $0x48] sm:$0xff]  ;;  %v227_v21 = vld [vmem:[%s3048_s1 + $0x10] sm:$0xff]  ;;  %381 = vperm.xlu2 %1864, %v299_v20   ;;  %v307_v24 = vld [vmem:[%s3049_s2 + $0x60] sm:$0xff]  ;;  %s224_s24 = scalar_lea.vmem %s3052_s5, %s1711_s4 }
  0x12   : > { %s220_s28 = scalar_lea.vmem %s3047_s0, %s1852_s25  ;;  %v305_v22 = vld [vmem:[%s3049_s2 + $0x50] sm:$0xff]  ;;  %v300_v25 = vld [vmem:[%s3049_s2 + $0x28] sm:$0xff]  ;;  %v228_v26 = vld [vmem:[%s3048_s1 + $0x18] sm:$0xff] }
  0x13   : > { %v293_v4 = vld [vmem:[%s220_s28 + $0x20] sm:$0x1]  ;;  %v294_v5 = vld [vmem:[%s220_s28 + $0x28] sm:$0x1]  ;;  %v291_v6 = vld [vmem:[%s220_s28 + $0x10] sm:$0xff] }
  0x14   : > { %1712 = vmatpush.msk.msra.mxu0 %vm872_vm0, %v293_v4  ;;  %1777 = vmatpush.msk.msra.mxu1 %vm872_vm0, %v294_v5  ;;  %v292_v7 = vld [vmem:[%s220_s28 + $0x18] sm:$0xff]  ;;  %v289_v9 = vld [vmem:[%s220_s28] sm:$0xff]  ;;  %v290_v10 = vld [vmem:[%s220_s28 + $0x8] sm:$0xff] }
  0x15   : > { %1849 = vmatpush.msk.msra.mxu3 %vm872_vm0, %v294_v5  ;;  %1846 = vmatpush.msk.msra.mxu2 %vm872_vm0, %v293_v4  ;;  %v267_v23 = vld [vmem:[%s3048_s1 + $0x150] sm:$0xff]  ;;  %v308_v27 = vld [vmem:[%s3049_s2 + $0x68] sm:$0xff]  ;;  %v268_v28 = vld [vmem:[%s3048_s1 + $0x158] sm:$0xff] }
  0x16   : > { %893 = vmatpush.msra.mxu0 %v291_v6  ;;  %1102 = vmatpush.msra.mxu1 %v292_v7  ;;  %v310_v29 = vld [vmem:[%s3049_s2 + $0x78] sm:$0xff]  ;;  %v303_v30 = vld [vmem:[%s3049_s2 + $0x40] sm:$0xff]  ;;  %v313_v34 = vld [vmem:[%s3049_s2 + $0x90] sm:$0xff] }
  0x17   : > { %1850 = vmatpush.msra.mxu3 %v292_v7  ;;  %366 = vperm.xlu0 %1862, %v296_v8   ;;  %v229_v31 = vld [vmem:[%s3048_s1 + $0x20] sm:$0xff]  ;;  %v306_v35 = vld [vmem:[%s3049_s2 + $0x58] sm:$0xff]  ;;  %v230_v36 = vld [vmem:[%s3048_s1 + $0x28] sm:$0xff] }
  0x18   : > { %894 = vmatpush.msra.mxu0 %v289_v9  ;;  %1103 = vmatpush.msra.mxu1 %v290_v10  ;;  %v311_v32 = vld [vmem:[%s3049_s2 + $0x80] sm:$0xff]  ;;  %v326_v37 = vld [vmem:[%s3049_s2 + $0xf8] sm:$0xff]  ;;  %v270_v38 = vld [vmem:[%s3048_s1 + $0x168] sm:$0xff] }
  0x19   : > { %1713 = vmatmul.msk.f32.vlgmr.msra.gmra.mxu0 %vm679_vm1, %v225_v11  ;;  %1778 = vmatmul.msk.f32.vlgmr.msra.gmra.mxu1 %vm679_vm1, %v225_v11  ;;  %v269_v33 = vld [vmem:[%s3048_s1 + $0x160] sm:$0xff]  ;;  %v324_v39 = vld [vmem:[%s3049_s2 + $0xe8] sm:$0xff]  ;;  %v309_v40 = vld [vmem:[%s3049_s2 + $0x70] sm:$0xff] }
  0x1a   : > { %1851 = vmatpush.msra.mxu3 %v290_v10  ;;  %1847 = vmatpush.msra.mxu2 %v291_v6  ;;  %v231_v41 = vld [vmem:[%s3048_s1 + $0x30] sm:$0xff]  ;;  %v323_v42 = vld [vmem:[%s3049_s2 + $0xe0] sm:$0xff]  ;;  %v322_v44 = vld [vmem:[%s3049_s2 + $0xd8] sm:$0xff] }
  0x1b   : > { %1817 = vmatmul.msk.f32.vlgmr.msra.gmra.mxu3 %vm679_vm1, %v264_v12  ;;  %376 = vperm.xlu1 %1863, %v298_v13   ;;  %v271_v43 = vld [vmem:[%s3048_s1 + $0x170] sm:$0xff]  ;;  %v312_v45 = vld [vmem:[%s3049_s2 + $0x88] sm:$0xff]  ;;  %v232_v46 = vld [vmem:[%s3048_s1 + $0x38] sm:$0xff] }
  0x1c   : > { %1848 = vmatpush.msra.mxu2 %v289_v9  ;;  %386 = vperm.xlu2 %1864, %v300_v25   ;;  %v341_v47 = vld [vmem:[%s3049_s2 + $0x170] sm:$0xff]  ;;  %v272_v48 = vld [vmem:[%s3048_s1 + $0x178] sm:$0xff]  ;;  %v233_v51 = vld [vmem:[%s3048_s1 + $0x40] sm:$0xff] }
  0x1d   : > { %1753 = vmatmul.msk.f32.vlgmr.msra.gmra.mxu2 %vm679_vm1, %v265_v14  ;;  %v321_v49 = vld [vmem:[%s3049_s2 + $0xd0] sm:$0xff]  ;;  %v340_v52 = vld [vmem:[%s3049_s2 + $0x168] sm:$0xff]  ;;  %v273_v53 = vld [vmem:[%s3048_s1 + $0x180] sm:$0xff] }
  0x1e   : > { %v325_v50 = vld [vmem:[%s3049_s2 + $0xf0] sm:$0xff]  ;;  %v320_v54 = vld [vmem:[%s3049_s2 + $0xc8] sm:$0xff]  ;;  %v342_v55 = vld [vmem:[%s3049_s2 + $0x178] sm:$0xff] }
  0x1f   : > { %391 = vperm.xlu0 %1862, %v301_v15   ;;  %v234_v56 = vld [vmem:[%s3048_s1 + $0x48] sm:$0xff]  ;;  %v339_v57 = vld [vmem:[%s3049_s2 + $0x160] sm:$0xff]  ;;  %v358_v60 = vld [vmem:[%s3049_s2 + $0x1f8] sm:$0xff] }
  0x20   : > { %v274_v58 = vld [vmem:[%s3048_s1 + $0x188] sm:$0xff]  ;;  %v319_v59 = vld [vmem:[%s3049_s2 + $0xc0] sm:$0xff]  ;;  %v235_v61 = vld [vmem:[%s3048_s1 + $0x50] sm:$0xff] }
  0x21   : > { %1714 = vmatmul.msk.f32.gmra.mxu0 %vm679_vm1, %v226_v16  ;;  %1779 = vmatmul.msk.f32.gmra.mxu1 %vm679_vm1, %v226_v16  ;;  %v338_v62 = vld [vmem:[%s3049_s2 + $0x158] sm:$0xff]  ;;  %v275_v63 = vld [vmem:[%s3048_s1 + $0x190] sm:$0xff]  ;;  %v356_v6 = vld [vmem:[%s3049_s2 + $0x1e8] sm:$0xff] }
  0x22   : > { %v318_v0 = vld [vmem:[%s3049_s2 + $0xb8] sm:$0xff]  ;;  %v357_v1 = vld [vmem:[%s3049_s2 + $0x1f0] sm:$0xff]  ;;  %v237_v7 = vld [vmem:[%s3048_s1 + $0x60] sm:$0xff] }
  0x23   : > { %1818 = vmatmul.msk.f32.gmra.mxu3 %vm679_vm1, %v265_v14  ;;  %396 = vperm.xlu1 %1863, %v302_v17   ;;  %v236_v2 = vld [vmem:[%s3048_s1 + $0x58] sm:$0xff]  ;;  %v337_v3 = vld [vmem:[%s3049_s2 + $0x150] sm:$0xff]  ;;  %v336_v8 = vld [vmem:[%s3049_s2 + $0x148] sm:$0xff] }
  0x24   : > { %401 = vperm.xlu2 %1864, %v303_v30   ;;  %v276_v4 = vld [vmem:[%s3048_s1 + $0x198] sm:$0xff]  ;;  %v317_v5 = vld [vmem:[%s3049_s2 + $0xb0] sm:$0xff]  ;;  %v277_v9 = vld [vmem:[%s3048_s1 + $0x1a0] sm:$0xff] }
  0x25   : > { %1754 = vmatmul.msk.f32.gmra.mxu2 %vm679_vm1, %v266_v18  ;;  %v316_v10 = vld [vmem:[%s3049_s2 + $0xa8] sm:$0xff]  ;;  %v355_v11 = vld [vmem:[%s3049_s2 + $0x1e0] sm:$0xff]  ;;  %v239_v20 = vld [vmem:[%s3048_s1 + $0x70] sm:$0xff] }
  0x26   : > { %v238_v12 = vld [vmem:[%s3048_s1 + $0x68] sm:$0xff]  ;;  %v335_v14 = vld [vmem:[%s3049_s2 + $0x140] sm:$0xff]  ;;  %v314_v25 = vld [vmem:[%s3049_s2 + $0x98] sm:$0xff] }
  0x27   : > { %406 = vperm.xlu0 %1862, %v304_v19   ;;  %v278_v16 = vld [vmem:[%s3048_s1 + $0x1a8] sm:$0xff]  ;;  %v354_v19 = vld [vmem:[%s3049_s2 + $0x1d8] sm:$0xff] }
  0x29   : > { %1715 = vmatmul.msk.f32.gmra.mxu0 %vm679_vm1, %v227_v21  ;;  %1780 = vmatmul.msk.f32.gmra.mxu1 %vm679_vm1, %v227_v21  ;;  %v334_v21 = vld [vmem:[%s3049_s2 + $0x138] sm:$0xff] }
  0x2b   : > { %1819 = vmatmul.msk.f32.gmra.mxu3 %vm679_vm1, %v266_v18  ;;  %411 = vperm.xlu1 %1863, %v305_v22   ;;  %v315_v18 = vld [vmem:[%s3049_s2 + $0xa0] sm:$0xff] }
  0x2c   : > { %416 = vperm.xlu2 %1864, %v306_v35   ;;  %v352_v35 = vld [vmem:[%s3049_s2 + $0x1c8] sm:$0xff] }
  0x2d   : > { %1755 = vmatmul.msk.f32.gmra.mxu2 %vm679_vm1, %v267_v23 }
  0x2f   : > { %421 = vperm.xlu0 %1862, %v307_v24   ;;  %v279_v24 = vld [vmem:[%s3048_s1 + $0x1b0] sm:$0xff] }
  0x31   : > { %1716 = vmatmul.msk.f32.gmra.mxu0 %vm679_vm1, %v228_v26  ;;  %1781 = vmatmul.msk.f32.gmra.mxu1 %vm679_vm1, %v228_v26 }
  0x33   : > { %1820 = vmatmul.msk.f32.gmra.mxu3 %vm679_vm1, %v267_v23  ;;  %426 = vperm.xlu1 %1863, %v308_v27   ;;  %v353_v27 = vld [vmem:[%s3049_s2 + $0x1d0] sm:$0xff] }
  0x34   : > { %431 = vperm.xlu2 %1864, %v309_v40  }
  0x35   : > { %1756 = vmatmul.msk.f32.gmra.mxu2 %vm679_vm1, %v268_v28 }
  0x37   : > { %436 = vperm.xlu0 %1862, %v310_v29   ;;  %v333_v29 = vld [vmem:[%s3049_s2 + $0x130] sm:$0xff] }
  0x39   : > { %1717 = vmatmul.msk.f32.gmra.mxu0 %vm679_vm1, %v229_v31  ;;  %1782 = vmatmul.msk.f32.gmra.mxu1 %vm679_vm1, %v229_v31 }
  0x3b   : > { %1821 = vmatmul.msk.f32.gmra.mxu3 %vm679_vm1, %v268_v28  ;;  %441 = vperm.xlu1 %1863, %v311_v32   ;;  %v240_v28 = vld [vmem:[%s3048_s1 + $0x78] sm:$0xff] }
  0x3c   : > { %446 = vperm.xlu2 %1864, %v312_v45   ;;  %v280_v32 = vld [vmem:[%s3048_s1 + $0x1b8] sm:$0xff]  ;;  %v351_v45 = vld [vmem:[%s3049_s2 + $0x1c0] sm:$0xff] }
  0x3d   : > { %1757 = vmatmul.msk.f32.gmra.mxu2 %vm679_vm1, %v269_v33 }
  0x3f   : > { %451 = vperm.xlu0 %1862, %v313_v34  }
  0x41   : > { %1718 = vmatmul.msk.f32.gmra.mxu0 %vm679_vm1, %v230_v36  ;;  %1783 = vmatmul.msk.f32.gmra.mxu1 %vm679_vm1, %v230_v36 }
  0x43   : > { %1822 = vmatmul.msk.f32.gmra.mxu3 %vm679_vm1, %v269_v33  ;;  %516 = vperm.xlu1 %1863, %v326_v37   ;;  %v332_v33 = vld [vmem:[%s3049_s2 + $0x128] sm:$0xff] }
  0x44   : > { %511 = vperm.xlu2 %1864, %v325_v50   ;;  %v330_v50 = vld [vmem:[%s3049_s2 + $0x118] sm:$0xff] }
  0x45   : > { %1758 = vmatmul.msk.f32.gmra.mxu2 %vm679_vm1, %v270_v38 }
  0x47   : > { %506 = vperm.xlu0 %1862, %v324_v39   ;;  %v349_v39 = vld [vmem:[%s3049_s2 + $0x1b0] sm:$0xff] }
  0x49   : > { %1719 = vmatmul.msk.f32.gmra.mxu0 %vm679_vm1, %v231_v41  ;;  %1784 = vmatmul.msk.f32.gmra.mxu1 %vm679_vm1, %v231_v41 }
  0x4b   : > { %1823 = vmatmul.msk.f32.gmra.mxu3 %vm679_vm1, %v270_v38  ;;  %501 = vperm.xlu1 %1863, %v323_v42   ;;  %v241_v38 = vld [vmem:[%s3048_s1 + $0x80] sm:$0xff] }
  0x4c   : > { %596 = vperm.xlu2 %1864, %v342_v55   ;;  %v281_v42 = vld [vmem:[%s3048_s1 + $0x1c0] sm:$0xff] }
  0x4d   : > { %1759 = vmatmul.msk.f32.gmra.mxu2 %vm679_vm1, %v271_v43 }
  0x4f   : > { %496 = vperm.xlu0 %1862, %v322_v44  }
  0x51   : > { %1720 = vmatmul.msk.f32.gmra.mxu0 %vm679_vm1, %v232_v46  ;;  %1785 = vmatmul.msk.f32.gmra.mxu1 %vm679_vm1, %v232_v46 }
  0x53   : > { %1824 = vmatmul.msk.f32.gmra.mxu3 %vm679_vm1, %v271_v43  ;;  %591 = vperm.xlu1 %1863, %v341_v47   ;;  %v348_v43 = vld [vmem:[%s3049_s2 + $0x1a8] sm:$0xff] }
  0x54   : > { %676 = vperm.xlu2 %1864, %v358_v60  }
  0x55   : > { %1760 = vmatmul.msk.f32.gmra.mxu2 %vm679_vm1, %v272_v48 }
  0x57   : > { %491 = vperm.xlu0 %1862, %v321_v49  }
  0x59   : > { %1721 = vmatmul.msk.f32.gmra.mxu0 %vm679_vm1, %v233_v51  ;;  %1786 = vmatmul.msk.f32.gmra.mxu1 %vm679_vm1, %v233_v51 }
  0x5b   : > { %1825 = vmatmul.msk.f32.gmra.mxu3 %vm679_vm1, %v272_v48  ;;  %586 = vperm.xlu1 %1863, %v340_v52   ;;  %v242_v48 = vld [vmem:[%s3048_s1 + $0x88] sm:$0xff] }
  0x5c   : > { %671 = vperm.xlu2 %1864, %v357_v1   ;;  %v345_v1 = vld [vmem:[%s3049_s2 + $0x190] sm:$0xff] }
  0x5d   : > { %1761 = vmatmul.msk.f32.gmra.mxu2 %vm679_vm1, %v273_v53 }
  0x5f   : > { %486 = vperm.xlu0 %1862, %v320_v54   ;;  %v329_v54 = vld [vmem:[%s3049_s2 + $0x110] sm:$0xff] }
  0x61   : > { %1722 = vmatmul.msk.f32.gmra.mxu0 %vm679_vm1, %v234_v56  ;;  %1787 = vmatmul.msk.f32.gmra.mxu1 %vm679_vm1, %v234_v56  ;;  %v350_v56 = vld [vmem:[%s3049_s2 + $0x1b8] sm:$0xff] }
  0x63   : > { %1826 = vmatmul.msk.f32.gmra.mxu3 %vm679_vm1, %v273_v53  ;;  %581 = vperm.xlu1 %1863, %v339_v57   ;;  %v282_v53 = vld [vmem:[%s3048_s1 + $0x1c8] sm:$0xff] }
  0x64   : > { %666 = vperm.xlu2 %1864, %v356_v6   ;;  %v244_v6 = vld [vmem:[%s3048_s1 + $0x98] sm:$0xff] }
  0x65   : > { %1762 = vmatmul.msk.f32.gmra.mxu2 %vm679_vm1, %v274_v58 }
  0x67   : > { %481 = vperm.xlu0 %1862, %v319_v59   ;;  %v243_v59 = vld [vmem:[%s3048_s1 + $0x90] sm:$0xff] }
  0x69   : > { %1723 = vmatmul.msk.f32.gmra.mxu0 %vm679_vm1, %v235_v61  ;;  %1788 = vmatmul.msk.f32.gmra.mxu1 %vm679_vm1, %v235_v61  ;;  %v346_v61 = vld [vmem:[%s3049_s2 + $0x198] sm:$0xff] }
  0x6b   : > { %1827 = vmatmul.msk.f32.gmra.mxu3 %vm679_vm1, %v274_v58  ;;  %576 = vperm.xlu1 %1863, %v338_v62   ;;  %v2198_v15 = vpop.permute.xlu2 %381 }
  0x6c   : > { %661 = vperm.xlu2 %1864, %v355_v11   ;;  %3100 = vst [vmem:[#allocation4_spill] sm:$0xff] %v2198_v15  ;;  %v284_v11 = vld [vmem:[%s3048_s1 + $0x1d8] sm:$0xff] }
  0x6d   : > { %1763 = vmatmul.msk.f32.gmra.mxu2 %vm679_vm1, %v275_v63 }
  0x6f   : > { %476 = vperm.xlu0 %1862, %v318_v0   ;;  %v283_v0 = vld [vmem:[%s3048_s1 + $0x1d0] sm:$0xff] }
  0x71   : > { %1724 = vmatmul.msk.f32.gmra.mxu0 %vm679_vm1, %v236_v2  ;;  %1789 = vmatmul.msk.f32.gmra.mxu1 %vm679_vm1, %v236_v2 }
  0x73   : > { %1828 = vmatmul.msk.f32.gmra.mxu3 %vm679_vm1, %v275_v63  ;;  %571 = vperm.xlu1 %1863, %v337_v3   ;;  %v331_v3 = vld [vmem:[%s3049_s2 + $0x120] sm:$0xff] }
  0x74   : > { %656 = vperm.xlu2 %1864, %v354_v19  }
  0x75   : > { %1764 = vmatmul.msk.f32.gmra.mxu2 %vm679_vm1, %v276_v4 }
  0x76   : > { %v2221_v22 = vpop.permute.xlu2 %386 }
  0x77   : > { %471 = vperm.xlu0 %1862, %v317_v5   ;;  %3102 = vst [vmem:[#allocation6_spill] sm:$0xff] %v2221_v22 }
  0x79   : > { %1725 = vmatmul.msk.f32.gmra.mxu0 %vm679_vm1, %v237_v7  ;;  %1790 = vmatmul.msk.f32.gmra.mxu1 %vm679_vm1, %v237_v7 }
  0x7b   : > { %1829 = vmatmul.msk.f32.gmra.mxu3 %vm679_vm1, %v276_v4  ;;  %566 = vperm.xlu1 %1863, %v336_v8   ;;  %v327_v8 = vld [vmem:[%s3049_s2 + $0x100] sm:$0xff] }
  0x7c   : > { %651 = vperm.xlu2 %1864, %v353_v27  }
  0x7d   : > { %1765 = vmatmul.msk.f32.gmra.mxu2 %vm679_vm1, %v277_v9 }
  0x7e   : > { %v2246_v30 = vpop.permute.xlu2 %401 }
  0x7f   : > { %466 = vperm.xlu0 %1862, %v316_v10   ;;  %3105 = vst [vmem:[#allocation9_spill] sm:$0xff] %v2246_v30 }
  0x81   : > { %v2193_v13 = vpop.permute.xlu0 %361  ;;  %1726 = vmatmul.msk.f32.gmra.mxu0 %vm679_vm1, %v238_v12  ;;  %1791 = vmatmul.msk.f32.gmra.mxu1 %vm679_vm1, %v238_v12  ;;  %v343_v12 = vld [vmem:[%s3049_s2 + $0x180] sm:$0xff] }
  0x82   : > { %3099 = vst [vmem:[#allocation3_spill] sm:$0xff] %v2193_v13  ;;  %v2206_v17 = vpop.permute.xlu1 %371 }
  0x83   : > { %1830 = vmatmul.msk.f32.gmra.mxu3 %vm679_vm1, %v277_v9  ;;  %3101 = vst [vmem:[#allocation5_spill] sm:$0xff] %v2206_v17  ;;  %561 = vperm.xlu1 %1863, %v335_v14  }
  0x84   : > { %646 = vperm.xlu2 %1864, %v352_v35  }
  0x85   : > { %1766 = vmatmul.msk.f32.gmra.mxu2 %vm679_vm1, %v278_v16 }
  0x86   : > { %v2275_v40 = vpop.permute.xlu2 %416 }
  0x87   : > { %461 = vperm.xlu0 %1862, %v315_v18   ;;  %3109 = vst [vmem:[#allocation13_spill] sm:$0xff] %v2275_v40 }
  0x89   : > { %1727 = vmatmul.msk.f32.gmra.mxu0 %vm679_vm1, %v239_v20  ;;  %1792 = vmatmul.msk.f32.gmra.mxu1 %vm679_vm1, %v239_v20  ;;  %v2225_v23 = vpop.permute.xlu0 %366  ;;  %v245_v20 = vld [vmem:[%s3048_s1 + $0xa0] sm:$0xff] }
  0x8a   : > { %3103 = vst [vmem:[#allocation7_spill] sm:$0xff] %v2225_v23 }
  0x8b   : > { %1831 = vmatmul.msk.f32.gmra.mxu3 %vm679_vm1, %v278_v16  ;;  %556 = vperm.xlu1 %1863, %v334_v21   ;;  %v347_v16 = vld [vmem:[%s3049_s2 + $0x1a0] sm:$0xff] }
  0x8c   : > { %641 = vperm.xlu2 %1864, %v351_v45   ;;  %v286_v45 = vld [vmem:[%s3048_s1 + $0x1e8] sm:$0xff] }
  0x8d   : > { %1767 = vmatmul.msk.f32.gmra.mxu2 %vm679_vm1, %v279_v24  ;;  %v2235_v26 = vpop.permute.xlu1 %376 }
  0x8e   : > { %3104 = vst [vmem:[#allocation8_spill] sm:$0xff] %v2235_v26  ;;  %v2306_v51 = vpop.permute.xlu2 %431 }
  0x8f   : > { %456 = vperm.xlu0 %1862, %v314_v25   ;;  %3114 = vst [vmem:[#allocation18_spill] sm:$0xff] %v2306_v51 }
  0x91   : > { %1728 = vmatmul.msk.f32.gmra.mxu0 %vm679_vm1, %v240_v28  ;;  %1793 = vmatmul.msk.f32.gmra.mxu1 %vm679_vm1, %v240_v28  ;;  %v2250_v31 = vpop.permute.xlu0 %391  ;;  %v285_v28 = vld [vmem:[%s3048_s1 + $0x1e0] sm:$0xff] }
  0x92   : > { %3106 = vst [vmem:[#allocation10_spill] sm:$0xff] %v2250_v31 }
  0x93   : > { %1832 = vmatmul.msk.f32.gmra.mxu3 %vm679_vm1, %v279_v24  ;;  %551 = vperm.xlu1 %1863, %v333_v29   ;;  %v1426_v24 = vld [vmem:[#allocation2] sm:$0x1] }
  0x94   : > { %636 = vperm.xlu2 %1864, %v350_v56  }
  0x95   : > { %1768 = vmatmul.msk.f32.gmra.mxu2 %vm679_vm1, %v280_v32  ;;  %v2260_v34 = vpop.permute.xlu1 %396 }
  0x96   : > { %3107 = vst [vmem:[#allocation11_spill] sm:$0xff] %v2260_v34  ;;  %v2265_v36 = vpop.f32.mrf.mxu0  ;;  %v2267_v37 = vpop.f32.mrf.mxu1 }
  0x97   : > { %3108 = vst [vmem:[#allocation12_spill] sm:$0xff] %v2267_v37  ;;  %546 = vperm.xlu0 %1862, %v332_v33   ;;  %v2337_v62 = vpop.permute.xlu2 %446 }
  0x98   : > { %3119 = vst [vmem:[#allocation23_spill] sm:$0xff] %v2337_v62 }
  0x99   : > { %1729 = vmatmul.msk.f32.gmra.mxu0 %vm679_vm1, %v241_v38  ;;  %1794 = vmatmul.msk.f32.gmra.mxu1 %vm679_vm1, %v241_v38  ;;  %v2279_v41 = vpop.permute.xlu0 %406  ;;  %v246_v38 = vld [vmem:[%s3048_s1 + $0xa8] sm:$0xff] }
  0x9a   : > { %3110 = vst [vmem:[#allocation14_spill] sm:$0xff] %v2279_v41 }
  0x9b   : > { %1833 = vmatmul.msk.f32.gmra.mxu3 %vm679_vm1, %v280_v32  ;;  %631 = vperm.xlu1 %1863, %v349_v39   ;;  %v328_v32 = vld [vmem:[%s3049_s2 + $0x108] sm:$0xff] }
  0x9c   : > { %541 = vperm.xlu2 %1864, %v331_v3   ;;  %v287_v3 = vld [vmem:[%s3048_s1 + $0x1f0] sm:$0xff] }
  0x9d   : > { %1769 = vmatmul.msk.f32.gmra.mxu2 %vm679_vm1, %v281_v42  ;;  %v2289_v44 = vpop.permute.xlu1 %411 }
  0x9e   : > { %3111 = vst [vmem:[#allocation15_spill] sm:$0xff] %v2289_v44  ;;  %v2294_v46 = vpop.f32.mrf.mxu0  ;;  %v2296_v47 = vpop.f32.mrf.mxu1 }
  0x9f   : > { %3112 = vst [vmem:[#allocation16_spill] sm:$0xff] %v2296_v47  ;;  %v2301_v49 = vpop.f32.mrf.mxu3  ;;  %626 = vperm.xlu0 %1862, %v348_v43   ;;  %v2368_v9 = vpop.permute.xlu2 %511 }
  0xa0   : > { %3113 = vst [vmem:[#allocation17_spill] sm:$0xff] %v2301_v49 }
  0xa1   : > { %1730 = vmatmul.msk.f32.gmra.mxu0 %vm679_vm1, %v242_v48  ;;  %1795 = vmatmul.msk.f32.gmra.mxu1 %vm679_vm1, %v242_v48  ;;  %v2310_v52 = vpop.permute.xlu0 %421  ;;  %3124 = vst [vmem:[#allocation28_spill] sm:$0xff] %v2368_v9  ;;  %v2430_v48 = vpop.f32.mrf.mxu2 }
  0xa2   : > { %3115 = vst [vmem:[#allocation19_spill] sm:$0xff] %v2310_v52 }
  0xa3   : > { %1834 = vmatmul.msk.f32.gmra.mxu3 %vm679_vm1, %v281_v42  ;;  %536 = vperm.xlu1 %1863, %v330_v50  }
  0xa4   : > { %621 = vperm.xlu2 %1864, %v347_v16   ;;  %v248_v16 = vld [vmem:[%s3048_s1 + $0xb8] sm:$0xff] }
  0xa5   : > { %1770 = vmatmul.msk.f32.gmra.mxu2 %vm679_vm1, %v282_v53  ;;  %v2320_v55 = vpop.permute.xlu1 %426 }
  0xa6   : > { %3116 = vst [vmem:[#allocation20_spill] sm:$0xff] %v2320_v55  ;;  %v2325_v57 = vpop.f32.mrf.mxu0  ;;  %v2327_v58 = vpop.f32.mrf.mxu1 }
  0xa7   : > { %3117 = vst [vmem:[#allocation21_spill] sm:$0xff] %v2327_v58  ;;  %v2332_v60 = vpop.f32.mrf.mxu3  ;;  %531 = vperm.xlu0 %1862, %v329_v54   ;;  %v2396_v25 = vpop.permute.xlu2 %596 }
  0xa8   : > { %3118 = vst [vmem:[#allocation22_spill] sm:$0xff] %v2332_v60 }
  0xa9   : > { %1731 = vmatmul.msk.f32.gmra.mxu0 %vm679_vm1, %v243_v59  ;;  %1796 = vmatmul.msk.f32.gmra.mxu1 %vm679_vm1, %v243_v59  ;;  %v2341_v63 = vpop.permute.xlu0 %436  ;;  %v247_v59 = vld [vmem:[%s3048_s1 + $0xb0] sm:$0xff] }
  0xaa   : > { %3120 = vst [vmem:[#allocation24_spill] sm:$0xff] %v2341_v63 }
  0xab   : > { %1835 = vmatmul.msk.f32.gmra.mxu3 %vm679_vm1, %v282_v53  ;;  %616 = vperm.xlu1 %1863, %v346_v61   ;;  %v344_v53 = vld [vmem:[%s3049_s2 + $0x188] sm:$0xff] }
  0xac   : > { %526 = vperm.xlu2 %1864, %v328_v32   ;;  %v288_v32 = vld [vmem:[%s3048_s1 + $0x1f8] sm:$0xff] }
  0xad   : > { %1771 = vmatmul.msk.f32.gmra.mxu2 %vm679_vm1, %v283_v0  ;;  %v2351_v2 = vpop.permute.xlu1 %441 }
  0xae   : > { %3121 = vst [vmem:[#allocation25_spill] sm:$0xff] %v2351_v2  ;;  %v2356_v4 = vpop.f32.mrf.mxu0  ;;  %v2358_v5 = vpop.f32.mrf.mxu1 }
  0xaf   : > { %3122 = vst [vmem:[#allocation26_spill] sm:$0xff] %v2358_v5  ;;  %v2363_v7 = vpop.f32.mrf.mxu3  ;;  %611 = vperm.xlu0 %1862, %v345_v1   ;;  %v2421_v42 = vpop.permute.xlu2 %676 }
  0xb0   : > { %3123 = vst [vmem:[#allocation27_spill] sm:$0xff] %v2363_v7 }
  0xb1   : > { %1732 = vmatmul.msk.f32.gmra.mxu0 %vm679_vm1, %v244_v6  ;;  %1797 = vmatmul.msk.f32.gmra.mxu1 %vm679_vm1, %v244_v6  ;;  %v2372_v10 = vpop.permute.xlu0 %451  ;;  %3133 = vst [vmem:[#allocation37_spill] sm:$0xff] %v2421_v42  ;;  %v2456_v6 = vpop.f32.mrf.mxu2 }
  0xb2   : > { %3125 = vst [vmem:[#allocation29_spill] sm:$0xff] %v2372_v10 }
  0xb3   : > { %1836 = vmatmul.msk.f32.gmra.mxu3 %vm679_vm1, %v283_v0  ;;  %521 = vperm.xlu1 %1863, %v327_v8  }
  0xb4   : > { %606 = vperm.xlu2 %1864, %v344_v53  }
  0xb5   : > { %1772 = vmatmul.msk.f32.gmra.mxu2 %vm679_vm1, %v284_v11  ;;  %v2382_v14 = vpop.permute.xlu1 %516 }
  0xb6   : > { %3126 = vst [vmem:[#allocation30_spill] sm:$0xff] %v2382_v14  ;;  %v2387_v18 = vpop.f32.mrf.mxu0  ;;  %v2389_v19 = vpop.f32.mrf.mxu1 }
  0xb7   : > { %3127 = vst [vmem:[#allocation31_spill] sm:$0xff] %v2389_v19  ;;  %v2394_v21 = vpop.f32.mrf.mxu3  ;;  %601 = vperm.xlu0 %1862, %v343_v12   ;;  %v2446_v0 = vpop.permute.xlu2 %671 }
  0xb8   : > { %3128 = vst [vmem:[#allocation32_spill] sm:$0xff] %v2394_v21 }
  0xb9   : > { %1733 = vmatmul.msk.f32.gmra.mxu0 %vm679_vm1, %v245_v20  ;;  %1798 = vmatmul.msk.f32.gmra.mxu1 %vm679_vm1, %v245_v20  ;;  %v2400_v27 = vpop.permute.xlu0 %506  ;;  %3136 = vst [vmem:[#allocation40_spill] sm:$0xff] %v2446_v0 }
  0xba   : > { %3129 = vst [vmem:[#allocation33_spill] sm:$0xff] %v2400_v27 }
  0xbb   : > { %1837 = vmatmul.msk.f32.gmra.mxu3 %vm679_vm1, %v284_v11  ;;  %1429 = vperm.xlu1 %1863, %v1426_v24  }
  0xbd   : > { %1773 = vmatmul.msk.f32.gmra.mxu2 %vm679_vm1, %v285_v28  ;;  %v2407_v29 = vpop.permute.xlu1 %501 }
  0xbe   : > { %3130 = vst [vmem:[#allocation34_spill] sm:$0xff] %v2407_v29  ;;  %v2412_v33 = vpop.f32.mrf.mxu0  ;;  %v2414_v35 = vpop.f32.mrf.mxu1 }
  0xbf   : > { %3131 = vst [vmem:[#allocation35_spill] sm:$0xff] %v2414_v35  ;;  %v2419_v39 = vpop.f32.mrf.mxu3  ;;  %v2468_v24 = vpop.permute.xlu2 %666 }
  0xc0   : > { %3132 = vst [vmem:[#allocation36_spill] sm:$0xff] %v2419_v39 }
  0xc1   : > { %1734 = vmatmul.msk.f32.gmra.mxu0 %vm679_vm1, %v246_v38  ;;  %1799 = vmatmul.msk.f32.gmra.mxu1 %vm679_vm1, %v246_v38  ;;  %v2425_v43 = vpop.permute.xlu0 %496  ;;  %3139 = vst [vmem:[#allocation43_spill] sm:$0xff] %v2468_v24 }
  0xc2   : > { %3134 = vst [vmem:[#allocation38_spill] sm:$0xff] %v2425_v43 }
  0xc3   : > { %1838 = vmatmul.msk.f32.gmra.mxu3 %vm679_vm1, %v285_v28 }
  0xc5   : > { %1774 = vmatmul.msk.f32.gmra.mxu2 %vm679_vm1, %v286_v45  ;;  %v2434_v50 = vpop.permute.xlu1 %591 }
  0xc6   : > { %v2439_v54 = vpop.f32.mrf.mxu0  ;;  %v2441_v56 = vpop.f32.mrf.mxu1 }
  0xc7   : > { %3135 = vst [vmem:[#allocation39_spill] sm:$0xff] %v2441_v56  ;;  %v1237_v61 = vpop.f32.mrf.mxu3  ;;  %v2500_v21 = vpop.permute.xlu2 %661 }
  0xc8   : > { %3145 = vst [vmem:[#allocation49_spill] sm:$0xff] %v2500_v21 }
  0xc9   : > { %1735 = vmatmul.msk.f32.gmra.mxu0 %vm679_vm1, %v247_v59  ;;  %1800 = vmatmul.msk.f32.gmra.mxu1 %vm679_vm1, %v247_v59  ;;  %v2450_v1 = vpop.permute.xlu0 %491  ;;  %v249_v59 = vld [vmem:[%s3048_s1 + $0xc0] sm:$0xff] }
  0xca   : > { %3137 = vst [vmem:[#allocation41_spill] sm:$0xff] %v2450_v1  ;;  %v256_v1 = vld [vmem:[%s3048_s1 + $0xf8] sm:$0xff] }
  0xcb   : > { %1839 = vmatmul.msk.f32.gmra.mxu3 %vm679_vm1, %v286_v45 }
  0xcd   : > { %1775 = vmatmul.msk.f32.gmra.mxu2 %vm679_vm1, %v287_v3  ;;  %v2459_v8 = vpop.permute.xlu1 %586 }
  0xce   : > { %v2461_v11 = vpop.f32.mrf.mxu0  ;;  %v2463_v12 = vpop.f32.mrf.mxu1 }
  0xcf   : > { %3138 = vst [vmem:[#allocation42_spill] sm:$0xff] %v2463_v12  ;;  %v1240_v20 = vpop.f32.mrf.mxu3  ;;  %v2524_v58 = vpop.permute.xlu2 %656 }
  0xd0   : > { %3151 = vst [vmem:[#allocation55_spill] sm:$0xff] %v2524_v58 }
  0xd1   : > { %1736 = vmatmul.msk.f32.gmra.mxu0 %vm679_vm1, %v248_v16  ;;  %1801 = vmatmul.msk.f32.gmra.mxu1 %vm679_vm1, %v248_v16  ;;  %v2472_v28 = vpop.permute.xlu0 %486  ;;  %v2488_v16 = vpop.f32.mrf.mxu2 }
  0xd2   : > { %3140 = vst [vmem:[#allocation44_spill] sm:$0xff] %v2472_v28 }
  0xd3   : > { %1840 = vmatmul.msk.f32.gmra.mxu3 %vm679_vm1, %v287_v3  ;;  %v2496_v3 = vadd.f32 %v1240_v20, %v2459_v8 }
  0xd5   : > { %1776 = vmatmul.msk.f32.gmra.mxu2 %vm679_vm1, %v288_v32  ;;  %v2479_v38 = vpop.permute.xlu1 %581  ;;  %3143 = vst [vmem:[#allocation47_spill] sm:$0xff] %v2496_v3 }
  0xd6   : > { %v2481_v45 = vpop.f32.mrf.mxu0  ;;  %v2483_v53 = vpop.f32.mrf.mxu1  ;;  %v2522_v3 = vadd.f32 %v1237_v61, %v2479_v38 }
  0xd7   : > { %3141 = vst [vmem:[#allocation45_spill] sm:$0xff] %v2483_v53  ;;  %v1243_v49 = vpop.f32.mrf.mxu3  ;;  %v252_v53 = vld [vmem:[%s3048_s1 + $0xd8] sm:$0xff] }
  0xd8   : > { %v2491_v60 = vadd.f32 %v1243_v49, %v2434_v50  ;;  %v250_v49 = vld [vmem:[%s3048_s1 + $0xc8] sm:$0xff]  ;;  %3150 = vst [vmem:[#allocation54_spill] sm:$0xff] %v2522_v3  ;;  %v2543_v3 = vpop.permute.xlu2 %651 }
  0xd9   : > { %1737 = vmatmul.msk.f32.gmra.mxu0 %vm679_vm1, %v249_v59  ;;  %1802 = vmatmul.msk.f32.gmra.mxu1 %vm679_vm1, %v249_v59  ;;  %v2498_v7 = vpop.permute.xlu0 %481  ;;  %3156 = vst [vmem:[#allocation60_spill] sm:$0xff] %v2543_v3 }
  0xda   : > { %3142 = vst [vmem:[#allocation46_spill] sm:$0xff] %v2491_v60  ;;  %v2512_v60 = vpop.f32.mrf.mxu2 }
  0xdb   : > { %3144 = vst [vmem:[#allocation48_spill] sm:$0xff] %v2498_v7  ;;  %1841 = vmatmul.msk.f32.gmra.mxu3 %vm679_vm1, %v288_v32 }
  0xdd   : > { %v2503_v39 = vpop.permute.xlu1 %576 }
  0xde   : > { %3146 = vst [vmem:[#allocation50_spill] sm:$0xff] %v2503_v39  ;;  %v2505_v37 = vpop.f32.mrf.mxu0  ;;  %v2507_v47 = vpop.f32.mrf.mxu1 }
  0xdf   : > { %3147 = vst [vmem:[#allocation51_spill] sm:$0xff] %v2507_v47  ;;  %v1246_v59 = vpop.f32.mrf.mxu3 }
  0xe0   : > { %v2517_v20 = vadd.f32 %v1246_v59, %v2396_v25 }
  0xe1   : > { %1738 = vmatmul.msk.f32.gmra.mxu0 %vm679_vm1, %v250_v49  ;;  %1803 = vmatmul.msk.f32.gmra.mxu1 %vm679_vm1, %v250_v49  ;;  %v2519_v32 = vpop.permute.xlu0 %476  ;;  %v251_v49 = vld [vmem:[%s3048_s1 + $0xd0] sm:$0xff] }
  0xe2   : > { %3148 = vst [vmem:[#allocation52_spill] sm:$0xff] %v2517_v20  ;;  %v2541_v59 = vpop.f32.mrf.mxu2 }
  0xe3   : > { %3149 = vst [vmem:[#allocation53_spill] sm:$0xff] %v2519_v32 }
  0xe5   : > { %v2526_v5 = vpop.permute.xlu1 %571 }
  0xe6   : > { %3152 = vst [vmem:[#allocation56_spill] sm:$0xff] %v2526_v5  ;;  %v2528_v19 = vpop.f32.mrf.mxu0  ;;  %v2530_v35 = vpop.f32.mrf.mxu1 }
  0xe7   : > { %3153 = vst [vmem:[#allocation57_spill] sm:$0xff] %v2530_v35  ;;  %v2535_v56 = vpop.f32.mrf.mxu3 }
  0xe8   : > { %3154 = vst [vmem:[#allocation58_spill] sm:$0xff] %v2535_v56 }
  0xe9   : > { %1739 = vmatmul.msk.f32.gmra.mxu0 %vm679_vm1, %v251_v49  ;;  %1804 = vmatmul.msk.f32.gmra.mxu1 %vm679_vm1, %v251_v49  ;;  %v2539_v61 = vpop.permute.xlu0 %471 }
  0xea   : > { %3155 = vst [vmem:[#allocation59_spill] sm:$0xff] %v2539_v61  ;;  %v2558_v35 = vpop.f32.mrf.mxu2  ;;  %v255_v61 = vld [vmem:[%s3048_s1 + $0xf0] sm:$0xff] }
  0xed   : > { %v2552_v56 = vpop.permute.xlu1 %566 }
  0xee   : > { %v929_v20 = vpop.f32.mrf.mxu0  ;;  %v2545_v12 = vpop.f32.mrf.mxu1  ;;  %3159 = vst [vmem:[#allocation63_spill] sm:$0xff] %v2552_v56 }
  0xef   : > { %3157 = vst [vmem:[#allocation61_spill] sm:$0xff] %v2545_v12  ;;  %v2550_v47 = vpop.f32.mrf.mxu3  ;;  %v253_v12 = vld [vmem:[%s3048_s1 + $0xe0] sm:$0xff] }
  0xf0   : > { %3158 = vst [vmem:[#allocation62_spill] sm:$0xff] %v2550_v47  ;;  %v2567_v47 = vpop.permute.xlu2 %646 }
  0xf1   : > { %1740 = vmatmul.msk.f32.gmra.mxu0 %vm679_vm1, %v252_v53  ;;  %1805 = vmatmul.msk.f32.gmra.mxu1 %vm679_vm1, %v252_v53  ;;  %v2556_v49 = vpop.permute.xlu0 %466  ;;  %3162 = vst [vmem:[#allocation66_spill] sm:$0xff] %v2567_v47 }
  0xf2   : > { %3160 = vst [vmem:[#allocation64_spill] sm:$0xff] %v2556_v49  ;;  %v2580_v2 = vpop.f32.mrf.mxu2 }
  0xf5   : > { %v2571_v53 = vpop.permute.xlu1 %561 }
  0xf6   : > { %v932_v3 = vpop.f32.mrf.mxu0  ;;  %v2560_v58 = vpop.f32.mrf.mxu1  ;;  %3163 = vst [vmem:[#allocation67_spill] sm:$0xff] %v2571_v53 }
  0xf7   : > { %3161 = vst [vmem:[#allocation65_spill] sm:$0xff] %v2560_v58  ;;  %v2565_v21 = vpop.f32.mrf.mxu3  ;;  %v254_v58 = vld [vmem:[%s3048_s1 + $0xe8] sm:$0xff]  ;;  %v933_v9 = vadd.f32 %v932_v3, %v2310_v52 }
  0xf8   : > { %v2590_v10 = vpop.permute.xlu2 %641 }
  0xf9   : > { %1741 = vmatmul.msk.f32.gmra.mxu0 %vm679_vm1, %v253_v12  ;;  %1806 = vmatmul.msk.f32.gmra.mxu1 %vm679_vm1, %v253_v12  ;;  %v2573_v24 = vpop.permute.xlu0 %461 }
  0xfd   : > { %v2588_v47 = vpop.permute.xlu1 %556 }
  0xfe   : > { %v935_v0 = vpop.f32.mrf.mxu0  ;;  %v2575_v42 = vpop.f32.mrf.mxu1  ;;  %3166 = vst [vmem:[#allocation70_spill] sm:$0xff] %v2588_v47 }
  0xff   : > { %3164 = vst [vmem:[#allocation68_spill] sm:$0xff] %v2575_v42  ;;  %v2582_v62 = vpop.f32.mrf.mxu3 }
 0x100   : > { %3165 = vst [vmem:[#allocation69_spill] sm:$0xff] %v2582_v62  ;;  %v2599_v62 = vpop.f32.mrf.mxu2  ;;  %v2607_v7 = vpop.permute.xlu2 %636 }
 0x101   : > { %1742 = vmatmul.msk.f32.gmra.mxu0 %vm679_vm1, %v254_v58  ;;  %1807 = vmatmul.msk.f32.gmra.mxu1 %vm679_vm1, %v254_v58  ;;  %v2586_v12 = vpop.permute.xlu0 %456 }
 0x105   : > { %v2605_v47 = vpop.permute.xlu1 %551 }
 0x106   : > { %v938_v49 = vpop.f32.mrf.mxu0  ;;  %v2592_v42 = vpop.f32.mrf.mxu1  ;;  %3169 = vst [vmem:[#allocation73_spill] sm:$0xff] %v2605_v47 }
 0x107   : > { %3167 = vst [vmem:[#allocation71_spill] sm:$0xff] %v2592_v42  ;;  %v2597_v32 = vpop.f32.mrf.mxu3  ;;  %v939_v43 = vadd.f32 %v938_v49, %v2306_v51 }
 0x108   : > { %v2621_v14 = vpop.f32.mrf.mxu2 }
 0x109   : > { %1743 = vmatmul.msk.f32.gmra.mxu0 %vm679_vm1, %v255_v61  ;;  %1808 = vmatmul.msk.f32.gmra.mxu1 %vm679_vm1, %v255_v61  ;;  %v2603_v58 = vpop.permute.xlu0 %546  ;;  %v936_v61 = vadd.f32 %v935_v0, %v2320_v55 }
 0x10a   : > { %3168 = vst [vmem:[#allocation72_spill] sm:$0xff] %v2603_v58 }
 0x10b   : > { %v1323_v49 = vmax.f32 %v936_v61, 0.0 }
 0x10d   : > { %v2634_v55 = vpop.permute.xlu1 %631 }
 0x10e   : > { %v941_v28 = vpop.f32.mrf.mxu0  ;;  %v2609_v42 = vpop.f32.mrf.mxu1 }
 0x10f   : > { %3170 = vst [vmem:[#allocation74_spill] sm:$0xff] %v2609_v42  ;;  %v942_v29 = vadd.f32 %v941_v28, %v2341_v63  ;;  %v1264_v27 = vpop.f32.mrf.mxu3  ;;  %v1325_v42 = vmax.f32 %v939_v43, 0.0  ;;  %v930_v28 = vadd.f32 %v929_v20, %v2275_v40  ;;  %v1321_v43 = vmax.f32 %v933_v9, 0.0  ;;  %v3189_v40 = vld [vmem:[#allocation41_spill] sm:$0xff]  ;;  %v3193_v63 = vld [vmem:[#allocation59_spill] sm:$0xff] }
 0x110   : > { %v924_v20 = vadd.f32 %v2505_v37, %v2279_v41  ;;  %v3188_v41 = vld [vmem:[#allocation38_spill] sm:$0xff] }
 0x111   : > { %1744 = vmatmul.msk.f32.gmra.mxu0 %vm679_vm1, %v256_v1  ;;  %1809 = vmatmul.msk.f32.gmra.mxu1 %vm679_vm1, %v256_v1  ;;  %v1327_v58 = vmax.f32 %v942_v29, 0.0  ;;  %v2619_v47 = vpop.permute.xlu0 %626  ;;  %v257_v29 = vld [vmem:[%s3048_s1 + $0x100] sm:$0xff]  ;;  %v1319_v61 = vmax.f32 %v930_v28, 0.0 }
 0x112   : > { %v2648_v9 = vadd.f32 %v1264_v27, %v2619_v47  ;;  %v1315_v28 = vmax.f32 %v924_v20, 0.0  ;;  %v258_v27 = vld [vmem:[%s3048_s1 + $0x108] sm:$0xff] }
 0x113   : > { %1442 = vmatpush.msrb.mxu2 %v1327_v58  ;;  %v927_v58 = vadd.f32 %v2528_v19, %v2289_v44  ;;  %v921_v19 = vadd.f32 %v2481_v45, %v2246_v30  ;;  %v2652_v44 = vpop.f32.mrf.mxu2  ;;  %v915_v45 = vadd.f32 %v2439_v54, %v2250_v31  ;;  %v909_v54 = vadd.f32 %v2387_v18, %v2198_v15  ;;  %v259_v18 = vld [vmem:[%s3048_s1 + $0x110] sm:$0xff] }
 0x114   : > { %3173 = vst [vmem:[#allocation77_spill] sm:$0xff] %v2648_v9 }
 0x115   : > { %1443 = vmatpush.msrb.mxu2 %v1325_v42  ;;  %v2636_v42 = vpop.permute.xlu2 %541 }
 0x116   : > { %v2625_v51 = vpop.f32.mrf.mxu0  ;;  %v2627_v0 = vpop.f32.mrf.mxu1 }
 0x117   : > { %3171 = vst [vmem:[#allocation75_spill] sm:$0xff] %v2627_v0  ;;  %1444 = vmatpush.msrb.mxu2 %v1323_v49  ;;  %v1267_v1 = vpop.f32.mrf.mxu3  ;;  %v1317_v0 = vmax.f32 %v927_v58, 0.0  ;;  %v1313_v58 = vmax.f32 %v921_v19, 0.0  ;;  %v1309_v19 = vmax.f32 %v915_v45, 0.0 }
 0x118   : > { %v2641_v3 = vadd.f32 %v1267_v1, %v2634_v55 }
 0x119   : > { %1745 = vmatmul.msk.f32.gmra.mxu0 %vm679_vm1, %v257_v29  ;;  %1810 = vmatmul.msk.f32.gmra.mxu1 %vm679_vm1, %v257_v29  ;;  %v2645_v49 = vpop.permute.xlu0 %531  ;;  %v918_v29 = vadd.f32 %v2461_v11, %v2260_v34  ;;  %v912_v11 = vadd.f32 %v2412_v33, %v2221_v22  ;;  %v3187_v22 = vld [vmem:[#allocation34_spill] sm:$0xff] }
 0x11a   : > { %3172 = vst [vmem:[#allocation76_spill] sm:$0xff] %v2641_v3  ;;  %1445 = vmatpush.msrb.mxu2 %v1321_v43 }
 0x11c   : > { %1446 = vmatpush.msrb.mxu2 %v1319_v61 }
 0x11d   : > { %v2672_v61 = vpop.permute.xlu2 %621 }
 0x11e   : > { %1447 = vmatpush.msrb.mxu2 %v1317_v0  ;;  %v2656_v1 = vpop.f32.mrf.mxu0  ;;  %v2658_v37 = vpop.f32.mrf.mxu1  ;;  %v1311_v0 = vmax.f32 %v918_v29, 0.0  ;;  %v2676_v9 = vadd.f32 %v2597_v32, %v2672_v61  ;;  %v906_v29 = vadd.f32 %v2356_v4, %v2235_v26  ;;  %v1307_v32 = vmax.f32 %v912_v11, 0.0 }
 0x11f   : > { %3174 = vst [vmem:[#allocation78_spill] sm:$0xff] %v2658_v37  ;;  %v1270_v43 = vpop.f32.mrf.mxu3  ;;  %v900_v11 = vadd.f32 %v2294_v46, %v2225_v23 }
 0x120   : > { %1448 = vmatpush.msrb.mxu2 %v1315_v28  ;;  %v2670_v20 = vadd.f32 %v1270_v43, %v2607_v7  ;;  %3176 = vst [vmem:[#allocation80_spill] sm:$0xff] %v2676_v9 }
 0x121   : > { %1746 = vmatmul.msk.f32.gmra.mxu0 %vm679_vm1, %v258_v27  ;;  %1811 = vmatmul.msk.f32.gmra.mxu1 %vm679_vm1, %v258_v27  ;;  %v2680_v28 = vpop.permute.xlu0 %611 }
 0x122   : > { %1449 = vmatpush.msrb.mxu2 %v1313_v58  ;;  %3175 = vst [vmem:[#allocation79_spill] sm:$0xff] %v2670_v20  ;;  %v2684_v33 = vadd.f32 %v2565_v21, %v2680_v28  ;;  %v903_v58 = vadd.f32 %v2325_v57, %v2206_v17  ;;  %v1305_v21 = vmax.f32 %v909_v54, 0.0  ;;  %v1038_v57 = vadd.f32 %v2599_v62, %v2396_v25  ;;  %v3184_v20 = vld [vmem:[#allocation28_spill] sm:$0xff]  ;;  %v3186_v17 = vld [vmem:[#allocation33_spill] sm:$0xff] }
 0x124   : > { %1450 = vmatpush.msrb.mxu2 %v1311_v0  ;;  %3177 = vst [vmem:[#allocation81_spill] sm:$0xff] %v2684_v33  ;;  %v2697_v0 = vpop.f32.mrf.mxu2  ;;  %v897_v33 = vadd.f32 %v2265_v36, %v2193_v13  ;;  %v1301_v54 = vmax.f32 %v903_v58, 0.0  ;;  %v260_v36 = vld [vmem:[%s3048_s1 + $0x118] sm:$0xff]  ;;  %v1032_v58 = vadd.f32 %v2558_v35, %v2459_v8  ;;  %v1026_v35 = vadd.f32 %v2512_v60, %v2503_v39 }
 0x125   : > { %v3185_v13 = vld [vmem:[#allocation30_spill] sm:$0xff] }
 0x126   : > { %1451 = vmatpush.msrb.mxu2 %v1309_v19  ;;  %v2688_v27 = vpop.f32.mrf.mxu0  ;;  %v2690_v43 = vpop.f32.mrf.mxu1  ;;  %v1303_v19 = vmax.f32 %v906_v29, 0.0  ;;  %v1383_v60 = vmax.f32 %v1026_v35, 0.0 }
 0x127   : > { %3178 = vst [vmem:[#allocation82_spill] sm:$0xff] %v2690_v43  ;;  %v1273_v45 = vpop.f32.mrf.mxu3 }
 0x128   : > { %1452 = vmatpush.msrb.mxu2 %v1307_v32  ;;  %v2700_v4 = vadd.f32 %v1273_v45, %v2590_v10  ;;  %v2713_v32 = vld [vmem:[%s3050_s3] sm:$0xf]  ;;  %v1299_v45 = vmax.f32 %v900_v11, 0.0 }
 0x129   : > { %1747 = vmatmul.msk.f32.gmra.mxu0 %vm679_vm1, %v259_v18  ;;  %1812 = vmatmul.msk.f32.gmra.mxu1 %vm679_vm1, %v259_v18  ;;  %v1035_v18 = vadd.f32 %v2580_v2, %v2434_v50  ;;  %v3080_v25 = vperm.slane %v2713_v32, 0  ;;  %v1297_v2 = vmax.f32 %v897_v33, 0.0 }
 0x12a   : > { %3179 = vst [vmem:[#allocation83_spill] sm:$0xff] %v2700_v4  ;;  %1453 = vmatpush.msrb.mxu2 %v1305_v21  ;;  %v1391_v21 = vmax.f32 %v1038_v57, 0.0  ;;  %v261_v57 = vld [vmem:[%s3048_s1 + $0x120] sm:$0xff] }
 0x12b   : > { %v1389_v50 = vmax.f32 %v1035_v18, 0.0 }
 0x12c   : > { %1454 = vmatpush.msrb.mxu2 %v1303_v19  ;;  %v2730_v11 = vpop.f32.mrf.mxu2  ;;  %v1387_v19 = vmax.f32 %v1032_v58, 0.0  ;;  %v1017_v58 = vadd.f32 %v2430_v48, %v2571_v53  ;;  %v263_v48 = vld [vmem:[%s3048_s1 + $0x130] sm:$0xff] }
 0x12e   : > { %1455 = vmatpush.msrb.mxu2 %v1301_v54  ;;  %v2717_v46 = vpop.f32.mrf.mxu0  ;;  %v1162_v29 = vpop.f32.mrf.mxu1  ;;  %v1029_v54 = vadd.f32 %v2541_v59, %v2479_v38  ;;  %v1020_v38 = vadd.f32 %v2456_v6, %v2552_v56 }
 0x12f   : > { %v2723_v62 = vadd.f32 %v1162_v29, %v2586_v12 }
 0x130   : > { %1456 = vmatpush.msrb.mxu2 %v1299_v45  ;;  %v1385_v29 = vmax.f32 %v1029_v54, 0.0  ;;  %v1023_v45 = vadd.f32 %v2488_v16, %v2526_v5  ;;  %v262_v16 = vld [vmem:[%s3048_s1 + $0x128] sm:$0xff] }
 0x131   : > { %3180 = vst [vmem:[#allocation84_spill] sm:$0xff] %v2723_v62  ;;  %1748 = vmatmul.msk.f32.gmra.mxu0 %vm679_vm1, %v260_v36  ;;  %1813 = vmatmul.msk.f32.gmra.mxu1 %vm679_vm1, %v260_v36 }
 0x132   : > { %1457 = vmatpush.msrb.mxu2 %v1297_v2  ;;  %v1381_v36 = vmax.f32 %v1023_v45, 0.0 }
 0x133   : > { %1458 = vmatmul.f32.vlgmr.msrb.gmra.mxu2 %v3080_v25 }
 0x134   : > { %1482 = vmatpush.msra.mxu2 %v1391_v21  ;;  %v2752_v59 = vpop.f32.mrf.mxu2  ;;  %v1379_v21 = vmax.f32 %v1020_v38, 0.0 }
 0x136   : > { %v2738_v8 = vpop.f32.mrf.mxu0  ;;  %v1165_v33 = vpop.f32.mrf.mxu1  ;;  %1483 = vmatpush.msra.mxu2 %v1389_v50  ;;  %v1377_v50 = vmax.f32 %v1017_v58, 0.0 }
 0x137   : > { %v2744_v18 = vadd.f32 %v1165_v33, %v2573_v24  ;;  %v1873_v33 = vld [vmem:[%s3048_s1 + $0x138] sm:$0xff] }
 0x138   : > { %1484 = vmatpush.msra.mxu2 %v1387_v19 }
 0x139   : > { %3181 = vst [vmem:[#allocation85_spill] sm:$0xff] %v2744_v18  ;;  %1749 = vmatmul.msk.f32.gmra.mxu0 %vm679_vm1, %v261_v57  ;;  %1814 = vmatmul.msk.f32.gmra.mxu1 %vm679_vm1, %v261_v57 }
 0x13a   : > { %1485 = vmatpush.msra.mxu2 %v1385_v29 }
 0x13c   : > { %1486 = vmatpush.msra.mxu2 %v1383_v60  ;;  %v2763_v6 = vpop.f32.mrf.mxu2 }
 0x13e   : > { %v2756_v2 = vpop.f32.mrf.mxu0  ;;  %1487 = vmatpush.msra.mxu2 %v1381_v36  ;;  %v2778_v60 = vpop.f32.mrf.mxu1 }
 0x13f   : > { %3182 = vst [vmem:[#allocation86_spill] sm:$0xff] %v2778_v60  ;;  %v3192_v60 = vld [vmem:[#allocation53_spill] sm:$0xff] }
 0x140   : > { %1488 = vmatpush.msra.mxu2 %v1379_v21 }
 0x141   : > { %1750 = vmatmul.msk.f32.gmra.mxu0 %vm679_vm1, %v262_v16  ;;  %1815 = vmatmul.msk.f32.gmra.mxu1 %vm679_vm1, %v262_v16 }
 0x142   : > { %1489 = vmatpush.msra.mxu2 %v1377_v50 }
 0x144   : > { %v2770_v35 = vpop.f32.mrf.mxu2 }
 0x146   : > { %v962_v19 = vpop.f32.mrf.mxu0  ;;  %v2782_v58 = vpop.f32.mrf.mxu1 }
 0x147   : > { %3183 = vst [vmem:[#allocation87_spill] sm:$0xff] %v2782_v58 }
 0x149   : > { %1751 = vmatmul.msk.f32.gmra.mxu0 %vm679_vm1, %v263_v48  ;;  %1816 = vmatmul.msk.f32.gmra.mxu1 %vm679_vm1, %v263_v48 }
 0x14c   : > { %v2776_v29 = vpop.f32.mrf.mxu2 }
 0x14e   : > { %v965_v54 = vpop.f32.mrf.mxu0  ;;  %v2786_v50 = vpop.f32.mrf.mxu1 }
 0x14f   : > { %v966_v58 = vadd.f32 %v965_v54, %v3192_v60 }
 0x151   : > { %1752 = vmatmul.msk.f32.gmra.mxu0 %vm679_vm1, %v1873_v33 }
 0x154   : > { %v2780_v38 = vpop.f32.mrf.mxu2 }
 0x156   : > { %v968_v57 = vpop.f32.mrf.mxu0  ;;  %v2790_v53 = vpop.f32.mrf.mxu1 }
 0x15c   : > { %v2784_v21 = vpop.f32.mrf.mxu2 }
 0x15e   : > { %v971_v45 = vpop.f32.mrf.mxu0  ;;  %v2794_v9 = vpop.f32.mrf.mxu1 }
 0x164   : > { %v2788_v25 = vpop.f32.mrf.mxu2 }
 0x166   : > { %v974_v36 = vpop.f32.mrf.mxu0  ;;  %v2802_v30 = vpop.f32.mrf.mxu1 }
 0x16c   : > { %v2792_v56 = vpop.f32.mrf.mxu2 }
 0x16e   : > { %v977_v16 = vpop.f32.mrf.mxu0 }
 0x16f   : > { %v978_v62 = vadd.f32 %v977_v16, %v3188_v41 }
 0x174   : > { %v2796_v39 = vpop.f32.mrf.mxu2 }
 0x176   : > { %v980_v48 = vpop.f32.mrf.mxu0 }
 0x177   : > { %v981_v31 = vadd.f32 %v980_v48, %v3187_v22  ;;  %v3191_v48 = vld [vmem:[#allocation48_spill] sm:$0xff] }
 0x179   : > { %v1353_v52 = vmax.f32 %v981_v31, 0.0 }
 0x17c   : > { %v1079_v18 = vpop.f32.mrf.mxu2 }
 0x17e   : > { %v983_v33 = vpop.f32.mrf.mxu0 }
 0x17f   : > { %v984_v26 = vadd.f32 %v983_v33, %v3186_v17 }
 0x181   : > { %v1355_v37 = vmax.f32 %v984_v26, 0.0  ;;  %v2811_v26 = vpop.f32.mrf.mxu1 }
 0x186   : > { %v986_v5 = vpop.f32.mrf.mxu0 }
 0x187   : > { %v987_v4 = vadd.f32 %v986_v5, %v3184_v20  ;;  %v975_v5 = vadd.f32 %v974_v36, %v3189_v40  ;;  %v963_v36 = vadd.f32 %v962_v19, %v3193_v63  ;;  %v3195_v19 = vld [vmem:[#allocation29_spill] sm:$0xff] }
 0x189   : > { %v1357_v34 = vmax.f32 %v987_v4, 0.0  ;;  %v969_v4 = vadd.f32 %v968_v57, %v3191_v48  ;;  %v957_v57 = vadd.f32 %v2738_v8, %v2573_v24  ;;  %v1341_v54 = vmax.f32 %v963_v36, 0.0  ;;  %v3197_v36 = vld [vmem:[#allocation25_spill] sm:$0xff] }
 0x18b   : > { %v1345_v31 = vmax.f32 %v969_v4, 0.0  ;;  %v951_v4 = vadd.f32 %v2688_v27, %v3195_v19 }
 0x18e   : > { %v989_v3 = vpop.f32.mrf.mxu0 }
 0x18f   : > { %v990_v23 = vadd.f32 %v989_v3, %v3185_v13  ;;  %v3190_v3 = vld [vmem:[#allocation44_spill] sm:$0xff] }
 0x190   : > { %v972_v33 = vadd.f32 %v971_v45, %v3190_v3  ;;  %v3194_v45 = vld [vmem:[#allocation64_spill] sm:$0xff] }
 0x191   : > { %v1359_v15 = vmax.f32 %v990_v23, 0.0  ;;  %v1351_v23 = vmax.f32 %v978_v62, 0.0  ;;  %v1343_v62 = vmax.f32 %v966_v58, 0.0  ;;  %v3196_v58 = vld [vmem:[#allocation23_spill] sm:$0xff] }
 0x192   : > { %v1347_v16 = vmax.f32 %v972_v33, 0.0 }
 0x193   : > { %1462 = vmatpush.msrb.mxu3 %v1359_v15  ;;  %v1349_v15 = vmax.f32 %v975_v5, 0.0  ;;  %v954_v5 = vadd.f32 %v2717_v46, %v2586_v12  ;;  %v945_v12 = vadd.f32 %v2625_v51, %v3197_v36  ;;  %v1333_v46 = vmax.f32 %v951_v4, 0.0  ;;  %v3202_v4 = vld [vmem:[#allocation49_spill] sm:$0xff] }
 0x195   : > { %1463 = vmatpush.msrb.mxu3 %v1357_v34  ;;  %v1335_v24 = vmax.f32 %v954_v5, 0.0 }
 0x196   : > { %v2805_v43 = vpop.f32.mrf.mxu0 }
 0x197   : > { %1464 = vmatpush.msrb.mxu3 %v1355_v37  ;;  %v1082_v37 = vpop.f32.mrf.mxu2 }
 0x199   : > { %1465 = vmatpush.msrb.mxu3 %v1353_v52  ;;  %v960_v52 = vadd.f32 %v2756_v2, %v3194_v45  ;;  %v2826_v2 = vpop.f32.mrf.mxu1 }
 0x19b   : > { %1466 = vmatpush.msrb.mxu3 %v1351_v23  ;;  %v1339_v33 = vmax.f32 %v960_v52, 0.0 }
 0x19d   : > { %1467 = vmatpush.msrb.mxu3 %v1349_v15  ;;  %v1337_v15 = vmax.f32 %v957_v57, 0.0 }
 0x19e   : > { %v2813_v34 = vpop.f32.mrf.mxu0 }
 0x19f   : > { %1468 = vmatpush.msrb.mxu3 %v1347_v16  ;;  %v948_v16 = vadd.f32 %v2656_v1, %v3196_v58  ;;  %v1085_v8 = vpop.f32.mrf.mxu2  ;;  %v3200_v1 = vld [vmem:[#allocation40_spill] sm:$0xff] }
 0x1a0   : > { %v1083_v5 = vadd.f32 %v1082_v37, %v3200_v1 }
 0x1a1   : > { %1469 = vmatpush.msrb.mxu3 %v1345_v31  ;;  %v2832_v31 = vpop.f32.mrf.mxu3  ;;  %v1331_v52 = vmax.f32 %v948_v16, 0.0  ;;  %v2840_v51 = vpop.f32.mrf.mxu1  ;;  %v1077_v16 = vadd.f32 %v2796_v39, %v3202_v4 }
 0x1a2   : > { %3198 = vst [vmem:[#allocation28_spill] sm:$0xff] %v2832_v31 }
 0x1a3   : > { %1470 = vmatpush.msrb.mxu3 %v1343_v62  ;;  %v3199_v62 = vld [vmem:[#allocation37_spill] sm:$0xff] }
 0x1a4   : > { %v1086_v27 = vadd.f32 %v1085_v8, %v3199_v62  ;;  %v3203_v8 = vld [vmem:[#allocation55_spill] sm:$0xff] }
 0x1a5   : > { %1471 = vmatpush.msrb.mxu3 %v1341_v54  ;;  %v3098_v54 = vperm.slane %v2713_v32, 1 }
 0x1a6   : > { %v2822_v23 = vpop.f32.mrf.mxu0  ;;  %v1423_v19 = vmax.f32 %v1086_v27, 0.0 }
 0x1a7   : > { %1472 = vmatpush.msrb.mxu3 %v1339_v33  ;;  %v1329_v33 = vmax.f32 %v945_v12, 0.0  ;;  %v1074_v12 = vadd.f32 %v2792_v56, %v3203_v8  ;;  %v1065_v56 = vadd.f32 %v2780_v38, %v2590_v10  ;;  %v1056_v10 = vadd.f32 %v2763_v6, %v2619_v47  ;;  %v2880_v6 = vpop.permute.xlu0 %601 }
 0x1a8   : > { %v1047_v47 = vadd.f32 %v2697_v0, %v2680_v28 }
 0x1a9   : > { %1473 = vmatpush.msrb.mxu3 %v1337_v15  ;;  %v3201_v15 = vld [vmem:[#allocation43_spill] sm:$0xff]  ;;  %v2848_v37 = vpop.f32.mrf.mxu3  ;;  %v1415_v39 = vmax.f32 %v1074_v12, 0.0  ;;  %v1409_v12 = vmax.f32 %v1065_v56, 0.0 }
 0x1aa   : > { %v1080_v58 = vadd.f32 %v1079_v18, %v3201_v15  ;;  %3204 = vst [vmem:[#allocation30_spill] sm:$0xff] %v2848_v37 }
 0x1ab   : > { %1474 = vmatpush.msrb.mxu3 %v1335_v24  ;;  %v1421_v24 = vmax.f32 %v1083_v5, 0.0  ;;  %v2860_v5 = vpop.permute.xlu2 %526 }
 0x1ad   : > { %1475 = vmatpush.msrb.mxu3 %v1333_v46  ;;  %v1419_v46 = vmax.f32 %v1080_v58, 0.0 }
 0x1ae   : > { %v2835_v57 = vpop.f32.mrf.mxu0 }
 0x1af   : > { %1476 = vmatpush.msrb.mxu3 %v1331_v52  ;;  %v3205_v52 = vld [vmem:[#allocation60_spill] sm:$0xff] }
 0x1b0   : > { %v1071_v27 = vadd.f32 %v2788_v25, %v3205_v52  ;;  %v1062_v25 = vadd.f32 %v2776_v29, %v2607_v7 }
 0x1b1   : > { %1477 = vmatpush.msrb.mxu3 %v1329_v33  ;;  %v1417_v33 = vmax.f32 %v1077_v16, 0.0 }
 0x1b2   : > { %1478 = vmatmul.f32.vlgmr.msrb.gmra.mxu3 %v3098_v54  ;;  %v3206_v54 = vld [vmem:[#allocation66_spill] sm:$0xff]  ;;  %v1413_v58 = vmax.f32 %v1071_v27, 0.0 }
 0x1b3   : > { %1502 = vmatpush.msra.mxu3 %v1423_v19  ;;  %v1068_v31 = vadd.f32 %v2784_v21, %v3206_v54  ;;  %v2856_v19 = vpop.permute.xlu1 %536  ;;  %v1059_v21 = vadd.f32 %v2770_v35, %v2634_v55  ;;  %v1403_v55 = vmax.f32 %v1056_v10, 0.0  ;;  %v2876_v35 = vpop.permute.xlu2 %606 }
 0x1b5   : > { %1503 = vmatpush.msra.mxu3 %v1421_v24  ;;  %v1195_v24 = vpop.f32.mrf.mxu1  ;;  %v1411_v37 = vmax.f32 %v1068_v31, 0.0  ;;  %v1405_v38 = vmax.f32 %v1059_v21, 0.0  ;;  %v1053_v31 = vadd.f32 %v2752_v59, %v2672_v61  ;;  %v1044_v59 = vadd.f32 %v2652_v44, %v2876_v35 }
 0x1b6   : > { %v2850_v18 = vpop.f32.mrf.mxu0  ;;  %v1196_v28 = vadd.f32 %v1195_v24, %v3184_v20  ;;  %v1190_v20 = vadd.f32 %v2826_v2, %v3187_v22  ;;  %v1002_v22 = vadd.f32 %v2835_v57, %v2856_v19  ;;  %v996_v57 = vadd.f32 %v2813_v34, %v2860_v5 }
 0x1b7   : > { %1504 = vmatpush.msra.mxu3 %v1419_v46  ;;  %v2866_v46 = vpop.f32.mrf.mxu3  ;;  %v1395_v21 = vmax.f32 %v1044_v59, 0.0  ;;  %v999_v59 = vadd.f32 %v2822_v23, %v2645_v49 }
 0x1b8   : > { %v1358_v24 = vmax.f32 %v1196_v28, 0.0  ;;  %v3210_v28 = vld [vmem:[#allocation24_spill] sm:$0xff] }
 0x1b9   : > { %1505 = vmatpush.msra.mxu3 %v1417_v33  ;;  %v1407_v33 = vmax.f32 %v1062_v25, 0.0 }
 0x1bb   : > { %1506 = vmatpush.msra.mxu3 %v1415_v39  ;;  %v2872_v7 = vpop.permute.xlu1 %616  ;;  %v1401_v39 = vmax.f32 %v1053_v31, 0.0  ;;  %v1437_v31 = vperm.slane %v2713_v32, 3 }
 0x1bc   : > { %v1050_v29 = vadd.f32 %v2730_v11, %v2872_v7  ;;  %v1397_v11 = vmax.f32 %v1047_v47, 0.0 }
 0x1bd   : > { %1507 = vmatpush.msra.mxu3 %v1413_v58  ;;  %v1041_v58 = vadd.f32 %v2621_v14, %v2880_v6 }
 0x1be   : > { %v1007_v16 = vpop.f32.mrf.mxu0  ;;  %v1399_v61 = vmax.f32 %v1050_v29, 0.0  ;;  %v1193_v29 = vadd.f32 %v2840_v51, %v3186_v17  ;;  %v1187_v51 = vadd.f32 %v2811_v26, %v3188_v41  ;;  %v1181_v41 = vadd.f32 %v2794_v9, %v3190_v3 }
 0x1bf   : > { %1508 = vmatpush.msra.mxu3 %v1411_v37  ;;  %v1198_v37 = vpop.f32.mrf.mxu1  ;;  %v2884_v56 = vpop.f32.mrf.mxu3  ;;  %v1365_v9 = vmax.f32 %v999_v59, 0.0  ;;  %v1175_v3 = vadd.f32 %v2786_v50, %v3192_v60  ;;  %v3215_v60 = vld [vmem:[#allocation86_spill] sm:$0xff] }
 0x1c0   : > { %v1199_v25 = vadd.f32 %v1198_v37, %v3185_v13  ;;  %v3209_v13 = vld [vmem:[#allocation72_spill] sm:$0xff]  ;;  %v1352_v26 = vmax.f32 %v1187_v51, 0.0  ;;  %v1348_v34 = vmax.f32 %v1181_v41, 0.0  ;;  %v1169_v50 = vadd.f32 %v3215_v60, %v3194_v45  ;;  %v3220_v45 = vld [vmem:[#allocation13_spill] sm:$0xff] }
 0x1c1   : > { %1509 = vmatpush.msra.mxu3 %v1409_v12  ;;  %v1393_v12 = vmax.f32 %v1041_v58, 0.0  ;;  %v1008_v37 = vadd.f32 %v1007_v16, %v3209_v13  ;;  %v1356_v16 = vmax.f32 %v1193_v29, 0.0  ;;  %v1367_v58 = vmax.f32 %v1002_v22, 0.0  ;;  %v3218_v22 = vld [vmem:[#allocation19_spill] sm:$0xff]  ;;  %v3221_v41 = vld [vmem:[#allocation61_spill] sm:$0xff] }
 0x1c2   : > { %v1360_v14 = vmax.f32 %v1199_v25, 0.0  ;;  %v1340_v59 = vmax.f32 %v1169_v50, 0.0  ;;  %v3232_v50 = vld [vmem:[#allocation75_spill] sm:$0xff] }
 0x1c3   : > { %1510 = vmatpush.msra.mxu3 %v1407_v33  ;;  %v3207_v33 = vld [vmem:[#allocation73_spill] sm:$0xff]  ;;  %v1371_v2 = vmax.f32 %v1008_v37, 0.0  ;;  %v2918_v25 = vpop.permute.xlu1 %521  ;;  %v3214_v37 = vld [vmem:[#allocation71_spill] sm:$0xff] }
 0x1c4   : > { %v993_v23 = vadd.f32 %v2805_v43, %v2918_v25  ;;  %v1436_v43 = vperm.slane %v2713_v32, 2 }
 0x1c5   : > { %1511 = vmatpush.msra.mxu3 %v1405_v38  ;;  %v3208_v38 = vld [vmem:[#allocation70_spill] sm:$0xff] }
 0x1c6   : > { %v1010_v27 = vpop.f32.mrf.mxu0 }
 0x1c7   : > { %1512 = vmatpush.msra.mxu3 %v1403_v55  ;;  %v1011_v10 = vadd.f32 %v1010_v27, %v3207_v33  ;;  %v2895_v55 = vpop.f32.mrf.mxu1  ;;  %v1005_v27 = vadd.f32 %v2850_v18, %v2636_v42  ;;  %v2904_v17 = vpop.f32.mrf.mxu3  ;;  %v1184_v18 = vadd.f32 %v2802_v30, %v3189_v40  ;;  %v1178_v30 = vadd.f32 %v2790_v53, %v3191_v48  ;;  %v3212_v53 = vld [vmem:[#allocation87_spill] sm:$0xff] }
 0x1c8   : > { %v1172_v48 = vadd.f32 %v3212_v53, %v3193_v63 }
 0x1c9   : > { %1513 = vmatpush.msra.mxu3 %v1401_v39  ;;  %v1373_v47 = vmax.f32 %v1011_v10, 0.0  ;;  %v1350_v40 = vmax.f32 %v1184_v18, 0.0  ;;  %v1363_v10 = vmax.f32 %v996_v57, 0.0 }
 0x1ca   : > { %v1342_v63 = vmax.f32 %v1172_v48, 0.0  ;;  %v3229_v48 = vld [vmem:[#allocation84_spill] sm:$0xff] }
 0x1cb   : > { %1514 = vmatpush.msra.mxu3 %v1399_v61  ;;  %v1354_v61 = vmax.f32 %v1190_v20, 0.0  ;;  %v1361_v20 = vmax.f32 %v993_v23, 0.0  ;;  %v3224_v23 = vld [vmem:[#allocation85_spill] sm:$0xff] }
 0x1cd   : > { %1515 = vmatpush.msra.mxu3 %v1397_v11  ;;  %v1369_v11 = vmax.f32 %v1005_v27, 0.0  ;;  %v3216_v27 = vld [vmem:[#allocation20_spill] sm:$0xff] }
 0x1ce   : > { %v1013_v0 = vpop.f32.mrf.mxu0 }
 0x1cf   : > { %v1014_v44 = vadd.f32 %v1013_v0, %v3208_v38  ;;  %1516 = vmatpush.msra.mxu3 %v1395_v21  ;;  %v2922_v21 = vpop.f32.mrf.mxu1  ;;  %v3211_v0 = vld [vmem:[#allocation74_spill] sm:$0xff]  ;;  %v1291_v29 = vpop.f32.mrf.mxu3 }
 0x1d1   : > { %v1375_v39 = vmax.f32 %v1014_v44, 0.0  ;;  %1517 = vmatpush.msra.mxu3 %v1393_v12  ;;  %v1151_v12 = vadd.f32 %v3211_v0, %v3210_v28  ;;  %v1346_v44 = vmax.f32 %v1178_v30, 0.0  ;;  %v3223_v30 = vld [vmem:[#allocation82_spill] sm:$0xff] }
 0x1d2   : > { %1518 = vmatmul.f32.vlgmr.msra.gmra.mxu3 %v1437_v31 }
 0x1d3   : > { %1542 = vmatpush.msrb.mxu3 %v1360_v14  ;;  %1490 = vmatpush.msra.mxu2 %v1375_v39  ;;  %v3213_v14 = vld [vmem:[#allocation18_spill] sm:$0xff] }
 0x1d4   : > { %v1148_v39 = vadd.f32 %v3214_v37, %v3213_v14  ;;  %v3230_v37 = vld [vmem:[#allocation14_spill] sm:$0xff] }
 0x1d5   : > { %1543 = vmatpush.msrb.mxu3 %v1358_v24  ;;  %1491 = vmatpush.msra.mxu2 %v1373_v47  ;;  %v1344_v24 = vmax.f32 %v1175_v3, 0.0  ;;  %v3217_v47 = vld [vmem:[#allocation68_spill] sm:$0xff]  ;;  %v3225_v3 = vld [vmem:[#allocation15_spill] sm:$0xff] }
 0x1d6   : > { %v1145_v51 = vadd.f32 %v3217_v47, %v3216_v27  ;;  %v3233_v47 = vld [vmem:[#allocation9_spill] sm:$0xff] }
 0x1d7   : > { %1544 = vmatpush.msrb.mxu3 %v1356_v16  ;;  %1492 = vmatpush.msra.mxu2 %v1371_v2  ;;  %v1328_v16 = vmax.f32 %v1151_v12, 0.0  ;;  %v3219_v2 = vld [vmem:[#allocation65_spill] sm:$0xff]  ;;  %v3227_v12 = vld [vmem:[#allocation23_spill] sm:$0xff]  ;;  %v1294_v14 = vpop.f32.mrf.mxu3 }
 0x1d8   : > { %v1142_v18 = vadd.f32 %v3219_v2, %v3218_v22  ;;  %v1324_v57 = vmax.f32 %v1145_v51, 0.0  ;;  %v3234_v51 = vld [vmem:[#allocation45_spill] sm:$0xff]  ;;  %v1295_v22 = vadd.f32 %v1294_v14, %v3199_v62  ;;  %v1289_v62 = vadd.f32 %v2904_v17, %v3201_v15  ;;  %v3245_v14 = vld [vmem:[#allocation26_spill] sm:$0xff] }
 0x1d9   : > { %1545 = vmatpush.msrb.mxu3 %v1354_v61  ;;  %1493 = vmatpush.msra.mxu2 %v1369_v11  ;;  %v1326_v61 = vmax.f32 %v1148_v39, 0.0  ;;  %v2943_v11 = vpop.f32.mrf.mxu1  ;;  %v3231_v39 = vld [vmem:[#allocation51_spill] sm:$0xff]  ;;  %v1283_v17 = vadd.f32 %v2866_v46, %v3203_v8 }
 0x1da   : > { %v1322_v0 = vmax.f32 %v1142_v18, 0.0  ;;  %v3235_v18 = vld [vmem:[#allocation11_spill] sm:$0xff] }
 0x1db   : > { %1546 = vmatpush.msrb.mxu3 %v1352_v26  ;;  %1494 = vmatpush.msra.mxu2 %v1367_v58  ;;  %v1139_v26 = vadd.f32 %v3221_v41, %v3220_v45  ;;  %v3222_v58 = vld [vmem:[#allocation29_spill] sm:$0xff]  ;;  %v1292_v41 = vadd.f32 %v1291_v29, %v3200_v1  ;;  %v1286_v1 = vadd.f32 %v2884_v56, %v3202_v4  ;;  %v3246_v56 = vld [vmem:[#allocation30_spill] sm:$0xff]  ;;  %v1416_v46 = vmax.f32 %v1283_v17, 0.0 }
 0x1dd   : > { %1547 = vmatpush.msrb.mxu3 %v1350_v40  ;;  %1495 = vmatpush.msra.mxu2 %v1365_v9  ;;  %v1160_v40 = vadd.f32 %v3223_v30, %v3222_v58  ;;  %v1338_v9 = vmax.f32 %v3224_v23, 0.0  ;;  %v1320_v60 = vmax.f32 %v1139_v26, 0.0  ;;  %v3238_v58 = vld [vmem:[#allocation39_spill] sm:$0xff]  ;;  %v1424_v23 = vmax.f32 %v1295_v22, 0.0 }
 0x1de   : > { %v1422_v29 = vmax.f32 %v1292_v41, 0.0 }
 0x1df   : > { %1548 = vmatpush.msrb.mxu3 %v1348_v34  ;;  %1496 = vmatpush.msra.mxu2 %v1363_v10  ;;  %v3226_v34 = vld [vmem:[#allocation57_spill] sm:$0xff]  ;;  %v3228_v10 = vld [vmem:[#allocation78_spill] sm:$0xff]  ;;  %v1334_v27 = vmax.f32 %v1160_v40, 0.0 }
 0x1e0   : > { %v1136_v28 = vadd.f32 %v3226_v34, %v3225_v3  ;;  %v1157_v53 = vadd.f32 %v3228_v10, %v3227_v12  ;;  %v3240_v3 = vld [vmem:[#allocation35_spill] sm:$0xff]  ;;  %v3242_v12 = vld [vmem:[#allocation4_spill] sm:$0xff] }
 0x1e1   : > { %1549 = vmatpush.msrb.mxu3 %v1346_v44  ;;  %1497 = vmatpush.msra.mxu2 %v1361_v20  ;;  %v1336_v44 = vmax.f32 %v3229_v48, 0.0  ;;  %v1133_v20 = vadd.f32 %v3231_v39, %v3230_v37  ;;  %v3243_v10 = vld [vmem:[#allocation31_spill] sm:$0xff]  ;;  %v1420_v48 = vmax.f32 %v1289_v62, 0.0  ;;  %v1280_v39 = vadd.f32 %v3246_v56, %v3205_v52  ;;  %v3256_v62 = vld [vmem:[#allocation52_spill] sm:$0xff]  ;;  %v3266_v56 = vld [vmem:[#allocation54_spill] sm:$0xff] }
 0x1e2   : > { %1498 = vmatmul.f32.vlgmr.msra.gmra.mxu2 %v1436_v43  ;;  %v1332_v2 = vmax.f32 %v1157_v53, 0.0  ;;  %v1118_v53 = vadd.f32 %v3243_v10, %v3242_v12  ;;  %v3261_v10 = vld [vmem:[#allocation77_spill] sm:$0xff] }
 0x1e3   : > { %1550 = vmatpush.msrb.mxu3 %v1344_v24  ;;  %1522 = vmatpush.msrb.mxu2 %v1328_v16  ;;  %v1154_v24 = vadd.f32 %v3232_v50, %v3197_v36  ;;  %v1130_v16 = vadd.f32 %v3234_v51, %v3233_v47  ;;  %v1316_v45 = vmax.f32 %v1133_v20, 0.0  ;;  %v2965_v36 = vpop.f32.mrf.mxu1  ;;  %v1418_v20 = vmax.f32 %v1286_v1, 0.0  ;;  %v3248_v50 = vld [vmem:[#allocation21_spill] sm:$0xff]  ;;  %v3249_v47 = vld [vmem:[#allocation28_spill] sm:$0xff]  ;;  %v3259_v1 = vld [vmem:[#allocation46_spill] sm:$0xff] }
 0x1e4   : > { %v1277_v8 = vadd.f32 %v3249_v47, %v3206_v54  ;;  %v1414_v52 = vmax.f32 %v1280_v39, 0.0  ;;  %v1386_v39 = vmax.f32 %v3266_v56, 0.0 }
 0x1e5   : > { %1551 = vmatpush.msrb.mxu3 %v1342_v63  ;;  %1523 = vmatpush.msrb.mxu2 %v1326_v61  ;;  %v1318_v63 = vmax.f32 %v1136_v28, 0.0  ;;  %v3236_v61 = vld [vmem:[#allocation42_spill] sm:$0xff]  ;;  %v1330_v26 = vmax.f32 %v1154_v24, 0.0  ;;  %v1314_v40 = vmax.f32 %v1130_v16, 0.0  ;;  %v3250_v16 = vld [vmem:[#allocation7_spill] sm:$0xff] }
 0x1e6   : > { %v1412_v41 = vmax.f32 %v1277_v8, 0.0  ;;  %v3270_v8 = vld [vmem:[#allocation63_spill] sm:$0xff] }
 0x1e7   : > { %1552 = vmatpush.msrb.mxu3 %v1340_v59  ;;  %1524 = vmatpush.msrb.mxu2 %v1324_v57  ;;  %v1127_v59 = vadd.f32 %v3236_v61, %v3235_v18  ;;  %v3237_v57 = vld [vmem:[#allocation10_spill] sm:$0xff]  ;;  %v3252_v18 = vld [vmem:[#allocation3_spill] sm:$0xff]  ;;  %v3253_v61 = vld [vmem:[#allocation12_spill] sm:$0xff] }
 0x1e8   : > { %v1124_v30 = vadd.f32 %v3238_v58, %v3237_v57 }
 0x1e9   : > { %1553 = vmatpush.msrb.mxu3 %v1338_v9  ;;  %1525 = vmatpush.msrb.mxu2 %v1322_v0  ;;  %v3239_v9 = vld [vmem:[#allocation6_spill] sm:$0xff]  ;;  %v1312_v28 = vmax.f32 %v1127_v59, 0.0  ;;  %v3241_v0 = vperm.slane %v2713_v32, 1  ;;  %v1106_v59 = vadd.f32 %v3253_v61, %v3252_v18  ;;  %v3274_v61 = vld [vmem:[#allocation67_spill] sm:$0xff] }
 0x1ea   : > { %v1121_v34 = vadd.f32 %v3240_v3, %v3239_v9  ;;  %v1310_v15 = vmax.f32 %v1124_v30, 0.0  ;;  %v3255_v30 = vld [vmem:[#allocation79_spill] sm:$0xff]  ;;  %v3257_v9 = vld [vmem:[#allocation76_spill] sm:$0xff] }
 0x1eb   : > { %1554 = vmatpush.msrb.mxu3 %v1336_v44  ;;  %1526 = vmatpush.msrb.mxu2 %v1320_v60  ;;  %v3244_v44 = vld [vmem:[#allocation8_spill] sm:$0xff]  ;;  %v3247_v60 = vld [vmem:[#allocation5_spill] sm:$0xff]  ;;  %v2989_v51 = vpop.f32.mrf.mxu1  ;;  %v1298_v58 = vmax.f32 %v1106_v59, 0.0  ;;  %v1406_v3 = vmax.f32 %v3257_v9, 0.0  ;;  %v3275_v59 = vld [vmem:[#allocation22_spill] sm:$0xff] }
 0x1ec   : > { %v1115_v37 = vadd.f32 %v3245_v14, %v3244_v44  ;;  %v1308_v4 = vmax.f32 %v1121_v34, 0.0  ;;  %v1112_v24 = vadd.f32 %v3248_v50, %v3247_v60  ;;  %v3264_v44 = vld [vmem:[#allocation36_spill] sm:$0xff] }
 0x1ed   : > { %1555 = vmatpush.msrb.mxu3 %v1334_v27  ;;  %1527 = vmatpush.msrb.mxu2 %v1318_v63  ;;  %v1306_v27 = vmax.f32 %v1118_v53, 0.0  ;;  %v3251_v63 = vld [vmem:[#allocation16_spill] sm:$0xff]  ;;  %v1404_v53 = vmax.f32 %v3261_v10, 0.0 }
 0x1ee   : > { %v1109_v22 = vadd.f32 %v3251_v63, %v3250_v16  ;;  %v3268_v60 = vld [vmem:[#allocation32_spill] sm:$0xff]  ;;  %v3272_v63 = vld [vmem:[#allocation81_spill] sm:$0xff] }
 0x1ef   : > { %1556 = vmatpush.msrb.mxu3 %v1332_v2  ;;  %1528 = vmatpush.msrb.mxu2 %v1316_v45  ;;  %v1304_v2 = vmax.f32 %v1115_v37, 0.0  ;;  %v1302_v45 = vmax.f32 %v1112_v24, 0.0  ;;  %v3265_v37 = vld [vmem:[#allocation80_spill] sm:$0xff] }
 0x1f0   : > { %v1300_v54 = vmax.f32 %v1109_v22, 0.0  ;;  %v1398_v22 = vmax.f32 %v3272_v63, 0.0 }
 0x1f1   : > { %1557 = vmatpush.msrb.mxu3 %v1330_v26  ;;  %1529 = vmatpush.msrb.mxu2 %v1314_v40  ;;  %v3254_v26 = vld [vmem:[#allocation83_spill] sm:$0xff]  ;;  %v1408_v40 = vmax.f32 %v3255_v30, 0.0 }
 0x1f2   : > { %1558 = vmatmul.f32.vlgmr.msrb.gmra.mxu3 %v3241_v0  ;;  %v1410_v57 = vmax.f32 %v3254_v26, 0.0  ;;  %v3260_v0 = vld [vmem:[#allocation69_spill] sm:$0xff] }
 0x1f3   : > { %1582 = vmatpush.msra.mxu3 %v1424_v23  ;;  %1530 = vmatpush.msrb.mxu2 %v1312_v28  ;;  %v1392_v23 = vmax.f32 %v3256_v62, 0.0  ;;  %v1216_v34 = vpop.f32.mrf.mxu1  ;;  %v3258_v28 = vperm.slane %v2713_v32, 0  ;;  %v1259_v12 = vadd.f32 %v3260_v0, %v2872_v7  ;;  %v3269_v7 = vld [vmem:[#allocation62_spill] sm:$0xff]  ;;  %v3276_v26 = vld [vmem:[#allocation17_spill] sm:$0xff] }
 0x1f4   : > { %v1217_v62 = vadd.f32 %v1216_v34, %v3209_v13 }
 0x1f5   : > { %1583 = vmatpush.msra.mxu3 %v1422_v29  ;;  %1531 = vmatpush.msrb.mxu2 %v1310_v15  ;;  %v1390_v29 = vmax.f32 %v3259_v1, 0.0  ;;  %v3262_v15 = vld [vmem:[#allocation47_spill] sm:$0xff]  ;;  %v1400_v24 = vmax.f32 %v1259_v12, 0.0 }
 0x1f6   : > { %v1388_v17 = vmax.f32 %v3262_v15, 0.0 }
 0x1f7   : > { %1584 = vmatpush.msra.mxu3 %v1420_v48  ;;  %1532 = vmatpush.msrb.mxu2 %v1308_v4  ;;  %v3263_v48 = vld [vmem:[#allocation50_spill] sm:$0xff]  ;;  %v1402_v4 = vmax.f32 %v3265_v37, 0.0 }
 0x1f8   : > { %v1235_v14 = vadd.f32 %v3264_v44, %v3263_v48 }
 0x1f9   : > { %1585 = vmatpush.msra.mxu3 %v1418_v20  ;;  %1533 = vmatpush.msrb.mxu2 %v1306_v27  ;;  %v3267_v20 = vld [vmem:[#allocation56_spill] sm:$0xff]  ;;  %v1253_v27 = vadd.f32 %v3269_v7, %v2876_v35 }
 0x1fa   : > { %v1232_v50 = vadd.f32 %v3268_v60, %v3267_v20  ;;  %v1384_v47 = vmax.f32 %v1235_v14, 0.0 }
 0x1fb   : > { %1586 = vmatpush.msra.mxu3 %v1416_v46  ;;  %1534 = vmatpush.msrb.mxu2 %v1304_v2  ;;  %v3271_v46 = vld [vmem:[#allocation27_spill] sm:$0xff]  ;;  %v3273_v2 = vld [vmem:[#allocation58_spill] sm:$0xff]  ;;  %v1219_v35 = vpop.f32.mrf.mxu1 }
 0x1fc   : > { %v1229_v16 = vadd.f32 %v3271_v46, %v3270_v8  ;;  %v1382_v18 = vmax.f32 %v1232_v50, 0.0 }
 0x1fd   : > { %1587 = vmatpush.msra.mxu3 %v1414_v52  ;;  %1535 = vmatpush.msrb.mxu2 %v1302_v45  ;;  %v1250_v52 = vadd.f32 %v3273_v2, %v2880_v6  ;;  %v1226_v45 = vadd.f32 %v3275_v59, %v3274_v61  ;;  %v1220_v6 = vadd.f32 %v1219_v35, %v3207_v33 }
 0x1fe   : > { %v1208_v33 = vadd.f32 %v2943_v11, %v2645_v49  ;;  %v1459_v49 = vpop.f32.mrf.mxu2  ;;  %v1430_v11 = vpop.permute.xlu1 %1429 }
 0x1ff   : > { %1588 = vmatpush.msra.mxu3 %v1412_v41  ;;  %1536 = vmatpush.msrb.mxu2 %v1300_v54  ;;  %v1396_v41 = vmax.f32 %v1253_v27, 0.0  ;;  %v1380_v54 = vmax.f32 %v1229_v16, 0.0  ;;  %v1378_v30 = vmax.f32 %v1226_v45, 0.0  ;;  %v1374_v9 = vmax.f32 %v1220_v6, 0.0 }
 0x200   : > { %v1432_v1 = vperm.slane %v1430_v11, 0 }
 0x201   : > { %1589 = vmatpush.msra.mxu3 %v1410_v57  ;;  %1537 = vmatpush.msrb.mxu2 %v1298_v58  ;;  %v1223_v57 = vadd.f32 %v3276_v26, %v3208_v38  ;;  %v1394_v58 = vmax.f32 %v1250_v52, 0.0  ;;  %v1211_v38 = vadd.f32 %v2965_v36, %v2856_v19 }
 0x202   : > { %1538 = vmatmul.f32.vlgmr.msrb.gmra.mxu2 %v3258_v28 }
 0x203   : > { %1590 = vmatpush.msra.mxu3 %v1408_v40  ;;  %1562 = vmatpush.msra.mxu2 %v1392_v23  ;;  %v1376_v40 = vmax.f32 %v1223_v57, 0.0  ;;  %v1214_v23 = vadd.f32 %v2989_v51, %v2636_v42  ;;  %v1368_v13 = vmax.f32 %v1211_v38, 0.0  ;;  %v1202_v42 = vadd.f32 %v2895_v55, %v2918_v25 }
 0x204   : > { %v1366_v51 = vmax.f32 %v1208_v33, 0.0 }
 0x205   : > { %1591 = vmatpush.msra.mxu3 %v1406_v3  ;;  %1563 = vmatpush.msra.mxu2 %v1390_v29  ;;  %v1372_v3 = vmax.f32 %v1217_v62, 0.0  ;;  %v1370_v28 = vmax.f32 %v1214_v23, 0.0  ;;  %v1362_v19 = vmax.f32 %v1202_v42, 0.0 }
 0x207   : > { %1592 = vmatpush.msra.mxu3 %v1404_v53  ;;  %1564 = vmatpush.msra.mxu2 %v1388_v17 }
 0x209   : > { %1593 = vmatpush.msra.mxu3 %v1402_v4  ;;  %1565 = vmatpush.msra.mxu2 %v1386_v39 }
 0x20b   : > { %1594 = vmatpush.msra.mxu3 %v1400_v24  ;;  %1566 = vmatpush.msra.mxu2 %v1384_v47 }
 0x20d   : > { %1595 = vmatpush.msra.mxu3 %v1398_v22  ;;  %1567 = vmatpush.msra.mxu2 %v1382_v18 }
 0x20f   : > { %1596 = vmatpush.msra.mxu3 %v1396_v41  ;;  %1568 = vmatpush.msra.mxu2 %v1380_v54  ;;  %v1647_v41 = vlaneseq }
 0x211   : > { %1597 = vmatpush.msra.mxu3 %v1394_v58  ;;  %1569 = vmatpush.msra.mxu2 %v1378_v30  ;;  %vm1649_vm10 = vcmp.lt.s32.totalorder %v1647_v41, 221 }
 0x212   : > { %1598 = vmatmul.f32.vlgmr.msra.gmra.mxu3 %v1437_v31  ;;  %v1205_v31 = vadd.f32 %v2922_v21, %v2860_v5  ;;  %v1460_v5 = vadd.f32 %v1459_v49, %v1432_v1 }
 0x213   : > { %1570 = vmatpush.msra.mxu2 %v1376_v40 }
 0x214   : > { %v1364_v34 = vmax.f32 %v1205_v31, 0.0 }
 0x215   : > { %1571 = vmatpush.msra.mxu2 %v1374_v9 }
 0x217   : > { %1572 = vmatpush.msra.mxu2 %v1372_v3 }
 0x219   : > { %1573 = vmatpush.msra.mxu2 %v1370_v28 }
 0x21b   : > { %1574 = vmatpush.msra.mxu2 %v1368_v13 }
 0x21d   : > { %1575 = vmatpush.msra.mxu2 %v1366_v51 }
 0x21f   : > { %1576 = vmatpush.msra.mxu2 %v1364_v34 }
 0x221   : > { %1577 = vmatpush.msra.mxu2 %v1362_v19 }
 0x222   : > { %1578 = vmatmul.f32.vlgmr.msra.gmra.mxu2 %v1436_v43 }
 0x235   : > { %v1479_v36 = vpop.f32.mrf.mxu3 }
 0x236   : > { %v1480_v29 = vadd.f32 %v1479_v36, %v1460_v5 }
 0x255   : > { %v1519_v12 = vpop.f32.mrf.mxu3 }
 0x265   : > { %v1499_v21 = vpop.f32.mrf.mxu2 }
 0x266   : > { %v1500_v0 = vadd.f32 %v1499_v21, %v1480_v29 }
 0x268   : > { %v1520_v55 = vadd.f32 %v1519_v12, %v1500_v0 }
 0x26a   : > { %v1842_v25 = vmul.f32 -1.442695, %v1520_v55 }
 0x26c   : > { %1865 = vpow2.f32 %v1842_v25 }
 0x272   : > { %v1866_v17 = vpop.eup %1865 }
 0x273   : > { %v1608_v44 = vadd.f32 1.0, %v1866_v17 }
 0x275   : > { %v1559_v53 = vpop.f32.mrf.mxu3  ;;  %1867 = vrcp.f32 %v1608_v44  ;;  %vm1615_vm3 = vweird.f32 %v1608_v44  ;;  %v1621_v46 = vand.u32 2147483648, %v1608_v44  ;;  %v1619_v63 = vand.u32 2147483647, %v1608_v44 }
 0x277   : > { %v1622_v61 = vor.u32 1.1754944e-38, %v1621_v46  ;;  %vm1620_vm8 = vcmp.eq.f32.partialorder %v1619_v63, 8.507059e+37 }
 0x27b   : > { %v1868_v56 = vpop.eup %1867 }
 0x27c   : > { %v1611_v20 = vmul.f32 %v1868_v56, %v1608_v44  ;;  %vm1616_vm2 = vweird.f32 %v1868_v56 }
 0x27d   : > { %vm1617_vm5 = vmor %vm1615_vm3, %vm1616_vm2 }
 0x27e   : > { %v1612_v50 = vsub.f32 1.0, %v1611_v20 }
 0x280   : > { %v1613_v24 = vmul.f32 %v1868_v56, %v1612_v50 }
 0x282   : > { %v1614_v47 = vadd.f32 %v1868_v56, %v1613_v24 }
 0x284   : > { %v1618_v52 = vsel %vm1617_vm5, %v1868_v56, %v1614_v47 }
 0x285   : > { %v1539_v10 = vpop.f32.mrf.mxu2  ;;  %v1623_v35 = vsel %vm1620_vm8, %v1622_v61, %v1618_v52 }
 0x286   : > { %v1540_v15 = vadd.f32 %v1539_v10, %v1432_v1  ;;  %v1640_v57 = vadd.f32 1.0, %v1623_v35 }
 0x288   : > { %v1560_v48 = vadd.f32 %v1559_v53, %v1540_v15 }
 0x295   : > { %v1599_v43 = vpop.f32.mrf.mxu3 }
 0x2a5   : > { %v1579_v32 = vpop.f32.mrf.mxu2 }
 0x2a6   : > { %v1580_v14 = vadd.f32 %v1579_v32, %v1560_v48 }
 0x2a8   : > { %v1600_v37 = vadd.f32 %v1599_v43, %v1580_v14 }
 0x2aa   : > { %v1843_v4 = vmul.f32 -1.442695, %v1600_v37 }
 0x2ac   : > { %1869 = vpow2.f32 %v1843_v4 }
 0x2b2   : > { %v1870_v39 = vpop.eup %1869 }
 0x2b3   : > { %v1609_v60 = vadd.f32 1.0, %v1870_v39 }
 0x2b5   : > { %1871 = vrcp.f32 %v1609_v60  ;;  %v1636_v16 = vand.u32 2147483648, %v1609_v60  ;;  %v1634_v2 = vand.u32 2147483647, %v1609_v60  ;;  %vm1630_vm6 = vweird.f32 %v1609_v60 }
 0x2b7   : > { %v1637_v59 = vor.u32 1.1754944e-38, %v1636_v16  ;;  %vm1635_vm9 = vcmp.eq.f32.partialorder %v1634_v2, 8.507059e+37 }
 0x2bb   : > { %v1872_v7 = vpop.eup %1871 }
 0x2bc   : > { %v1626_v27 = vmul.f32 %v1872_v7, %v1609_v60  ;;  %vm1631_vm4 = vweird.f32 %v1872_v7 }
 0x2bd   : > { %vm1632_vm7 = vmor %vm1630_vm6, %vm1631_vm4 }
 0x2be   : > { %v1627_v8 = vsub.f32 1.0, %v1626_v27 }
 0x2c0   : > { %v1628_v22 = vmul.f32 %v1872_v7, %v1627_v8 }
 0x2c2   : > { %v1629_v18 = vadd.f32 %v1872_v7, %v1628_v22 }
 0x2c4   : > { %v1633_v45 = vsel %vm1632_vm7, %v1872_v7, %v1629_v18 }
 0x2c5   : > { %v1638_v54 = vsel %vm1635_vm9, %v1637_v59, %v1633_v45 }
 0x2c6   : > { %v1641_v26 = vadd.f32 1.0, %v1638_v54 }
 0x2c8   : > { %v1644_v58 = vrot.slane %v1641_v26, 7 }
 0x2ca   : > { %v1645_v30 = vsel %vm872_vm0, %v1640_v57, %v1644_v58 }
 0x2cb   : > { %1651 = vst.msk [vmem:[%s224_s24] sm:$0x3] %vm1649_vm10, %v1645_v30 }
 0x2cc PF: > { %s17_s20 = sadd.s32 1, %s1880_s20  }
 0x2cd   : > { %p14_p4 = scmp.ge.s32.totalorder %s17_s20, 4  }
 0x2cf   :  { %16 = sbr.rel (!%p14_p4) target bundleno = 3 (0x3), region = 70 }

// kernel: single_block_forward.7
= control target key start
LH: loop header
LB: loop body
LE: loop exit
PB: predicated region body
PF: predicated region fallthrough
CT: control target
= control target key end

     0   :  { %s4639_s0 = inlined_call_operand.vmem [shape: f32[2,16,32], index: 0, kind: input, shape index: {}]   ;;  %s4640_s1 = inlined_call_operand.vmem [shape: f32[2,8,32], index: 1, kind: input, shape index: {}]   ;;  %s4641_s2 = inlined_call_operand.vmem [shape: f32[2,12,32], index: 2, kind: input, shape index: {}]   ;;  %s4642_s3 = inlined_call_operand.vmem [shape: f32[2,16,1], index: 3, kind: input, shape index: {}]   ;;  %s4643_s4 = inlined_call_operand.vmem [shape: f32[2,8,1], index: 4, kind: input, shape index: {}]   ;;  %s4644_s5 = inlined_call_operand.vmem [shape: f32[2,12,1], index: 5, kind: input, shape index: {}]   ;;  %s4645_s6 = inlined_call_operand.vmem [shape: f32[2,1,17], index: 6, kind: input, shape index: {}]   ;;  %s4646_s7 = inlined_call_operand.vmem [shape: f32[2,1,8], index: 7, kind: input, shape index: {}]   ;;  %s4647_s8 = inlined_call_operand.vmem [shape: f32[2,1,13], index: 8, kind: input, shape index: {}]   ;;  %s4648_s9 = inlined_call_operand.vmem [shape: f32[2,32,32], index: 9, kind: input, shape index: {}]   ;;  %s4649_s10 = inlined_call_operand.vmem [shape: f32[2,1,32], index: 10, kind: input, shape index: {}]   ;;  %s4650_s11 = inlined_call_operand.vmem [shape: f32[3,32,96], index: 11, kind: input, shape index: {}]   ;;  %s4651_s12 = inlined_call_operand.vmem [shape: f32[3,1,96], index: 12, kind: input, shape index: {}]   ;;  %s4652_s13 = inlined_call_operand.vmem [shape: f32[4,1,32], index: 13, kind: input, shape index: {}]   ;;  %s4653_s14 = inlined_call_operand.vmem [shape: f32[3,32,32], index: 14, kind: input, shape index: {}]   ;;  %s4654_s15 = inlined_call_operand.vmem [shape: f32[3,1,32], index: 15, kind: input, shape index: {}]   ;;  %s4655_s16 = inlined_call_operand.vmem [shape: f32[3,1,32], index: 16, kind: input, shape index: {}]   ;;  %s4656_s17 = inlined_call_operand.vmem [shape: f32[3,1,32], index: 17, kind: input, shape index: {}]   ;;  %s4657_s18 = inlined_call_operand.hbm [shape: f32[2,16,32], index: 18, kind: output, shape index: {0}]   ;;  %s4658_s19 = inlined_call_operand.hbm [shape: f32[2,8,32], index: 19, kind: output, shape index: {1}]   ;;  %s4659_s20 = inlined_call_operand.vmem [shape: f32[2,12,32], index: 20, kind: output, shape index: {2}]  }
   0x1   :  { %4677 = sst [smem:[#allocation18_spill]] %s4639_s0 }
   0x2   :  { %4678 = sst [smem:[#allocation19_spill]] %s4640_s1 }
   0x3   :  { %4679 = sst [smem:[#allocation20_spill]] %s4641_s2 }
   0x4   :  { %4680 = sst [smem:[#allocation21_spill]] %s4642_s3 }
   0x5   :  { %4681 = sst [smem:[#allocation22_spill]] %s4643_s4 }
   0x6   :  { %4682 = sst [smem:[#allocation23_spill]] %s4645_s6 }
   0x7   :  { %4683 = sst [smem:[#allocation24_spill]] %s4646_s7 }
   0x8   :  { %4684 = sst [smem:[#allocation25_spill]] %s4648_s9 }
   0x9   :  { %4685 = sst [smem:[#allocation26_spill]] %s4659_s20 }
   0xa   :  { %26 = vsyncpa [#allocation7], 0 }
   0xb   :  { %28 = vsyncpa [#allocation7 + $0x1], 0 }
   0xc   :  { %29 = vsyncpa [#allocation9], 0 }
   0xd   :  { %31 = vsyncpa [#allocation9 + $0x1], 0  ;;  %s3728_s1 = smov 0   ;;  %s3730_s22 = smov 0  }
   0xe   :  { %s3732_s23 = smov 0   ;;  %s3734_s24 = smov 0  }
   0xf LB: > { %4686 = sst [smem:[#allocation12_spill]] %s3594_s1  ;;  %s3749_s2 = sadd.s32 4294967295, %s3606_s24   ;;  %s3606_s24 = sphi %s3734_s24, %s4720_s24   ;;  %s3602_s23 = sphi %s3732_s23, %s4722_s23   ;;  %s3598_s22 = sphi %s3730_s22, %s4724_s22   ;;  %s3594_s1 = sphi %s3728_s1, %s4723_s1  }
  0x10   : > { %4687 = sst [smem:[#allocation13_spill]] %s3602_s23  ;;  %s3143_s25 = sadd.s32 4294967294, %s3606_s24  }
  0x11   : > { %4688 = sst [smem:[#allocation14_spill]] %s3606_s24  ;;  %s3753_s3 = sadd.s32 1, %s3606_s24  }
  0x12   : > { %4689 = sst [smem:[#allocation15_spill]] %s3753_s3  ;;  %s467_s26 = sadd.s32 1, %s3602_s23 }
  0x13   : > { %s464_s27 = ssub.s32 %s3606_s24, %s3753_s3  ;;  %p477_p0 = scmp.ne.s32.totalorder %s3602_s23, %s3598_s22 }
  0x14   : > { %p465_p1 = scmp.eq.s32.totalorder %s464_s27, 0  ;;  %p478_p2 = scmp.eq.s32.totalorder %s3749_s2, 1 }
  0x15   : > { %p483_p3 = scmp.ne.s32.totalorder %s3598_s22, %s3594_s1  ;;  %p484_p4 = scmp.eq.s32.totalorder %s3143_s25, 1 }
  0x16   : > { %s3764_s28 = scalar_select %p465_p1, %s3602_s23, %s467_s26  }
  0x17   : > { %p3766_p5 = por %p478_p2, %p477_p0  ;;  %p3770_p6 = por %p484_p4, %p483_p3 }
  0x18   : > { %4690 = sst [smem:[#allocation16_spill]] %s3764_s28  ;;  %p3146_p7 = scmp.ge.s32.totalorder %s3606_s24, 1 }
  0x19   : > { %s4692_s29 = scalar_select %p3770_p6, 1, 0 }
  0x1a   : > { %p645_p8 = scmp.lt.s32.totalorder %s3606_s24, 3 }
  0x1b   : > { %4693 = sst [smem:[#allocation17_spill]] %s4692_s29 }
  0x1c   : > { %p646_p9 = pnand %p3146_p7, %p645_p8 }
  0x1d   : > { %p745_p10 = scmp.lt.s32.totalorder (!%p646_p9), %s3749_s2, 1  ;;  %s4694_s7 = sld [smem:[#allocation24_spill]] (!%p646_p9) }
  0x1e   : > { %649 = sbr.rel (%p646_p9) target bundleno = 3637 (0xe35), region = 92  ;;  %s4695_s28 = sld [smem:[#allocation19_spill]] (!%p646_p9) }
  0x1f   : > { %s4696_s0 = sld [smem:[#allocation18_spill]] (!%p646_p9)  ;;  %s4675_s23 = smov (!%p646_p9), 112  }
  0x20   : > { %s4698_s9 = sld [smem:[#allocation25_spill]] (!%p646_p9)  ;;  %s4710_s29 = smov (!%p646_p9), 104  }
  0x21   : > { %s4699_s6 = sld [smem:[#allocation23_spill]] (!%p646_p9) }
  0x23   : > { %v961_v0 = vld [vmem:[%s4650_s11 + $0x18] sm:$0xff]  ;;  %v960_v1 = vld [vmem:[%s4650_s11 + $0x10] sm:$0xff]  ;;  %vm849_vm0 = vcmask 57344   ;;  %v3608_v2 = vmov 0   ;;  %s3785_s26 = scalar_select %p745_p10, %s3749_s2, 1  ;;  %v959_v3 = vld [vmem:[%s4650_s11 + $0x8] sm:$0xff] }
  0x24   : > { %984 = vmatpush.msra.mxu1 %v961_v0  ;;  %3373 = vset.pattern.permute.xlu0 %v3608_v2  ;;  %vm825_vm1 = vcmask 64512   ;;  %v958_v5 = vld [vmem:[%s4650_s11] sm:$0xff]  ;;  %vm861_vm2 = vcmask 261120   ;;  %vm1108_vm3 = vcmask 253952   ;;  %v3177_v33 = vld [vmem:[%s4650_s11 + $0x38] sm:$0xff]  ;;  %vm795_vm4 = vcmask 130048  }
  0x25   : > { %3374 = vset.pattern.permute.xlu1 %v3608_v2  ;;  %3380 = vset.pattern.permute.xlu2 %v3608_v2  ;;  %s4666_s30 = sshll.u32 %s3785_s26, 3  ;;  %s778_s25 = scalar_lea.vmem %s4694_s7, %s3785_s26  ;;  %v3391_v19 = vld [vmem:[%s4651_s12] ss:$0 sm:$0xff]  ;;  %v3176_v35 = vld [vmem:[%s4650_s11 + $0x30] sm:$0xff]  ;;  %v3169_v36 = vld [vmem:[%s4649_s10 + $0x1] sm:$0x1] }
  0x26   : > { %985 = vmatpush.msra.mxu1 %v960_v1  ;;  %s3802_s27 = scalar_lea.vmem %s4695_s28, %s4666_s30  ;;  %v3804_v4 = vld [vmem:[%s778_s25] sm:$0x1]  ;;  %s3810_s24 = sshll.u32 %s3785_s26, 4  ;;  %v3168_v14 = vld [vmem:[%s4698_s9 + $0x38] sm:$0xff]  ;;  %v3167_v15 = vld [vmem:[%s4698_s9 + $0x30] sm:$0xff]  ;;  %vm1293_vm9 = vcmask 1040384  }
  0x27   : > { %v3813_v6 = vld [vmem:[%s3802_s27] sm:$0xff]  ;;  %v850_v7 = vsel %vm849_vm0, %v3804_v4, 0.0  ;;  %s3821_s21 = scalar_lea.vmem %s4696_s0, %s3810_s24  ;;  %s4697_s25 = sld [smem:[#allocation21_spill]]  ;;  %927 = vmatpush.msra.mxu3 %v3168_v14  ;;  %v3166_v16 = vld [vmem:[%s4698_s9 + $0x28] sm:$0xff]  ;;  %v3901_v53 = vld [vmem:[%s4653_s14 + $0x18] sm:$0xff]  ;;  %vm1264_vm12 = vcmask 138240  }
  0x28   : > { %986 = vmatpush.msra.mxu1 %v959_v3  ;;  %844 = vmatpush.msra.mxu2 %v3813_v6  ;;  %v3825_v8 = vld [vmem:[%s3821_s21] sm:$0xff]  ;;  %v3835_v10 = vld [vmem:[%s3821_s21 + $0x8] sm:$0xff]  ;;  %s4667_s7 = smov 96   ;;  %s4669_s30 = smov 64   ;;  %v1009_v42 = vmax.f32 %v3813_v6, 0.0  ;;  %v3906_v54 = vld [vmem:[%s4653_s14 + $0x10] sm:$0xff] }
  0x29   : > { %851 = vadd.xlane.f32.xlu0 %v850_v7  ;;  %3162 = vmatmul.msk.f32.vlgmr.msra.gmra.mxu2 %vm825_vm1, %v3804_v4  ;;  %v956_v9 = vmax.f32 %v3825_v8, 0.0  ;;  %v957_v12 = vmax.f32 %v3835_v10, 0.0  ;;  %v3165_v17 = vld [vmem:[%s4698_s9 + $0x20] sm:$0xff]  ;;  %s775_s1 = scalar_lea.vmem %s4699_s6, %s3785_s26  ;;  %v3175_v39 = vld [vmem:[%s4650_s11 + $0x28] sm:$0xff]  ;;  %vm819_vm13 = vcmask 122880   ;;  %s4702_s3 = sshll.u32 %s3785_s26, 3 }
  0x2a   : > { %987 = vmatpush.msra.mxu1 %v958_v5  ;;  %813 = vmatpush.msra.mxu0 %v3835_v10  ;;  %v1107_v32 = vld [vmem:[%s4652_s13] sm:$0x1]  ;;  %v3187_v52 = vld [vmem:[%s4652_s13 + $0x1] sm:$0x1]  ;;  %v3914_v56 = vld [vmem:[%s4653_s14 + $0x8] sm:$0xff]  ;;  %s4249_s0 = scalar_lea.vmem %s4644_s5, %s3810_s24 }
  0x2b   : > { %3172 = vmatmul.msk.f32.vlgmr.msra.gmra.mxu1 %vm861_vm2, %v956_v9  ;;  %928 = vmatpush.msra.mxu3 %v3167_v15  ;;  %v3877_v34 = vld [vmem:[%s775_s1] sm:$0x1]  ;;  %1109 = vst.msk [vmem:[#allocation2 + $0x10] sm:$0x1] %vm1108_vm3, %v1107_v32  ;;  %s4703_s1 = sld [smem:[#allocation22_spill]] }
  0x2c   : > { %814 = vmatpush.msra.mxu0 %v3825_v8  ;;  %v3174_v41 = vld [vmem:[%s4650_s11 + $0x20] sm:$0xff]  ;;  %1122 = vst.msk [vmem:[#allocation3 + $0x10] sm:$0x1] %vm1108_vm3, %v3187_v52  ;;  %vm1256_vm10 = vcmp.eq.f32.partialorder %v3877_v34, 0.0 }
  0x2d   : > { %s763_s28 = scalar_lea.vmem %s4697_s25, %s3810_s24  ;;  %929 = vmatpush.msra.mxu3 %v3166_v16  ;;  %3161 = vmatmul.msk.f32.vlgmr.msra.gmra.mxu0 %vm795_vm4, %v3877_v34  ;;  %v3920_v59 = vld [vmem:[%s4653_s14] sm:$0xff]  ;;  %s4709_s25 = smov 64  }
  0x2e   : > { %v996_v11 = vld [vmem:[%s763_s28 + $0x8] sm:$0xff]  ;;  %v995_v13 = vld [vmem:[%s763_s28] sm:$0xff]  ;;  %1035 = vmatpush.msrb.mxu0 %v3177_v33  ;;  %s4671_s28 = smov 120  }
  0x2f   : > { %1004 = vperm.xlu1 %3374, %v996_v11   ;;  %930 = vmatpush.msra.mxu3 %v3165_v17 }
  0x30   : > { %1036 = vmatpush.msrb.mxu0 %v3176_v35 }
  0x31   : > { %1207 = vmatpush.msrb.mxu3 %v3901_v53  ;;  %s767_s20 = scalar_lea.vmem %s4703_s1, %s4702_s3  ;;  %s4704_s1 = sld [smem:[#allocation20_spill]] }
  0x32   : > { %1037 = vmatpush.msrb.mxu0 %v3175_v39  ;;  %v1153_v62 = vld [vmem:[#allocation2 + $0x10] sm:$0x1]  ;;  %s3616_s3 = smov 88  }
  0x33   : > { %3173 = vmatmul.msk.f32.gmra.mxu1 %vm861_vm2, %v957_v12  ;;  %1208 = vmatpush.msrb.mxu3 %v3906_v54  ;;  %v3926_v1 = vld [vmem:[#allocation3 + $0x10] sm:$0x1] }
  0x34   : > { %1038 = vmatpush.msrb.mxu0 %v3174_v41  ;;  %3205 = vmatpush.msk.msrb.mxu1 %vm1293_vm9, %v3926_v1 }
  0x35   : > { %3179 = vmatmul.msk.f32.vlgmr.msrb.gmra.mxu0 %vm861_vm2, %v1009_v42  ;;  %1209 = vmatpush.msrb.mxu3 %v3914_v56 }
  0x37   : > { %1210 = vmatpush.msrb.mxu3 %v3920_v59 }
  0x3d   : > { %999 = vperm.xlu0 %3373, %v995_v13  }
  0x9c   : > { %v852_v18 = vpop.xlane.xlu0 %851 }
  0x9d   : > { %3403 = vrcp.f32 %v852_v18 }
  0xa1   : > { %v1005_v29 = vpop.permute.xlu1 %1004 }
  0xa3   : > { %v3404_v21 = vpop.eup %3403 }
  0xa8   : > { %v989_v20 = vpop.f32.mrf.mxu1 }
  0xa9   : > { %v990_v22 = vadd.f32 %v3391_v19, %v989_v20  ;;  %v1257_v20 = vsel %vm1256_vm10, 1, %v3608_v2  ;;  %vm2243_vm10 = vcmask 105472  }
  0xaa   : > { %v3967_v16 = vpop.f32.mrf.mxu0 }
  0xac   : > { %v846_v23 = vpop.f32.mrf.mxu2 }
  0xad   : > { %v854_v24 = vmul.f32 %v3404_v21, %v846_v23 }
  0xaf   : > { %v1000_v25 = vpop.permute.xlu0 %999  ;;  %v904_v26 = vmax.f32 %v854_v24, 0.0 }
  0xb0   : > { %v3857_v27 = vmul.f32 %v1000_v25, %v990_v22  ;;  %v992_v28 = vpop.f32.mrf.mxu1  ;;  %v1258_v22 = vperm.slane %v1257_v20, 0  ;;  %v3180_v20 = vld [vmem:[%s4650_s11 + $0x40] sm:$0xff] }
  0xb1   : > { %3170 = vmatmul.msk.f32.vlgmr.msra.gmra.mxu3 %vm861_vm2, %v904_v26  ;;  %v993_v30 = vadd.f32 %v3391_v19, %v992_v28 }
  0xb2   : > { %1105 = vst.msk [vmem:[#allocation2] sm:$0xff] %vm861_vm2, %v3857_v27  ;;  %1143 = vrot.lane.b32.xlu1 %v3857_v27, %s4667_s7  ;;  %v3972_v19 = vpop.f32.mrf.mxu0  ;;  %vm3976_vm11 = vcmp.eq.s32.totalorder %v1258_v22, 1 }
  0xb3   : > { %v1008_v31 = vmul.f32 %v1005_v29, %v993_v30 }
  0xb5   : > { %1106 = vst.msk [vmem:[#allocation2 + $0x8] sm:$0xff] %vm861_vm2, %v1008_v31  ;;  %1145 = vrot.lane.b32.xlu2 %v1008_v31, %s4667_s7  ;;  %1114 = vrot.lane.b32.xlu0 %v1008_v31, %s4669_s30  ;;  %s4673_s7 = smov 104  }
  0xb9   : > { %3198 = vmatmul.msk.f32.vlgmr.msrb.gmra.mxu3 %vm861_vm2, %v3825_v8  ;;  %v1151_v9 = vld [vmem:[#allocation2] sm:$0xff] }
  0xbc   : > { %v1152_v0 = vld [vmem:[#allocation2 + $0x8] sm:$0xff] }
  0xc1   : > { %3199 = vmatmul.msk.f32.gmra.mxu3 %vm861_vm2, %v3835_v10 }
 0x10f   : > { %v1146_v13 = vpop.permute.xlu2 %1145 }
 0x124   : > { %v1144_v8 = vpop.permute.xlu1 %1143 }
 0x127   : > { %v1115_v51 = vpop.permute.xlu0 %1114 }
 0x128   : > { %1119 = vst.msk [vmem:[#allocation3 + $0x8] sm:$0xff] %vm861_vm2, %v1115_v51 }
 0x12f   : > { %v3934_v7 = vld [vmem:[#allocation3 + $0x8] sm:$0xff] }
 0x130   : > { %1311 = vmatpush.msrb.mxu1 %v3934_v7 }
 0x134   : > { %v932_v37 = vpop.f32.mrf.mxu3 }
 0x135   : > { %v933_v38 = vadd.f32 %v3169_v36, %v932_v37 }
 0x137   : > { %v3171_v40 = vmul.f32 -1.442695, %v933_v38 }
 0x139   : > { %3405 = vpow2.f32 %v3171_v40 }
 0x13c   : > { %v3988_v33 = vpop.f32.mrf.mxu3 }
 0x13f   : > { %v3406_v43 = vpop.eup %3405 }
 0x140   : > { %v938_v44 = vadd.f32 1.0, %v3406_v43 }
 0x142   : > { %3407 = vrcp.f32 %v938_v44  ;;  %v950_v48 = vand.u32 2147483648, %v938_v44  ;;  %v948_v50 = vand.u32 2147483647, %v938_v44  ;;  %vm944_vm6 = vweird.f32 %v938_v44 }
 0x144   : > { %v951_v57 = vor.u32 1.1754944e-38, %v950_v48  ;;  %vm949_vm8 = vcmp.eq.f32.partialorder %v948_v50, 8.507059e+37  ;;  %v3990_v35 = vpop.f32.mrf.mxu3 }
 0x148   : > { %v3408_v45 = vpop.eup %3407 }
 0x149   : > { %v940_v46 = vmul.f32 %v3408_v45, %v938_v44  ;;  %vm945_vm5 = vweird.f32 %v3408_v45 }
 0x14a   : > { %vm946_vm7 = vmor %vm944_vm6, %vm945_vm5  ;;  %vm1824_vm5 = vcmp.eq.f32.partialorder %v3804_v4, 0.0 }
 0x14b   : > { %v941_v47 = vsub.f32 1.0, %v940_v46 }
 0x14d   : > { %v942_v49 = vmul.f32 %v3408_v45, %v941_v47 }
 0x14f   : > { %v943_v55 = vadd.f32 %v3408_v45, %v942_v49 }
 0x151   : > { %v947_v58 = vsel %vm946_vm7, %v3408_v45, %v943_v55  ;;  %vm1124_vm7 = vcmask 257024  }
 0x152   : > { %v952_v60 = vsel %vm949_vm8, %v951_v57, %v947_v58  ;;  %v820_v58 = vsel %vm819_vm13, %v3877_v34, 0.0 }
 0x153   : > { %v954_v61 = vadd.f32 1.0, %v952_v60  ;;  %v859_v60 = vld [vmem:[%s4698_s9 + $0x18] sm:$0xff] }
 0x154   : > { %877 = vmatpush.msrb.mxu2 %v859_v60 }
 0x155   : > { %v1142_v63 = vperm.slane %v954_v61, 0 }
 0x157   : > { %v3928_v3 = vmul.f32 %v1153_v62, %v1142_v63  ;;  %v3930_v5 = vmul.f32 %v1152_v0, %v1142_v63  ;;  %v3947_v11 = vmul.f32 %v1144_v8, %v1142_v63  ;;  %v3949_v12 = vmul.f32 %v1151_v9, %v1142_v63  ;;  %v3183_v8 = vld [vmem:[%s4650_s11 + $0x58] sm:$0xff]  ;;  %v3182_v9 = vld [vmem:[%s4650_s11 + $0x50] sm:$0xff] }
 0x158   : > { %v3959_v10 = vmul.f32 %v1146_v13, %v1142_v63  ;;  %v858_v63 = vld [vmem:[%s4698_s9 + $0x10] sm:$0xff]  ;;  %v3181_v13 = vld [vmem:[%s4650_s11 + $0x48] sm:$0xff] }
 0x159   : > { %1359 = vrot.lane.b32.xlu2 %v3928_v3, %s4671_s28  ;;  %1357 = vrot.lane.b32.xlu1 %v3930_v5, %s4671_s28 }
 0x15a   : > { %3200 = vmatpush.xpose.msk.msra.mxu0 %vm825_vm1, %v3928_v3  ;;  %878 = vmatpush.msrb.mxu2 %v858_v63 }
 0x15e   : > { %3201 = vmatpush.xpose.msk.msra.mxu0 %vm825_vm1, %v3930_v5 }
 0x161   : > { %1351 = vrot.lane.b32.xlu1 %v3947_v11, %s4671_s28  ;;  %1355 = vrot.lane.b32.xlu2 %v3949_v12, %s4671_s28 }
 0x162   : > { %3202 = vmatpush.xpose.msk.msra.mxu0 %vm825_vm1, %v3949_v12 }
 0x165   : > { %3203 = vmatmul.msk.f32.vlgmr.msra.gmra.mxu0 %vm825_vm1, %v3947_v11 }
 0x169   : > { %1353 = vrot.lane.b32.xlu2 %v3959_v10, %s4671_s28 }
 0x16d   : > { %3204 = vmatmul.msk.f32.gmra.mxu0 %vm825_vm1, %v3959_v10 }
 0x1b3   : > { %v1360_v14 = vpop.permute.xlu2 %1359 }
 0x1b4   : > { %3210 = vmatpush.xpose.msk.msra.mxu3 %vm825_vm1, %v1360_v14 }
 0x1bb   : > { %v1356_v17 = vpop.permute.xlu2 %1355 }
 0x1c3   : > { %v1354_v21 = vpop.permute.xlu2 %1353 }
 0x1cb   : > { %v1358_v15 = vpop.permute.xlu1 %1357 }
 0x1cc   : > { %3211 = vmatpush.xpose.msk.msra.mxu3 %vm825_vm1, %v1358_v15 }
 0x1d0   : > { %3212 = vmatpush.xpose.msk.msra.mxu3 %vm825_vm1, %v1356_v17 }
 0x1d3   : > { %v1352_v18 = vpop.permute.xlu1 %1351 }
 0x1d4   : > { %3213 = vmatmul.msk.f32.vlgmr.msra.gmra.mxu3 %vm825_vm1, %v1352_v18 }
 0x1dc   : > { %3214 = vmatmul.msk.f32.gmra.mxu3 %vm825_vm1, %v1354_v21 }
 0x1e2   : > { %v1250_v24 = vpop.f32.mrf.mxu0 }
 0x1e3   : > { %v1260_v25 = vsel %vm3976_vm11, -1e+09, %v1250_v24 }
 0x1e4   : > { %v1262_v26 = vmul.f32 0.35355338, %v1260_v25 }
 0x1e6   : > { %v1265_v28 = vsel %vm1264_vm12, %v1262_v26, -inf }
 0x1e7   : > { %1266 = vmax.xlane.f32.xlu1 %v1265_v28 }
 0x1ea   : > { %v1253_v29 = vpop.f32.mrf.mxu0 }
 0x1eb   : > { %v1261_v30 = vsel %vm3976_vm11, -1e+09, %v1253_v29 }
 0x1ec   : > { %v1263_v31 = vmul.f32 0.35355338, %v1261_v30 }
 0x1ee   : > { %v1268_v32 = vsel %vm1264_vm12, %v1263_v31, -inf }
 0x1ef   : > { %1269 = vmax.xlane.f32.xlu2 %v1268_v32 }
 0x207   : > { %1112 = vrot.lane.b32.xlu2 %v3857_v27, %s4669_s30  ;;  %s4705_s30 = smov 96  }
 0x257   : > { %v1388_v36 = vpop.f32.mrf.mxu3 }
 0x258   : > { %v1394_v51 = vsel %vm3976_vm11, -1e+09, %v1388_v36  ;;  %v3392_v36 = vld [vmem:[%s4651_s12 + $0x1] ss:$0 sm:$0xff] }
 0x259   : > { %v1396_v52 = vmul.f32 0.35355338, %v1394_v51 }
 0x25a   : > { %v1267_v37 = vpop.xlane.xlu1 %1266 }
 0x25b   : > { %v1271_v38 = vsub.f32 %v1262_v26, %v1267_v37  ;;  %v1398_v57 = vsel %vm1264_vm12, %v1396_v52, -inf }
 0x25d   : > { %v1273_v39 = vmul.f32 1.442695, %v1271_v38 }
 0x25f   : > { %3409 = vpow2.f32 %v1273_v39  ;;  %v1391_v40 = vpop.f32.mrf.mxu3 }
 0x260   : > { %v1395_v41 = vsel %vm3976_vm11, -1e+09, %v1391_v40  ;;  %v1041_v40 = vadd.f32 %v3392_v36, %v3972_v19 }
 0x261   : > { %v1397_v42 = vmul.f32 0.35355338, %v1395_v41 }
 0x262   : > { %v1270_v43 = vpop.xlane.xlu2 %1269 }
 0x263   : > { %v1272_v44 = vsub.f32 %v1263_v31, %v1270_v43  ;;  %v1401_v45 = vsel %vm1264_vm12, %v1397_v42, -inf }
 0x264   : > { %1402 = vmax.xlane.f32.xlu2 %v1401_v45 }
 0x265   : > { %v3410_v27 = vpop.eup %3409  ;;  %v1275_v46 = vmul.f32 1.442695, %v1272_v44 }
 0x266   : > { %v1277_v47 = vsel %vm1264_vm12, %v3410_v27, 0.0 }
 0x267   : > { %3411 = vpow2.f32 %v1275_v46  ;;  %1278 = vadd.xlane.f32.xlu0 %v1277_v47 }
 0x26a   : > { %v1113_v48 = vpop.permute.xlu2 %1112 }
 0x26b   : > { %1118 = vst.msk [vmem:[#allocation3] sm:$0xff] %vm861_vm2, %v1113_v48 }
 0x26d   : > { %v3412_v49 = vpop.eup %3411 }
 0x26e   : > { %v1280_v50 = vsel %vm1264_vm12, %v3412_v49, 0.0 }
 0x26f   : > { %1281 = vadd.xlane.f32.xlu1 %v1280_v50 }
 0x272   : > { %v1157_v55 = vld [vmem:[#allocation3] sm:$0xff] }
 0x273   : > { %1312 = vmatpush.msrb.mxu1 %v1157_v55  ;;  %v4025_v34 = vpack.i.bf16 %v1157_v55, %v3934_v7  ;;  %v856_v7 = vld [vmem:[%s4698_s9] sm:$0xff] }
 0x275   : > { %1482 = vmatpush.msra.mxu1 %v3914_v56  ;;  %v1043_v56 = vld [vmem:[%s767_s20] sm:$0xff]  ;;  %s4075_s20 = scalar_lea.vmem %s4704_s1, %s3810_s24  ;;  %s3615_s1 = smov 56  }
 0x276   : > { %v4082_v44 = vld [vmem:[%s4075_s20] sm:$0xff] }
 0x277   : > { %1399 = vmax.xlane.f32.xlu1 %v1398_v57 }
 0x27b   : > { %1500 = vrot.lane.b32.xlu0 %v3928_v3, %s4675_s23 }
 0x27c   : > { %1492 = vrot.lane.b32.xlu2 %v3947_v11, %s4675_s23 }
 0x27f   : > { %821 = vadd.xlane.f32.xlu1 %v820_v58 }
 0x284   : > { %1046 = vperm.xlu2 %3380, %v1043_v56  }
 0x28c   : > { %1639 = vrot.lane.b32.xlu2 %v3928_v3, %s4673_s7 }
 0x294   : > { %1637 = vrot.lane.b32.xlu2 %v3930_v5, %s4673_s7 }
 0x298   : > { %1498 = vrot.lane.b32.xlu1 %v3930_v5, %s4675_s23  ;;  %v857_v5 = vld [vmem:[%s4698_s9 + $0x8] sm:$0xff]  ;;  %s3618_s9 = smov 72  }
 0x299   : > { %879 = vmatpush.msrb.mxu2 %v857_v5  ;;  %v4119_v5 = vld [vmem:[%s4651_s12 + $0x2] ss:$0 sm:$0xff] }
 0x29b   : > { %880 = vmatpush.msrb.mxu2 %v856_v7 }
 0x29c   : > { %1631 = vrot.lane.b32.xlu2 %v3947_v11, %s4673_s7 }
 0x29d   : > { %1080 = vmatpush.msra.mxu2 %v3183_v8 }
 0x29f   : > { %1081 = vmatpush.msra.mxu2 %v3182_v9 }
 0x2a0   : > { %1496 = vrot.lane.b32.xlu1 %v3949_v12, %s4675_s23 }
 0x2a1   : > { %1082 = vmatpush.msra.mxu2 %v3181_v13 }
 0x2a3   : > { %1083 = vmatpush.msra.mxu2 %v3180_v20  ;;  %v3393_v20 = vld [vmem:[%s4654_s15] ss:$0 sm:$0xff] }
 0x2a8   : > { %1426 = vrot.lane.b32.xlu1 %v3926_v1, %s4671_s28 }
 0x2b0   : > { %3376 = vrot.lane.b32.xlu1 %v4025_v34, %s4671_s28  ;;  %s4708_s28 = smov 120  }
 0x2d7   : > { %v1403_v61 = vpop.xlane.xlu2 %1402 }
 0x2d8   : > { %v1405_v62 = vsub.f32 %v1397_v42, %v1403_v61 }
 0x2da   : > { %v1408_v0 = vmul.f32 1.442695, %v1405_v62  ;;  %v1279_v3 = vpop.xlane.xlu0 %1278  ;;  %v860_v62 = vld [vmem:[%s4649_s10] sm:$0x1] }
 0x2db   : > { %3413 = vrcp.f32 %v1279_v3 }
 0x2dc   : > { %3415 = vpow2.f32 %v1408_v0 }
 0x2df   : > { %v4047_v11 = vpop.permute.xlu2 %1492 }
 0x2e1   : > { %v3414_v14 = vpop.eup %3413 }
 0x2e2   : > { %v4052_v15 = vpop.eup %3415  ;;  %v1282_v17 = vpop.xlane.xlu1 %1281  ;;  %v1285_v18 = vmul.f32 %v3414_v14, %v3410_v27 }
 0x2e3   : > { %3417 = vrcp.f32 %v1282_v17  ;;  %v1413_v21 = vsel %vm1264_vm12, %v4052_v15, 0.0 }
 0x2e4   : > { %3206 = vmatmul.msk.f32.vlgmr.msrb.gmra.mxu1 %vm1264_vm12, %v1285_v18  ;;  %1414 = vadd.xlane.f32.xlu1 %v1413_v21 }
 0x2e7   : > { %v1047_v22 = vpop.permute.xlu2 %1046 }
 0x2e8   : > { %v4069_v42 = vmul.f32 %v1047_v22, %v1041_v40 }
 0x2e9   : > { %v3418_v24 = vpop.eup %3417 }
 0x2ea   : > { %v1400_v25 = vpop.xlane.xlu1 %1399  ;;  %v1286_v26 = vmul.f32 %v3418_v24, %v3412_v49  ;;  %v4098_v49 = vld [vmem:[%s4075_s20 + $0x8] sm:$0xf] }
 0x2eb   : > { %v1404_v28 = vsub.f32 %v1396_v52, %v1400_v25  ;;  %v1051_v50 = vmax.f32 %v4098_v49, 0.0  ;;  %v1213_v25 = vadd.f32 %v3393_v20, %v3988_v33 }
 0x2ec   : > { %3207 = vmatmul.msk.f32.gmra.mxu1 %vm1264_vm12, %v1286_v26 }
 0x2ed   : > { %v1406_v29 = vmul.f32 1.442695, %v1404_v28  ;;  %v1501_v19 = vpop.permute.xlu0 %1500 }
 0x2ef   : > { %3419 = vpow2.f32 %v1406_v29  ;;  %v1640_v30 = vpop.permute.xlu2 %1639 }
 0x2f0   : > { %3230 = vmatpush.xpose.msk.msrb.mxu1 %vm825_vm1, %v1640_v30 }
 0x2f2   : > { %v822_v31 = vpop.xlane.xlu1 %821 }
 0x2f3   : > { %3421 = vrcp.f32 %v822_v31 }
 0x2f5   : > { %v3420_v32 = vpop.eup %3419 }
 0x2f6   : > { %v1410_v37 = vsel %vm1264_vm12, %v3420_v32, 0.0 }
 0x2f7   : > { %1411 = vadd.xlane.f32.xlu0 %v1410_v37  ;;  %v1638_v38 = vpop.permute.xlu2 %1637 }
 0x2f8   : > { %3231 = vmatpush.xpose.msk.msrb.mxu1 %vm825_vm1, %v1638_v38 }
 0x2f9   : > { %v3422_v39 = vpop.eup %3421 }
 0x2fa   : > { %v824_v41 = vmul.f32 %v3422_v39, %v3967_v16  ;;  %v1050_v16 = vmax.f32 %v4082_v44, 0.0 }
 0x2fc   : > { %v855_v43 = vmax.f32 %v824_v41, 0.0 }
 0x2fd   : > { %1162 = vrot.lane.b32.xlu1 %v4069_v42, %s4705_s30 }
 0x2fe   : > { %3163 = vmatmul.msk.f32.vlgmr.msrb.gmra.mxu2 %vm861_vm2, %v855_v43 }
 0x2ff   : > { %1341 = vmatpush.msrb.mxu2 %v3920_v59 }
 0x306   : > { %3185 = vmatmul.msk.f32.vlgmr.msra.gmra.mxu2 %vm861_vm2, %v1050_v16  ;;  %v1632_v16 = vpop.permute.xlu2 %1631 }
 0x307   : > { %3220 = vmatpush.xpose.msk.msra.mxu2 %vm825_vm1, %v1501_v19 }
 0x30a   : > { %v1499_v45 = vpop.permute.xlu1 %1498 }
 0x30b   : > { %1494 = vrot.lane.b32.xlu0 %v3959_v10, %s4675_s23  ;;  %3221 = vmatpush.xpose.msk.msra.mxu2 %vm825_vm1, %v1499_v45 }
 0x30e   : > { %3186 = vmatmul.msk.f32.gmra.mxu2 %vm861_vm2, %v1051_v50 }
 0x312   : > { %v1497_v27 = vpop.permute.xlu1 %1496 }
 0x313   : > { %1635 = vrot.lane.b32.xlu0 %v3949_v12, %s4673_s7  ;;  %3222 = vmatpush.xpose.msk.msra.mxu2 %vm825_vm1, %v1497_v27 }
 0x31a   : > { %v1427_v59 = vpop.permute.xlu1 %1426 }
 0x31b   : > { %1633 = vrot.lane.b32.xlu0 %v3959_v10, %s4673_s7  ;;  %3215 = vmatpush.msk.msrb.mxu0 %vm1293_vm9, %v1427_v59 }
 0x322   : > { %v3377_v46 = vpop.permute.xlu1 %3376 }
 0x323   : > { %v3378_v47 = vunpack.i.l.bf16 %v3377_v46  ;;  %v3379_v48 = vunpack.i.h.bf16 %v3377_v46 }
 0x325   : > { %1452 = vmatpush.msrb.mxu0 %v3378_v47 }
 0x327   : > { %1453 = vmatpush.msrb.mxu0 %v3379_v48 }
 0x329   : > { %1621 = vmatpush.msra.mxu0 %v3906_v54 }
 0x357   : > { %v1415_v52 = vpop.xlane.xlu1 %1414 }
 0x361   : > { %v1314_v12 = vpop.f32.mrf.mxu1 }
 0x362   : > { %3208 = vmatmul.msk.f32.vlgmr.msrb.gmra.mxu2 %vm825_vm1, %v1314_v12 }
 0x369   : > { %v1317_v51 = vpop.f32.mrf.mxu1 }
 0x36a   : > { %v1412_v10 = vpop.xlane.xlu0 %1411  ;;  %3209 = vmatmul.msk.f32.gmra.mxu2 %vm825_vm1, %v1317_v51 }
 0x36b   : > { %3423 = vrcp.f32 %v1412_v10 }
 0x36c   : > { %3425 = vrcp.f32 %v1415_v52 }
 0x36f   : > { %v1163_v47 = vpop.permute.xlu1 %1162 }
 0x371   : > { %v3424_v55 = vpop.eup %3423 }
 0x372   : > { %v1418_v57 = vmul.f32 %v3424_v55, %v3420_v32  ;;  %3223 = vmatmul.msk.f32.vlgmr.msra.gmra.mxu2 %vm825_vm1, %v4047_v11  ;;  %v3426_v54 = vpop.eup %3425  ;;  %v1216_v55 = vadd.f32 %v3393_v20, %v3990_v35 }
 0x373   : > { %v1419_v58 = vmul.f32 %v3426_v54, %v4052_v15 }
 0x374   : > { %3216 = vmatmul.msk.f32.vlgmr.msrb.gmra.mxu0 %vm1264_vm12, %v1418_v57 }
 0x37c   : > { %3217 = vmatmul.msk.f32.gmra.mxu0 %vm1264_vm12, %v1419_v58 }
 0x37d   : > { %v1495_v56 = vpop.permute.xlu0 %1494 }
 0x37e   : > { %3224 = vmatmul.msk.f32.gmra.mxu2 %vm825_vm1, %v1495_v56 }
 0x381   : > { %v882_v61 = vpop.f32.mrf.mxu2 }
 0x382   : > { %v883_v0 = vadd.f32 %v882_v61, %v860_v62 }
 0x384   : > { %v3164_v3 = vmul.f32 -1.442695, %v883_v0 }
 0x385   : > { %v1636_v60 = vpop.permute.xlu0 %1635 }
 0x386   : > { %3232 = vmatpush.xpose.msk.msrb.mxu1 %vm825_vm1, %v1636_v60  ;;  %3427 = vpow2.f32 %v3164_v3 }
 0x389   : > { %v4114_v63 = vpop.f32.mrf.mxu2 }
 0x38c   : > { %v3428_v9 = vpop.eup %3427 }
 0x38d   : > { %v888_v11 = vadd.f32 1.0, %v3428_v9  ;;  %v1634_v46 = vpop.permute.xlu0 %1633 }
 0x38f   : > { %3429 = vrcp.f32 %v888_v11  ;;  %v900_v21 = vand.u32 2147483648, %v888_v11  ;;  %vm894_vm15 = vweird.f32 %v888_v11  ;;  %v898_v22 = vand.u32 2147483647, %v888_v11 }
 0x391   : > { %v1088_v7 = vpop.f32.mrf.mxu2  ;;  %v901_v26 = vor.u32 1.1754944e-38, %v900_v21  ;;  %vm899_vm4 = vcmp.eq.f32.partialorder %v898_v22, 8.507059e+37 }
 0x392   : > { %v4122_v8 = vadd.f32 %v4119_v5, %v1088_v7 }
 0x395   : > { %v3430_v13 = vpop.eup %3429 }
 0x396   : > { %v890_v14 = vmul.f32 %v3430_v13, %v888_v11  ;;  %vm895_vm14 = vweird.f32 %v3430_v13 }
 0x397   : > { %vm896_vm0 = vmor %vm894_vm15, %vm895_vm14 }
 0x398   : > { %v891_v15 = vsub.f32 1.0, %v890_v14 }
 0x39a   : > { %v892_v17 = vmul.f32 %v3430_v13, %v891_v15  ;;  %v1825_v15 = vsel %vm1824_vm5, 1, %v3608_v2 }
 0x39b   : > { %v1826_v21 = vperm.slane %v1825_v15, 0 }
 0x39c   : > { %v893_v18 = vadd.f32 %v3430_v13, %v892_v17 }
 0x39d   : > { %vm4167_vm6 = vcmp.eq.s32.totalorder %v1826_v21, 1 }
 0x39e   : > { %v897_v24 = vsel %vm896_vm0, %v3430_v13, %v893_v18 }
 0x39f   : > { %v902_v30 = vsel %vm899_vm4, %v901_v26, %v897_v24 }
 0x3a0   : > { %v955_v31 = vadd.f32 1.0, %v902_v30 }
 0x3a2   : > { %v1160_v36 = vperm.slane %v955_v31, 0 }
 0x3a4   : > { %v4129_v38 = vmul.f32 %v1160_v36, %v4069_v42  ;;  %v4143_v48 = vmul.f32 %v1163_v47, %v1160_v36 }
 0x3e5   : > { %v1343_v28 = vpop.f32.mrf.mxu2 }
 0x3e6   : > { %v1349_v29 = vadd.f32 %v1343_v28, %v1213_v25 }
 0x3ed   : > { %v1346_v32 = vpop.f32.mrf.mxu2 }
 0x3ee   : > { %v1350_v54 = vadd.f32 %v1346_v32, %v1216_v55  ;;  %v4202_v55 = vld [vmem:[%s4653_s14 + $0x30] sm:$0xff] }
 0x3f1   : > { %v1455_v37 = vpop.f32.mrf.mxu0 }
 0x3f2   : > { %3218 = vmatmul.msk.f32.vlgmr.msra.gmra.mxu1 %vm825_vm1, %v1455_v37 }
 0x3f3   : > { %3242 = vmatpush.xpose.msk.msra.mxu1 %vm825_vm1, %v4129_v38 }
 0x3f5   : > { %v1529_v39 = vpop.f32.mrf.mxu2 }
 0x3f6   : > { %v1535_v33 = vsel %vm3976_vm11, -1e+09, %v1529_v39 }
 0x3f7   : > { %v1537_v40 = vmul.f32 0.35355338, %v1535_v33 }
 0x3f9   : > { %v1458_v41 = vpop.f32.mrf.mxu0  ;;  %v1539_v43 = vsel %vm1264_vm12, %v1537_v40, -inf }
 0x3fa   : > { %3219 = vmatmul.msk.f32.gmra.mxu1 %vm825_vm1, %v1458_v41  ;;  %1540 = vmax.xlane.f32.xlu2 %v1539_v43 }
 0x401   : > { %v1532_v19 = vpop.f32.mrf.mxu2 }
 0x402   : > { %v1536_v45 = vsel %vm3976_vm11, -1e+09, %v1532_v19  ;;  %3233 = vmatmul.msk.f32.vlgmr.msrb.gmra.mxu1 %vm825_vm1, %v1632_v16 }
 0x403   : > { %v1538_v27 = vmul.f32 0.35355338, %v1536_v45 }
 0x405   : > { %v1542_v59 = vsel %vm1264_vm12, %v1538_v27, -inf }
 0x406   : > { %1543 = vmax.xlane.f32.xlu0 %v1542_v59 }
 0x40a   : > { %3234 = vmatmul.msk.f32.gmra.mxu1 %vm825_vm1, %v1634_v46 }
 0x412   : > { %3243 = vmatmul.msk.f32.vlgmr.msra.gmra.mxu1 %vm825_vm1, %v4143_v48  ;;  %1565 = vrot.lane.b32.xlu2 %v3926_v1, %s4675_s23 }
 0x41a   : > { %3382 = vrot.lane.b32.xlu0 %v4025_v34, %s4675_s23 }
 0x46d   : > { %v1541_v50 = vpop.xlane.xlu2 %1540 }
 0x46e   : > { %v1545_v12 = vsub.f32 %v1537_v40, %v1541_v50 }
 0x46f   : > { %v1484_v51 = vpop.f32.mrf.mxu1 }
 0x470   : > { %v1547_v10 = vmul.f32 1.442695, %v1545_v12  ;;  %v4151_v52 = vadd.f32 %v1484_v51, %v1349_v29 }
 0x472   : > { %3431 = vpow2.f32 %v1547_v10  ;;  %v4197_v10 = vld [vmem:[%s4653_s14 + $0x38] sm:$0xff] }
 0x473   : > { %1790 = vmatpush.msrb.mxu0 %v4197_v10 }
 0x475   : > { %v1566_v57 = vpop.permute.xlu2 %1565  ;;  %1791 = vmatpush.msrb.mxu0 %v4202_v55 }
 0x476   : > { %3225 = vmatpush.msk.msrb.mxu3 %vm1293_vm9, %v1566_v57  ;;  %v3190_v57 = vld [vmem:[%s4653_s14 + $0x20] sm:$0xff] }
 0x477   : > { %v1487_v58 = vpop.f32.mrf.mxu1 }
 0x478   : > { %v3432_v56 = vpop.eup %3431  ;;  %v4155_v60 = vadd.f32 %v1487_v58, %v1350_v54 }
 0x479   : > { %v1544_v61 = vpop.xlane.xlu0 %1543  ;;  %v1551_v62 = vsel %vm1264_vm12, %v3432_v56, 0.0 }
 0x47a   : > { %v1546_v0 = vsub.f32 %v1538_v27, %v1544_v61  ;;  %1552 = vadd.xlane.f32.xlu1 %v1551_v62 }
 0x47c   : > { %v1549_v3 = vmul.f32 1.442695, %v1546_v0 }
 0x47e   : > { %3433 = vpow2.f32 %v1549_v3 }
 0x47f   : > { %v1668_v7 = vpop.f32.mrf.mxu1 }
 0x480   : > { %v1674_v9 = vsel %vm3976_vm11, -1e+09, %v1668_v7 }
 0x481   : > { %v1676_v35 = vmul.f32 0.35355338, %v1674_v9 }
 0x483   : > { %v1678_v11 = vsel %vm1264_vm12, %v1676_v35, -inf }
 0x484   : > { %v3434_v13 = vpop.eup %3433  ;;  %1679 = vmax.xlane.f32.xlu0 %v1678_v11 }
 0x485   : > { %v1554_v14 = vsel %vm1264_vm12, %v3434_v13, 0.0 }
 0x486   : > { %1555 = vadd.xlane.f32.xlu1 %v1554_v14 }
 0x487   : > { %v1671_v17 = vpop.f32.mrf.mxu1 }
 0x488   : > { %v1675_v18 = vsel %vm3976_vm11, -1e+09, %v1671_v17  ;;  %vm2247_vm11 = vcmask 101376  }
 0x489   : > { %v1677_v20 = vmul.f32 0.35355338, %v1675_v18 }
 0x48b   : > { %v1681_v25 = vsel %vm1264_vm12, %v1677_v20, -inf }
 0x48c   : > { %v3383_v22 = vpop.permute.xlu0 %3382 }
 0x48d   : > { %v3384_v24 = vunpack.i.l.bf16 %v3383_v22  ;;  %v3385_v26 = vunpack.i.h.bf16 %v3383_v22 }
 0x48e   : > { %1682 = vmax.xlane.f32.xlu1 %v1681_v25 }
 0x48f   : > { %1591 = vmatpush.msrb.mxu3 %v3384_v24  ;;  %v1821_v28 = vpop.f32.mrf.mxu1 }
 0x490   : > { %v1828_v29 = vsel %vm4167_vm6, -1e+09, %v1821_v28 }
 0x491   : > { %v1829_v30 = vmul.f32 0.35355338, %v1828_v29  ;;  %1592 = vmatpush.msrb.mxu3 %v3385_v26 }
 0x493   : > { %1760 = vmatpush.msra.mxu3 %v3901_v53  ;;  %v1830_v23 = vsel %vm825_vm1, %v1829_v30, -inf }
 0x494   : > { %1831 = vmax.xlane.f32.xlu2 %v1830_v23 }
 0x498   : > { %3387 = vrot.lane.b32.xlu0 %v4025_v34, %s4673_s7 }
 0x4a0   : > { %1982 = vrot.lane.b32.xlu0 %v4143_v48, %s4675_s23 }
 0x4a8   : > { %1891 = vrot.lane.b32.xlu0 %v4143_v48, %s4708_s28 }
 0x4ed   : > { %v1553_v31 = vpop.xlane.xlu1 %1552 }
 0x4ee   : > { %3435 = vrcp.f32 %v1553_v31 }
 0x4f4   : > { %v3436_v32 = vpop.eup %3435 }
 0x4f5   : > { %v1559_v36 = vmul.f32 %v3436_v32, %v3432_v56 }
 0x4f7   : > { %v1680_v37 = vpop.xlane.xlu0 %1679  ;;  %3226 = vmatmul.msk.f32.vlgmr.msrb.gmra.mxu3 %vm1264_vm12, %v1559_v36 }
 0x4f8   : > { %v1684_v53 = vsub.f32 %v1676_v35, %v1680_v37 }
 0x4f9   : > { %v1556_v39 = vpop.xlane.xlu1 %1555 }
 0x4fa   : > { %v1686_v33 = vmul.f32 1.442695, %v1684_v53  ;;  %3437 = vrcp.f32 %v1556_v39 }
 0x4fc   : > { %3439 = vpow2.f32 %v1686_v33 }
 0x500   : > { %v3438_v40 = vpop.eup %3437 }
 0x501   : > { %v1683_v34 = vpop.xlane.xlu1 %1682  ;;  %v1560_v41 = vmul.f32 %v3438_v40, %v3434_v13 }
 0x502   : > { %v3440_v43 = vpop.eup %3439  ;;  %v1685_v16 = vsub.f32 %v1677_v20, %v1683_v34 }
 0x503   : > { %3227 = vmatmul.msk.f32.gmra.mxu3 %vm1264_vm12, %v1560_v41  ;;  %v1690_v19 = vsel %vm1264_vm12, %v3440_v43, 0.0 }
 0x504   : > { %v1688_v45 = vmul.f32 1.442695, %v1685_v16  ;;  %1691 = vadd.xlane.f32.xlu1 %v1690_v19 }
 0x506   : > { %3441 = vpow2.f32 %v1688_v45 }
 0x507   : > { %v1832_v27 = vpop.xlane.xlu2 %1831 }
 0x508   : > { %v1833_v59 = vsub.f32 %v1829_v30, %v1832_v27 }
 0x50a   : > { %v1834_v46 = vmul.f32 1.442695, %v1833_v59  ;;  %v3388_v9 = vpop.permute.xlu0 %3387  ;;  %v1091_v59 = vld [vmem:[%s4249_s0] sm:$0xff] }
 0x50b   : > { %v3389_v13 = vunpack.i.l.bf16 %v3388_v9  ;;  %v3390_v14 = vunpack.i.h.bf16 %v3388_v9 }
 0x50c   : > { %v3442_v47 = vpop.eup %3441  ;;  %3443 = vpow2.f32 %v1834_v46 }
 0x50d   : > { %v1693_v50 = vsel %vm1264_vm12, %v3442_v47, 0.0 }
 0x50e   : > { %1694 = vadd.xlane.f32.xlu2 %v1693_v50 }
 0x512   : > { %v3444_v12 = vpop.eup %3443  ;;  %v1983_v29 = vpop.permute.xlu0 %1982 }
 0x513   : > { %v1836_v51 = vsel %vm825_vm1, %v3444_v12, 0.0 }
 0x514   : > { %1837 = vadd.xlane.f32.xlu1 %v1836_v51 }
 0x51a   : > { %v1892_v31 = vpop.permute.xlu0 %1891 }
 0x526   : > { %1841 = vrot.lane.b32.xlu2 %v4069_v42, %s4709_s25 }
 0x52d   : > { %1704 = vrot.lane.b32.xlu1 %v3926_v1, %s4673_s7  ;;  %v3191_v1 = vld [vmem:[%s4653_s14 + $0x28] sm:$0xff] }
 0x52e   : > { %1792 = vmatpush.msrb.mxu0 %v3191_v1 }
 0x530   : > { %1793 = vmatpush.msrb.mxu0 %v3190_v57 }
 0x535   : > { %1984 = vrot.lane.b32.xlu1 %v4129_v38, %s4675_s23  ;;  %s3614_s23 = smov 48  }
 0x53d   : > { %1893 = vrot.lane.b32.xlu1 %v4129_v38, %s4708_s28 }
 0x577   : > { %v1692_v58 = vpop.xlane.xlu1 %1691 }
 0x57a   : > { %v1594_v54 = vpop.f32.mrf.mxu3 }
 0x57b   : > { %3228 = vmatmul.msk.f32.vlgmr.msra.gmra.mxu0 %vm825_vm1, %v1594_v54 }
 0x581   : > { %v1695_v56 = vpop.xlane.xlu2 %1694 }
 0x586   : > { %v1597_v61 = vpop.f32.mrf.mxu3 }
 0x587   : > { %3229 = vmatmul.msk.f32.gmra.mxu0 %vm825_vm1, %v1597_v61  ;;  %v1838_v62 = vpop.xlane.xlu1 %1837 }
 0x588   : > { %3445 = vrcp.f32 %v1838_v62 }
 0x589   : > { %v1842_v0 = vpop.permute.xlu2 %1841  ;;  %3447 = vrcp.f32 %v1692_v58  ;;  %v1086_v58 = vadd.f32 %v4119_v5, %v4114_v63  ;;  %v1092_v5 = vld [vmem:[%s4249_s0 + $0x8] sm:$0xf]  ;;  %s781_s0 = scalar_lea.vmem %s4647_s8, %s3785_s26  ;;  %s3617_s26 = smov 40  }
 0x58a   : > { %1862 = vmatpush.msra.mxu0 %v1842_v0  ;;  %3449 = vrcp.f32 %v1695_v56 }
 0x58e   : > { %v3446_v3 = vpop.eup %3445 }
 0x58f   : > { %3241 = vmatmul.msk.f32.vlgmr.msrb.gmra.mxu0 %vm861_vm2, %v3813_v6  ;;  %v1840_v7 = vmul.f32 %v3446_v3, %v3444_v12  ;;  %v3448_v11 = vpop.eup %3447 }
 0x590   : > { %1976 = vmatpush.msrb.mxu0 %v3191_v1  ;;  %v1698_v15 = vmul.f32 %v3448_v11, %v3440_v43  ;;  %v3450_v17 = vpop.eup %3449 }
 0x591   : > { %v1699_v18 = vmul.f32 %v3450_v17, %v3442_v47  ;;  %v4286_v17 = vld [vmem:[%s4653_s14 + $0x58] sm:$0xff] }
 0x597   : > { %3244 = vmatmul.msk.f32.vlgmr.msra.gmra.mxu0 %vm825_vm1, %v1840_v7  ;;  %v3188_v7 = vld [vmem:[%s4652_s13 + $0x2] sm:$0x1] }
 0x598   : > { %1128 = vst.msk [vmem:[#allocation4 + $0xc] sm:$0x1] %vm1108_vm3, %v3188_v7 }
 0x59f   : > { %v1705_v35 = vpop.permute.xlu1 %1704 }
 0x5a0   : > { %3235 = vmatpush.msk.msrb.mxu2 %vm1293_vm9, %v1705_v35 }
 0x5a2   : > { %1730 = vmatpush.msrb.mxu2 %v3389_v13 }
 0x5a4   : > { %1731 = vmatpush.msrb.mxu2 %v3390_v14 }
 0x5a5   : > { %3236 = vmatmul.msk.f32.vlgmr.msrb.gmra.mxu2 %vm1264_vm12, %v1698_v15 }
 0x5a6   : > { %1885 = vmatpush.msra.mxu2 %v3190_v57 }
 0x5a7   : > { %v1985_v6 = vpop.permute.xlu1 %1984 }
 0x5a8   : > { %3250 = vmatpush.xpose.msk.msrb.mxu2 %vm825_vm1, %v1985_v6 }
 0x5ad   : > { %3237 = vmatmul.msk.f32.gmra.mxu2 %vm1264_vm12, %v1699_v18  ;;  %v4309_v18 = vld [vmem:[%s4653_s14 + $0x48] sm:$0xff] }
 0x5af   : > { %v1894_v20 = vpop.permute.xlu1 %1893 }
 0x5b0   : > { %3246 = vmatpush.xpose.msk.msrb.mxu3 %vm825_vm1, %v1894_v20  ;;  %v3194_v20 = vld [vmem:[%s4653_s14 + $0x40] sm:$0xff] }
 0x5f8   : > { %v1623_v21 = vpop.f32.mrf.mxu0 }
 0x5f9   : > { %v1629_v22 = vadd.f32 %v1623_v21, %v4151_v52  ;;  %v3395_v52 = vld [vmem:[%s4654_s15 + $0x1] ss:$0 sm:$0xff] }
 0x604   : > { %v1626_v24 = vpop.f32.mrf.mxu0 }
 0x605   : > { %v1630_v25 = vadd.f32 %v1626_v24, %v4155_v60 }
 0x60c   : > { %v1795_v26 = vpop.f32.mrf.mxu0 }
 0x60d   : > { %v1796_v60 = vadd.f32 %v3395_v52, %v1795_v26 }
 0x614   : > { %v1864_v28 = vpop.f32.mrf.mxu0 }
 0x615   : > { %3245 = vmatmul.msk.f32.vlgmr.msra.gmra.mxu2 %vm825_vm1, %v1864_v28 }
 0x61d   : > { %3251 = vmatmul.msk.f32.vlgmr.msrb.gmra.mxu2 %vm825_vm1, %v1983_v29 }
 0x628   : > { %v1733_v30 = vpop.f32.mrf.mxu2 }
 0x629   : > { %3238 = vmatmul.msk.f32.vlgmr.msra.gmra.mxu3 %vm825_vm1, %v1733_v30 }
 0x630   : > { %v1736_v23 = vpop.f32.mrf.mxu2 }
 0x631   : > { %3239 = vmatmul.msk.f32.gmra.mxu3 %vm825_vm1, %v1736_v23 }
 0x639   : > { %3247 = vmatmul.msk.f32.vlgmr.msrb.gmra.mxu3 %vm825_vm1, %v1892_v31  ;;  %v794_v31 = vld [vmem:[%s781_s0] sm:$0x1] }
 0x63a   : > { %vm2235_vm8 = vcmp.eq.f32.partialorder %v794_v31, 0.0 }
 0x63b   : > { %v2236_v52 = vsel %vm2235_vm8, 1, %v3608_v2 }
 0x698   : > { %v1887_v32 = vpop.f32.mrf.mxu2 }
 0x699   : > { %v4232_v36 = vadd.f32 %v1887_v32, %v1796_v60  ;;  %v2237_v32 = vperm.slane %v2236_v52, 0 }
 0x69b   : > { %vm4341_vm9 = vcmp.eq.s32.totalorder %v2237_v32, 1 }
 0x6a0   : > { %v2007_v37 = vpop.f32.mrf.mxu2 }
 0x6a1   : > { %v2010_v53 = vsel %vm4167_vm6, -1e+09, %v2007_v37 }
 0x6a2   : > { %v2011_v39 = vmul.f32 0.35355338, %v2010_v53 }
 0x6a4   : > { %v2012_v33 = vsel %vm825_vm1, %v2011_v39, -inf }
 0x6a5   : > { %2013 = vmax.xlane.f32.xlu1 %v2012_v33 }
 0x6ac   : > { %v1762_v40 = vpop.f32.mrf.mxu3 }
 0x6ad   : > { %v4237_v34 = vadd.f32 %v1762_v40, %v1629_v22 }
 0x6b4   : > { %v1765_v41 = vpop.f32.mrf.mxu3 }
 0x6b5   : > { %v4239_v43 = vadd.f32 %v1765_v41, %v1630_v25 }
 0x6bc   : > { %v1916_v16 = vpop.f32.mrf.mxu3 }
 0x6bd   : > { %v1919_v19 = vsel %vm4167_vm6, -1e+09, %v1916_v16 }
 0x6be   : > { %v1920_v45 = vmul.f32 0.35355338, %v1919_v19  ;;  %2023 = vrot.lane.b32.xlu1 %v4069_v42, %s3614_s23 }
 0x6c0   : > { %v1921_v27 = vsel %vm825_vm1, %v1920_v45, -inf }
 0x6c1   : > { %1922 = vmax.xlane.f32.xlu2 %v1921_v27 }
 0x6c6   : > { %1095 = vperm.xlu1 %3374, %v1091_v59  }
 0x6ce   : > { %2073 = vrot.lane.b32.xlu1 %v4143_v48, %s4710_s29 }
 0x718   : > { %v2014_v46 = vpop.xlane.xlu1 %2013 }
 0x719   : > { %v2015_v47 = vsub.f32 %v2011_v39, %v2014_v46 }
 0x71b   : > { %v2016_v50 = vmul.f32 1.442695, %v2015_v47 }
 0x71d   : > { %3451 = vpow2.f32 %v2016_v50 }
 0x723   : > { %v3452_v12 = vpop.eup %3451 }
 0x724   : > { %v2018_v51 = vsel %vm825_vm1, %v3452_v12, 0.0 }
 0x725   : > { %2019 = vadd.xlane.f32.xlu0 %v2018_v51 }
 0x730   : > { %v2024_v1 = vpop.permute.xlu1 %2023 }
 0x731   : > { %2044 = vmatpush.msra.mxu3 %v2024_v1 }
 0x733   : > { %2158 = vmatpush.msrb.mxu3 %v4197_v10 }
 0x734   : > { %v1923_v57 = vpop.xlane.xlu2 %1922 }
 0x735   : > { %v1924_v54 = vsub.f32 %v1920_v45, %v1923_v57 }
 0x737   : > { %v1925_v56 = vmul.f32 1.442695, %v1924_v54 }
 0x738   : > { %v1096_v48 = vpop.permute.xlu1 %1095 }
 0x739   : > { %3453 = vpow2.f32 %v1925_v56  ;;  %v4258_v61 = vmul.f32 %v1096_v48, %v1086_v58  ;;  %1932 = vrot.lane.b32.xlu0 %v4069_v42, %s3615_s1  ;;  %v3189_v48 = vld [vmem:[%s4652_s13 + $0x3] sm:$0x1] }
 0x73a   : > { %1141 = vst.msk [vmem:[#allocation5 + $0xc] sm:$0x1] %vm1108_vm3, %v3189_v48  ;;  %vm2273_vm3 = vcmask 1044480  }
 0x73b   : > { %1123 = vst.msk [vmem:[#allocation4] sm:$0xff] %vm861_vm2, %v4258_v61  ;;  %2198 = vrot.lane.b32.xlu1 %v4258_v61, %s4705_s30 }
 0x73f   : > { %v3454_v10 = vpop.eup %3453 }
 0x740   : > { %v1927_v62 = vsel %vm825_vm1, %v3454_v10, 0.0  ;;  %v2074_v25 = vpop.permute.xlu1 %2073 }
 0x741   : > { %2075 = vrot.lane.b32.xlu0 %v4129_v38, %s4710_s29  ;;  %1928 = vadd.xlane.f32.xlu2 %v1927_v62 }
 0x742   : > { %v4268_v63 = vld [vmem:[#allocation4] sm:$0xff] }
 0x749   : > { %2335 = vrot.lane.b32.xlu0 %v4268_v63, %s4708_s28 }
 0x759   : > { %1100 = vperm.xlu2 %3380, %v1092_v5  }
 0x798   : > { %v2020_v0 = vpop.xlane.xlu0 %2019 }
 0x799   : > { %3455 = vrcp.f32 %v2020_v0 }
 0x79f   : > { %v3456_v3 = vpop.eup %3455 }
 0x7a0   : > { %v2022_v9 = vmul.f32 %v3456_v3, %v3452_v12 }
 0x7a2   : > { %3252 = vmatmul.msk.f32.vlgmr.msra.gmra.mxu3 %vm825_vm1, %v2022_v9 }
 0x7a3   : > { %2321 = vmatpush.msra.mxu3 %v3194_v20 }
 0x7ab   : > { %v1933_v38 = vpop.permute.xlu0 %1932 }
 0x7ac   : > { %1953 = vmatpush.msrb.mxu1 %v1933_v38 }
 0x7ad   : > { %v2199_v28 = vpop.permute.xlu1 %2198 }
 0x7ae   : > { %2067 = vmatpush.msra.mxu1 %v4202_v55 }
 0x7b3   : > { %v2076_v35 = vpop.permute.xlu0 %2075 }
 0x7b4   : > { %3254 = vmatpush.xpose.msk.msra.mxu0 %vm825_vm1, %v2076_v35  ;;  %v1929_v11 = vpop.xlane.xlu2 %1928 }
 0x7b5   : > { %3457 = vrcp.f32 %v1929_v11 }
 0x7bb   : > { %v3458_v13 = vpop.eup %3457  ;;  %v2336_v24 = vpop.permute.xlu0 %2335 }
 0x7bc   : > { %v1931_v14 = vmul.f32 %v3458_v13, %v3454_v10  ;;  %v1101_v15 = vpop.permute.xlu2 %1100 }
 0x7bd   : > { %v4281_v6 = vmul.f32 %v1101_v15, %v4122_v8  ;;  %v4297_v8 = vld [vmem:[%s4653_s14 + $0x50] sm:$0xff] }
 0x7be   : > { %3248 = vmatmul.msk.f32.vlgmr.msrb.gmra.mxu1 %vm825_vm1, %v1931_v14 }
 0x7bf   : > { %1125 = vst.msk [vmem:[#allocation4 + $0x8] sm:$0xf] %vm1124_vm7, %v4281_v6  ;;  %2333 = vrot.lane.b32.xlu1 %v4281_v6, %s3616_s3  ;;  %2200 = vrot.lane.b32.xlu0 %v4281_v6, %s4705_s30  ;;  %s3619_s30 = smov 80  }
 0x7c0   : > { %2187 = vmatpush.msrb.mxu1 %v4286_v17 }
 0x7c2   : > { %2188 = vmatpush.msrb.mxu1 %v4297_v8 }
 0x7c4   : > { %2189 = vmatpush.msrb.mxu1 %v4309_v18 }
 0x7c6   : > { %v4301_v55 = vld [vmem:[#allocation4 + $0x8] sm:$0x1f]  ;;  %2190 = vmatpush.msrb.mxu1 %v3194_v20 }
 0x7c7   : > { %2337 = vrot.lane.b32.xlu2 %v4301_v55, %s4708_s28 }
 0x7cf   : > { %2331 = vrot.lane.b32.xlu2 %v4258_v61, %s3616_s3 }
 0x821   : > { %v2338_v22 = vpop.permute.xlu2 %2337 }
 0x825   : > { %v2046_v21 = vpop.f32.mrf.mxu3 }
 0x826   : > { %3253 = vmatmul.msk.f32.vlgmr.msra.gmra.mxu1 %vm825_vm1, %v2046_v21 }
 0x827   : > { %3270 = vmatpush.xpose.msk.msra.mxu1 %vm825_vm1, %v2338_v22 }
 0x829   : > { %v2332_v29 = vpop.permute.xlu2 %2331 }
 0x82b   : > { %3271 = vmatpush.xpose.msk.msra.mxu1 %vm825_vm1, %v2336_v24 }
 0x82e   : > { %3259 = vmatmul.msk.f32.vlgmr.msrb.gmra.mxu1 %vm861_vm2, %v4082_v44 }
 0x831   : > { %v2334_v44 = vpop.permute.xlu1 %2333 }
 0x836   : > { %3260 = vmatmul.msk.f32.gmra.mxu1 %vm861_vm2, %v4098_v49  ;;  %v2201_v49 = vpop.permute.xlu0 %2200 }
 0x83b   : > { %v1955_v26 = vpop.f32.mrf.mxu1 }
 0x83c   : > { %3249 = vmatmul.msk.f32.vlgmr.msrb.gmra.mxu0 %vm825_vm1, %v1955_v26 }
 0x83d   : > { %3261 = vmatpush.xpose.msk.msrb.mxu0 %vm825_vm1, %v4301_v55 }
 0x83e   : > { %3272 = vmatmul.msk.f32.vlgmr.msra.gmra.mxu1 %vm825_vm1, %v2332_v29 }
 0x841   : > { %3262 = vmatpush.xpose.msk.msrb.mxu0 %vm825_vm1, %v4268_v63 }
 0x844   : > { %3255 = vmatmul.msk.f32.vlgmr.msra.gmra.mxu0 %vm825_vm1, %v2074_v25 }
 0x846   : > { %3273 = vmatmul.msk.f32.gmra.mxu1 %vm825_vm1, %v2334_v44 }
 0x84c   : > { %3263 = vmatmul.msk.f32.vlgmr.msrb.gmra.mxu0 %vm825_vm1, %v2199_v28 }
 0x854   : > { %3264 = vmatmul.msk.f32.gmra.mxu0 %vm825_vm1, %v2201_v49 }
 0x8a3   : > { %v2069_v30 = vpop.f32.mrf.mxu1 }
 0x8ab   : > { %v4336_v23 = vpop.f32.mrf.mxu1 }
 0x8b3   : > { %v4339_v60 = vpop.f32.mrf.mxu1 }
 0x8b9   : > { %v1978_v37 = vpop.f32.mrf.mxu0 }
 0x8ba   : > { %v1981_v39 = vadd.f32 %v1978_v37, %v4232_v36 }
 0x8bb   : > { %v2364_v33 = vpop.f32.mrf.mxu1 }
 0x8bc   : > { %v2370_v40 = vsel %vm4341_vm9, -1e+09, %v2364_v33  ;;  %v4348_v41 = vadd.f32 %v2069_v30, %v1981_v39 }
 0x8bd   : > { %v2372_v16 = vmul.f32 0.35355338, %v2370_v40 }
 0x8bf   : > { %v2374_v2 = vsel %vm2243_vm10, %v2372_v16, -inf }
 0x8c0   : > { %2375 = vmax.xlane.f32.xlu1 %v2374_v2 }
 0x8c1   : > { %v2098_v19 = vpop.f32.mrf.mxu0 }
 0x8c2   : > { %v2101_v45 = vsel %vm4167_vm6, -1e+09, %v2098_v19 }
 0x8c3   : > { %v2102_v27 = vmul.f32 0.35355338, %v2101_v45  ;;  %v2367_v57 = vpop.f32.mrf.mxu1 }
 0x8c4   : > { %v2371_v54 = vsel %vm4341_vm9, -1e+09, %v2367_v57 }
 0x8c5   : > { %v2103_v59 = vsel %vm825_vm1, %v2102_v27, -inf  ;;  %v2373_v58 = vmul.f32 0.35355338, %v2371_v54 }
 0x8c6   : > { %2104 = vmax.xlane.f32.xlu2 %v2103_v59 }
 0x8c7   : > { %v2377_v56 = vsel %vm2247_vm11, %v2373_v58, -inf }
 0x8c9   : > { %v2229_v36 = vpop.f32.mrf.mxu0 }
 0x8ca   : > { %v2239_v46 = vsel %vm4341_vm9, -1e+09, %v2229_v36 }
 0x8cb   : > { %v2241_v47 = vmul.f32 0.35355338, %v2239_v46 }
 0x8cd   : > { %v2244_v50 = vsel %vm2243_vm10, %v2241_v47, -inf }
 0x8ce   : > { %2245 = vmax.xlane.f32.xlu0 %v2244_v50 }
 0x8d1   : > { %v2232_v12 = vpop.f32.mrf.mxu0 }
 0x8d2   : > { %v2240_v51 = vsel %vm4341_vm9, -1e+09, %v2232_v12 }
 0x8d3   : > { %v2242_v1 = vmul.f32 0.35355338, %v2240_v51 }
 0x8d5   : > { %v2248_v4 = vsel %vm2247_vm11, %v2242_v1, -inf }
 0x8d6   : > { %2249 = vmax.xlane.f32.xlu2 %v2248_v4 }
 0x8d9   : > { %1133 = vrot.lane.b32.xlu1 %v4281_v6, %s4709_s25 }
 0x8e2   : > { %2114 = vrot.lane.b32.xlu0 %v4069_v42, %s3617_s26 }
 0x8ee   : > { %1131 = vrot.lane.b32.xlu2 %v4258_v61, %s4709_s25  ;;  %s4713_s25 = smov 112  }
 0x90c   : > { %2378 = vmax.xlane.f32.xlu0 %v2377_v56 }
 0x933   : > { %v2376_v10 = vpop.xlane.xlu1 %2375 }
 0x934   : > { %v2380_v62 = vsub.f32 %v2372_v16, %v2376_v10 }
 0x936   : > { %v2382_v42 = vmul.f32 1.442695, %v2380_v62 }
 0x938   : > { %3459 = vpow2.f32 %v2382_v42 }
 0x939   : > { %v2105_v5 = vpop.xlane.xlu2 %2104 }
 0x93a   : > { %v2106_v0 = vsub.f32 %v2102_v27, %v2105_v5 }
 0x93c   : > { %v2107_v3 = vmul.f32 1.442695, %v2106_v0 }
 0x93e   : > { %v4372_v7 = vpop.eup %3459  ;;  %3461 = vpow2.f32 %v2107_v3  ;;  %v3396_v3 = vld [vmem:[%s4654_s15 + $0x2] ss:$0 sm:$0xff] }
 0x93f   : > { %v2386_v9 = vsel %vm2243_vm10, %v4372_v7, 0.0 }
 0x940   : > { %2387 = vadd.xlane.f32.xlu2 %v2386_v9 }
 0x941   : > { %v2246_v38 = vpop.xlane.xlu0 %2245 }
 0x942   : > { %v2251_v35 = vsub.f32 %v2241_v47, %v2246_v38 }
 0x944   : > { %v3462_v11 = vpop.eup %3461  ;;  %v2253_v13 = vmul.f32 1.442695, %v2251_v35  ;;  %v2196_v35 = vadd.f32 %v3396_v3, %v4339_v60 }
 0x945   : > { %v2109_v14 = vsel %vm825_vm1, %v3462_v11, 0.0 }
 0x946   : > { %3463 = vpow2.f32 %v2253_v13  ;;  %2110 = vadd.xlane.f32.xlu0 %v2109_v14 }
 0x949   : > { %v2250_v15 = vpop.xlane.xlu2 %2249 }
 0x94a   : > { %v2252_v20 = vsub.f32 %v2242_v1, %v2250_v15 }
 0x94b   : > { %v1134_v21 = vpop.permute.xlu1 %1133 }
 0x94c   : > { %v3464_v22 = vpop.eup %3463  ;;  %v2255_v24 = vmul.f32 1.442695, %v2252_v20  ;;  %1138 = vst.msk [vmem:[#allocation5 + $0x8] sm:$0xf] %vm1124_vm7, %v1134_v21 }
 0x94d   : > { %v2257_v25 = vsel %vm2243_vm10, %v3464_v22, 0.0 }
 0x94e   : > { %3465 = vpow2.f32 %v2255_v24  ;;  %2258 = vadd.xlane.f32.xlu0 %v2257_v25 }
 0x951   : > { %v1132_v26 = vpop.permute.xlu2 %1131 }
 0x952   : > { %1137 = vst.msk [vmem:[#allocation5] sm:$0xff] %vm861_vm2, %v1132_v26 }
 0x953   : > { %v4380_v44 = vld [vmem:[#allocation5 + $0x8] sm:$0x1f] }
 0x954   : > { %v3466_v28 = vpop.eup %3465  ;;  %v2115_v29 = vpop.permute.xlu0 %2114 }
 0x955   : > { %2135 = vmatpush.msra.mxu2 %v2115_v29  ;;  %v2260_v49 = vsel %vm2247_vm11, %v3466_v28, 0.0 }
 0x956   : > { %2261 = vadd.xlane.f32.xlu1 %v2260_v49 }
 0x957   : > { %3265 = vmatpush.msk.msrb.mxu2 %vm2273_vm3, %v4380_v44 }
 0x959   : > { %v4385_v30 = vld [vmem:[#allocation5] sm:$0xff] }
 0x95a   : > { %2397 = vrot.lane.b32.xlu2 %v4385_v30, %s4708_s28  ;;  %2292 = vmatpush.msrb.mxu2 %v4385_v30 }
 0x962   : > { %2399 = vrot.lane.b32.xlu0 %v4380_v44, %s4708_s28  ;;  %2600 = vrot.lane.b32.xlu2 %v4268_v63, %s4710_s29  ;;  %s3305_s28 = sshll.u32 %s3749_s2, 3 }
 0x963   : > { %s2931_s3 = scalar_lea.hbm %s4658_s19, %s3305_s28 }
 0x96a   : > { %2468 = vrot.lane.b32.xlu2 %v4268_v63, %s4713_s25 }
 0x96f   : > { %2602 = vrot.lane.b32.xlu1 %v4301_v55, %s4710_s29 }
 0x972   : > { %2598 = vrot.lane.b32.xlu2 %v4281_v6, %s3618_s9 }
 0x977   : > { %2596 = vrot.lane.b32.xlu1 %v4258_v61, %s3618_s9 }
 0x97f   : > { %v2379_v31 = vpop.xlane.xlu0 %2378  ;;  %2464 = vrot.lane.b32.xlu1 %v4258_v61, %s3619_s30 }
 0x980   : > { %v2381_v52 = vsub.f32 %v2373_v58, %v2379_v31 }
 0x982   : > { %v2384_v32 = vmul.f32 1.442695, %v2381_v52 }
 0x984   : > { %3467 = vpow2.f32 %v2384_v32 }
 0x98a   : > { %v3468_v37 = vpop.eup %3467 }
 0x98b   : > { %v2389_v39 = vsel %vm2247_vm11, %v3468_v37, 0.0 }
 0x98c   : > { %2390 = vadd.xlane.f32.xlu0 %v2389_v39 }
 0x9a0   : > { %2470 = vrot.lane.b32.xlu0 %v4301_v55, %s4713_s25 }
 0x9a8   : > { %2466 = vrot.lane.b32.xlu0 %v4281_v6, %s3619_s30 }
 0x9b3   : > { %v2388_v45 = vpop.xlane.xlu2 %2387 }
 0x9b9   : > { %v2111_v63 = vpop.xlane.xlu0 %2110 }
 0x9ba   : > { %3469 = vrcp.f32 %v2111_v63 }
 0x9bb   : > { %v2398_v46 = vpop.permute.xlu2 %2397 }
 0x9c0   : > { %v3470_v33 = vpop.eup %3469 }
 0x9c1   : > { %v2113_v40 = vmul.f32 %v3470_v33, %v3462_v11  ;;  %v2259_v16 = vpop.xlane.xlu0 %2258 }
 0x9c2   : > { %3471 = vrcp.f32 %v2259_v16 }
 0x9c3   : > { %3256 = vmatmul.msk.f32.vlgmr.msra.gmra.mxu2 %vm825_vm1, %v2113_v40  ;;  %v2601_v47 = vpop.permute.xlu2 %2600 }
 0x9c4   : > { %2454 = vmatpush.msra.mxu2 %v4309_v18 }
 0x9c8   : > { %v3472_v61 = vpop.eup %3471 }
 0x9c9   : > { %v2265_v2 = vmul.f32 %v3472_v61, %v3464_v22  ;;  %v2262_v19 = vpop.xlane.xlu1 %2261 }
 0x9ca   : > { %3473 = vrcp.f32 %v2262_v19 }
 0x9cb   : > { %3266 = vmatmul.msk.f32.vlgmr.msrb.gmra.mxu2 %vm2243_vm10, %v2265_v2  ;;  %3475 = vrcp.f32 %v2388_v45  ;;  %v2469_v57 = vpop.permute.xlu2 %2468 }
 0x9d0   : > { %v3474_v55 = vpop.eup %3473 }
 0x9d1   : > { %v2266_v6 = vmul.f32 %v3474_v55, %v3466_v28  ;;  %v3476_v27 = vpop.eup %3475 }
 0x9d2   : > { %v2394_v36 = vmul.f32 %v3476_v27, %v4372_v7  ;;  %v2193_v7 = vadd.f32 %v3396_v3, %v4336_v23  ;;  %v3507_v27 = vld [vmem:[%s3802_s27] sm:$0xff]  ;;  %s4500_s27 = sand.u32 1, %s3598_s22  }
 0x9d3   : > { %3267 = vmatmul.msk.f32.gmra.mxu2 %vm2243_vm10, %v2266_v6  ;;  %v2599_v42 = vpop.permute.xlu2 %2598  ;;  %s3147_s0 = sshll.u32 %s4500_s27, 4  ;;  %s3148_s23 = sshll.u32 %s4500_s27, 3 }
 0x9d4   : > { %v2400_v59 = vpop.permute.xlu0 %2399  ;;  %s4515_s26 = scalar_lea.vmem [#allocation6], %s3147_s0  ;;  %s2894_s0 = scalar_lea.sflag [#allocation7], %s4500_s27 }
 0x9d5   : > { %3274 = vmatpush.msk.msra.mxu0 %vm2273_vm3, %v2400_v59  ;;  %s2916_s9 = sshll.u32 %s4515_s26, 4  ;;  %s4556_s9 = int_to_ptr.vmem [resolvable:$true] %s2916_s9 }
 0x9d7   : > { %2425 = vmatpush.msra.mxu0 %v2398_v46 }
 0x9d8   : > { %3275 = vmatmul.msk.f32.vlgmr.msra.gmra.mxu0 %vm2243_vm10, %v2394_v36 }
 0x9d9   : > { %2586 = vmatpush.msrb.mxu0 %v4297_v8 }
 0x9e1   : > { %v2603_v18 = vpop.permute.xlu1 %2602 }
 0x9e2   : > { %3288 = vmatpush.xpose.msk.msrb.mxu2 %vm825_vm1, %v2603_v18 }
 0x9e6   : > { %3289 = vmatpush.xpose.msk.msrb.mxu2 %vm825_vm1, %v2601_v47 }
 0x9e9   : > { %v2597_v54 = vpop.permute.xlu1 %2596 }
 0x9f1   : > { %v2465_v48 = vpop.permute.xlu1 %2464 }
 0x9ff   : > { %v2391_v50 = vpop.xlane.xlu0 %2390 }
 0xa00   : > { %3477 = vrcp.f32 %v2391_v50 }
 0xa06   : > { %v3478_v12 = vpop.eup %3477 }
 0xa07   : > { %v2395_v51 = vmul.f32 %v3478_v12, %v3468_v37 }
 0xa09   : > { %3276 = vmatmul.msk.f32.gmra.mxu0 %vm2243_vm10, %v2395_v51 }
 0xa12   : > { %v2471_v4 = vpop.permute.xlu0 %2470 }
 0xa1a   : > { %v2467_v10 = vpop.permute.xlu0 %2466 }
 0xa46   : > { %v2137_v1 = vpop.f32.mrf.mxu2 }
 0xa47   : > { %3257 = vmatmul.msk.f32.vlgmr.msrb.gmra.mxu3 %vm825_vm1, %v2137_v1 }
 0xa48   : > { %3279 = vmatpush.xpose.msk.msrb.mxu3 %vm825_vm1, %v2471_v4 }
 0xa4c   : > { %3280 = vmatpush.xpose.msk.msrb.mxu3 %vm825_vm1, %v2469_v57 }
 0xa4e   : > { %v2294_v8 = vpop.f32.mrf.mxu2 }
 0xa4f   : > { %3268 = vmatmul.msk.f32.vlgmr.msra.gmra.mxu3 %vm825_vm1, %v2294_v8 }
 0xa55   : > { %v2427_v58 = vpop.f32.mrf.mxu0 }
 0xa56   : > { %v2297_v56 = vpop.f32.mrf.mxu2  ;;  %3277 = vmatmul.msk.f32.vlgmr.msra.gmra.mxu2 %vm825_vm1, %v2427_v58 }
 0xa57   : > { %3269 = vmatmul.msk.f32.gmra.mxu3 %vm825_vm1, %v2297_v56 }
 0xa5f   : > { %3281 = vmatmul.msk.f32.vlgmr.msrb.gmra.mxu3 %vm825_vm1, %v2465_v48 }
 0xa67   : > { %3282 = vmatmul.msk.f32.gmra.mxu3 %vm825_vm1, %v2467_v10  ;;  %v3509_v10 = vld [vmem:[%s3821_s21 + $0x8] sm:$0xff] }
 0xa86   : > { %v2430_v62 = vpop.f32.mrf.mxu0 }
 0xa87   : > { %3278 = vmatmul.msk.f32.gmra.mxu2 %vm825_vm1, %v2430_v62  ;;  %v4478_v62 = vadd.f32 %v3509_v10, %v4239_v43 }
 0xa8f   : > { %3290 = vmatmul.msk.f32.vlgmr.msrb.gmra.mxu2 %vm825_vm1, %v2597_v54  ;;  %v3508_v54 = vld [vmem:[%s3821_s21] sm:$0xff] }
 0xa97   : > { %3291 = vmatmul.msk.f32.gmra.mxu2 %vm825_vm1, %v2599_v42  ;;  %v2735_v42 = vsel %vm861_vm2, %v4478_v62, 0.0 }
 0xaca   : > { %v2160_v5 = vpop.f32.mrf.mxu3 }
 0xacb   : > { %v2163_v0 = vadd.f32 %v2160_v5, %v4348_v41 }
 0xacd   : > { %v4462_v59 = vadd.f32 %v3507_v27, %v2163_v0  ;;  %v4510_v27 = vld [vmem:[%s4656_s17] ss:$0 sm:$0xff] }
 0xacf   : > { %v2800_v36 = vsel %vm861_vm2, %v4462_v59, 0.0 }
 0xad2   : > { %v2323_v9 = vpop.f32.mrf.mxu3 }
 0xad3   : > { %v2329_v38 = vadd.f32 %v2323_v9, %v2193_v7 }
 0xad9   : > { %v2456_v11 = vpop.f32.mrf.mxu2 }
 0xada   : > { %v4433_v13 = vadd.f32 %v2456_v11, %v2329_v38  ;;  %v2326_v14 = vpop.f32.mrf.mxu3 }
 0xadb   : > { %v2330_v15 = vadd.f32 %v2326_v14, %v2196_v35 }
 0xae2   : > { %v2497_v20 = vpop.f32.mrf.mxu3 }
 0xae3   : > { %v2503_v21 = vsel %vm4341_vm9, -1e+09, %v2497_v20 }
 0xae4   : > { %v2505_v41 = vmul.f32 0.35355338, %v2503_v21 }
 0xae6   : > { %v2507_v22 = vsel %vm2243_vm10, %v2505_v41, -inf }
 0xae7   : > { %2508 = vmax.xlane.f32.xlu2 %v2507_v22 }
 0xaea   : > { %v2500_v24 = vpop.f32.mrf.mxu3 }
 0xaeb   : > { %v2504_v23 = vsel %vm4341_vm9, -1e+09, %v2500_v24 }
 0xaec   : > { %v2506_v25 = vmul.f32 0.35355338, %v2504_v23 }
 0xaee   : > { %v2510_v60 = vsel %vm2247_vm11, %v2506_v25, -inf }
 0xaef   : > { %2511 = vmax.xlane.f32.xlu1 %v2510_v60 }
 0xb0a   : > { %v2459_v26 = vpop.f32.mrf.mxu2 }
 0xb0b   : > { %v4441_v28 = vadd.f32 %v2459_v26, %v2330_v15 }
 0xb12   : > { %v2629_v29 = vpop.f32.mrf.mxu2 }
 0xb13   : > { %v2635_v49 = vsel %vm4341_vm9, -1e+09, %v2629_v29 }
 0xb14   : > { %v2637_v31 = vmul.f32 0.35355338, %v2635_v49 }
 0xb16   : > { %v2639_v52 = vsel %vm2243_vm10, %v2637_v31, -inf }
 0xb17   : > { %2640 = vmax.xlane.f32.xlu1 %v2639_v52 }
 0xb1a   : > { %v2632_v32 = vpop.f32.mrf.mxu2 }
 0xb1b   : > { %v2636_v37 = vsel %vm4341_vm9, -1e+09, %v2632_v32 }
 0xb1c   : > { %v2638_v39 = vmul.f32 0.35355338, %v2636_v37 }
 0xb1e   : > { %v2642_v63 = vsel %vm2247_vm11, %v2638_v39, -inf }
 0xb1f   : > { %2643 = vmax.xlane.f32.xlu0 %v2642_v63 }
 0xb30   : > { %2663 = vrot.lane.b32.xlu1 %v4380_v44, %s4710_s29 }
 0xb33   : > { %2661 = vrot.lane.b32.xlu0 %v4385_v30, %s4710_s29 }
 0xb5a   : > { %v2509_v33 = vpop.xlane.xlu2 %2508 }
 0xb5b   : > { %v2513_v40 = vsub.f32 %v2505_v41, %v2509_v33 }
 0xb5d   : > { %v2515_v16 = vmul.f32 1.442695, %v2513_v40 }
 0xb5f   : > { %3479 = vpow2.f32 %v2515_v16 }
 0xb62   : > { %v2512_v61 = vpop.xlane.xlu1 %2511 }
 0xb63   : > { %v2514_v2 = vsub.f32 %v2506_v25, %v2512_v61 }
 0xb65   : > { %v4453_v19 = vpop.eup %3479  ;;  %v2517_v53 = vmul.f32 1.442695, %v2514_v2 }
 0xb66   : > { %v2519_v45 = vsel %vm2243_vm10, %v4453_v19, 0.0 }
 0xb67   : > { %3481 = vpow2.f32 %v2517_v53  ;;  %2520 = vadd.xlane.f32.xlu0 %v2519_v45 }
 0xb6d   : > { %v4457_v55 = vpop.eup %3481 }
 0xb6e   : > { %v2522_v6 = vsel %vm2247_vm11, %v4457_v55, 0.0 }
 0xb6f   : > { %2523 = vadd.xlane.f32.xlu1 %v2522_v6 }
 0xb77   : > { %2801 = vadd.xlane.f32.xlu1 %v2800_v36 }
 0xb7b   : > { %2529 = vrot.lane.b32.xlu0 %v4385_v30, %s4713_s25  ;;  %v2728_v30 = vadd.f32 %v3508_v54, %v4237_v34  ;;  %v3620_v34 = vmov 32.0  }
 0xb7d   : > { %v2732_v56 = vsel %vm861_vm2, %v2728_v30, 0.0 }
 0xb8a   : > { %v2641_v46 = vpop.xlane.xlu1 %2640 }
 0xb8b   : > { %v2645_v18 = vsub.f32 %v2637_v31, %v2641_v46 }
 0xb8d   : > { %v2647_v47 = vmul.f32 1.442695, %v2645_v18 }
 0xb8f   : > { %3483 = vpow2.f32 %v2647_v47 }
 0xb92   : > { %v2644_v50 = vpop.xlane.xlu0 %2643 }
 0xb93   : > { %v2646_v12 = vsub.f32 %v2638_v39, %v2644_v50 }
 0xb95   : > { %v3484_v51 = vpop.eup %3483  ;;  %v2649_v1 = vmul.f32 1.442695, %v2646_v12 }
 0xb96   : > { %v2651_v4 = vsel %vm2243_vm10, %v3484_v51, 0.0 }
 0xb97   : > { %3485 = vpow2.f32 %v2649_v1  ;;  %2652 = vadd.xlane.f32.xlu2 %v2651_v4 }
 0xb98   : > { %3487 = vrcp.f32 %v3620_v34 }
 0xb9d   : > { %v3486_v57 = vpop.eup %3485 }
 0xb9e   : > { %v2654_v8 = vsel %vm2247_vm11, %v3486_v57, 0.0  ;;  %v3488_v5 = vpop.eup %3487 }
 0xb9f   : > { %2655 = vadd.xlane.f32.xlu2 %v2654_v8  ;;  %v2739_v3 = vmul.f32 32.0, %v3488_v5  ;;  %vm2743_vm12 = vweird.f32 %v3488_v5 }
 0xba1   : > { %v2740_v9 = vsub.f32 1.0, %v2739_v3 }
 0xba2   : > { %v2664_v58 = vpop.permute.xlu1 %2663 }
 0xba3   : > { %3292 = vmatpush.msk.msra.mxu3 %vm2273_vm3, %v2664_v58  ;;  %v2741_v38 = vmul.f32 %v3488_v5, %v2740_v9 }
 0xba5   : > { %v2662_v48 = vpop.permute.xlu0 %2661  ;;  %2733 = vadd.xlane.f32.xlu0 %v2732_v56  ;;  %v2742_v43 = vadd.f32 %v3488_v5, %v2741_v38 }
 0xba6   : > { %2689 = vmatpush.msra.mxu3 %v2662_v48 }
 0xba7   : > { %v4483_v21 = vsel %vm2743_vm12, %v3488_v5, %v2742_v43 }
 0xbb7   : > { %2531 = vrot.lane.b32.xlu2 %v4380_v44, %s4713_s25 }
 0xbda   : > { %v2521_v0 = vpop.xlane.xlu0 %2520 }
 0xbe0   : > { %2736 = vadd.xlane.f32.xlu2 %v2735_v42 }
 0xbe2   : > { %v2524_v20 = vpop.xlane.xlu1 %2523 }
 0xbea   : > { %v2802_v58 = vpop.xlane.xlu1 %2801 }
 0xbeb   : > { %v2803_v42 = vmul.f32 %v2802_v58, %v4483_v21 }
 0xbed   : > { %v2530_v35 = vpop.permute.xlu0 %2529  ;;  %v4528_v3 = vsub.f32 %v4462_v59, %v2803_v42 }
 0xbef   : > { %v2805_v9 = vmul.f32 %v4528_v3, %v4528_v3 }
 0xc0a   : > { %v2653_v7 = vpop.xlane.xlu2 %2652 }
 0xc0b   : > { %3489 = vrcp.f32 %v2653_v7 }
 0xc0c   : > { %3491 = vrcp.f32 %v2521_v0 }
 0xc11   : > { %v3490_v11 = vpop.eup %3489 }
 0xc12   : > { %v2659_v44 = vmul.f32 %v3490_v11, %v3484_v51  ;;  %v2656_v14 = vpop.xlane.xlu2 %2655  ;;  %v3492_v15 = vpop.eup %3491 }
 0xc13   : > { %3493 = vrcp.f32 %v2656_v14  ;;  %v2527_v26 = vmul.f32 %v3492_v15, %v4453_v19 }
 0xc14   : > { %3293 = vmatmul.msk.f32.vlgmr.msra.gmra.mxu3 %vm2243_vm10, %v2659_v44  ;;  %3495 = vrcp.f32 %v2524_v20 }
 0xc18   : > { %v2734_v41 = vpop.xlane.xlu0 %2733 }
 0xc19   : > { %v3494_v22 = vpop.eup %3493  ;;  %v2745_v24 = vmul.f32 %v4483_v21, %v2734_v41 }
 0xc1a   : > { %v2532_v23 = vpop.permute.xlu2 %2531  ;;  %v2660_v25 = vmul.f32 %v3494_v22, %v3486_v57  ;;  %v3496_v31 = vpop.eup %3495  ;;  %v3510_v57 = vld [vmem:[%s4075_s20] sm:$0xff] }
 0xc1b   : > { %v2747_v60 = vsub.f32 %v2728_v30, %v2745_v24  ;;  %3283 = vmatpush.msk.msrb.mxu1 %vm2273_vm3, %v2532_v23  ;;  %v2528_v52 = vmul.f32 %v3496_v31, %v4457_v55  ;;  %v4505_v55 = vld [vmem:[%s4655_s16] ss:$0 sm:$0xff] }
 0xc1c   : > { %3294 = vmatmul.msk.f32.gmra.mxu3 %vm2243_vm10, %v2660_v25 }
 0xc1d   : > { %2557 = vmatpush.msrb.mxu1 %v2530_v35  ;;  %v2749_v29 = vmul.f32 %v2747_v60, %v2747_v60 }
 0xc1e   : > { %3284 = vmatmul.msk.f32.vlgmr.msrb.gmra.mxu1 %vm2243_vm10, %v2527_v26 }
 0xc1f   : > { %v2751_v49 = vsel %vm861_vm2, %v2749_v29, 0.0  ;;  %2718 = vmatpush.msra.mxu1 %v4286_v17 }
 0xc20   : > { %2752 = vadd.xlane.f32.xlu0 %v2751_v49 }
 0xc26   : > { %3285 = vmatmul.msk.f32.gmra.mxu1 %vm2243_vm10, %v2528_v52 }
 0xc53   : > { %v2737_v47 = vpop.xlane.xlu2 %2736 }
 0xc54   : > { %v2746_v1 = vmul.f32 %v4483_v21, %v2737_v47 }
 0xc56   : > { %v2748_v54 = vsub.f32 %v4478_v62, %v2746_v1 }
 0xc58   : > { %v2750_v5 = vmul.f32 %v2748_v54, %v2748_v54 }
 0xc5a   : > { %v2754_v62 = vsel %vm861_vm2, %v2750_v5, 0.0 }
 0xc93   : > { %v2753_v32 = vpop.xlane.xlu0 %2752 }
 0xc94   : > { %v2757_v37 = vmul.f32 %v2753_v32, %v4483_v21 }
 0xc96   : > { %v2759_v39 = vadd.f32 1e-05, %v2757_v37 }
 0xc97   : > { %v2691_v63 = vpop.f32.mrf.mxu3 }
 0xc98   : > { %3497 = vrsqrt.f32 %v2759_v39  ;;  %3295 = vmatmul.msk.f32.vlgmr.msra.gmra.mxu1 %vm825_vm1, %v2691_v63  ;;  %vm2767_vm14 = vweird.f32 %v2759_v39 }
 0xc9b   : > { %v2559_v33 = vpop.f32.mrf.mxu1 }
 0xc9c   : > { %3286 = vmatmul.msk.f32.vlgmr.msrb.gmra.mxu0 %vm825_vm1, %v2559_v33 }
 0xc9e   : > { %v3498_v40 = vpop.eup %3497 }
 0xc9f   : > { %v2762_v17 = vmul.f32 %v3498_v40, %v2759_v39  ;;  %v2694_v16 = vpop.f32.mrf.mxu3  ;;  %vm2768_vm13 = vweird.f32 %v3498_v40 }
 0xca0   : > { %3296 = vmatmul.msk.f32.gmra.mxu1 %vm825_vm1, %v2694_v16  ;;  %vm2769_vm15 = vmor %vm2767_vm14, %vm2768_vm13 }
 0xca1   : > { %v2763_v61 = vmul.f32 %v3498_v40, %v2762_v17 }
 0xca3   : > { %v2764_v2 = vmul.f32 0.5, %v2763_v61  ;;  %v2562_v19 = vpop.f32.mrf.mxu1 }
 0xca4   : > { %3287 = vmatmul.msk.f32.gmra.mxu0 %vm825_vm1, %v2562_v19 }
 0xca5   : > { %v2765_v53 = vsub.f32 1.5, %v2764_v2 }
 0xca7   : > { %v2766_v45 = vmul.f32 %v3498_v40, %v2765_v53 }
 0xca9   : > { %v2770_v6 = vsel %vm2769_vm15, %v3498_v40, %v2766_v45 }
 0xcaa   : > { %v2781_v36 = vmul.f32 %v2770_v6, %v2747_v60 }
 0xcac   : > { %v2786_v46 = vmul.f32 %v4505_v55, %v2781_v36 }
 0xcae   : > { %v2791_v18 = vadd.f32 %v4510_v27, %v2786_v46 }
 0xcb0   : > { %2793 = vst.msk [vmem:[%s4515_s26] sm:$0xff] %vm861_vm2, %v2791_v18 }
 0xd15   : > { %v2720_v50 = vpop.f32.mrf.mxu1 }
 0xd19   : > { %v2588_v12 = vpop.f32.mrf.mxu0 }
 0xd1a   : > { %v2594_v51 = vadd.f32 %v2588_v12, %v4433_v13  ;;  %v3511_v13 = vld [vmem:[%s4075_s20 + $0x8] sm:$0xf]  ;;  %s3313_s20 = sshll.u32 %s3749_s2, 4 }
 0xd1b   : > { %s2915_s25 = scalar_lea.hbm %s4657_s18, %s3313_s20 }
 0xd1c   : > { %v2726_v4 = vadd.f32 %v2720_v50, %v2594_v51  ;;  %s2918_s30 = sshll.u32 %s2915_s25, 4  ;;  %s3532_s25 = scalar_lea.hbm %s4657_s18, 32  ;;  %s4558_s30 = int_to_ptr.hbm [resolvable:$true] %s2918_s30 }
 0xd1d   : > { %v2723_v10 = vpop.f32.mrf.mxu1  ;;  %s3526_s20 = sshra.s32 %s4558_s30, 4  ;;  %s3527_s20 = int_to_ptr.hbm [resolvable:$true] %s3526_s20 }
 0xd1e   : > { %v2831_v8 = vadd.f32 %v3510_v57, %v2726_v4  ;;  %s3528_s1 = scalar_lea.hbm %s3527_s20, 16  ;;  %p3533_p0 = scmp.lt.s32.totalorder %s3527_s20, %s4657_s18 }
 0xd1f   : > { %p3529_p11 = scmp.ne.s32.totalorder %s3527_s20, %s3528_s1  ;;  %p3534_p1 = scmp.lt.s32.totalorder %s3532_s25, %s3528_s1 }
 0xd20   : > { %v2837_v30 = vsel %vm861_vm2, %v2831_v8, 0.0 }
 0xd21   : > { %2838 = vadd.xlane.f32.xlu1 %v2837_v30  ;;  %v2591_v56 = vpop.f32.mrf.mxu0  ;;  %p3530_p12 = pnand %p3529_p11, %p3766_p5  ;;  %p3535_p2 = por %p3534_p1, %p3533_p0 }
 0xd22   : > { %v2595_v48 = vadd.f32 %v2591_v56, %v4441_v28  ;;  %v2806_v28 = vsel %vm861_vm2, %v2805_v9, 0.0 }
 0xd23   : > { %p3531_p13 = pneg %p3530_p12 }
 0xd24   : > { %v2727_v34 = vadd.f32 %v2723_v10, %v2595_v48 }
 0xd25   : > { %p3536_p3 = pnand %p3535_p2, %p3531_p13 }
 0xd26   : > { %v2832_v0 = vadd.f32 %v3511_v13, %v2727_v34 }
 0xd28   : > { %v2840_v7 = vsel %vm1124_vm7, %v2832_v0, 0.0 }
 0xd29   : > { %2841 = vadd.xlane.f32.xlu2 %v2840_v7  ;;  %2755 = vadd.xlane.f32.xlu1 %v2754_v62 }
 0xd31   : > { %2807 = vadd.xlane.f32.xlu2 %v2806_v28 }
 0xd94   : > { %v2839_v38 = vpop.xlane.xlu1 %2838 }
 0xd95   : > { %v2843_v35 = vmul.f32 %v2839_v38, %v4483_v21 }
 0xd97   : > { %v4536_v11 = vsub.f32 %v2831_v8, %v2843_v35 }
 0xd99   : > { %v2847_v59 = vmul.f32 %v4536_v11, %v4536_v11 }
 0xd9b   : > { %v2849_v44 = vsel %vm861_vm2, %v2847_v59, 0.0 }
 0xd9c   : > { %2850 = vadd.xlane.f32.xlu0 %v2849_v44  ;;  %v2756_v14 = vpop.xlane.xlu1 %2755  ;;  %v2842_v43 = vpop.xlane.xlu2 %2841 }
 0xd9d   : > { %v2758_v15 = vmul.f32 %v2756_v14, %v4483_v21  ;;  %v2844_v20 = vmul.f32 %v2842_v43, %v4483_v21 }
 0xd9f   : > { %v2760_v41 = vadd.f32 1e-05, %v2758_v15  ;;  %v4543_v22 = vsub.f32 %v2832_v0, %v2844_v20 }
 0xda1   : > { %3499 = vrsqrt.f32 %v2760_v41  ;;  %v2848_v24 = vmul.f32 %v4543_v22, %v4543_v22  ;;  %vm2777_vm0 = vweird.f32 %v2760_v41 }
 0xda3   : > { %v2852_v23 = vsel %vm1124_vm7, %v2848_v24, 0.0 }
 0xda4   : > { %2853 = vadd.xlane.f32.xlu1 %v2852_v23  ;;  %v2808_v25 = vpop.xlane.xlu2 %2807 }
 0xda5   : > { %v2809_v60 = vmul.f32 %v2808_v25, %v4483_v21 }
 0xda7   : > { %v3500_v26 = vpop.eup %3499  ;;  %v2810_v29 = vadd.f32 1e-05, %v2809_v60 }
 0xda8   : > { %v2772_v49 = vmul.f32 %v3500_v26, %v2760_v41  ;;  %vm2778_vm1 = vweird.f32 %v3500_v26 }
 0xda9   : > { %3501 = vrsqrt.f32 %v2810_v29  ;;  %vm2779_vm4 = vmor %vm2777_vm0, %vm2778_vm1  ;;  %vm2817_vm6 = vweird.f32 %v2810_v29 }
 0xdaa   : > { %v2773_v31 = vmul.f32 %v3500_v26, %v2772_v49 }
 0xdac   : > { %v2774_v52 = vmul.f32 0.5, %v2773_v31 }
 0xdae   : > { %v2775_v32 = vsub.f32 1.5, %v2774_v52 }
 0xdaf   : > { %v3502_v37 = vpop.eup %3501 }
 0xdb0   : > { %v2776_v39 = vmul.f32 %v3500_v26, %v2775_v32  ;;  %v2812_v63 = vmul.f32 %v3502_v37, %v2810_v29  ;;  %vm2818_vm5 = vweird.f32 %v3502_v37 }
 0xdb1   : > { %vm4562_vm8 = vmor %vm2817_vm6, %vm2818_vm5 }
 0xdb2   : > { %v2780_v33 = vsel %vm2779_vm4, %v3500_v26, %v2776_v39  ;;  %v2813_v40 = vmul.f32 %v3502_v37, %v2812_v63 }
 0xdb3   : > { %v2782_v17 = vmul.f32 %v2780_v33, %v2748_v54 }
 0xdb4   : > { %v2814_v16 = vmul.f32 0.5, %v2813_v40 }
 0xdb5   : > { %v2787_v61 = vmul.f32 %v4505_v55, %v2782_v17  ;;  %v3401_v55 = vld [vmem:[%s4655_s16 + $0x1] ss:$0 sm:$0xff] }
 0xdb6   : > { %v2815_v2 = vsub.f32 1.5, %v2814_v16 }
 0xdb7   : > { %v2792_v19 = vadd.f32 %v4510_v27, %v2787_v61 }
 0xdb8   : > { %v2816_v53 = vmul.f32 %v3502_v37, %v2815_v2 }
 0xdb9   : > { %2794 = vst.msk [vmem:[%s4515_s26 + $0x8] sm:$0xff] %vm861_vm2, %v2792_v19 }
 0xdba   : > { %v2820_v6 = vsel %vm4562_vm8, %v3502_v37, %v2816_v53 }
 0xdbb   : > { %3539 = shalt.err (!%p3536_p3)
}
 0xdbc   : > { %s3621_s28 = smov 128   ;;  %s3622_s29 = smov 8   ;;  %v2821_v27 = vmul.f32 %v2820_v6, %v4528_v3  ;;  %v3402_v36 = vld [vmem:[%s4656_s17 + $0x1] ss:$0 sm:$0xff] }
 0xdbd   : > { %3314 = dma.vmem_to_hbm [thread:$0]  (%p3766_p5), %s4556_s9, 256, %s4558_s30, %s2894_s0, %s3621_s28, %s3621_s28, %s3622_s29  }
 0xdbe   : > { %s737_s20 = scalar_lea.vmem [#allocation8], %s3148_s23  ;;  %s2935_s6 = sshll.u32 %s2931_s3, 4  ;;  %v2825_v46 = vmul.f32 %v3401_v55, %v2821_v27  ;;  %s2936_s6 = int_to_ptr.hbm [resolvable:$true] %s2935_s6 }
 0xdbf   : > { %s2933_s1 = sshll.u32 %s737_s20, 4  ;;  %s2899_s25 = scalar_lea.sflag [#allocation9], %s4500_s27  ;;  %s2934_s1 = int_to_ptr.vmem [resolvable:$true] %s2933_s1 }
 0xdc0   : > { %v2829_v18 = vadd.f32 %v3402_v36, %v2825_v46  ;;  %s3554_s2 = sshra.s32 %s2936_s6, 4  ;;  %s3560_s23 = scalar_lea.hbm %s4658_s19, 16  ;;  %s3555_s2 = int_to_ptr.hbm [resolvable:$true] %s3554_s2 }
 0xdc1   : > { %s3556_s9 = scalar_lea.hbm %s3555_s2, 8  ;;  %p3561_p9 = scmp.lt.s32.totalorder %s3555_s2, %s4658_s19 }
 0xdc2   : > { %2830 = vst.msk [vmem:[%s737_s20] sm:$0xff] %vm861_vm2, %v2829_v18  ;;  %p3557_p4 = scmp.ne.s32.totalorder %s3555_s2, %s3556_s9  ;;  %p3562_p10 = scmp.lt.s32.totalorder %s3560_s23, %s3556_s9 }
 0xdc4   : > { %p3558_p7 = pnand %p3557_p4, %p3766_p5  ;;  %p3563_p11 = por %p3562_p10, %p3561_p9 }
 0xdc6   : > { %p3559_p8 = pneg %p3558_p7 }
 0xdc8   : > { %p3564_p12 = pnand %p3563_p11, %p3559_p8 }
 0xdca   : > { %3567 = shalt.err (!%p3564_p12)
}
 0xdcb   : > { %3315 = dma.vmem_to_hbm [thread:$0]  (%p3766_p5), %s2934_s1, 128, %s2936_s6, %s2899_s25   ;;  %v3399_v42 = vld [vmem:[%s4655_s16 + $0x2] ss:$0 sm:$0xff] }
 0xdcc   : > { %v3400_v5 = vld [vmem:[%s4656_s17 + $0x2] ss:$0 sm:$0xff]  ;;  %s4716_s20 = sld [smem:[#allocation26_spill]] }
 0xdd2   : > { %s786_s1 = scalar_lea.vmem %s4716_s20, %s3810_s24 }
 0xe0f   : > { %v2851_v47 = vpop.xlane.xlu0 %2850 }
 0xe10   : > { %v2855_v50 = vmul.f32 %v2851_v47, %v4483_v21 }
 0xe12   : > { %v2857_v12 = vadd.f32 1e-05, %v2855_v50 }
 0xe14   : > { %3503 = vrsqrt.f32 %v2857_v12  ;;  %vm2865_vm10 = vweird.f32 %v2857_v12 }
 0xe17   : > { %v2854_v51 = vpop.xlane.xlu1 %2853 }
 0xe18   : > { %v2856_v1 = vmul.f32 %v2854_v51, %v4483_v21 }
 0xe1a   : > { %v3504_v4 = vpop.eup %3503  ;;  %v2858_v57 = vadd.f32 1e-05, %v2856_v1 }
 0xe1b   : > { %v2860_v8 = vmul.f32 %v3504_v4, %v2857_v12  ;;  %vm2866_vm9 = vweird.f32 %v3504_v4 }
 0xe1c   : > { %3505 = vrsqrt.f32 %v2858_v57  ;;  %vm2867_vm11 = vmor %vm2865_vm10, %vm2866_vm9  ;;  %vm2875_vm12 = vweird.f32 %v2858_v57 }
 0xe1d   : > { %v2861_v54 = vmul.f32 %v3504_v4, %v2860_v8 }
 0xe1f   : > { %v2862_v30 = vmul.f32 0.5, %v2861_v54 }
 0xe21   : > { %v2863_v58 = vsub.f32 1.5, %v2862_v30 }
 0xe22   : > { %v3506_v56 = vpop.eup %3505 }
 0xe23   : > { %v2864_v48 = vmul.f32 %v3504_v4, %v2863_v58  ;;  %v2870_v10 = vmul.f32 %v3506_v56, %v2858_v57  ;;  %vm2876_vm3 = vweird.f32 %v3506_v56 }
 0xe24   : > { %vm2877_vm13 = vmor %vm2875_vm12, %vm2876_vm3 }
 0xe25   : > { %v2868_v34 = vsel %vm2867_vm11, %v3504_v4, %v2864_v48  ;;  %v2871_v21 = vmul.f32 %v3506_v56, %v2870_v10 }
 0xe26   : > { %v2879_v13 = vmul.f32 %v2868_v34, %v4536_v11 }
 0xe27   : > { %v2872_v0 = vmul.f32 0.5, %v2871_v21 }
 0xe28   : > { %v2884_v3 = vmul.f32 %v3399_v42, %v2879_v13 }
 0xe29   : > { %v2873_v7 = vsub.f32 1.5, %v2872_v0 }
 0xe2a   : > { %v2889_v62 = vadd.f32 %v3400_v5, %v2884_v3 }
 0xe2b   : > { %v2874_v9 = vmul.f32 %v3506_v56, %v2873_v7 }
 0xe2c   : > { %2891 = vst.msk [vmem:[%s786_s1] sm:$0xff] %vm861_vm2, %v2889_v62 }
 0xe2d   : > { %v2878_v28 = vsel %vm2877_vm13, %v3506_v56, %v2874_v9 }
 0xe2e   : > { %v2880_v38 = vmul.f32 %v2878_v28, %v4543_v22 }
 0xe30   : > { %v2885_v35 = vmul.f32 %v3399_v42, %v2880_v38 }
 0xe32   : > { %v2890_v59 = vadd.f32 %v3400_v5, %v2885_v35 }
 0xe34   : > { %2892 = vst.msk [vmem:[%s786_s1 + $0x8] sm:$0xf] %vm1124_vm7, %v2890_v59 }
 0xe35 PF: > { %s4717_s6 = sld [smem:[#allocation14_spill]] }
 0xe36   : > { %s4718_s25 = sld [smem:[#allocation12_spill]] }
 0xe3b   : > { %p3325_p5 = scmp.ge.s32.totalorder %s4717_s6, 2 }
 0xe3c   : > { %s2950_s24 = sand.u32 1, %s4718_s25  }
 0xe3d   : > { %p3319_p13 = pnand %p3325_p5, %p3770_p6  ;;  %s2951_s9 = scalar_lea.sflag [#allocation7], %s2950_s24 }
 0xe3f   : > { %p3320_p0 = pneg %p3319_p13 }
 0xe41   : > { %3585 = dma.done.wait (%p3320_p0), %s2951_s9, 256  }
 0xe42   : > { %3587 = vsyncadd (%p3320_p0), %s2951_s9, 4294967040  ;;  %s2961_s30 = scalar_lea.sflag [#allocation9], %s2950_s24 }
 0xe43   : > { %3589 = dma.done.wait (%p3320_p0), %s2961_s30, 128  }
 0xe44   : > { %3591 = vsyncadd (%p3320_p0), %s2961_s30, 4294967168  ;;  %s4720_s24 = sld [smem:[#allocation15_spill]]  ;;  %s4723_s1 = smov %s3598_s22 }
 0xe45   : > { %s4721_s0 = sld [smem:[#allocation13_spill]] }
 0xe46   : > { %s4722_s23 = sld [smem:[#allocation16_spill]] }
 0xe4a   : > { %p34_p1 = scmp.ge.s32.totalorder %s4720_s24, 4  }
 0xe4b   : > { %s4724_s22 = smov %s4721_s0 }
 0xe4c   :  { %36 = sbr.rel (!%p34_p1) target bundleno = 15 (0xf), region = 197 }
 0xe51   :  { %2975 = vsyncpa [#allocation7], 1 }
 0xe52   :  { %2977 = vsyncpa [#allocation7 + $0x1], 1 }
 0xe53   :  { %2978 = vsyncpa [#allocation9], 1 }
 0xe54   :  { %2980 = vsyncpa [#allocation9 + $0x1], 1 }

// kernel: single_block_forward.6
= control target key start
LH: loop header
LB: loop body
LE: loop exit
PB: predicated region body
PF: predicated region fallthrough
CT: control target
= control target key end

     0   :  { %s6120_s0 = inlined_call_operand.vmem [shape: f32[2,16,32], index: 0, kind: input, shape index: {}]   ;;  %s6121_s1 = inlined_call_operand.vmem [shape: f32[2,8,32], index: 1, kind: input, shape index: {}]   ;;  %s6122_s2 = inlined_call_operand.vmem [shape: f32[2,12,32], index: 2, kind: input, shape index: {}]   ;;  %s6123_s3 = inlined_call_operand.vmem [shape: f32[2,16,1], index: 3, kind: input, shape index: {}]   ;;  %s6124_s4 = inlined_call_operand.vmem [shape: f32[2,8,1], index: 4, kind: input, shape index: {}]   ;;  %s6125_s5 = inlined_call_operand.vmem [shape: f32[2,12,1], index: 5, kind: input, shape index: {}]   ;;  %s6126_s6 = inlined_call_operand.vmem [shape: f32[2,1,17], index: 6, kind: input, shape index: {}]   ;;  %s6127_s7 = inlined_call_operand.vmem [shape: f32[2,1,8], index: 7, kind: input, shape index: {}]   ;;  %s6128_s8 = inlined_call_operand.vmem [shape: f32[2,1,13], index: 8, kind: input, shape index: {}]   ;;  %s6129_s9 = inlined_call_operand.vmem [shape: f32[2,17,13], index: 9, kind: input, shape index: {}]   ;;  %s6130_s10 = inlined_call_operand.vmem [shape: f32[2,13,17], index: 10, kind: input, shape index: {}]   ;;  %s6131_s11 = inlined_call_operand.vmem [shape: f32[3,32,96], index: 11, kind: input, shape index: {}]   ;;  %s6132_s12 = inlined_call_operand.vmem [shape: f32[3,1,96], index: 12, kind: input, shape index: {}]   ;;  %s6133_s13 = inlined_call_operand.vmem [shape: f32[4,1,32], index: 13, kind: input, shape index: {}]   ;;  %s6134_s14 = inlined_call_operand.vmem [shape: f32[3,96,32], index: 14, kind: input, shape index: {}]   ;;  %s6135_s15 = inlined_call_operand.vmem [shape: f32[3,1,32], index: 15, kind: input, shape index: {}]   ;;  %s6136_s16 = inlined_call_operand.vmem [shape: f32[3,1,32], index: 16, kind: input, shape index: {}]   ;;  %s6137_s17 = inlined_call_operand.vmem [shape: f32[3,1,32], index: 17, kind: input, shape index: {}]   ;;  %s6138_s18 = inlined_call_operand.vmem [shape: f32[2,16,32], index: 18, kind: output, shape index: {0}]   ;;  %s6139_s19 = inlined_call_operand.vmem [shape: f32[2,8,32], index: 19, kind: output, shape index: {1}]   ;;  %s6140_s20 = inlined_call_operand.vmem [shape: f32[2,12,32], index: 20, kind: output, shape index: {2}]  }
   0x1   :  { %6156 = sst [smem:[#allocation7_spill]] %s6120_s0 }
   0x2   :  { %6157 = sst [smem:[#allocation8_spill]] %s6121_s1  ;;  %s4855_s1 = smov 0  }
   0x3   :  { %6158 = sst [smem:[#allocation9_spill]] %s6122_s2 }
   0x4   :  { %6159 = sst [smem:[#allocation10_spill]] %s6123_s3 }
   0x5   :  { %6160 = sst [smem:[#allocation11_spill]] %s6124_s4 }
   0x6   :  { %6161 = sst [smem:[#allocation12_spill]] %s6125_s5 }
   0x7   :  { %6162 = sst [smem:[#allocation13_spill]] %s6139_s19 }
   0x8   :  { %6163 = sst [smem:[#allocation14_spill]] %s6140_s20 }
   0x9 LB: > { %6164 = sst [smem:[#allocation6_spill]] %s4735_s1  ;;  %s4227_s22 = sadd.s32 4294967295, %s4735_s1   ;;  %s4735_s1 = sphi %s4855_s1, %s31_s1  }
   0xa   : > { %p4231_p0 = scmp.ge.s32.totalorder %s4735_s1, 1  ;;  %p659_p1 = scmp.lt.s32.totalorder %s4735_s1, 3 }
   0xc   : > { %p660_p2 = pnand %p4231_p0, %p659_p1 }
   0xd   : > { %p768_p3 = scmp.lt.s32.totalorder (!%p660_p2), %s4227_s22, 1  ;;  %s6165_s0 = sld [smem:[#allocation7_spill]] (!%p660_p2) }
   0xe   : > { %663 = sbr.rel (%p660_p2) target bundleno = 6755 (0x1a63), region = 92  ;;  %s6166_s3 = sld [smem:[#allocation10_spill]] (!%p660_p2) }
   0xf   : > { %s6167_s2 = sld [smem:[#allocation8_spill]] (!%p660_p2)  ;;  %s6146_s19 = smov (!%p660_p2), 96  }
  0x10   : > { %s6168_s28 = sld [smem:[#allocation11_spill]] (!%p660_p2)  ;;  %s6144_s20 = smov (!%p660_p2), 88  }
  0x11   : > { %s6154_s23 = smov (!%p660_p2), 120   ;;  %s4742_s27 = smov (!%p660_p2), 56  }
  0x12   : > { %s6148_s30 = smov (!%p660_p2), 104   ;;  %s6172_s5 = sld [smem:[#allocation12_spill]] (!%p660_p2) }
  0x13   : > { %v839_v0 = vld [vmem:[%s6131_s11 + $0x18] sm:$0xff]  ;;  %v838_v1 = vld [vmem:[%s6131_s11 + $0x10] sm:$0xff]  ;;  %v837_v2 = vld [vmem:[%s6131_s11 + $0x8] sm:$0xff]  ;;  %s6188_s22 = smov (!%p768_p3, %s4227_s22), 1  ;;  %v4737_v3 = vmov 0   ;;  %vm844_vm0 = vcmask 261120  }
  0x14   : > { %863 = vmatpush.msra.mxu0 %v839_v0  ;;  %4496 = vmatpush.msra.mxu1 %v839_v0  ;;  %v836_v4 = vld [vmem:[%s6131_s11] sm:$0xff]  ;;  %s4880_s4 = sshll.u32 %s6188_s22, 4  ;;  %v4255_v5 = vld [vmem:[%s6131_s11 + $0x38] sm:$0xff]  ;;  %v4254_v10 = vld [vmem:[%s6131_s11 + $0x30] sm:$0xff]  ;;  %s4904_s29 = sshll.u32 %s6188_s22, 3  ;;  %vm1113_vm1 = vcmask 64512  }
  0x15   : > { %4522 = vset.pattern.permute.xlu0 %v4737_v3  ;;  %4523 = vset.pattern.permute.xlu1 %v4737_v3  ;;  %s4886_s21 = scalar_lea.vmem %s6165_s0, %s4880_s4  ;;  %s786_s26 = scalar_lea.vmem %s6166_s3, %s4880_s4  ;;  %v4253_v12 = vld [vmem:[%s6131_s11 + $0x28] sm:$0xff]  ;;  %v4252_v14 = vld [vmem:[%s6131_s11 + $0x20] sm:$0xff]  ;;  %v1041_v32 = vld [vmem:[%s6134_s14 + $0x18] sm:$0xff]  ;;  %vm987_vm4 = vcmask 253952   ;;  %vm1003_vm5 = vcmask 257024   ;;  %vm1677_vm6 = vcmask 1044480  }
  0x16   : > { %864 = vmatpush.msra.mxu0 %v838_v1  ;;  %4497 = vmatpush.msra.mxu1 %v838_v1  ;;  %v4892_v6 = vld [vmem:[%s4886_s21] sm:$0xff]  ;;  %v830_v7 = vld [vmem:[%s4886_s21 + $0x8] sm:$0xff]  ;;  %s4915_s25 = scalar_lea.vmem %s6167_s2, %s4904_s29  ;;  %s790_s1 = scalar_lea.vmem %s6168_s28, %s4904_s29  ;;  %v1040_v33 = vld [vmem:[%s6134_s14 + $0x10] sm:$0xff]  ;;  %vm1648_vm9 = vcmask 105472   ;;  %vm2181_vm12 = vcmask 138240   ;;  %vm2196_vm13 = vcmask 1040384  }
  0x17   : > { %v834_v8 = vmax.f32 %v4892_v6, 0.0  ;;  %v835_v9 = vmax.f32 %v830_v7, 0.0  ;;  %v874_v11 = vld [vmem:[%s786_s26] sm:$0xff]  ;;  %v875_v17 = vld [vmem:[%s786_s26 + $0x8] sm:$0xff]  ;;  %1098 = vmatpush.msra.mxu3 %v1041_v32  ;;  %s801_s2 = scalar_lea.vmem %s6127_s7, %s6188_s22  ;;  %s4741_s3 = smov 64   ;;  %vm2958_vm14 = vcmask 134144  }
  0x18   : > { %865 = vmatpush.msra.mxu0 %v837_v2  ;;  %4498 = vmatpush.msra.mxu1 %v837_v2  ;;  %v831_v13 = vld [vmem:[%s4915_s25] sm:$0xff]  ;;  %v1039_v34 = vld [vmem:[%s6134_s14 + $0x8] sm:$0xff]  ;;  %s6142_s28 = smov 80   ;;  %s6150_s0 = smov 72   ;;  %vm3425_vm15 = vcmask 60416  }
  0x19   : > { %878 = vperm.xlu0 %4522, %v874_v11   ;;  %v922_v15 = vld [vmem:[%s790_s1] sm:$0xff]  ;;  %v888_v16 = vmax.f32 %v831_v13, 0.0  ;;  %1099 = vmatpush.msra.mxu3 %v1040_v33  ;;  %s4747_s1 = smov 48   ;;  %s4748_s26 = smov 40  }
  0x1a   : > { %866 = vmatpush.msra.mxu0 %v836_v4  ;;  %4499 = vmatpush.msra.mxu1 %v836_v4  ;;  %v4539_v19 = vld [vmem:[%s6132_s12] ss:$0 sm:$0xff]  ;;  %v4540_v27 = vld [vmem:[%s6132_s12 + $0x1] ss:$0 sm:$0xff]  ;;  %s6180_s24 = smov 80  }
  0x1b   : > { %4250 = vmatmul.msk.f32.vlgmr.msra.gmra.mxu0 %vm844_vm0, %v834_v8  ;;  %4251 = vmatmul.msk.f32.vlgmr.msra.gmra.mxu1 %vm844_vm0, %v835_v9  ;;  %v1038_v35 = vld [vmem:[%s6134_s14] sm:$0xff] }
  0x1c   : > { %914 = vmatpush.msrb.mxu1 %v4255_v5  ;;  %925 = vperm.xlu1 %4523, %v922_v15   ;;  %v1032_v41 = vld [vmem:[%s801_s2] sm:$0x1]  ;;  %s804_s2 = scalar_lea.vmem %s6128_s8, %s6188_s22 }
  0x1d   : > { %1100 = vmatpush.msra.mxu3 %v1039_v34  ;;  %vm1144_vm2 = vcmp.eq.f32.partialorder %v1032_v41, 0.0  ;;  %v4258_v41 = vld [vmem:[%s6131_s11 + $0x40] sm:$0xff] }
  0x1e   : > { %915 = vmatpush.msrb.mxu1 %v4254_v10  ;;  %v1145_v43 = vsel %vm1144_vm2, 1, %v4737_v3 }
  0x1f   : > { %1101 = vmatpush.msra.mxu3 %v1038_v35  ;;  %v1146_v44 = vperm.slane %v1145_v43, 0  ;;  %v4259_v35 = vld [vmem:[%s6131_s11 + $0x48] sm:$0xff] }
  0x20   : > { %916 = vmatpush.msrb.mxu1 %v4253_v12  ;;  %4292 = vmatmul.msk.f32.vlgmr.msra.gmra.mxu3 %vm844_vm0, %v4892_v6 }
  0x21   : > { %883 = vperm.xlu0 %4522, %v875_v17   ;;  %vm4996_vm3 = vcmp.eq.s32.totalorder %v1146_v44, 1 }
  0x22   : > { %917 = vmatpush.msrb.mxu1 %v4252_v14 }
  0x23   : > { %4257 = vmatmul.msk.f32.vlgmr.msrb.gmra.mxu1 %vm844_vm0, %v888_v16 }
  0x28   : > { %4293 = vmatmul.msk.f32.gmra.mxu3 %vm844_vm0, %v830_v7 }
  0x8b   : > { %v879_v18 = vpop.permute.xlu0 %878 }
  0x8e   : > { %v926_v29 = vpop.permute.xlu1 %925 }
  0x93   : > { %v884_v20 = vpop.permute.xlu0 %883 }
  0x98   : > { %v868_v21 = vpop.f32.mrf.mxu0  ;;  %v871_v22 = vpop.f32.mrf.mxu1 }
  0x99   : > { %v869_v23 = vadd.f32 %v4539_v19, %v868_v21  ;;  %v872_v24 = vadd.f32 %v4539_v19, %v871_v22 }
  0x9b   : > { %v4929_v25 = vmul.f32 %v879_v18, %v869_v23  ;;  %v4931_v26 = vmul.f32 %v884_v20, %v872_v24  ;;  %v1043_v23 = vld [vmem:[%s6134_s14 + $0x28] sm:$0xff] }
  0x9d   : > { %984 = vst.msk [vmem:[#allocation2] sm:$0xff] %vm844_vm0, %v4929_v25  ;;  %1111 = vrot.lane.b32.xlu2 %v4931_v26, %s6146_s19  ;;  %1237 = vrot.lane.b32.xlu0 %v4929_v25, %s6144_s20 }
  0x9e   : > { %985 = vst.msk [vmem:[#allocation2 + $0x8] sm:$0xff] %vm844_vm0, %v4931_v26  ;;  %1109 = vrot.lane.b32.xlu1 %v4929_v25, %s6146_s19  ;;  %s5137_s19 = scalar_lea.vmem %s6172_s5, %s4880_s4 }
  0xa0   : > { %v919_v28 = vpop.f32.mrf.mxu1 }
  0xa1   : > { %v920_v30 = vadd.f32 %v4540_v27, %v919_v28 }
  0xa3   : > { %v4946_v31 = vmul.f32 %v926_v29, %v920_v30  ;;  %v4993_v42 = vpop.f32.mrf.mxu3  ;;  %v4261_v29 = vld [vmem:[%s6131_s11 + $0x58] sm:$0xff]  ;;  %v4260_v30 = vld [vmem:[%s6131_s11 + $0x50] sm:$0xff] }
  0xa4   : > { %959 = vmatpush.msra.mxu2 %v4261_v29 }
  0xa5   : > { %1241 = vrot.lane.b32.xlu2 %v4946_v31, %s6154_s23  ;;  %4294 = vmatpush.xpose.msk.msra.mxu1 %vm1113_vm1, %v4946_v31 }
  0xa6   : > { %1239 = vrot.lane.b32.xlu1 %v4931_v26, %s6144_s20  ;;  %960 = vmatpush.msra.mxu2 %v4260_v30  ;;  %s6152_s20 = smov 112  }
  0xa8   : > { %961 = vmatpush.msra.mxu2 %v4259_v35 }
  0xaa   : > { %962 = vmatpush.msra.mxu2 %v4258_v41 }
  0xab   : > { %v5000_v46 = vpop.f32.mrf.mxu3 }
  0xf7   : > { %v4969_v36 = vpop.permute.xlu2 %1111 }
  0xff   : > { %v4971_v37 = vpop.permute.xlu2 %1241 }
 0x100   : > { %4301 = vmatpush.xpose.msk.msrb.mxu3 %vm1113_vm1, %v4971_v37 }
 0x10f   : > { %v4975_v38 = vpop.permute.xlu0 %1237 }
 0x110   : > { %v4977_v39 = vpop.permute.xlu1 %1109  ;;  %4302 = vmatmul.msk.f32.vlgmr.msrb.gmra.mxu3 %vm1113_vm1, %v4975_v38 }
 0x111   : > { %4295 = vmatmul.msk.f32.vlgmr.msra.gmra.mxu1 %vm1113_vm1, %v4977_v39 }
 0x118   : > { %v4983_v40 = vpop.permute.xlu1 %1239 }
 0x119   : > { %4296 = vmatmul.msk.f32.gmra.mxu1 %vm1113_vm1, %v4969_v36  ;;  %4303 = vmatmul.msk.f32.gmra.mxu3 %vm1113_vm1, %v4983_v40 }
 0x18e   : > { %v1138_v47 = vpop.f32.mrf.mxu1 }
 0x18f   : > { %v1148_v48 = vsel %vm4996_vm3, -1e+09, %v1138_v47 }
 0x190   : > { %v1150_v49 = vmul.f32 0.35355338, %v1148_v48 }
 0x192   : > { %v1152_v50 = vsel %vm1113_vm1, %v1150_v49, -inf }
 0x193   : > { %1153 = vmax.xlane.f32.xlu2 %v1152_v50  ;;  %v1266_v53 = vpop.f32.mrf.mxu3 }
 0x194   : > { %v1272_v56 = vsel %vm4996_vm3, -1e+09, %v1266_v53 }
 0x195   : > { %v1274_v57 = vmul.f32 0.35355338, %v1272_v56 }
 0x196   : > { %v1141_v51 = vpop.f32.mrf.mxu1 }
 0x197   : > { %v1149_v52 = vsel %vm4996_vm3, -1e+09, %v1141_v51  ;;  %v1276_v58 = vsel %vm1113_vm1, %v1274_v57, -inf }
 0x198   : > { %v1151_v54 = vmul.f32 0.35355338, %v1149_v52  ;;  %v1042_v52 = vld [vmem:[%s6134_s14 + $0x20] sm:$0xff] }
 0x199   : > { %1227 = vmatpush.msrb.mxu2 %v1042_v52  ;;  %v4266_v52 = vld [vmem:[%s6133_s13 + $0x2] sm:$0x1] }
 0x19a   : > { %v1155_v55 = vsel %vm1113_vm1, %v1151_v54, -inf  ;;  %1007 = vst.msk [vmem:[#allocation4 + $0xc] sm:$0x1] %vm987_vm4, %v4266_v52 }
 0x19b   : > { %1156 = vmax.xlane.f32.xlu0 %v1155_v55 }
 0x19c   : > { %v1269_v0 = vpop.f32.mrf.mxu3 }
 0x19d   : > { %v1273_v5 = vsel %vm4996_vm3, -1e+09, %v1269_v0 }
 0x19e   : > { %v1275_v6 = vmul.f32 0.35355338, %v1273_v5 }
 0x1a0   : > { %v1279_v12 = vsel %vm1113_vm1, %v1275_v6, -inf }
 0x1a3   : > { %1277 = vmax.xlane.f32.xlu0 %v1276_v58 }
 0x206   : > { %v1154_v59 = vpop.xlane.xlu2 %1153 }
 0x207   : > { %v1158_v60 = vsub.f32 %v1150_v49, %v1154_v59 }
 0x209   : > { %v1160_v61 = vmul.f32 1.442695, %v1158_v60 }
 0x20b   : > { %4551 = vpow2.f32 %v1160_v61 }
 0x20e   : > { %v1157_v62 = vpop.xlane.xlu0 %1156 }
 0x20f   : > { %v1159_v63 = vsub.f32 %v1151_v54, %v1157_v62 }
 0x211   : > { %v4552_v1 = vpop.eup %4551  ;;  %v1162_v2 = vmul.f32 1.442695, %v1159_v63 }
 0x212   : > { %v1164_v4 = vsel %vm1113_vm1, %v4552_v1, 0.0 }
 0x213   : > { %4553 = vpow2.f32 %v1162_v2  ;;  %1165 = vadd.xlane.f32.xlu1 %v1164_v4 }
 0x216   : > { %v1278_v7 = vpop.xlane.xlu0 %1277 }
 0x217   : > { %v1282_v8 = vsub.f32 %v1274_v57, %v1278_v7 }
 0x219   : > { %v4554_v9 = vpop.eup %4553  ;;  %v1284_v10 = vmul.f32 1.442695, %v1282_v8 }
 0x21a   : > { %v1167_v11 = vsel %vm1113_vm1, %v4554_v9, 0.0 }
 0x21b   : > { %4555 = vpow2.f32 %v1284_v10  ;;  %1168 = vadd.xlane.f32.xlu2 %v1167_v11  ;;  %1280 = vmax.xlane.f32.xlu1 %v1279_v12 }
 0x221   : > { %v4556_v13 = vpop.eup %4555 }
 0x222   : > { %v1288_v14 = vsel %vm1113_vm1, %v4556_v13, 0.0 }
 0x223   : > { %1289 = vadd.xlane.f32.xlu0 %v1288_v14 }
 0x233   : > { %1174 = vrot.lane.b32.xlu2 %v4946_v31, %s4741_s3 }
 0x237   : > { %1298 = vrot.lane.b32.xlu0 %v4946_v31, %s4742_s27  ;;  %s6171_s27 = sld [smem:[#allocation9_spill]] }
 0x23b   : > { %1361 = vrot.lane.b32.xlu2 %v4929_v25, %s6142_s28 }
 0x23f   : > { %1489 = vrot.lane.b32.xlu0 %v4946_v31, %s6148_s30  ;;  %s4500_s30 = smul.u32 24, %s6188_s22 }
 0x243   : > { %1363 = vrot.lane.b32.xlu2 %v4931_v26, %s6142_s28  ;;  %s5040_s28 = scalar_lea.vmem %s6171_s27, %s4880_s4  ;;  %s6185_s27 = sld [smem:[#allocation14_spill]] }
 0x244   : > { %v832_v33 = vld [vmem:[%s5040_s28] sm:$0xff]  ;;  %v833_v44 = vld [vmem:[%s5040_s28 + $0x8] sm:$0xf] }
 0x245   : > { %v929_v43 = vmax.f32 %v832_v33, 0.0  ;;  %v930_v48 = vmax.f32 %v833_v44, 0.0 }
 0x247   : > { %4263 = vmatmul.msk.f32.vlgmr.msra.gmra.mxu2 %vm844_vm0, %v929_v43 }
 0x24b   : > { %1485 = vrot.lane.b32.xlu2 %v4929_v25, %s6150_s0 }
 0x24f   : > { %4264 = vmatmul.msk.f32.gmra.mxu2 %vm844_vm0, %v930_v48  ;;  %v971_v48 = vld [vmem:[%s5137_s19 + $0x8] sm:$0xf] }
 0x286   : > { %v1166_v15 = vpop.xlane.xlu1 %1165 }
 0x287   : > { %4557 = vrcp.f32 %v1166_v15 }
 0x28d   : > { %v4558_v20 = vpop.eup %4557 }
 0x28e   : > { %v1169_v16 = vpop.xlane.xlu2 %1168  ;;  %v1281_v17 = vpop.xlane.xlu1 %1280  ;;  %v1172_v22 = vmul.f32 %v4558_v20, %v4552_v1 }
 0x28f   : > { %v1283_v18 = vsub.f32 %v1275_v6, %v1281_v17 }
 0x291   : > { %v1286_v19 = vmul.f32 1.442695, %v1283_v18 }
 0x293   : > { %4559 = vpow2.f32 %v1286_v19 }
 0x294   : > { %4561 = vrcp.f32 %v1169_v16 }
 0x296   : > { %v5028_v21 = vpop.permute.xlu2 %1174  ;;  %v1290_v32 = vpop.xlane.xlu0 %1289 }
 0x297   : > { %1198 = vmatpush.msrb.mxu0 %v5028_v21  ;;  %4563 = vrcp.f32 %v1290_v32 }
 0x298   : > { %4297 = vmatmul.msk.f32.vlgmr.msrb.gmra.mxu0 %vm1113_vm1, %v1172_v22 }
 0x299   : > { %v4560_v24 = vpop.eup %4559  ;;  %1351 = vmatpush.msra.mxu0 %v1043_v23 }
 0x29a   : > { %v1291_v27 = vsel %vm1113_vm1, %v4560_v24, 0.0  ;;  %v4562_v28 = vpop.eup %4561 }
 0x29b   : > { %1292 = vadd.xlane.f32.xlu1 %v1291_v27  ;;  %v1173_v34 = vmul.f32 %v4562_v28, %v4554_v9 }
 0x29d   : > { %v4564_v47 = vpop.eup %4563 }
 0x29e   : > { %v1296_v49 = vmul.f32 %v4564_v47, %v4556_v13  ;;  %v5079_v59 = vpop.permute.xlu2 %1361 }
 0x2a0   : > { %4298 = vmatmul.msk.f32.gmra.mxu0 %vm1113_vm1, %v1173_v34 }
 0x2a6   : > { %v5086_v61 = vpop.permute.xlu2 %1363 }
 0x2a9   : > { %v5058_v50 = vpop.permute.xlu0 %1298 }
 0x2aa   : > { %1322 = vmatpush.msrb.mxu1 %v5058_v50 }
 0x2ab   : > { %4304 = vmatmul.msk.f32.vlgmr.msrb.gmra.mxu1 %vm1113_vm1, %v1296_v49 }
 0x2ae   : > { %v5097_v2 = vpop.permute.xlu2 %1485 }
 0x2b1   : > { %v5063_v51 = vpop.permute.xlu0 %1489 }
 0x2b2   : > { %4315 = vmatpush.xpose.msk.msrb.mxu0 %vm1113_vm1, %v5063_v51 }
 0x2b4   : > { %1365 = vrot.lane.b32.xlu1 %v4946_v31, %s6152_s20 }
 0x2bc   : > { %1487 = vrot.lane.b32.xlu1 %v4931_v26, %s6150_s0  ;;  %s6183_s0 = smov 72  }
 0x2ca   : > { %v5090_v62 = vpop.f32.mrf.mxu2 }
 0x2d2   : > { %v5092_v63 = vpop.f32.mrf.mxu2 }
 0x30e   : > { %v1293_v53 = vpop.xlane.xlu1 %1292 }
 0x30f   : > { %4565 = vrcp.f32 %v1293_v53  ;;  %v1044_v53 = vld [vmem:[%s6134_s14 + $0x30] sm:$0xff] }
 0x310   : > { %1475 = vmatpush.msra.mxu1 %v1044_v53 }
 0x315   : > { %v4566_v54 = vpop.eup %4565  ;;  %v1200_v55 = vpop.f32.mrf.mxu0 }
 0x316   : > { %4299 = vmatmul.msk.f32.vlgmr.msrb.gmra.mxu2 %vm1113_vm1, %v1200_v55  ;;  %v1297_v56 = vmul.f32 %v4566_v54, %v4560_v24 }
 0x318   : > { %4305 = vmatmul.msk.f32.gmra.mxu1 %vm1113_vm1, %v1297_v56 }
 0x31d   : > { %v1203_v57 = vpop.f32.mrf.mxu0 }
 0x31e   : > { %4300 = vmatmul.msk.f32.gmra.mxu2 %vm1113_vm1, %v1203_v57 }
 0x326   : > { %v5077_v58 = vpop.permute.xlu1 %1365 }
 0x327   : > { %4308 = vmatpush.xpose.msk.msra.mxu2 %vm1113_vm1, %v5077_v58 }
 0x328   : > { %v1324_v60 = vpop.f32.mrf.mxu1 }
 0x329   : > { %4306 = vmatmul.msk.f32.vlgmr.msra.gmra.mxu0 %vm1113_vm1, %v1324_v60 }
 0x32a   : > { %4309 = vmatmul.msk.f32.vlgmr.msra.gmra.mxu2 %vm1113_vm1, %v5079_v59 }
 0x32e   : > { %v5101_v4 = vpop.permute.xlu1 %1487 }
 0x332   : > { %4310 = vmatmul.msk.f32.gmra.mxu2 %vm1113_vm1, %v5086_v61 }
 0x395   : > { %v1327_v0 = vpop.f32.mrf.mxu1 }
 0x396   : > { %4307 = vmatmul.msk.f32.gmra.mxu0 %vm1113_vm1, %v1327_v0 }
 0x399   : > { %v5095_v1 = vpop.f32.mrf.mxu2 }
 0x39e   : > { %4316 = vmatmul.msk.f32.vlgmr.msrb.gmra.mxu0 %vm1113_vm1, %v5097_v2 }
 0x3a1   : > { %v5103_v5 = vpop.f32.mrf.mxu2 }
 0x3a6   : > { %4317 = vmatmul.msk.f32.gmra.mxu0 %vm1113_vm1, %v5101_v4  ;;  %v5115_v14 = vpop.f32.mrf.mxu0 }
 0x3ad   : > { %v1390_v6 = vpop.f32.mrf.mxu2 }
 0x3ae   : > { %v1396_v7 = vsel %vm4996_vm3, -1e+09, %v1390_v6 }
 0x3af   : > { %v1398_v8 = vmul.f32 0.35355338, %v1396_v7 }
 0x3b1   : > { %v1400_v9 = vsel %vm1113_vm1, %v1398_v8, -inf }
 0x3b2   : > { %1401 = vmax.xlane.f32.xlu0 %v1400_v9 }
 0x3b5   : > { %v1393_v10 = vpop.f32.mrf.mxu2 }
 0x3b6   : > { %v1397_v11 = vsel %vm4996_vm3, -1e+09, %v1393_v10 }
 0x3b7   : > { %v1399_v12 = vmul.f32 0.35355338, %v1397_v11 }
 0x3b9   : > { %v1403_v13 = vsel %vm1113_vm1, %v1399_v12, -inf }
 0x3ba   : > { %1404 = vmax.xlane.f32.xlu2 %v1403_v13 }
 0x3d2   : > { %1422 = vrot.lane.b32.xlu2 %v4946_v31, %s4747_s1  ;;  %s828_s1 = scalar_lea.vmem %s6185_s27, %s4880_s4 }
 0x3da   : > { %1546 = vrot.lane.b32.xlu2 %v4946_v31, %s4748_s26  ;;  %s809_s26 = scalar_lea.vmem %s6129_s9, %s4500_s30  ;;  %s6176_s30 = smov 96  }
 0x413   : > { %v5117_v15 = vpop.f32.mrf.mxu0 }
 0x41b   : > { %v1514_v19 = vpop.f32.mrf.mxu0 }
 0x41c   : > { %v1520_v28 = vsel %vm4996_vm3, -1e+09, %v1514_v19 }
 0x41d   : > { %v1522_v29 = vmul.f32 0.35355338, %v1520_v28 }
 0x41f   : > { %v1524_v34 = vsel %vm1113_vm1, %v1522_v29, -inf }
 0x423   : > { %v1517_v32 = vpop.f32.mrf.mxu0 }
 0x424   : > { %v1521_v41 = vsel %vm4996_vm3, -1e+09, %v1517_v32 }
 0x425   : > { %v1402_v16 = vpop.xlane.xlu0 %1401  ;;  %v1523_v43 = vmul.f32 0.35355338, %v1521_v41 }
 0x426   : > { %v1406_v17 = vsub.f32 %v1398_v8, %v1402_v16 }
 0x427   : > { %v1527_v47 = vsel %vm1113_vm1, %v1523_v43, -inf }
 0x428   : > { %v1408_v18 = vmul.f32 1.442695, %v1406_v17  ;;  %v1045_v17 = vld [vmem:[%s6134_s14 + $0x38] sm:$0xff] }
 0x42a   : > { %4567 = vpow2.f32 %v1408_v18  ;;  %v4542_v18 = vld [vmem:[%s6132_s12 + $0x2] ss:$0 sm:$0xff] }
 0x42b   : > { %v968_v19 = vadd.f32 %v4542_v18, %v5092_v63 }
 0x42d   : > { %v1405_v20 = vpop.xlane.xlu2 %1404 }
 0x42e   : > { %v1407_v22 = vsub.f32 %v1399_v12, %v1405_v20 }
 0x430   : > { %v4568_v23 = vpop.eup %4567  ;;  %v1410_v24 = vmul.f32 1.442695, %v1407_v22 }
 0x431   : > { %v1412_v27 = vsel %vm1113_vm1, %v4568_v23, 0.0 }
 0x432   : > { %4569 = vpow2.f32 %v1410_v24  ;;  %1413 = vadd.xlane.f32.xlu1 %v1412_v27  ;;  %v970_v24 = vld [vmem:[%s5137_s19] sm:$0xff]  ;;  %s798_s19 = scalar_lea.vmem %s6126_s6, %s6188_s22  ;;  %s6179_s22 = smov 88  }
 0x435   : > { %v5122_v30 = vpop.permute.xlu2 %1422 }
 0x436   : > { %1446 = vmatpush.msra.mxu3 %v5122_v30 }
 0x438   : > { %v4570_v33 = vpop.eup %4569  ;;  %1599 = vmatpush.msrb.mxu3 %v1045_v17 }
 0x439   : > { %v1415_v35 = vsel %vm1113_vm1, %v4570_v33, 0.0 }
 0x43a   : > { %1525 = vmax.xlane.f32.xlu1 %v1524_v34  ;;  %1416 = vadd.xlane.f32.xlu0 %v1415_v35  ;;  %v4267_v34 = vld [vmem:[%s6133_s13 + $0x3] sm:$0x1] }
 0x43b   : > { %1020 = vst.msk [vmem:[#allocation5 + $0xc] sm:$0x1] %vm987_vm4, %v4267_v34 }
 0x43d   : > { %v5129_v44 = vpop.permute.xlu2 %1546 }
 0x43e   : > { %1570 = vmatpush.msrb.mxu2 %v5129_v44 }
 0x442   : > { %1528 = vmax.xlane.f32.xlu0 %v1527_v47  ;;  %v965_v47 = vadd.f32 %v4542_v18, %v5090_v62 }
 0x456   : > { %979 = vperm.xlu0 %4522, %v971_v48  }
 0x4a5   : > { %v1414_v49 = vpop.xlane.xlu1 %1413 }
 0x4a6   : > { %4571 = vrcp.f32 %v1414_v49 }
 0x4ac   : > { %v4572_v54 = vpop.eup %4571 }
 0x4ad   : > { %v1420_v55 = vmul.f32 %v4572_v54, %v4568_v23  ;;  %v1417_v56 = vpop.xlane.xlu0 %1416  ;;  %v1526_v57 = vpop.xlane.xlu1 %1525 }
 0x4ae   : > { %4573 = vrcp.f32 %v1417_v56  ;;  %v1530_v60 = vsub.f32 %v1522_v29, %v1526_v57  ;;  %v1033_v57 = vld [vmem:[%s804_s2] sm:$0x1]  ;;  %s6175_s2 = smov 104  }
 0x4af   : > { %4311 = vmatmul.msk.f32.vlgmr.msra.gmra.mxu3 %vm1113_vm1, %v1420_v55  ;;  %vm1640_vm7 = vcmp.eq.f32.partialorder %v1033_v57, 0.0 }
 0x4b0   : > { %v1532_v0 = vmul.f32 1.442695, %v1530_v60  ;;  %v1641_v60 = vsel %vm1640_vm7, 1, %v4737_v3 }
 0x4b2   : > { %4575 = vpow2.f32 %v1532_v0  ;;  %v1642_v0 = vperm.slane %v1641_v60, 0 }
 0x4b4   : > { %v4574_v6 = vpop.eup %4573  ;;  %vm5228_vm8 = vcmp.eq.s32.totalorder %v1642_v0, 1 }
 0x4b5   : > { %v1529_v7 = vpop.xlane.xlu0 %1528  ;;  %v1421_v8 = vmul.f32 %v4574_v6, %v4570_v33  ;;  %v5226_v6 = vld [vmem:[%s809_s26] sm:$0xff] }
 0x4b6   : > { %v1531_v9 = vsub.f32 %v1523_v43, %v1529_v7 }
 0x4b7   : > { %4312 = vmatmul.msk.f32.gmra.mxu3 %vm1113_vm1, %v1421_v8 }
 0x4b8   : > { %v4576_v10 = vpop.eup %4575  ;;  %v1534_v11 = vmul.f32 1.442695, %v1531_v9 }
 0x4b9   : > { %v1536_v12 = vsel %vm1113_vm1, %v4576_v10, 0.0 }
 0x4ba   : > { %4577 = vpow2.f32 %v1534_v11  ;;  %1537 = vadd.xlane.f32.xlu1 %v1536_v12  ;;  %v5236_v12 = vld [vmem:[%s809_s26 + $0x8] sm:$0xff]  ;;  %s6182_s26 = smov 112  }
 0x4c0   : > { %v4578_v13 = vpop.eup %4577 }
 0x4c1   : > { %v1539_v16 = vsel %vm1113_vm1, %v4578_v13, 0.0 }
 0x4c2   : > { %1540 = vadd.xlane.f32.xlu1 %v1539_v16 }
 0x4c8   : > { %v980_v20 = vpop.permute.xlu0 %979 }
 0x4c9   : > { %v5158_v22 = vmul.f32 %v980_v20, %v968_v19  ;;  %v1046_v19 = vld [vmem:[%s6134_s14 + $0x40] sm:$0xff] }
 0x4ca   : > { %1725 = vmatpush.msra.mxu2 %v1046_v19 }
 0x4cb   : > { %1004 = vst.msk [vmem:[#allocation4 + $0x8] sm:$0xf] %vm1003_vm5, %v5158_v22 }
 0x4d2   : > { %v5162_v23 = vld [vmem:[#allocation4 + $0x8] sm:$0x1f] }
 0x4d3   : > { %1737 = vrot.lane.b32.xlu2 %v5162_v23, %s6154_s23  ;;  %4322 = vmatpush.xpose.msk.msrb.mxu1 %vm1113_vm1, %v5162_v23 }
 0x4db   : > { %974 = vperm.xlu1 %4523, %v970_v24  }
 0x4e3   : > { %1012 = vrot.lane.b32.xlu1 %v5158_v22, %s4741_s3 }
 0x52d   : > { %v5171_v63 = vpop.permute.xlu2 %1737  ;;  %v1538_v27 = vpop.xlane.xlu1 %1537 }
 0x52e   : > { %4579 = vrcp.f32 %v1538_v27  ;;  %4331 = vmatpush.xpose.msk.msra.mxu3 %vm1113_vm1, %v5171_v63 }
 0x532   : > { %v1448_v28 = vpop.f32.mrf.mxu3 }
 0x533   : > { %4313 = vmatmul.msk.f32.vlgmr.msra.gmra.mxu1 %vm1113_vm1, %v1448_v28 }
 0x534   : > { %v4580_v29 = vpop.eup %4579 }
 0x535   : > { %v1544_v32 = vmul.f32 %v4580_v29, %v4576_v10  ;;  %v1541_v33 = vpop.xlane.xlu1 %1540 }
 0x536   : > { %4581 = vrcp.f32 %v1541_v33 }
 0x537   : > { %4318 = vmatmul.msk.f32.vlgmr.msrb.gmra.mxu2 %vm1113_vm1, %v1544_v32 }
 0x53a   : > { %v1451_v35 = vpop.f32.mrf.mxu3 }
 0x53b   : > { %4314 = vmatmul.msk.f32.gmra.mxu1 %vm1113_vm1, %v1451_v35 }
 0x53c   : > { %v4582_v41 = vpop.eup %4581 }
 0x53d   : > { %v1545_v43 = vmul.f32 %v4582_v41, %v4578_v13 }
 0x53f   : > { %4319 = vmatmul.msk.f32.gmra.mxu2 %vm1113_vm1, %v1545_v43 }
 0x54d   : > { %v975_v48 = vpop.permute.xlu1 %974 }
 0x54e   : > { %v5184_v49 = vmul.f32 %v975_v48, %v965_v47 }
 0x550   : > { %1002 = vst.msk [vmem:[#allocation4] sm:$0xff] %vm844_vm0, %v5184_v49 }
 0x555   : > { %v1013_v52 = vpop.permute.xlu1 %1012 }
 0x556   : > { %1017 = vst.msk [vmem:[#allocation5 + $0x8] sm:$0xf] %vm1003_vm5, %v1013_v52 }
 0x557   : > { %v5189_v53 = vld [vmem:[#allocation4] sm:$0xff] }
 0x558   : > { %1735 = vrot.lane.b32.xlu0 %v5189_v53, %s6154_s23  ;;  %4323 = vmatpush.xpose.msk.msrb.mxu1 %vm1113_vm1, %v5189_v53 }
 0x55b   : > { %4324 = vmatmul.msk.f32.vlgmr.msrb.gmra.mxu1 %vm1113_vm1, %v4977_v39 }
 0x55d   : > { %v5197_v62 = vld [vmem:[#allocation5 + $0x8] sm:$0x1f] }
 0x55e   : > { %4326 = vmatpush.msk.msra.mxu0 %vm1677_vm6, %v5197_v62 }
 0x563   : > { %4325 = vmatmul.msk.f32.gmra.mxu1 %vm1113_vm1, %v4969_v36 }
 0x5b0   : > { %v5205_v56 = vpop.f32.mrf.mxu1 }
 0x5b8   : > { %v5218_v36 = vpop.f32.mrf.mxu1 }
 0x5ba   : > { %v1572_v54 = vpop.f32.mrf.mxu2 }
 0x5bb   : > { %4320 = vmatmul.msk.f32.vlgmr.msrb.gmra.mxu3 %vm1113_vm1, %v1572_v54 }
 0x5c2   : > { %v1575_v55 = vpop.f32.mrf.mxu2 }
 0x5c3   : > { %4321 = vmatmul.msk.f32.gmra.mxu3 %vm1113_vm1, %v1575_v55 }
 0x5ca   : > { %v5211_v39 = vpop.permute.xlu0 %1735 }
 0x5cb   : > { %4332 = vmatpush.xpose.msk.msra.mxu3 %vm1113_vm1, %v5211_v39 }
 0x5ce   : > { %4333 = vmatmul.msk.f32.vlgmr.msra.gmra.mxu3 %vm1113_vm1, %v4975_v38 }
 0x5d6   : > { %4334 = vmatmul.msk.f32.gmra.mxu3 %vm1113_vm1, %v4983_v40 }
 0x5d8   : > { %v1632_v38 = vpop.f32.mrf.mxu1 }
 0x5d9   : > { %v1638_v8 = vmul.f32 %v1632_v38, %v5226_v6 }
 0x5db   : > { %v1644_v9 = vsel %vm5228_vm8, -1e+09, %v1638_v8 }
 0x5dc   : > { %v1646_v10 = vmul.f32 0.35355338, %v1644_v9 }
 0x5de   : > { %v1649_v11 = vsel %vm1648_vm9, %v1646_v10, -inf }
 0x5df   : > { %1650 = vmax.xlane.f32.xlu2 %v1649_v11 }
 0x5e0   : > { %v1635_v40 = vpop.f32.mrf.mxu1 }
 0x5e1   : > { %v1639_v13 = vmul.f32 %v1635_v40, %v5236_v12 }
 0x5e3   : > { %v1645_v16 = vsel %vm5228_vm8, -1e+09, %v1639_v13  ;;  %v1047_v13 = vld [vmem:[%s6134_s14 + $0x48] sm:$0xff] }
 0x5e4   : > { %v1647_v17 = vmul.f32 0.35355338, %v1645_v16 }
 0x5e6   : > { %v1652_v18 = vsel %vm1648_vm9, %v1647_v17, -inf }
 0x5e7   : > { %1653 = vmax.xlane.f32.xlu0 %v1652_v18 }
 0x5f7   : > { %1010 = vrot.lane.b32.xlu2 %v5184_v49, %s4741_s3 }
 0x5ff   : > { %1864 = vrot.lane.b32.xlu2 %v5162_v23, %s6152_s20 }
 0x63e   : > { %v5249_v20 = vpop.f32.mrf.mxu3 }
 0x646   : > { %v5251_v29 = vpop.f32.mrf.mxu3 }
 0x651   : > { %v1760_v43 = vpop.f32.mrf.mxu3 }
 0x652   : > { %v1651_v24 = vpop.xlane.xlu2 %1650  ;;  %v1766_v54 = vmul.f32 %v1760_v43, %v5226_v6 }
 0x653   : > { %v1655_v27 = vsub.f32 %v1646_v10, %v1651_v24 }
 0x654   : > { %v1768_v60 = vsel %vm5228_vm8, -1e+09, %v1766_v54 }
 0x655   : > { %v1657_v28 = vmul.f32 1.442695, %v1655_v27  ;;  %v1770_v38 = vmul.f32 0.35355338, %v1768_v60 }
 0x657   : > { %4583 = vpow2.f32 %v1657_v28  ;;  %v1772_v9 = vsel %vm1648_vm9, %v1770_v38, -inf }
 0x659   : > { %v1763_v0 = vpop.f32.mrf.mxu3 }
 0x65a   : > { %v1011_v32 = vpop.permute.xlu2 %1010  ;;  %v1654_v33 = vpop.xlane.xlu0 %1653  ;;  %v1767_v8 = vmul.f32 %v1763_v0, %v5236_v12 }
 0x65b   : > { %1016 = vst.msk [vmem:[#allocation5] sm:$0xff] %vm844_vm0, %v1011_v32  ;;  %v1656_v34 = vsub.f32 %v1647_v17, %v1654_v33 }
 0x65c   : > { %v1769_v10 = vsel %vm5228_vm8, -1e+09, %v1767_v8 }
 0x65d   : > { %v4584_v35 = vpop.eup %4583  ;;  %v1659_v41 = vmul.f32 1.442695, %v1656_v34  ;;  %v1771_v11 = vmul.f32 0.35355338, %v1769_v10 }
 0x65e   : > { %v1661_v47 = vsel %vm1648_vm9, %v4584_v35, 0.0 }
 0x65f   : > { %4585 = vpow2.f32 %v1659_v41  ;;  %1662 = vadd.xlane.f32.xlu1 %v1661_v47  ;;  %v1775_v40 = vsel %vm1648_vm9, %v1771_v11, -inf }
 0x662   : > { %v5255_v48 = vpop.permute.xlu2 %1864  ;;  %v5257_v52 = vld [vmem:[#allocation5] sm:$0xff] }
 0x663   : > { %1795 = vrot.lane.b32.xlu2 %v5257_v52, %s6154_s23  ;;  %1696 = vmatpush.msra.mxu0 %v5257_v52 }
 0x664   : > { %4340 = vmatpush.xpose.msk.msrb.mxu2 %vm1113_vm1, %v5255_v48 }
 0x665   : > { %v4586_v55 = vpop.eup %4585  ;;  %1852 = vmatpush.msrb.mxu0 %v1047_v13 }
 0x666   : > { %v1664_v57 = vsel %vm1648_vm9, %v4586_v55, 0.0 }
 0x667   : > { %1665 = vadd.xlane.f32.xlu0 %v1664_v57 }
 0x66b   : > { %1990 = vrot.lane.b32.xlu2 %v5162_v23, %s6175_s2 }
 0x66f   : > { %1773 = vmax.xlane.f32.xlu0 %v1772_v9 }
 0x673   : > { %2142 = vrot.lane.b32.xlu2 %v4946_v31, %s6176_s30 }
 0x677   : > { %1776 = vmax.xlane.f32.xlu0 %v1775_v40 }
 0x68b   : > { %1797 = vrot.lane.b32.xlu0 %v5197_v62, %s6154_s23 }
 0x693   : > { %1988 = vrot.lane.b32.xlu0 %v5189_v53, %s6175_s2 }
 0x6bd   : > { %v5284_v16 = vpop.permute.xlu2 %1795 }
 0x6c5   : > { %v5286_v27 = vpop.permute.xlu2 %1990 }
 0x6d2   : > { %v1663_v17 = vpop.xlane.xlu1 %1662 }
 0x6d3   : > { %4587 = vrcp.f32 %v1663_v17 }
 0x6d9   : > { %v4588_v18 = vpop.eup %4587 }
 0x6da   : > { %v1669_v19 = vmul.f32 %v4588_v18, %v4584_v35  ;;  %v1666_v24 = vpop.xlane.xlu0 %1665 }
 0x6db   : > { %4589 = vrcp.f32 %v1666_v24  ;;  %v986_v24 = vld [vmem:[%s6133_s13] sm:$0x1] }
 0x6dc   : > { %4327 = vmatmul.msk.f32.vlgmr.msra.gmra.mxu0 %vm1648_vm9, %v1669_v19  ;;  %988 = vst.msk [vmem:[#allocation2 + $0x10] sm:$0x1] %vm987_vm4, %v986_v24 }
 0x6dd   : > { %4349 = vmatpush.xpose.msk.msra.mxu0 %vm1113_vm1, %v5286_v27 }
 0x6e1   : > { %v4590_v28 = vpop.eup %4589 }
 0x6e2   : > { %v1774_v32 = vpop.xlane.xlu0 %1773  ;;  %v1670_v33 = vmul.f32 %v4590_v28, %v4586_v55 }
 0x6e3   : > { %v1778_v34 = vsub.f32 %v1770_v38, %v1774_v32  ;;  %v5321_v28 = vld [vmem:[#allocation2 + $0x10] sm:$0x1] }
 0x6e4   : > { %4328 = vmatmul.msk.f32.gmra.mxu0 %vm1648_vm9, %v1670_v33  ;;  %v5326_v33 = vld [vmem:[#allocation2 + $0x8] sm:$0xff] }
 0x6e5   : > { %v1780_v41 = vmul.f32 1.442695, %v1778_v34 }
 0x6e7   : > { %4591 = vpow2.f32 %v1780_v41 }
 0x6ea   : > { %v1777_v43 = vpop.xlane.xlu0 %1776 }
 0x6eb   : > { %v1779_v47 = vsub.f32 %v1771_v11, %v1777_v43  ;;  %v5339_v43 = vpop.permute.xlu2 %2142 }
 0x6ed   : > { %v4592_v35 = vpop.eup %4591  ;;  %v1782_v54 = vmul.f32 1.442695, %v1779_v47 }
 0x6ee   : > { %v1784_v57 = vsel %vm1648_vm9, %v4592_v35, 0.0 }
 0x6ef   : > { %4593 = vpow2.f32 %v1782_v54  ;;  %1785 = vadd.xlane.f32.xlu1 %v1784_v57 }
 0x6f5   : > { %v4594_v60 = vpop.eup %4593 }
 0x6f6   : > { %v1787_v0 = vsel %vm1648_vm9, %v4594_v60, 0.0 }
 0x6f7   : > { %1788 = vadd.xlane.f32.xlu1 %v1787_v0 }
 0x6fd   : > { %v5294_v8 = vpop.permute.xlu0 %1797 }
 0x6fe   : > { %4335 = vmatpush.msk.msra.mxu1 %vm1677_vm6, %v5294_v8 }
 0x700   : > { %1823 = vmatpush.msra.mxu1 %v5284_v16 }
 0x705   : > { %v5299_v55 = vpop.permute.xlu0 %1988 }
 0x706   : > { %4350 = vmatpush.xpose.msk.msra.mxu0 %vm1113_vm1, %v5299_v55 }
 0x710   : > { %1862 = vrot.lane.b32.xlu1 %v5189_v53, %s6152_s20 }
 0x759   : > { %v1698_v38 = vpop.f32.mrf.mxu0 }
 0x75a   : > { %4329 = vmatmul.msk.f32.vlgmr.msra.gmra.mxu2 %vm1113_vm1, %v1698_v38 }
 0x761   : > { %v1701_v9 = vpop.f32.mrf.mxu0 }
 0x762   : > { %4330 = vmatmul.msk.f32.gmra.mxu2 %vm1113_vm1, %v1701_v9  ;;  %v1786_v10 = vpop.xlane.xlu1 %1785 }
 0x763   : > { %4595 = vrcp.f32 %v1786_v10  ;;  %v4541_v10 = vld [vmem:[%s6135_s15] ss:$0 sm:$0xff] }
 0x769   : > { %v4596_v11 = vpop.eup %4595 }
 0x76a   : > { %v1792_v40 = vmul.f32 %v4596_v11, %v4592_v35  ;;  %v1789_v13 = vpop.xlane.xlu1 %1788  ;;  %v1104_v11 = vadd.f32 %v4541_v10, %v4993_v42 }
 0x76b   : > { %4597 = vrcp.f32 %v1789_v13 }
 0x76c   : > { %4336 = vmatmul.msk.f32.vlgmr.msra.gmra.mxu1 %vm1648_vm9, %v1792_v40  ;;  %v1235_v40 = vadd.f32 %v5095_v1, %v1104_v11 }
 0x76e   : > { %v1359_v13 = vadd.f32 %v5115_v14, %v1235_v40 }
 0x771   : > { %v4598_v17 = vpop.eup %4597 }
 0x772   : > { %v1793_v18 = vmul.f32 %v4598_v17, %v4594_v60  ;;  %v1483_v17 = vadd.f32 %v5205_v56, %v1359_v13 }
 0x774   : > { %4337 = vmatmul.msk.f32.gmra.mxu1 %vm1648_vm9, %v1793_v18  ;;  %v1107_v18 = vadd.f32 %v4541_v10, %v5000_v46  ;;  %v1607_v24 = vadd.f32 %v5249_v20, %v1483_v17 }
 0x782   : > { %v5309_v19 = vpop.permute.xlu1 %1862 }
 0x783   : > { %4341 = vmatpush.xpose.msk.msrb.mxu2 %vm1113_vm1, %v5309_v19 }
 0x786   : > { %4342 = vmatmul.msk.f32.vlgmr.msrb.gmra.mxu2 %vm1113_vm1, %v5079_v59 }
 0x78e   : > { %4343 = vmatmul.msk.f32.gmra.mxu2 %vm1113_vm1, %v5086_v61  ;;  %v5331_v61 = vld [vmem:[#allocation2] sm:$0xff] }
 0x7dd   : > { %v1727_v34 = vpop.f32.mrf.mxu2 }
 0x7e5   : > { %v1730_v41 = vpop.f32.mrf.mxu2 }
 0x7e9   : > { %v1825_v32 = vpop.f32.mrf.mxu1 }
 0x7ea   : > { %4338 = vmatmul.msk.f32.vlgmr.msrb.gmra.mxu0 %vm1113_vm1, %v1825_v32  ;;  %v1236_v32 = vadd.f32 %v5103_v5, %v1107_v18  ;;  %v1031_v5 = vld [vmem:[%s798_s19] sm:$0x1] }
 0x7eb   : > { %4360 = vmatpush.xpose.msk.msrb.mxu0 %vm1113_vm1, %v5321_v28  ;;  %vm2175_vm10 = vcmp.eq.f32.partialorder %v1031_v5, 0.0 }
 0x7ec   : > { %v2176_v56 = vsel %vm2175_vm10, 1, %v4737_v3 }
 0x7ed   : > { %v2177_v20 = vperm.slane %v2176_v56, 0 }
 0x7ef   : > { %4361 = vmatpush.xpose.msk.msrb.mxu0 %vm1113_vm1, %v5326_v33  ;;  %vm5375_vm11 = vcmp.eq.s32.totalorder %v2177_v20, 1 }
 0x7f1   : > { %v1828_v59 = vpop.f32.mrf.mxu1 }
 0x7f2   : > { %4339 = vmatmul.msk.f32.gmra.mxu0 %vm1113_vm1, %v1828_v59  ;;  %v1733_v59 = vadd.f32 %v1727_v34, %v1607_v24 }
 0x7f3   : > { %4362 = vmatpush.xpose.msk.msrb.mxu0 %vm1113_vm1, %v5331_v61 }
 0x7fa   : > { %4351 = vmatmul.msk.f32.vlgmr.msra.gmra.mxu0 %vm1113_vm1, %v5097_v2 }
 0x802   : > { %4352 = vmatmul.msk.f32.gmra.mxu0 %vm1113_vm1, %v5101_v4 }
 0x809   : > { %v1887_v47 = vpop.f32.mrf.mxu2 }
 0x80a   : > { %v1893_v35 = vmul.f32 %v1887_v47, %v5226_v6  ;;  %4363 = vmatmul.msk.f32.vlgmr.msrb.gmra.mxu0 %vm1113_vm1, %v5339_v43 }
 0x80c   : > { %v1895_v54 = vsel %vm5228_vm8, -1e+09, %v1893_v35  ;;  %v1360_v35 = vadd.f32 %v5117_v15, %v1236_v32 }
 0x80d   : > { %v1897_v57 = vmul.f32 0.35355338, %v1895_v54 }
 0x80e   : > { %v1484_v42 = vadd.f32 %v5218_v36, %v1360_v35 }
 0x80f   : > { %v1899_v60 = vsel %vm1648_vm9, %v1897_v57, -inf }
 0x810   : > { %1900 = vmax.xlane.f32.xlu0 %v1899_v60  ;;  %v1608_v1 = vadd.f32 %v5251_v29, %v1484_v42 }
 0x811   : > { %v1890_v2 = vpop.f32.mrf.mxu2 }
 0x812   : > { %v1894_v0 = vmul.f32 %v1890_v2, %v5236_v12  ;;  %v1734_v60 = vadd.f32 %v1730_v41, %v1608_v1 }
 0x814   : > { %v1896_v4 = vsel %vm5228_vm8, -1e+09, %v1894_v0 }
 0x815   : > { %v1898_v38 = vmul.f32 0.35355338, %v1896_v4 }
 0x817   : > { %v1902_v9 = vsel %vm1648_vm9, %v1898_v38, -inf }
 0x818   : > { %1903 = vmax.xlane.f32.xlu2 %v1902_v9 }
 0x824   : > { %1923 = vrot.lane.b32.xlu0 %v5197_v62, %s6152_s20 }
 0x867   : > { %v1854_v47 = vpop.f32.mrf.mxu0 }
 0x868   : > { %v5364_v54 = vadd.f32 %v1854_v47, %v1733_v59 }
 0x86f   : > { %v1857_v14 = vpop.f32.mrf.mxu0 }
 0x870   : > { %v5368_v2 = vadd.f32 %v1857_v14, %v1734_v60 }
 0x877   : > { %v2013_v46 = vpop.f32.mrf.mxu0 }
 0x878   : > { %v2019_v17 = vmul.f32 %v2013_v46, %v5226_v6 }
 0x87f   : > { %v2016_v15 = vpop.f32.mrf.mxu0 }
 0x880   : > { %v2020_v47 = vmul.f32 %v2016_v15, %v5236_v12 }
 0x882   : > { %v2022_v6 = vsel %vm5228_vm8, -1e+09, %v2020_v47  ;;  %v4271_v47 = vld [vmem:[%s6134_s14 + $0x78] sm:$0xff] }
 0x883   : > { %v1901_v34 = vpop.xlane.xlu0 %1900  ;;  %v2024_v42 = vmul.f32 0.35355338, %v2022_v6  ;;  %v4270_v6 = vld [vmem:[%s6134_s14 + $0x70] sm:$0xff] }
 0x884   : > { %v1905_v0 = vsub.f32 %v1897_v57, %v1901_v34 }
 0x885   : > { %v2028_v1 = vsel %vm1648_vm9, %v2024_v42, -inf }
 0x886   : > { %v1907_v29 = vmul.f32 1.442695, %v1905_v0 }
 0x887   : > { %v2172_v41 = vpop.f32.mrf.mxu0 }
 0x888   : > { %4599 = vpow2.f32 %v1907_v29  ;;  %v2179_v4 = vsel %vm5375_vm11, -1e+09, %v2172_v41 }
 0x889   : > { %v2180_v9 = vmul.f32 0.35355338, %v2179_v4 }
 0x88b   : > { %v1904_v10 = vpop.xlane.xlu2 %1903  ;;  %v2182_v11 = vsel %vm2181_vm12, %v2180_v9, -inf }
 0x88c   : > { %v1906_v3 = vsub.f32 %v1898_v38, %v1904_v10  ;;  %2183 = vmax.xlane.f32.xlu0 %v2182_v11  ;;  %v2021_v38 = vsel %vm5228_vm8, -1e+09, %v2019_v17 }
 0x88d   : > { %v2023_v59 = vmul.f32 0.35355338, %v2021_v38 }
 0x88e   : > { %v4600_v40 = vpop.eup %4599  ;;  %v1909_v13 = vmul.f32 1.442695, %v1906_v3 }
 0x88f   : > { %v1911_v57 = vsel %vm1648_vm9, %v4600_v40, 0.0  ;;  %v2025_v35 = vsel %vm1648_vm9, %v2023_v59, -inf }
 0x890   : > { %4601 = vpow2.f32 %v1909_v13  ;;  %1912 = vadd.xlane.f32.xlu1 %v1911_v57 }
 0x896   : > { %v4602_v18 = vpop.eup %4601  ;;  %v5384_v24 = vpop.permute.xlu0 %1923 }
 0x897   : > { %4344 = vmatpush.msk.msrb.mxu3 %vm1677_vm6, %v5384_v24  ;;  %v1914_v32 = vsel %vm1648_vm9, %v4602_v18, 0.0 }
 0x898   : > { %1915 = vadd.xlane.f32.xlu2 %v1914_v32 }
 0x8a0   : > { %2026 = vmax.xlane.f32.xlu2 %v2025_v35  ;;  %991 = vrot.lane.b32.xlu0 %v4929_v25, %s4741_s3  ;;  %v4265_v35 = vld [vmem:[%s6133_s13 + $0x1] sm:$0x1] }
 0x8a1   : > { %1001 = vst.msk [vmem:[#allocation3 + $0x10] sm:$0x1] %vm987_vm4, %v4265_v35 }
 0x8a8   : > { %2029 = vmax.xlane.f32.xlu2 %v2028_v1  ;;  %2358 = vrot.lane.b32.xlu0 %v5321_v28, %s6152_s20  ;;  %v4268_v1 = vld [vmem:[%s6134_s14 + $0x60] sm:$0xff] }
 0x8a9   : > { %1921 = vrot.lane.b32.xlu1 %v5257_v52, %s6152_s20 }
 0x8b0   : > { %2356 = vrot.lane.b32.xlu0 %v5326_v33, %s6152_s20 }
 0x8b1   : > { %2049 = vrot.lane.b32.xlu1 %v5197_v62, %s6175_s2 }
 0x8b9   : > { %2047 = vrot.lane.b32.xlu1 %v5257_v52, %s6175_s2 }
 0x8ff   : > { %v2184_v25 = vpop.xlane.xlu0 %2183 }
 0x900   : > { %v2185_v12 = vsub.f32 %v2180_v9, %v2184_v25  ;;  %v1049_v25 = vld [vmem:[%s6134_s14 + $0x58] sm:$0xff] }
 0x902   : > { %v2186_v60 = vmul.f32 1.442695, %v2185_v12 }
 0x903   : > { %v1913_v56 = vpop.xlane.xlu1 %1912 }
 0x904   : > { %4603 = vpow2.f32 %v2186_v60 }
 0x905   : > { %4605 = vrcp.f32 %v1913_v56 }
 0x90a   : > { %v5408_v14 = vpop.eup %4603 }
 0x90b   : > { %v1916_v46 = vpop.xlane.xlu2 %1915  ;;  %v2188_v5 = vsel %vm2181_vm12, %v5408_v14, 0.0  ;;  %v4606_v29 = vpop.eup %4605 }
 0x90c   : > { %2189 = vadd.xlane.f32.xlu1 %v2188_v5  ;;  %v1919_v41 = vmul.f32 %v4606_v29, %v4600_v40 }
 0x912   : > { %v992_v15 = vpop.permute.xlu0 %991 }
 0x913   : > { %997 = vst.msk [vmem:[#allocation3] sm:$0xff] %vm844_vm0, %v992_v15  ;;  %v2027_v20 = vpop.xlane.xlu2 %2026 }
 0x914   : > { %v2031_v34 = vsub.f32 %v2023_v59, %v2027_v20  ;;  %v5471_v20 = vld [vmem:[#allocation3 + $0x10] sm:$0x1] }
 0x916   : > { %v2033_v0 = vmul.f32 1.442695, %v2031_v34 }
 0x918   : > { %4607 = vpow2.f32 %v2033_v0 }
 0x919   : > { %4609 = vrcp.f32 %v1916_v46 }
 0x91a   : > { %v5466_v60 = vpop.permute.xlu0 %2358 }
 0x91b   : > { %v5413_v4 = vpop.permute.xlu1 %1921  ;;  %v2030_v9 = vpop.xlane.xlu2 %2029 }
 0x91c   : > { %v2032_v10 = vsub.f32 %v2024_v42, %v2030_v9  ;;  %1949 = vmatpush.msrb.mxu3 %v5413_v4  ;;  %v4269_v42 = vld [vmem:[%s6134_s14 + $0x68] sm:$0xff] }
 0x91d   : > { %4345 = vmatmul.msk.f32.vlgmr.msrb.gmra.mxu3 %vm1648_vm9, %v1919_v41 }
 0x91e   : > { %v4608_v11 = vpop.eup %4607  ;;  %v2035_v3 = vmul.f32 1.442695, %v2032_v10  ;;  %2104 = vmatpush.msra.mxu3 %v1049_v25 }
 0x91f   : > { %v2037_v13 = vsel %vm1648_vm9, %v4608_v11, 0.0  ;;  %v4610_v57 = vpop.eup %4609 }
 0x920   : > { %4611 = vpow2.f32 %v2035_v3  ;;  %2038 = vadd.xlane.f32.xlu2 %v2037_v13  ;;  %v1920_v32 = vmul.f32 %v4610_v57, %v4602_v18  ;;  %v4272_v18 = vld [vmem:[%s6134_s14 + $0x80] sm:$0xff]  ;;  %v5494_v57 = vld [vmem:[#allocation3] sm:$0xff] }
 0x922   : > { %v5473_v0 = vpop.permute.xlu0 %2356 }
 0x923   : > { %v5418_v17 = vpop.permute.xlu1 %2049 }
 0x924   : > { %4353 = vmatpush.msk.msra.mxu2 %vm1677_vm6, %v5418_v17 }
 0x925   : > { %4346 = vmatmul.msk.f32.gmra.mxu3 %vm1648_vm9, %v1920_v32  ;;  %2354 = vrot.lane.b32.xlu1 %v5331_v61, %s6152_s20  ;;  %v4723_v32 = vld [vmem:[%s4915_s25] sm:$0xff] }
 0x926   : > { %v4612_v40 = vpop.eup %4611 }
 0x927   : > { %v2040_v38 = vsel %vm1648_vm9, %v4612_v40, 0.0 }
 0x928   : > { %2041 = vadd.xlane.f32.xlu2 %v2040_v38 }
 0x92b   : > { %v5426_v59 = vpop.permute.xlu1 %2047 }
 0x92c   : > { %2075 = vmatpush.msra.mxu2 %v5426_v59 }
 0x92e   : > { %2238 = vmatpush.msrb.mxu2 %v4272_v18 }
 0x940   : > { %993 = vrot.lane.b32.xlu2 %v4931_v26, %s4741_s3  ;;  %v1048_v26 = vld [vmem:[%s6134_s14 + $0x50] sm:$0xff]  ;;  %s6181_s3 = smov 120  }
 0x941   : > { %1978 = vmatpush.msrb.mxu1 %v1048_v26 }
 0x943   : > { %2134 = vmatpush.msra.mxu1 %v4271_v47 }
 0x945   : > { %2135 = vmatpush.msra.mxu1 %v4270_v6 }
 0x947   : > { %2136 = vmatpush.msra.mxu1 %v4269_v42 }
 0x948   : > { %2250 = vrot.lane.b32.xlu2 %v5321_v28, %s6154_s23 }
 0x949   : > { %2137 = vmatpush.msra.mxu1 %v4268_v1 }
 0x950   : > { %2248 = vrot.lane.b32.xlu2 %v5326_v33, %s6154_s23 }
 0x958   : > { %2246 = vrot.lane.b32.xlu2 %v5331_v61, %s6154_s23 }
 0x960   : > { %2244 = vrot.lane.b32.xlu2 %v4946_v31, %s6179_s22 }
 0x968   : > { %2352 = vrot.lane.b32.xlu2 %v4946_v31, %s6180_s24 }
 0x97f   : > { %v2190_v15 = vpop.xlane.xlu1 %2189 }
 0x993   : > { %v2039_v12 = vpop.xlane.xlu2 %2038 }
 0x994   : > { %4613 = vrcp.f32 %v2039_v12 }
 0x997   : > { %v5481_v10 = vpop.permute.xlu1 %2354 }
 0x99a   : > { %v4614_v46 = vpop.eup %4613 }
 0x99b   : > { %v2045_v5 = vmul.f32 %v4614_v46, %v4608_v11  ;;  %v2042_v56 = vpop.xlane.xlu2 %2041  ;;  %v4275_v46 = vld [vmem:[%s6134_s14 + $0x98] sm:$0xff] }
 0x99c   : > { %4615 = vrcp.f32 %v2042_v56 }
 0x99d   : > { %4354 = vmatmul.msk.f32.vlgmr.msra.gmra.mxu2 %vm1648_vm9, %v2045_v5  ;;  %4617 = vrcp.f32 %v2190_v15 }
 0x99e   : > { %4374 = vmatpush.xpose.msk.msra.mxu2 %vm1113_vm1, %v5466_v60 }
 0x9a0   : > { %v1951_v34 = vpop.f32.mrf.mxu3 }
 0x9a1   : > { %4347 = vmatmul.msk.f32.vlgmr.msrb.gmra.mxu1 %vm1113_vm1, %v1951_v34 }
 0x9a2   : > { %v4616_v29 = vpop.eup %4615  ;;  %4375 = vmatpush.xpose.msk.msra.mxu2 %vm1113_vm1, %v5473_v0  ;;  %4364 = vmatpush.msk.msrb.mxu1 %vm2196_vm13, %v5471_v20 }
 0x9a3   : > { %v994_v41 = vpop.permute.xlu2 %993  ;;  %v2046_v9 = vmul.f32 %v4616_v29, %v4612_v40  ;;  %v4618_v38 = vpop.eup %4617 }
 0x9a4   : > { %998 = vst.msk [vmem:[#allocation3 + $0x8] sm:$0xff] %vm844_vm0, %v994_v41  ;;  %v2192_v18 = vmul.f32 %v4618_v38, %v5408_v14  ;;  %v4543_v41 = vld [vmem:[%s6135_s15 + $0x1] ss:$0 sm:$0xff] }
 0x9a5   : > { %4355 = vmatmul.msk.f32.gmra.mxu2 %vm1648_vm9, %v2046_v9 }
 0x9a6   : > { %4376 = vmatpush.xpose.msk.msra.mxu2 %vm1113_vm1, %v5481_v10 }
 0x9a8   : > { %v1954_v11 = vpop.f32.mrf.mxu3 }
 0x9a9   : > { %4348 = vmatmul.msk.f32.gmra.mxu1 %vm1113_vm1, %v1954_v11 }
 0x9ab   : > { %v5487_v3 = vpop.permute.xlu2 %2250  ;;  %v5489_v13 = vld [vmem:[#allocation3 + $0x8] sm:$0xff] }
 0x9ac   : > { %2214 = vmatpush.msrb.mxu1 %v5489_v13  ;;  %4367 = vmatpush.xpose.msk.msrb.mxu3 %vm1113_vm1, %v5487_v3 }
 0x9ae   : > { %2215 = vmatpush.msrb.mxu1 %v5494_v57 }
 0x9b1   : > { %4359 = vmatmul.msk.f32.vlgmr.msra.gmra.mxu1 %vm844_vm0, %v4723_v32 }
 0x9b3   : > { %v5499_v40 = vpop.permute.xlu2 %2248 }
 0x9b4   : > { %4368 = vmatpush.xpose.msk.msrb.mxu3 %vm1113_vm1, %v5499_v40 }
 0x9b9   : > { %4365 = vmatmul.msk.f32.vlgmr.msrb.gmra.mxu1 %vm2181_vm12, %v2192_v18 }
 0x9bb   : > { %v5505_v26 = vpop.permute.xlu2 %2246 }
 0x9bc   : > { %4369 = vmatpush.xpose.msk.msrb.mxu3 %vm1113_vm1, %v5505_v26 }
 0x9c3   : > { %v5513_v12 = vpop.permute.xlu2 %2244 }
 0x9cb   : > { %v5521_v5 = vpop.permute.xlu2 %2352 }
 0xa1e   : > { %v1980_v47 = vpop.f32.mrf.mxu1 }
 0xa1f   : > { %v1986_v35 = vadd.f32 %v1980_v47, %v5364_v54 }
 0xa20   : > { %v2077_v6 = vpop.f32.mrf.mxu2 }
 0xa21   : > { %4356 = vmatmul.msk.f32.vlgmr.msra.gmra.mxu3 %vm1113_vm1, %v2077_v6 }
 0xa26   : > { %v1983_v42 = vpop.f32.mrf.mxu1 }
 0xa27   : > { %v1987_v1 = vadd.f32 %v1983_v42, %v5368_v2  ;;  %v5552_v42 = vpack.i.bf16 %v5494_v57, %v5489_v13 }
 0xa28   : > { %v2080_v25 = vpop.f32.mrf.mxu2 }
 0xa29   : > { %4357 = vmatmul.msk.f32.gmra.mxu3 %vm1113_vm1, %v2080_v25 }
 0xa2e   : > { %v2139_v14 = vpop.f32.mrf.mxu1 }
 0xa2f   : > { %v2140_v32 = vadd.f32 %v4543_v41, %v2139_v14 }
 0xa31   : > { %4370 = vmatmul.msk.f32.vlgmr.msrb.gmra.mxu3 %vm1113_vm1, %v5513_v12 }
 0xa36   : > { %v2217_v54 = vpop.f32.mrf.mxu1 }
 0xa37   : > { %4366 = vmatmul.msk.f32.vlgmr.msrb.gmra.mxu2 %vm1113_vm1, %v2217_v54 }
 0xa38   : > { %2558 = vmatpush.msrb.mxu2 %v4275_v46 }
 0xa3f   : > { %4377 = vmatmul.msk.f32.vlgmr.msra.gmra.mxu2 %vm1113_vm1, %v5521_v5 }
 0xa40   : > { %4394 = vmatpush.xpose.msk.msra.mxu2 %vm1113_vm1, %v5171_v63 }
 0xa44   : > { %4395 = vmatpush.xpose.msk.msra.mxu2 %vm1113_vm1, %v5211_v39 }
 0xaa4   : > { %v2106_v2 = vpop.f32.mrf.mxu3 }
 0xaa5   : > { %v5529_v56 = vadd.f32 %v2106_v2, %v1986_v35 }
 0xaac   : > { %v2109_v15 = vpop.f32.mrf.mxu3 }
 0xaad   : > { %v5531_v34 = vadd.f32 %v2109_v15, %v1987_v1  ;;  %v4273_v1 = vld [vmem:[%s6134_s14 + $0x88] sm:$0xff] }
 0xaae   : > { %2346 = vmatpush.msra.mxu1 %v4273_v1 }
 0xab4   : > { %v2277_v29 = vpop.f32.mrf.mxu3 }
 0xab5   : > { %v2280_v9 = vsel %vm5375_vm11, -1e+09, %v2277_v29 }
 0xab6   : > { %v2281_v11 = vmul.f32 0.35355338, %v2280_v9 }
 0xab8   : > { %v2282_v63 = vsel %vm2181_vm12, %v2281_v11, -inf }
 0xab9   : > { %2283 = vmax.xlane.f32.xlu0 %v2282_v63 }
 0xaba   : > { %v2240_v39 = vpop.f32.mrf.mxu2 }
 0xabb   : > { %v5539_v38 = vadd.f32 %v2240_v39, %v2140_v32 }
 0xac2   : > { %v2385_v18 = vpop.f32.mrf.mxu2 }
 0xac3   : > { %v2388_v47 = vsel %vm5375_vm11, -1e+09, %v2385_v18 }
 0xac4   : > { %v2389_v35 = vmul.f32 0.35355338, %v2388_v47 }
 0xac6   : > { %v2390_v6 = vsel %vm2181_vm12, %v2389_v35, -inf }
 0xac7   : > { %2391 = vmax.xlane.f32.xlu2 %v2390_v6 }
 0xacd   : > { %2299 = vrot.lane.b32.xlu0 %v5471_v20, %s6181_s3 }
 0xad5   : > { %2405 = vrot.lane.b32.xlu0 %v5471_v20, %s6182_s26 }
 0xadd   : > { %2464 = vrot.lane.b32.xlu0 %v5321_v28, %s6175_s2 }
 0xadf   : > { %4525 = vrot.lane.b32.xlu2 %v5552_v42, %s6181_s3 }
 0xae5   : > { %2460 = vrot.lane.b32.xlu0 %v5331_v61, %s6175_s2 }
 0xae7   : > { %2462 = vrot.lane.b32.xlu2 %v5326_v33, %s6175_s2 }
 0xaef   : > { %2458 = vrot.lane.b32.xlu2 %v4946_v31, %s6183_s0 }
 0xb2c   : > { %v2284_v25 = vpop.xlane.xlu0 %2283 }
 0xb2d   : > { %v2285_v14 = vsub.f32 %v2281_v11, %v2284_v25  ;;  %v4274_v25 = vld [vmem:[%s6134_s14 + $0x90] sm:$0xff] }
 0xb2f   : > { %v2286_v46 = vmul.f32 1.442695, %v2285_v14 }
 0xb31   : > { %4619 = vpow2.f32 %v2286_v46 }
 0xb37   : > { %v4620_v54 = vpop.eup %4619 }
 0xb38   : > { %v2288_v2 = vsel %vm2181_vm12, %v4620_v54, 0.0 }
 0xb39   : > { %2289 = vadd.xlane.f32.xlu1 %v2288_v2 }
 0xb3a   : > { %v2392_v15 = vpop.xlane.xlu2 %2391 }
 0xb3b   : > { %v2393_v29 = vsub.f32 %v2389_v35, %v2392_v15 }
 0xb3d   : > { %v2394_v41 = vmul.f32 1.442695, %v2393_v29 }
 0xb3f   : > { %4621 = vpow2.f32 %v2394_v41  ;;  %v5566_v9 = vpop.permute.xlu0 %2299 }
 0xb40   : > { %4371 = vmatpush.msk.msra.mxu0 %vm2196_vm13, %v5566_v9 }
 0xb42   : > { %v5570_v63 = vpop.permute.xlu2 %4525 }
 0xb43   : > { %v4527_v32 = vunpack.i.l.bf16 %v5570_v63  ;;  %v4528_v39 = vunpack.i.h.bf16 %v5570_v63 }
 0xb45   : > { %v4622_v11 = vpop.eup %4621  ;;  %2322 = vmatpush.msra.mxu0 %v4527_v32 }
 0xb46   : > { %v2396_v18 = vsel %vm2181_vm12, %v4622_v11, 0.0 }
 0xb47   : > { %2397 = vadd.xlane.f32.xlu1 %v2396_v18  ;;  %2323 = vmatpush.msra.mxu0 %v4528_v39  ;;  %v5579_v47 = vpop.permute.xlu0 %2405 }
 0xb48   : > { %4378 = vmatpush.msk.msra.mxu3 %vm2196_vm13, %v5579_v47 }
 0xb49   : > { %2452 = vmatpush.msrb.mxu0 %v4274_v25 }
 0xb4a   : > { %v5587_v6 = vpop.permute.xlu2 %2462 }
 0xb4f   : > { %v5583_v35 = vpop.permute.xlu0 %2464 }
 0xb50   : > { %4381 = vmatpush.xpose.msk.msrb.mxu1 %vm1113_vm1, %v5583_v35 }
 0xb54   : > { %4382 = vmatpush.xpose.msk.msrb.mxu1 %vm1113_vm1, %v5587_v6 }
 0xb57   : > { %v5591_v1 = vpop.permute.xlu0 %2460 }
 0xb58   : > { %4383 = vmatpush.xpose.msk.msrb.mxu1 %vm1113_vm1, %v5591_v1 }
 0xb60   : > { %4530 = vrot.lane.b32.xlu1 %v5552_v42, %s6182_s26  ;;  %s814_s26 = scalar_lea.vmem %s6130_s10, %s4880_s4 }
 0xbac   : > { %v2290_v14 = vpop.xlane.xlu1 %2289 }
 0xbad   : > { %4623 = vrcp.f32 %v2290_v14  ;;  %v5618_v14 = vpop.permute.xlu2 %2458 }
 0xbb3   : > { %v4624_v46 = vpop.eup %4623 }
 0xbb4   : > { %v2292_v2 = vmul.f32 %v4624_v46, %v4620_v54 }
 0xbb6   : > { %4372 = vmatmul.msk.f32.vlgmr.msra.gmra.mxu0 %vm2181_vm12, %v2292_v2 }
 0xbb7   : > { %4388 = vmatpush.xpose.msk.msra.mxu0 %vm1113_vm1, %v5162_v23  ;;  %v4276_v23 = vld [vmem:[%s6134_s14 + $0xa0] sm:$0xff] }
 0xbba   : > { %v2398_v15 = vpop.xlane.xlu1 %2397 }
 0xbbb   : > { %4389 = vmatpush.xpose.msk.msra.mxu0 %vm1113_vm1, %v5189_v53  ;;  %4625 = vrcp.f32 %v2398_v15 }
 0xbc1   : > { %v4626_v41 = vpop.eup %4625 }
 0xbc2   : > { %v2400_v54 = vmul.f32 %v4626_v41, %v4622_v11 }
 0xbd2   : > { %v5605_v29 = vpop.permute.xlu1 %4530 }
 0xbd3   : > { %v4532_v18 = vunpack.i.l.bf16 %v5605_v29  ;;  %v4533_v25 = vunpack.i.h.bf16 %v5605_v29 }
 0xbd5   : > { %2428 = vmatpush.msra.mxu3 %v4532_v18 }
 0xbd7   : > { %2429 = vmatpush.msra.mxu3 %v4533_v25 }
 0xbd8   : > { %4379 = vmatmul.msk.f32.vlgmr.msra.gmra.mxu3 %vm2181_vm12, %v2400_v54 }
 0xc33   : > { %v2325_v53 = vpop.f32.mrf.mxu0 }
 0xc34   : > { %4373 = vmatmul.msk.f32.vlgmr.msra.gmra.mxu1 %vm1113_vm1, %v2325_v53 }
 0xc35   : > { %2638 = vmatpush.msra.mxu1 %v4276_v23 }
 0xc3c   : > { %4384 = vmatmul.msk.f32.vlgmr.msrb.gmra.mxu1 %vm1113_vm1, %v5618_v14 }
 0xc3d   : > { %4400 = vmatpush.xpose.msk.msrb.mxu1 %vm1113_vm1, %v5255_v48 }
 0xc41   : > { %4401 = vmatpush.xpose.msk.msrb.mxu1 %vm1113_vm1, %v5309_v19 }
 0xc5b   : > { %v2431_v11 = vpop.f32.mrf.mxu3 }
 0xc5c   : > { %4380 = vmatmul.msk.f32.vlgmr.msrb.gmra.mxu0 %vm1113_vm1, %v2431_v11 }
 0xc5d   : > { %4397 = vmatpush.msk.msrb.mxu0 %vm1677_vm6, %v5294_v8 }
 0xc5f   : > { %2695 = vmatpush.msrb.mxu0 %v5284_v16 }
 0xc64   : > { %4390 = vmatmul.msk.f32.vlgmr.msra.gmra.mxu0 %vm1113_vm1, %v5339_v43 }
 0xcb1   : > { %v2348_v46 = vpop.f32.mrf.mxu1 }
 0xcb2   : > { %v2351_v2 = vadd.f32 %v2348_v46, %v5539_v38 }
 0xcb9   : > { %v2491_v15 = vpop.f32.mrf.mxu1 }
 0xcba   : > { %v2494_v48 = vsel %vm5375_vm11, -1e+09, %v2491_v15 }
 0xcbb   : > { %v2495_v41 = vmul.f32 0.35355338, %v2494_v48 }
 0xcbd   : > { %v2496_v19 = vsel %vm2181_vm12, %v2495_v41, -inf }
 0xcbe   : > { %2497 = vmax.xlane.f32.xlu0 %v2496_v19 }
 0xcd2   : > { %2511 = vrot.lane.b32.xlu0 %v5471_v20, %s6175_s2 }
 0xcd9   : > { %v2454_v8 = vpop.f32.mrf.mxu0 }
 0xcda   : > { %v2457_v54 = vadd.f32 %v2454_v8, %v2351_v2 }
 0xce1   : > { %v2581_v16 = vpop.f32.mrf.mxu0 }
 0xce2   : > { %v2584_v43 = vsel %vm5228_vm8, -1e+09, %v2581_v16 }
 0xce3   : > { %v2585_v23 = vmul.f32 0.35355338, %v2584_v43 }
 0xce5   : > { %v2586_v38 = vsel %vm1648_vm9, %v2585_v23, -inf }
 0xce6   : > { %2587 = vmax.xlane.f32.xlu2 %v2586_v38 }
 0xcfe   : > { %4535 = vrot.lane.b32.xlu2 %v5552_v42, %s6175_s2  ;;  %s6055_s2 = scalar_lea.vmem %s6138_s18, %s4880_s4 }
 0xd31   : > { %v2498_v53 = vpop.xlane.xlu0 %2497 }
 0xd32   : > { %v2499_v11 = vsub.f32 %v2495_v41, %v2498_v53 }
 0xd34   : > { %v2500_v46 = vmul.f32 1.442695, %v2499_v11 }
 0xd36   : > { %4627 = vpow2.f32 %v2500_v46 }
 0xd3c   : > { %v4628_v15 = vpop.eup %4627 }
 0xd3d   : > { %v2502_v48 = vsel %vm2181_vm12, %v4628_v15, 0.0 }
 0xd3e   : > { %2503 = vadd.xlane.f32.xlu1 %v2502_v48  ;;  %v4277_v48 = vld [vmem:[%s6134_s14 + $0xa8] sm:$0xff] }
 0xd44   : > { %v5644_v2 = vpop.permute.xlu0 %2511 }
 0xd45   : > { %4385 = vmatpush.msk.msrb.mxu3 %vm2196_vm13, %v5644_v2 }
 0xd59   : > { %v2588_v19 = vpop.xlane.xlu2 %2587 }
 0xd5a   : > { %v2589_v8 = vsub.f32 %v2585_v23, %v2588_v19 }
 0xd5c   : > { %v2590_v16 = vmul.f32 1.442695, %v2589_v8 }
 0xd5e   : > { %4629 = vpow2.f32 %v2590_v16 }
 0xd61   : > { %v5648_v43 = vpop.permute.xlu2 %4535 }
 0xd62   : > { %v4537_v42 = vunpack.i.l.bf16 %v5648_v43  ;;  %v4538_v38 = vunpack.i.h.bf16 %v5648_v43 }
 0xd64   : > { %v4630_v41 = vpop.eup %4629  ;;  %2534 = vmatpush.msrb.mxu3 %v4537_v42 }
 0xd65   : > { %v2592_v53 = vsel %vm1648_vm9, %v4630_v41, 0.0 }
 0xd66   : > { %2593 = vadd.xlane.f32.xlu1 %v2592_v53  ;;  %2535 = vmatpush.msrb.mxu3 %v4538_v38 }
 0xd68   : > { %4391 = vmatpush.msk.msra.mxu3 %vm1677_vm6, %v5197_v62 }
 0xd6a   : > { %2615 = vmatpush.msra.mxu3 %v5257_v52 }
 0xdb1   : > { %v2504_v23 = vpop.xlane.xlu1 %2503 }
 0xdb2   : > { %4631 = vrcp.f32 %v2504_v23 }
 0xdb8   : > { %v4632_v11 = vpop.eup %4631 }
 0xdb9   : > { %v2506_v46 = vmul.f32 %v4632_v11, %v4628_v15 }
 0xdbb   : > { %4386 = vmatmul.msk.f32.vlgmr.msrb.gmra.mxu3 %vm2181_vm12, %v2506_v46 }
 0xdbc   : > { %2718 = vmatpush.msrb.mxu3 %v4277_v48 }
 0xdd9   : > { %v2594_v19 = vpop.xlane.xlu1 %2593 }
 0xdda   : > { %4633 = vrcp.f32 %v2594_v19 }
 0xde0   : > { %v4634_v8 = vpop.eup %4633 }
 0xde1   : > { %v2596_v16 = vmul.f32 %v4634_v8, %v4630_v41 }
 0xde3   : > { %4392 = vmatmul.msk.f32.vlgmr.msra.gmra.mxu3 %vm1648_vm9, %v2596_v16 }
 0xde4   : > { %4406 = vmatpush.xpose.msk.msra.mxu3 %vm1113_vm1, %v5286_v27 }
 0xde8   : > { %4407 = vmatpush.xpose.msk.msra.mxu3 %vm1113_vm1, %v5299_v55 }
 0xe3e   : > { %v2537_v62 = vpop.f32.mrf.mxu3 }
 0xe3f   : > { %4387 = vmatmul.msk.f32.vlgmr.msrb.gmra.mxu2 %vm1113_vm1, %v2537_v62 }
 0xe40   : > { %4403 = vmatpush.msk.msrb.mxu2 %vm1677_vm6, %v5384_v24 }
 0xe42   : > { %2775 = vmatpush.msrb.mxu2 %v5413_v4 }
 0xe47   : > { %4396 = vmatmul.msk.f32.vlgmr.msra.gmra.mxu2 %vm1113_vm1, %v5513_v12 }
 0xe66   : > { %v2617_v52 = vpop.f32.mrf.mxu3 }
 0xe67   : > { %4393 = vmatmul.msk.f32.vlgmr.msra.gmra.mxu1 %vm1113_vm1, %v2617_v52 }
 0xe68   : > { %4409 = vmatpush.msk.msra.mxu1 %vm1677_vm6, %v5418_v17 }
 0xe6a   : > { %2855 = vmatpush.msra.mxu1 %v5426_v59 }
 0xe6f   : > { %4402 = vmatmul.msk.f32.vlgmr.msrb.gmra.mxu1 %vm1113_vm1, %v5521_v5 }
 0xe70   : > { %4420 = vmatpush.msk.msrb.mxu1 %vm2196_vm13, %v5471_v20 }
 0xe72   : > { %2998 = vmatpush.msrb.mxu1 %v5489_v13 }
 0xe74   : > { %2999 = vmatpush.msrb.mxu1 %v5494_v57 }
 0xec2   : > { %v2560_v27 = vpop.f32.mrf.mxu2 }
 0xec3   : > { %v2563_v55 = vadd.f32 %v2560_v27, %v2457_v54 }
 0xeca   : > { %v2661_v24 = vpop.f32.mrf.mxu2 }
 0xecb   : > { %v2664_v4 = vsel %vm5228_vm8, -1e+09, %v2661_v24 }
 0xecc   : > { %v2665_v12 = vmul.f32 0.35355338, %v2664_v4 }
 0xece   : > { %v2666_v17 = vsel %vm1648_vm9, %v2665_v12, -inf }
 0xecf   : > { %2667 = vmax.xlane.f32.xlu1 %v2666_v17  ;;  %v4283_v17 = vld [vmem:[%s6134_s14 + $0xd8] sm:$0xff] }
 0xee4   : > { %v2640_v59 = vpop.f32.mrf.mxu1 }
 0xee5   : > { %v5688_v15 = vadd.f32 %v2640_v59, %v2563_v55  ;;  %v4282_v59 = vld [vmem:[%s6134_s14 + $0xd0] sm:$0xff] }
 0xeec   : > { %v2741_v5 = vpop.f32.mrf.mxu1 }
 0xeed   : > { %v2744_v20 = vsel %vm5228_vm8, -1e+09, %v2741_v5  ;;  %v4281_v5 = vld [vmem:[%s6134_s14 + $0xc8] sm:$0xff] }
 0xeee   : > { %v2745_v13 = vmul.f32 0.35355338, %v2744_v20 }
 0xef0   : > { %v2746_v57 = vsel %vm1648_vm9, %v2745_v13, -inf }
 0xef1   : > { %2747 = vmax.xlane.f32.xlu0 %v2746_v57 }
 0xf05   : > { %3038 = vrot.lane.b32.xlu0 %v5184_v49, %s6179_s22 }
 0xf42   : > { %v2668_v54 = vpop.xlane.xlu1 %2667 }
 0xf43   : > { %v2669_v41 = vsub.f32 %v2665_v12, %v2668_v54  ;;  %v4278_v12 = vld [vmem:[%s6134_s14 + $0xb0] sm:$0xff] }
 0xf44   : > { %2798 = vmatpush.msra.mxu0 %v4278_v12 }
 0xf45   : > { %v2670_v53 = vmul.f32 1.442695, %v2669_v41 }
 0xf47   : > { %4635 = vpow2.f32 %v2670_v53 }
 0xf4d   : > { %v4636_v23 = vpop.eup %4635 }
 0xf4e   : > { %v2672_v11 = vsel %vm1648_vm9, %v4636_v23, 0.0 }
 0xf4f   : > { %2673 = vadd.xlane.f32.xlu1 %v2672_v11 }
 0xf64   : > { %v2748_v46 = vpop.xlane.xlu0 %2747 }
 0xf65   : > { %v2749_v48 = vsub.f32 %v2745_v13, %v2748_v46  ;;  %v4280_v13 = vld [vmem:[%s6134_s14 + $0xc0] sm:$0xff] }
 0xf67   : > { %v2750_v19 = vmul.f32 1.442695, %v2749_v48 }
 0xf68   : > { %2918 = vrot.lane.b32.xlu1 %v5184_v49, %s6176_s30 }
 0xf69   : > { %4637 = vpow2.f32 %v2750_v19 }
 0xf6f   : > { %v4638_v8 = vpop.eup %4637 }
 0xf70   : > { %2920 = vrot.lane.b32.xlu1 %v5158_v22, %s6176_s30  ;;  %v2752_v16 = vsel %vm1648_vm9, %v4638_v8, 0.0 }
 0xf71   : > { %2753 = vadd.xlane.f32.xlu2 %v2752_v16 }
 0xf78   : > { %3040 = vrot.lane.b32.xlu1 %v5158_v22, %s6179_s22 }
 0xfc2   : > { %v2674_v62 = vpop.xlane.xlu1 %2673 }
 0xfc3   : > { %4639 = vrcp.f32 %v2674_v62 }
 0xfc9   : > { %v4640_v52 = vpop.eup %4639 }
 0xfca   : > { %v2676_v27 = vmul.f32 %v4640_v52, %v4636_v23 }
 0xfcc   : > { %4398 = vmatmul.msk.f32.vlgmr.msrb.gmra.mxu0 %vm1648_vm9, %v2676_v27 }
 0xfcd   : > { %2907 = vmatpush.msrb.mxu0 %v4283_v17 }
 0xfcf   : > { %2908 = vmatpush.msrb.mxu0 %v4282_v59 }
 0xfd1   : > { %2909 = vmatpush.msrb.mxu0 %v4281_v5 }
 0xfd3   : > { %2910 = vmatpush.msrb.mxu0 %v4280_v13 }
 0xfda   : > { %v5731_v57 = vpop.permute.xlu1 %2918 }
 0xfe4   : > { %v2754_v55 = vpop.xlane.xlu2 %2753 }
 0xfe5   : > { %4641 = vrcp.f32 %v2754_v55 }
 0xfeb   : > { %v4642_v24 = vpop.eup %4641 }
 0xfec   : > { %v2756_v4 = vmul.f32 %v4642_v24, %v4638_v8 }
 0xfee   : > { %4404 = vmatmul.msk.f32.vlgmr.msrb.gmra.mxu2 %vm1648_vm9, %v2756_v4 }
0x1049   : > { %v2697_v20 = vpop.f32.mrf.mxu0 }
0x104a   : > { %4399 = vmatmul.msk.f32.vlgmr.msrb.gmra.mxu3 %vm1113_vm1, %v2697_v20 }
0x104b   : > { %4415 = vmatpush.xpose.msk.msrb.mxu3 %vm1113_vm1, %v5321_v28  ;;  %v5743_v28 = vpop.permute.xlu1 %2920 }
0x104f   : > { %4416 = vmatpush.xpose.msk.msrb.mxu3 %vm1113_vm1, %v5326_v33 }
0x1052   : > { %4408 = vmatmul.msk.f32.vlgmr.msra.gmra.mxu3 %vm1113_vm1, %v5618_v14 }
0x1053   : > { %4417 = vmatpush.xpose.msk.msrb.mxu3 %vm1113_vm1, %v5331_v61  ;;  %v5755_v61 = vld [vmem:[%s5040_s28] sm:$0xff] }
0x1057   : > { %4435 = vmatpush.xpose.msk.msra.mxu3 %vm1113_vm1, %v5466_v60  ;;  %v5768_v60 = vld [vmem:[%s5040_s28 + $0x8] sm:$0xf] }
0x105a   : > { %4418 = vmatmul.msk.f32.vlgmr.msrb.gmra.mxu3 %vm1113_vm1, %v5731_v57 }
0x105b   : > { %4436 = vmatpush.xpose.msk.msra.mxu3 %vm1113_vm1, %v5473_v0  ;;  %v5772_v0 = vpop.permute.xlu0 %3038 }
0x105f   : > { %4437 = vmatpush.xpose.msk.msra.mxu3 %vm1113_vm1, %v5481_v10  ;;  %v5776_v10 = vpop.permute.xlu1 %3040 }
0x1062   : > { %4419 = vmatmul.msk.f32.gmra.mxu3 %vm1113_vm1, %v5743_v28 }
0x1063   : > { %4450 = vmatpush.msk.msrb.mxu3 %vm2196_vm13, %v5644_v2 }
0x1065   : > { %3355 = vmatpush.msrb.mxu3 %v4537_v42 }
0x1067   : > { %3356 = vmatpush.msrb.mxu3 %v4538_v38  ;;  %v5794_v38 = vld [vmem:[%s814_s26 + $0x8] sm:$0x1f] }
0x1071   : > { %v2777_v33 = vpop.f32.mrf.mxu2 }
0x1072   : > { %4405 = vmatmul.msk.f32.vlgmr.msra.gmra.mxu0 %vm1113_vm1, %v2777_v33 }
0x1073   : > { %4425 = vmatpush.xpose.msk.msra.mxu0 %vm1113_vm1, %v5487_v3 }
0x1077   : > { %4426 = vmatpush.xpose.msk.msra.mxu0 %vm1113_vm1, %v5499_v40 }
0x107a   : > { %4413 = vmatmul.msk.f32.vlgmr.msrb.gmra.mxu0 %vm844_vm0, %v5755_v61 }
0x107b   : > { %4427 = vmatpush.xpose.msk.msra.mxu0 %vm1113_vm1, %v5505_v26 }
0x107f   : > { %4440 = vmatpush.msk.msrb.mxu0 %vm2196_vm13, %v5579_v47 }
0x1081   : > { %3236 = vmatpush.msrb.mxu0 %v4532_v18 }
0x1082   : > { %4414 = vmatmul.msk.f32.gmra.mxu0 %vm844_vm0, %v5768_v60 }
0x1083   : > { %3237 = vmatpush.msrb.mxu0 %v4533_v25  ;;  %v5788_v25 = vld [vmem:[%s814_s26] sm:$0xff] }
0x108a   : > { %4428 = vmatmul.msk.f32.vlgmr.msra.gmra.mxu0 %vm1113_vm1, %v5772_v0 }
0x1092   : > { %4429 = vmatmul.msk.f32.gmra.mxu0 %vm1113_vm1, %v5776_v10 }
0x10cd   : > { %v2720_v3 = vpop.f32.mrf.mxu3 }
0x10ce   : > { %v2723_v40 = vadd.f32 %v2720_v3, %v5688_v15 }
0x10d5   : > { %v2821_v26 = vpop.f32.mrf.mxu3 }
0x10d6   : > { %v2824_v47 = vsel %vm5228_vm8, -1e+09, %v2821_v26 }
0x10d7   : > { %v2825_v29 = vmul.f32 0.35355338, %v2824_v47 }
0x10d9   : > { %v2826_v18 = vsel %vm1648_vm9, %v2825_v29, -inf }
0x10da   : > { %2827 = vmax.xlane.f32.xlu2 %v2826_v18 }
0x10dd   : > { %v2943_v14 = vpop.f32.mrf.mxu3 }
0x10de   : > { %v2949_v2 = vmul.f32 %v2943_v14, %v5788_v25 }
0x10e0   : > { %v2951_v43 = vsel %vm5375_vm11, -1e+09, %v2949_v2 }
0x10e1   : > { %v2953_v42 = vmul.f32 0.35355338, %v2951_v43 }
0x10e3   : > { %v2955_v7 = vsel %vm2181_vm12, %v2953_v42, -inf }
0x10e4   : > { %2956 = vmax.xlane.f32.xlu1 %v2955_v7 }
0x10e5   : > { %v2946_v15 = vpop.f32.mrf.mxu3 }
0x10e6   : > { %v2950_v54 = vmul.f32 %v2946_v15, %v5794_v38 }
0x10e8   : > { %v2952_v41 = vsel %vm5375_vm11, -1e+09, %v2950_v54 }
0x10e9   : > { %v2954_v53 = vmul.f32 0.35355338, %v2952_v41 }
0x10eb   : > { %v2959_v23 = vsel %vm2958_vm14, %v2954_v53, -inf }
0x10ec   : > { %2960 = vmax.xlane.f32.xlu2 %v2959_v23 }
0x10ef   : > { %v2800_v11 = vpop.f32.mrf.mxu0 }
0x10f0   : > { %v5800_v46 = vadd.f32 %v2800_v11, %v2723_v40 }
0x10f7   : > { %v5802_v48 = vpop.f32.mrf.mxu0 }
0x10ff   : > { %v5804_v19 = vpop.f32.mrf.mxu0 }
0x1107   : > { %v3063_v8 = vpop.f32.mrf.mxu0 }
0x1108   : > { %v3069_v16 = vmul.f32 %v3063_v8, %v5788_v25 }
0x110a   : > { %v3071_v62 = vsel %vm5375_vm11, -1e+09, %v3069_v16 }
0x110b   : > { %v3073_v52 = vmul.f32 0.35355338, %v3071_v62 }
0x110d   : > { %v3075_v27 = vsel %vm2181_vm12, %v3073_v52, -inf }
0x110e   : > { %3076 = vmax.xlane.f32.xlu2 %v3075_v27 }
0x110f   : > { %v3066_v55 = vpop.f32.mrf.mxu0 }
0x1110   : > { %v3070_v24 = vmul.f32 %v3066_v55, %v5794_v38 }
0x1112   : > { %v3072_v4 = vsel %vm5375_vm11, -1e+09, %v3070_v24 }
0x1113   : > { %v3074_v12 = vmul.f32 0.35355338, %v3072_v4 }
0x1115   : > { %v3078_v17 = vsel %vm2958_vm14, %v3074_v12, -inf }
0x1116   : > { %3079 = vmax.xlane.f32.xlu0 %v3078_v17 }
0x112a   : > { %3278 = vrot.lane.b32.xlu0 %v5158_v22, %s6183_s0 }
0x1132   : > { %3159 = vrot.lane.b32.xlu0 %v5158_v22, %s6180_s24 }
0x114d   : > { %v2828_v59 = vpop.xlane.xlu2 %2827 }
0x114e   : > { %v2829_v5 = vsub.f32 %v2825_v29, %v2828_v59 }
0x1150   : > { %v2830_v20 = vmul.f32 1.442695, %v2829_v5 }
0x1152   : > { %4643 = vpow2.f32 %v2830_v20 }
0x1157   : > { %v2957_v13 = vpop.xlane.xlu1 %2956 }
0x1158   : > { %v4644_v33 = vpop.eup %4643  ;;  %v2962_v3 = vsub.f32 %v2953_v42, %v2957_v13 }
0x1159   : > { %v2832_v40 = vsel %vm1648_vm9, %v4644_v33, 0.0 }
0x115a   : > { %v2964_v26 = vmul.f32 1.442695, %v2962_v3  ;;  %2833 = vadd.xlane.f32.xlu2 %v2832_v40  ;;  %v4284_v40 = vld [vmem:[%s6134_s14 + $0xe0] sm:$0xff] }
0x115c   : > { %4645 = vpow2.f32 %v2964_v26  ;;  %v4285_v26 = vld [vmem:[%s6134_s14 + $0xe8] sm:$0xff] }
0x115f   : > { %v2961_v47 = vpop.xlane.xlu2 %2960 }
0x1160   : > { %v2963_v18 = vsub.f32 %v2954_v53, %v2961_v47 }
0x1162   : > { %v4646_v14 = vpop.eup %4645  ;;  %v2966_v2 = vmul.f32 1.442695, %v2963_v18 }
0x1163   : > { %v2968_v43 = vsel %vm2181_vm12, %v4646_v14, 0.0 }
0x1164   : > { %4647 = vpow2.f32 %v2966_v2  ;;  %2969 = vadd.xlane.f32.xlu2 %v2968_v43 }
0x116a   : > { %v4648_v22 = vpop.eup %4647 }
0x116b   : > { %v2971_v29 = vsel %vm2958_vm14, %v4648_v22, 0.0 }
0x116c   : > { %2972 = vadd.xlane.f32.xlu2 %v2971_v29 }
0x1181   : > { %v3077_v7 = vpop.xlane.xlu2 %3076 }
0x1182   : > { %v3081_v15 = vsub.f32 %v3073_v52, %v3077_v7 }
0x1184   : > { %v3083_v42 = vmul.f32 1.442695, %v3081_v15 }
0x1186   : > { %4649 = vpow2.f32 %v3083_v42  ;;  %v4544_v42 = vld [vmem:[%s6135_s15 + $0x2] ss:$0 sm:$0xff] }
0x1189   : > { %v3080_v54 = vpop.xlane.xlu0 %3079 }
0x118a   : > { %v3082_v41 = vsub.f32 %v3074_v12, %v3080_v54  ;;  %v2913_v54 = vadd.f32 %v4544_v42, %v5802_v48 }
0x118c   : > { %v4650_v23 = vpop.eup %4649  ;;  %v3085_v11 = vmul.f32 1.442695, %v3082_v41 }
0x118d   : > { %v3087_v53 = vsel %vm2181_vm12, %v4650_v23, 0.0 }
0x118e   : > { %4651 = vpow2.f32 %v3085_v11  ;;  %3088 = vadd.xlane.f32.xlu1 %v3087_v53  ;;  %v2916_v11 = vadd.f32 %v4544_v42, %v5804_v19 }
0x1194   : > { %v4652_v8 = vpop.eup %4651 }
0x1195   : > { %v3090_v16 = vsel %vm2958_vm14, %v4652_v8, 0.0 }
0x1196   : > { %3091 = vadd.xlane.f32.xlu2 %v3090_v16 }
0x119c   : > { %v5842_v5 = vpop.permute.xlu0 %3278 }
0x11a4   : > { %v5849_v3 = vpop.permute.xlu0 %3159 }
0x11a7   : > { %3276 = vrot.lane.b32.xlu1 %v5184_v49, %s6183_s0 }
0x11ae   : > { %3157 = vrot.lane.b32.xlu2 %v5184_v49, %s6180_s24 }
0x11cd   : > { %v2834_v62 = vpop.xlane.xlu2 %2833 }
0x11ce   : > { %4653 = vrcp.f32 %v2834_v62 }
0x11d4   : > { %v4654_v52 = vpop.eup %4653 }
0x11d5   : > { %v2836_v27 = vmul.f32 %v4654_v52, %v4644_v33 }
0x11d7   : > { %4410 = vmatmul.msk.f32.vlgmr.msra.gmra.mxu1 %vm1648_vm9, %v2836_v27  ;;  %v2970_v55 = vpop.xlane.xlu2 %2969 }
0x11d8   : > { %4430 = vmatpush.msk.msra.mxu1 %vm2196_vm13, %v5566_v9  ;;  %4655 = vrcp.f32 %v2970_v55  ;;  %v4286_v9 = vld [vmem:[%s6134_s14 + $0xf0] sm:$0xff] }
0x11da   : > { %3117 = vmatpush.msra.mxu1 %v4527_v32 }
0x11dc   : > { %3118 = vmatpush.msra.mxu1 %v4528_v39 }
0x11de   : > { %v4656_v24 = vpop.eup %4655 }
0x11df   : > { %v2976_v4 = vmul.f32 %v4656_v24, %v4646_v14  ;;  %v2973_v49 = vpop.xlane.xlu2 %2972 }
0x11e0   : > { %4657 = vrcp.f32 %v2973_v49 }
0x11e1   : > { %4421 = vmatmul.msk.f32.vlgmr.msrb.gmra.mxu1 %vm2181_vm12, %v2976_v4 }
0x11e2   : > { %3266 = vmatpush.msrb.mxu1 %v4286_v9 }
0x11e6   : > { %v4658_v12 = vpop.eup %4657 }
0x11e7   : > { %v2977_v17 = vmul.f32 %v4658_v12, %v4648_v22 }
0x11e9   : > { %4422 = vmatmul.msk.f32.gmra.mxu1 %vm2181_vm12, %v2977_v17 }
0x1201   : > { %v3089_v59 = vpop.xlane.xlu1 %3088 }
0x1202   : > { %4659 = vrcp.f32 %v3089_v59 }
0x1208   : > { %v4660_v32 = vpop.eup %4659 }
0x1209   : > { %v3095_v63 = vmul.f32 %v4660_v32, %v4650_v23  ;;  %v3092_v39 = vpop.xlane.xlu2 %3091 }
0x120a   : > { %4661 = vrcp.f32 %v3092_v39 }
0x120b   : > { %4431 = vmatmul.msk.f32.vlgmr.msra.gmra.mxu1 %vm2181_vm12, %v3095_v63 }
0x120c   : > { %4455 = vmatpush.xpose.msk.msra.mxu1 %vm1113_vm1, %v4946_v31  ;;  %v4279_v31 = vld [vmem:[%s6134_s14 + $0xb8] sm:$0xff] }
0x120d   : > { %2878 = vmatpush.msra.mxu2 %v4279_v31 }
0x120f   : > { %3028 = vmatpush.msrb.mxu2 %v4284_v40 }
0x1210   : > { %v4662_v20 = vpop.eup %4661 }
0x1211   : > { %v5844_v13 = vpop.permute.xlu2 %3157  ;;  %v3096_v33 = vmul.f32 %v4662_v20, %v4652_v8 }
0x1212   : > { %4438 = vmatmul.msk.f32.vlgmr.msra.gmra.mxu3 %vm1113_vm1, %v5844_v13 }
0x1213   : > { %4432 = vmatmul.msk.f32.gmra.mxu1 %vm2181_vm12, %v3096_v33 }
0x1219   : > { %v5875_v29 = vpop.permute.xlu1 %3276 }
0x121a   : > { %4439 = vmatmul.msk.f32.gmra.mxu3 %vm1113_vm1, %v5849_v3 }
0x1254   : > { %v2857_v47 = vpop.f32.mrf.mxu1 }
0x1255   : > { %4411 = vmatmul.msk.f32.vlgmr.msra.gmra.mxu2 %vm1113_vm1, %v2857_v47 }
0x1256   : > { %3147 = vmatpush.msra.mxu2 %v4285_v26 }
0x125e   : > { %v3001_v18 = vpop.f32.mrf.mxu1 }
0x125f   : > { %4423 = vmatmul.msk.f32.vlgmr.msrb.gmra.mxu2 %vm1113_vm1, %v3001_v18 }
0x1260   : > { %4445 = vmatpush.xpose.msk.msrb.mxu2 %vm1113_vm1, %v5583_v35 }
0x1264   : > { %4446 = vmatpush.xpose.msk.msrb.mxu2 %vm1113_vm1, %v5587_v6 }
0x1266   : > { %v3004_v14 = vpop.f32.mrf.mxu1 }
0x1267   : > { %4424 = vmatmul.msk.f32.gmra.mxu2 %vm1113_vm1, %v3004_v14 }
0x1268   : > { %4447 = vmatpush.xpose.msk.msrb.mxu2 %vm1113_vm1, %v5591_v1 }
0x1288   : > { %v3120_v2 = vpop.f32.mrf.mxu1 }
0x1289   : > { %4433 = vmatmul.msk.f32.vlgmr.msra.gmra.mxu2 %vm1113_vm1, %v3120_v2 }
0x128a   : > { %3466 = vmatpush.msra.mxu2 %v5028_v21 }
0x1290   : > { %v3123_v43 = vpop.f32.mrf.mxu1 }
0x1291   : > { %4434 = vmatmul.msk.f32.gmra.mxu2 %vm1113_vm1, %v3123_v43 }
0x1295   : > { %v3182_v22 = vpop.f32.mrf.mxu3 }
0x1296   : > { %v3188_v35 = vmul.f32 %v3182_v22, %v5788_v25 }
0x1298   : > { %v3190_v6 = vsel %vm5375_vm11, -1e+09, %v3188_v35 }
0x1299   : > { %4448 = vmatmul.msk.f32.vlgmr.msrb.gmra.mxu2 %vm1113_vm1, %v5875_v29  ;;  %v3192_v1 = vmul.f32 0.35355338, %v3190_v6 }
0x129b   : > { %v3194_v7 = vsel %vm2181_vm12, %v3192_v1, -inf }
0x129c   : > { %3195 = vmax.xlane.f32.xlu1 %v3194_v7 }
0x12a1   : > { %4449 = vmatmul.msk.f32.gmra.mxu2 %vm1113_vm1, %v5842_v5 }
0x12d8   : > { %v2880_v21 = vpop.f32.mrf.mxu2 }
0x12d9   : > { %v5885_v15 = vadd.f32 %v2880_v21, %v5800_v46  ;;  %v3185_v46 = vpop.f32.mrf.mxu3 }
0x12da   : > { %v3189_v49 = vmul.f32 %v3185_v46, %v5794_v38 }
0x12dc   : > { %v3191_v9 = vsel %vm5375_vm11, -1e+09, %v3189_v49 }
0x12dd   : > { %v3193_v39 = vmul.f32 0.35355338, %v3191_v9 }
0x12df   : > { %v3197_v33 = vsel %vm2958_vm14, %v3193_v39, -inf }
0x12e2   : > { %v3030_v41 = vpop.f32.mrf.mxu2 }
0x12e3   : > { %v3036_v23 = vadd.f32 %v3030_v41, %v2913_v54 }
0x12ea   : > { %v3033_v53 = vpop.f32.mrf.mxu2 }
0x12eb   : > { %v3037_v8 = vadd.f32 %v3033_v53, %v2916_v11 }
0x130c   : > { %v3149_v16 = vpop.f32.mrf.mxu2 }
0x130d   : > { %v5892_v62 = vadd.f32 %v3149_v16, %v3036_v23 }
0x130f   : > { %v3196_v4 = vpop.xlane.xlu1 %3195 }
0x1310   : > { %v3200_v19 = vsub.f32 %v3192_v1, %v3196_v4 }
0x1312   : > { %v3202_v32 = vmul.f32 1.442695, %v3200_v19 }
0x1314   : > { %v3152_v52 = vpop.f32.mrf.mxu2  ;;  %4663 = vpow2.f32 %v3202_v32 }
0x1315   : > { %v5894_v27 = vadd.f32 %v3152_v52, %v3037_v8  ;;  %v4288_v8 = vld [vmem:[%s6134_s14 + $0x100] sm:$0xff] }
0x1316   : > { %3495 = vmatpush.msra.mxu3 %v4288_v8 }
0x131a   : > { %v4664_v40 = vpop.eup %4663 }
0x131b   : > { %v3206_v26 = vsel %vm2181_vm12, %v4664_v40, 0.0 }
0x131c   : > { %v3301_v55 = vpop.f32.mrf.mxu2 }
0x131d   : > { %v3307_v24 = vmul.f32 %v3301_v55, %v5788_v25 }
0x131f   : > { %v3309_v48 = vsel %vm5375_vm11, -1e+09, %v3307_v24 }
0x1320   : > { %v3311_v12 = vmul.f32 0.35355338, %v3309_v48 }
0x1322   : > { %v3313_v17 = vsel %vm2181_vm12, %v3311_v12, -inf }
0x1323   : > { %3314 = vmax.xlane.f32.xlu2 %v3313_v17 }
0x1324   : > { %v3304_v59 = vpop.f32.mrf.mxu2 }
0x1325   : > { %v3308_v63 = vmul.f32 %v3304_v59, %v5794_v38  ;;  %v4287_v38 = vld [vmem:[%s6134_s14 + $0xf8] sm:$0xff] }
0x1326   : > { %3385 = vmatpush.msra.mxu0 %v4287_v38 }
0x1327   : > { %v3310_v25 = vsel %vm5375_vm11, -1e+09, %v3308_v63 }
0x1328   : > { %v3312_v20 = vmul.f32 0.35355338, %v3310_v25 }
0x132a   : > { %v3316_v31 = vsel %vm2958_vm14, %v3312_v20, -inf }
0x132b   : > { %3198 = vmax.xlane.f32.xlu2 %v3197_v33  ;;  %3317 = vmax.xlane.f32.xlu0 %v3316_v31 }
0x1333   : > { %3207 = vadd.xlane.f32.xlu0 %v3206_v26 }
0x1396   : > { %v3315_v47 = vpop.xlane.xlu2 %3314 }
0x1397   : > { %v3319_v36 = vsub.f32 %v3311_v12, %v3315_v47 }
0x1399   : > { %v3321_v18 = vmul.f32 1.442695, %v3319_v36 }
0x139b   : > { %4665 = vpow2.f32 %v3321_v18 }
0x139e   : > { %v3199_v14 = vpop.xlane.xlu2 %3198  ;;  %v3318_v2 = vpop.xlane.xlu0 %3317 }
0x139f   : > { %v3201_v43 = vsub.f32 %v3193_v39, %v3199_v14  ;;  %v3320_v22 = vsub.f32 %v3312_v20, %v3318_v2 }
0x13a1   : > { %v4666_v35 = vpop.eup %4665  ;;  %v3204_v6 = vmul.f32 1.442695, %v3201_v43  ;;  %v3323_v1 = vmul.f32 1.442695, %v3320_v22 }
0x13a2   : > { %v3325_v7 = vsel %vm2181_vm12, %v4666_v35, 0.0 }
0x13a3   : > { %4667 = vpow2.f32 %v3204_v6  ;;  %3326 = vadd.xlane.f32.xlu1 %v3325_v7 }
0x13a4   : > { %4669 = vpow2.f32 %v3323_v1 }
0x13a6   : > { %v3208_v21 = vpop.xlane.xlu0 %3207 }
0x13a7   : > { %4671 = vrcp.f32 %v3208_v21 }
0x13a9   : > { %v4668_v42 = vpop.eup %4667 }
0x13aa   : > { %v4670_v54 = vpop.eup %4669  ;;  %v3209_v41 = vsel %vm2958_vm14, %v4668_v42, 0.0 }
0x13ab   : > { %3210 = vadd.xlane.f32.xlu1 %v3209_v41  ;;  %v3328_v23 = vsel %vm2958_vm14, %v4670_v54, 0.0 }
0x13ac   : > { %3329 = vadd.xlane.f32.xlu2 %v3328_v23 }
0x13ad   : > { %v4672_v11 = vpop.eup %4671 }
0x13ae   : > { %v3214_v53 = vmul.f32 %v4672_v11, %v4664_v40 }
0x13b0   : > { %4441 = vmatmul.msk.f32.vlgmr.msrb.gmra.mxu0 %vm2181_vm12, %v3214_v53 }
0x13b1   : > { %4462 = vmatpush.xpose.msk.msrb.mxu0 %vm1113_vm1, %v4971_v37 }
0x1416   : > { %v3327_v16 = vpop.xlane.xlu1 %3326 }
0x1417   : > { %4673 = vrcp.f32 %v3327_v16 }
0x141d   : > { %v4674_v52 = vpop.eup %4673 }
0x141e   : > { %v3333_v46 = vmul.f32 %v4674_v52, %v4666_v35  ;;  %v3211_v55 = vpop.xlane.xlu1 %3210 }
0x141f   : > { %v3330_v24 = vpop.xlane.xlu2 %3329  ;;  %4675 = vrcp.f32 %v3211_v55 }
0x1420   : > { %4677 = vrcp.f32 %v3330_v24  ;;  %4451 = vmatmul.msk.f32.vlgmr.msrb.gmra.mxu3 %vm2181_vm12, %v3333_v46 }
0x1421   : > { %4469 = vmatpush.xpose.msk.msrb.mxu3 %vm1113_vm1, %v5077_v58 }
0x1425   : > { %v4676_v4 = vpop.eup %4675 }
0x1426   : > { %v4678_v37 = vpop.eup %4677  ;;  %v3215_v49 = vmul.f32 %v4676_v4, %v4668_v42  ;;  %v4289_v4 = vld [vmem:[%s6134_s14 + $0x108] sm:$0xff] }
0x1427   : > { %v3334_v48 = vmul.f32 %v4678_v37, %v4670_v54  ;;  %3604 = vmatpush.msrb.mxu2 %v4289_v4 }
0x1428   : > { %4442 = vmatmul.msk.f32.gmra.mxu0 %vm2181_vm12, %v3215_v49 }
0x1429   : > { %4452 = vmatmul.msk.f32.gmra.mxu3 %vm2181_vm12, %v3334_v48 }
0x142d   : > { %v3239_v12 = vpop.f32.mrf.mxu0 }
0x142e   : > { %4443 = vmatmul.msk.f32.vlgmr.msrb.gmra.mxu1 %vm1113_vm1, %v3239_v12 }
0x142f   : > { %3575 = vmatpush.msrb.mxu1 %v5058_v50 }
0x14a3   : > { %v3358_v19 = vpop.f32.mrf.mxu3 }
0x14a4   : > { %4453 = vmatmul.msk.f32.vlgmr.msra.gmra.mxu0 %vm1113_vm1, %v3358_v19 }
0x14a5   : > { %3684 = vmatpush.msra.mxu0 %v5122_v30  ;;  %v3242_v17 = vpop.f32.mrf.mxu0 }
0x14a6   : > { %4444 = vmatmul.msk.f32.gmra.mxu1 %vm1113_vm1, %v3242_v17 }
0x14ab   : > { %v3268_v50 = vpop.f32.mrf.mxu1 }
0x14ac   : > { %v3361_v58 = vpop.f32.mrf.mxu3  ;;  %v3274_v30 = vadd.f32 %v3268_v50, %v5892_v62 }
0x14ad   : > { %4454 = vmatmul.msk.f32.gmra.mxu0 %vm1113_vm1, %v3361_v58 }
0x14ae   : > { %4456 = vmatmul.msk.f32.vlgmr.msra.gmra.mxu1 %vm1113_vm1, %v5731_v57 }
0x14b5   : > { %4463 = vmatmul.msk.f32.vlgmr.msrb.gmra.mxu0 %vm1113_vm1, %v5772_v0 }
0x14b6   : > { %4457 = vmatmul.msk.f32.gmra.mxu1 %vm1113_vm1, %v5743_v28 }
0x14bd   : > { %4464 = vmatmul.msk.f32.gmra.mxu0 %vm1113_vm1, %v5776_v10 }
0x1521   : > { %v3387_v9 = vpop.f32.mrf.mxu0 }
0x1522   : > { %v5941_v59 = vadd.f32 %v3387_v9, %v3274_v30 }
0x1523   : > { %v3271_v32 = vpop.f32.mrf.mxu1 }
0x1524   : > { %v3275_v63 = vadd.f32 %v3271_v32, %v5894_v27 }
0x152a   : > { %v3390_v39 = vpop.f32.mrf.mxu0 }
0x152b   : > { %v5944_v57 = vadd.f32 %v3390_v39, %v3275_v63  ;;  %v3412_v25 = vpop.f32.mrf.mxu1 }
0x152c   : > { %v3418_v0 = vsel %vm4996_vm3, -1e+09, %v3412_v25 }
0x152d   : > { %v3420_v28 = vmul.f32 0.35355338, %v3418_v0 }
0x152f   : > { %v3422_v20 = vsel %vm1113_vm1, %v3420_v28, -inf }
0x1530   : > { %3423 = vmax.xlane.f32.xlu0 %v3422_v20 }
0x1532   : > { %v3522_v10 = vpop.f32.mrf.mxu0 }
0x1533   : > { %v3528_v62 = vsel %vm4996_vm3, -1e+09, %v3522_v10  ;;  %v3415_v33 = vpop.f32.mrf.mxu1 }
0x1534   : > { %v3530_v31 = vmul.f32 0.35355338, %v3528_v62  ;;  %v3419_v27 = vsel %vm4996_vm3, -1e+09, %v3415_v33 }
0x1535   : > { %v3421_v40 = vmul.f32 0.35355338, %v3419_v27 }
0x1536   : > { %v3532_v26 = vsel %vm1113_vm1, %v3530_v31, -inf }
0x1537   : > { %3533 = vmax.xlane.f32.xlu2 %v3532_v26  ;;  %v3426_v38 = vsel %vm3425_vm15, %v3421_v40, -inf }
0x1538   : > { %3427 = vmax.xlane.f32.xlu1 %v3426_v38 }
0x153a   : > { %v3525_v47 = vpop.f32.mrf.mxu0 }
0x153b   : > { %v3529_v36 = vsel %vm4996_vm3, -1e+09, %v3525_v47 }
0x153c   : > { %v3531_v18 = vmul.f32 0.35355338, %v3529_v36 }
0x153e   : > { %v3535_v14 = vsel %vm3425_vm15, %v3531_v18, -inf }
0x153f   : > { %3536 = vmax.xlane.f32.xlu0 %v3535_v14 }
0x15a3   : > { %v3424_v2 = vpop.xlane.xlu0 %3423 }
0x15a4   : > { %v3429_v43 = vsub.f32 %v3420_v28, %v3424_v2 }
0x15a6   : > { %v3431_v22 = vmul.f32 1.442695, %v3429_v43 }
0x15a8   : > { %4679 = vpow2.f32 %v3431_v22 }
0x15aa   : > { %v3534_v35 = vpop.xlane.xlu2 %3533 }
0x15ab   : > { %v3538_v6 = vsub.f32 %v3530_v31, %v3534_v35  ;;  %v3428_v1 = vpop.xlane.xlu1 %3427 }
0x15ac   : > { %v3430_v7 = vsub.f32 %v3421_v40, %v3428_v1 }
0x15ad   : > { %v3540_v21 = vmul.f32 1.442695, %v3538_v6 }
0x15ae   : > { %v4680_v42 = vpop.eup %4679  ;;  %v3433_v54 = vmul.f32 1.442695, %v3430_v7 }
0x15af   : > { %4681 = vpow2.f32 %v3540_v21  ;;  %v3435_v41 = vsel %vm1113_vm1, %v4680_v42, 0.0 }
0x15b0   : > { %4683 = vpow2.f32 %v3433_v54  ;;  %3436 = vadd.xlane.f32.xlu2 %v3435_v41 }
0x15b2   : > { %v3537_v23 = vpop.xlane.xlu0 %3536 }
0x15b3   : > { %v3539_v11 = vsub.f32 %v3531_v18, %v3537_v23 }
0x15b5   : > { %v4682_v53 = vpop.eup %4681  ;;  %v3542_v8 = vmul.f32 1.442695, %v3539_v11 }
0x15b6   : > { %v4684_v16 = vpop.eup %4683  ;;  %v3544_v52 = vsel %vm1113_vm1, %v4682_v53, 0.0 }
0x15b7   : > { %4685 = vpow2.f32 %v3542_v8  ;;  %3545 = vadd.xlane.f32.xlu1 %v3544_v52  ;;  %v3438_v46 = vsel %vm3425_vm15, %v4684_v16, 0.0 }
0x15b8   : > { %3439 = vadd.xlane.f32.xlu0 %v3438_v46 }
0x15bd   : > { %v4686_v55 = vpop.eup %4685 }
0x15be   : > { %v3547_v24 = vsel %vm3425_vm15, %v4686_v55, 0.0 }
0x15bf   : > { %3548 = vadd.xlane.f32.xlu2 %v3547_v24 }
0x1623   : > { %v3437_v37 = vpop.xlane.xlu2 %3436 }
0x1624   : > { %4687 = vrcp.f32 %v3437_v37 }
0x162a   : > { %v4688_v49 = vpop.eup %4687  ;;  %v3546_v48 = vpop.xlane.xlu1 %3545 }
0x162b   : > { %v3443_v12 = vmul.f32 %v4688_v49, %v4680_v42  ;;  %4689 = vrcp.f32 %v3546_v48  ;;  %v3440_v19 = vpop.xlane.xlu0 %3439 }
0x162c   : > { %4691 = vrcp.f32 %v3440_v19  ;;  %v4727_v19 = vld [vmem:[%s4915_s25] sm:$0xff]  ;;  %s6184_s25 = sld [smem:[#allocation13_spill]] }
0x162d   : > { %4458 = vmatmul.msk.f32.vlgmr.msra.gmra.mxu2 %vm1113_vm1, %v3443_v12 }
0x162e   : > { %4476 = vmatpush.xpose.msk.msra.mxu2 %vm1113_vm1, %v5063_v51 }
0x1631   : > { %v4690_v17 = vpop.eup %4689 }
0x1632   : > { %v4692_v58 = vpop.eup %4691  ;;  %v3552_v50 = vmul.f32 %v4690_v17, %v4682_v53  ;;  %v3549_v30 = vpop.xlane.xlu2 %3548  ;;  %v6011_v17 = vadd.f32 %v4727_v19, %v5885_v15  ;;  %s823_s30 = scalar_lea.vmem %s6184_s25, %s4904_s29 }
0x1633   : > { %4693 = vrcp.f32 %v3549_v30  ;;  %v3444_v9 = vmul.f32 %v4692_v58, %v4684_v16  ;;  %v4728_v58 = vld [vmem:[%s4886_s21 + $0x8] sm:$0xff] }
0x1634   : > { %4465 = vmatmul.msk.f32.vlgmr.msrb.gmra.mxu1 %vm1113_vm1, %v3552_v50  ;;  %v6015_v50 = vadd.f32 %v4728_v58, %v5531_v34 }
0x1635   : > { %4459 = vmatmul.msk.f32.gmra.mxu2 %vm1113_vm1, %v3444_v9  ;;  %v4749_v9 = vmov 32.0  }
0x1636   : > { %v3839_v30 = vsel %vm844_vm0, %v6015_v50, 0.0 }
0x1639   : > { %v4694_v32 = vpop.eup %4693 }
0x163a   : > { %v3553_v63 = vmul.f32 %v4694_v32, %v4686_v55  ;;  %v4726_v55 = vld [vmem:[%s4886_s21] sm:$0xff] }
0x163b   : > { %v3832_v24 = vadd.f32 %v4726_v55, %v5529_v56  ;;  %v3904_v56 = vsel %vm844_vm0, %v6011_v17, 0.0 }
0x163c   : > { %4466 = vmatmul.msk.f32.gmra.mxu1 %vm1113_vm1, %v3553_v63 }
0x163d   : > { %v3836_v37 = vsel %vm844_vm0, %v3832_v24, 0.0 }
0x16b0   : > { %v3468_v39 = vpop.f32.mrf.mxu2 }
0x16b1   : > { %v3577_v25 = vpop.f32.mrf.mxu1  ;;  %4460 = vmatmul.msk.f32.vlgmr.msra.gmra.mxu3 %vm1113_vm1, %v3468_v39 }
0x16b2   : > { %4467 = vmatmul.msk.f32.vlgmr.msrb.gmra.mxu2 %vm1113_vm1, %v3577_v25  ;;  %3793 = vmatpush.msra.mxu3 %v5129_v44 }
0x16b8   : > { %v3471_v51 = vpop.f32.mrf.mxu2 }
0x16b9   : > { %v3580_v0 = vpop.f32.mrf.mxu1  ;;  %4461 = vmatmul.msk.f32.gmra.mxu3 %vm1113_vm1, %v3471_v51 }
0x16ba   : > { %4468 = vmatmul.msk.f32.gmra.mxu2 %vm1113_vm1, %v3580_v0 }
0x16c1   : > { %4470 = vmatmul.msk.f32.vlgmr.msrb.gmra.mxu3 %vm1113_vm1, %v5844_v13 }
0x16c2   : > { %4477 = vmatmul.msk.f32.vlgmr.msra.gmra.mxu2 %vm1113_vm1, %v5875_v29 }
0x16c9   : > { %4471 = vmatmul.msk.f32.gmra.mxu3 %vm1113_vm1, %v5849_v3 }
0x16ca   : > { %4478 = vmatmul.msk.f32.gmra.mxu2 %vm1113_vm1, %v5842_v5 }
0x1734   : > { %v3497_v28 = vpop.f32.mrf.mxu3 }
0x1735   : > { %v3503_v44 = vadd.f32 %v3497_v28, %v5941_v59  ;;  %v3606_v20 = vpop.f32.mrf.mxu2 }
0x1737   : > { %v5985_v10 = vadd.f32 %v3606_v20, %v3503_v44 }
0x173c   : > { %v3500_v62 = vpop.f32.mrf.mxu3 }
0x173d   : > { %v3504_v33 = vadd.f32 %v3500_v62, %v5944_v57  ;;  %v3609_v31 = vpop.f32.mrf.mxu2 }
0x173f   : > { %v5988_v13 = vadd.f32 %v3609_v31, %v3504_v33 }
0x1744   : > { %v3631_v27 = vpop.f32.mrf.mxu3 }
0x1745   : > { %v3637_v29 = vsel %vm4996_vm3, -1e+09, %v3631_v27  ;;  %v3740_v3 = vpop.f32.mrf.mxu2 }
0x1746   : > { %v3639_v40 = vmul.f32 0.35355338, %v3637_v29  ;;  %v3746_v5 = vsel %vm4996_vm3, -1e+09, %v3740_v3 }
0x1747   : > { %v3748_v26 = vmul.f32 0.35355338, %v3746_v5 }
0x1748   : > { %v3641_v59 = vsel %vm1113_vm1, %v3639_v40, -inf }
0x1749   : > { %3642 = vmax.xlane.f32.xlu0 %v3641_v59  ;;  %v3750_v38 = vsel %vm1113_vm1, %v3748_v26, -inf }
0x174a   : > { %3751 = vmax.xlane.f32.xlu1 %v3750_v38 }
0x174c   : > { %v3634_v57 = vpop.f32.mrf.mxu3 }
0x174d   : > { %v3638_v47 = vsel %vm4996_vm3, -1e+09, %v3634_v57  ;;  %v3743_v36 = vpop.f32.mrf.mxu2 }
0x174e   : > { %v3640_v18 = vmul.f32 0.35355338, %v3638_v47  ;;  %v3747_v14 = vsel %vm4996_vm3, -1e+09, %v3743_v36  ;;  %v4290_v47 = vld [vmem:[%s6134_s14 + $0x110] sm:$0xff]  ;;  %v4291_v36 = vld [vmem:[%s6134_s14 + $0x118] sm:$0xff] }
0x174f   : > { %v3749_v2 = vmul.f32 0.35355338, %v3747_v14  ;;  %3713 = vmatpush.msra.mxu1 %v4290_v47  ;;  %3822 = vmatpush.msrb.mxu0 %v4291_v36 }
0x1750   : > { %v3644_v43 = vsel %vm3425_vm15, %v3640_v18, -inf }
0x1751   : > { %v3753_v22 = vsel %vm3425_vm15, %v3749_v2, -inf }
0x1752   : > { %3645 = vmax.xlane.f32.xlu1 %v3644_v43  ;;  %3754 = vmax.xlane.f32.xlu2 %v3753_v22 }
0x17bc   : > { %v3643_v35 = vpop.xlane.xlu0 %3642 }
0x17bd   : > { %v3647_v6 = vsub.f32 %v3639_v40, %v3643_v35  ;;  %v3752_v1 = vpop.xlane.xlu1 %3751 }
0x17be   : > { %v3756_v7 = vsub.f32 %v3748_v26, %v3752_v1 }
0x17bf   : > { %v3649_v21 = vmul.f32 1.442695, %v3647_v6 }
0x17c0   : > { %v3758_v42 = vmul.f32 1.442695, %v3756_v7 }
0x17c1   : > { %4695 = vpow2.f32 %v3649_v21 }
0x17c2   : > { %4697 = vpow2.f32 %v3758_v42 }
0x17c5   : > { %v3646_v54 = vpop.xlane.xlu1 %3645  ;;  %v3755_v41 = vpop.xlane.xlu2 %3754 }
0x17c6   : > { %v3648_v45 = vsub.f32 %v3640_v18, %v3646_v54  ;;  %v3757_v23 = vsub.f32 %v3749_v2, %v3755_v41 }
0x17c7   : > { %v4696_v11 = vpop.eup %4695 }
0x17c8   : > { %v4698_v53 = vpop.eup %4697  ;;  %v3651_v8 = vmul.f32 1.442695, %v3648_v45  ;;  %v3760_v16 = vmul.f32 1.442695, %v3757_v23  ;;  %v3653_v52 = vsel %vm1113_vm1, %v4696_v11, 0.0 }
0x17c9   : > { %v3762_v46 = vsel %vm1113_vm1, %v4698_v53, 0.0  ;;  %3654 = vadd.xlane.f32.xlu2 %v3653_v52  ;;  %v6042_v23 = vld [vmem:[%s6136_s16] ss:$0 sm:$0xff] }
0x17ca   : > { %4699 = vpow2.f32 %v3651_v8  ;;  %3763 = vadd.xlane.f32.xlu0 %v3762_v46 }
0x17cb   : > { %4701 = vpow2.f32 %v3760_v16 }
0x17cc   : > { %4703 = vrcp.f32 %v4749_v9 }
0x17d0   : > { %v4700_v4 = vpop.eup %4699 }
0x17d1   : > { %v4702_v49 = vpop.eup %4701  ;;  %v3656_v48 = vsel %vm3425_vm15, %v4700_v4, 0.0  ;;  %3837 = vadd.xlane.f32.xlu2 %v3836_v37 }
0x17d2   : > { %3657 = vadd.xlane.f32.xlu0 %v3656_v48  ;;  %v3765_v12 = vsel %vm3425_vm15, %v4702_v49, 0.0  ;;  %v4704_v32 = vpop.eup %4703 }
0x17d3   : > { %3766 = vadd.xlane.f32.xlu1 %v3765_v12  ;;  %v3843_v63 = vmul.f32 32.0, %v4704_v32  ;;  %vm3847_vm2 = vweird.f32 %v4704_v32 }
0x17d5   : > { %v3844_v39 = vsub.f32 1.0, %v3843_v63 }
0x17d7   : > { %v3845_v25 = vmul.f32 %v4704_v32, %v3844_v39 }
0x17d9   : > { %v3846_v34 = vadd.f32 %v4704_v32, %v3845_v25 }
0x17da   : > { %3905 = vadd.xlane.f32.xlu0 %v3904_v56 }
0x17db   : > { %3840 = vadd.xlane.f32.xlu1 %v3839_v30  ;;  %v6021_v0 = vsel %vm3847_vm2, %v4704_v32, %v3846_v34 }
0x183c   : > { %v3655_v15 = vpop.xlane.xlu2 %3654 }
0x183d   : > { %v3764_v51 = vpop.xlane.xlu0 %3763  ;;  %4705 = vrcp.f32 %v3655_v15 }
0x183e   : > { %4707 = vrcp.f32 %v3764_v51 }
0x1843   : > { %v4706_v28 = vpop.eup %4705 }
0x1844   : > { %v4708_v44 = vpop.eup %4707  ;;  %v3661_v20 = vmul.f32 %v4706_v28, %v4696_v11  ;;  %v3838_v62 = vpop.xlane.xlu2 %3837 }
0x1845   : > { %v3770_v33 = vmul.f32 %v4708_v44, %v4698_v53  ;;  %v3658_v31 = vpop.xlane.xlu0 %3657  ;;  %v3849_v27 = vmul.f32 %v6021_v0, %v3838_v62  ;;  %v6048_v53 = vld [vmem:[%s6137_s17] ss:$0 sm:$0xff] }
0x1846   : > { %4709 = vrcp.f32 %v3658_v31  ;;  %v3767_v29 = vpop.xlane.xlu1 %3766  ;;  %4472 = vmatmul.msk.f32.vlgmr.msra.gmra.mxu0 %vm1113_vm1, %v3661_v20 }
0x1847   : > { %4711 = vrcp.f32 %v3767_v29  ;;  %v3851_v3 = vsub.f32 %v3832_v24, %v3849_v27  ;;  %4479 = vmatmul.msk.f32.vlgmr.msra.gmra.mxu3 %vm1113_vm1, %v3770_v33 }
0x1849   : > { %v3853_v40 = vmul.f32 %v3851_v3, %v3851_v3 }
0x184b   : > { %v3855_v5 = vsel %vm844_vm0, %v3853_v40, 0.0 }
0x184c   : > { %v4710_v26 = vpop.eup %4709  ;;  %3856 = vadd.xlane.f32.xlu0 %v3855_v5 }
0x184d   : > { %v4712_v59 = vpop.eup %4711  ;;  %v3662_v38 = vmul.f32 %v4710_v26, %v4700_v4  ;;  %v3906_v18 = vpop.xlane.xlu0 %3905 }
0x184e   : > { %v3771_v57 = vmul.f32 %v4712_v59, %v4702_v49  ;;  %v3841_v55 = vpop.xlane.xlu1 %3840  ;;  %v3907_v32 = vmul.f32 %v3906_v18, %v6021_v0 }
0x184f   : > { %4473 = vmatmul.msk.f32.gmra.mxu0 %vm1113_vm1, %v3662_v38  ;;  %v3850_v37 = vmul.f32 %v6021_v0, %v3841_v55 }
0x1850   : > { %4480 = vmatmul.msk.f32.gmra.mxu3 %vm1113_vm1, %v3771_v57  ;;  %v3908_v25 = vsub.f32 %v6011_v17, %v3907_v32 }
0x1851   : > { %v3852_v12 = vsub.f32 %v6015_v50, %v3850_v37 }
0x1852   : > { %v3909_v50 = vmul.f32 %v3908_v25, %v3908_v25 }
0x1853   : > { %v3854_v9 = vmul.f32 %v3852_v12, %v3852_v12 }
0x1854   : > { %v3910_v15 = vsel %vm844_vm0, %v3909_v50, 0.0 }
0x1855   : > { %v3858_v39 = vsel %vm844_vm0, %v3854_v9, 0.0 }
0x18bf   : > { %v3857_v14 = vpop.xlane.xlu0 %3856 }
0x18c0   : > { %v3861_v2 = vmul.f32 %v3857_v14, %v6021_v0 }
0x18c2   : > { %v3863_v43 = vadd.f32 1e-05, %v3861_v2 }
0x18c3   : > { %v3686_v22 = vpop.f32.mrf.mxu0 }
0x18c4   : > { %4713 = vrsqrt.f32 %v3863_v43  ;;  %4474 = vmatmul.msk.f32.vlgmr.msra.gmra.mxu1 %vm1113_vm1, %v3686_v22  ;;  %vm3871_vm4 = vweird.f32 %v3863_v43 }
0x18ca   : > { %v4714_v35 = vpop.eup %4713  ;;  %v3795_v6 = vpop.f32.mrf.mxu3 }
0x18cb   : > { %v3866_v1 = vmul.f32 %v4714_v35, %v3863_v43  ;;  %4481 = vmatmul.msk.f32.vlgmr.msrb.gmra.mxu0 %vm1113_vm1, %v3795_v6  ;;  %vm3872_vm3 = vweird.f32 %v4714_v35 }
0x18cc   : > { %v3689_v7 = vpop.f32.mrf.mxu0  ;;  %vm3873_vm6 = vmor %vm3871_vm4, %vm3872_vm3 }
0x18cd   : > { %v3867_v21 = vmul.f32 %v4714_v35, %v3866_v1  ;;  %4475 = vmatmul.msk.f32.gmra.mxu1 %vm1113_vm1, %v3689_v7 }
0x18cf   : > { %v3868_v42 = vmul.f32 0.5, %v3867_v21 }
0x18d1   : > { %v3869_v54 = vsub.f32 1.5, %v3868_v42  ;;  %v4547_v42 = vld [vmem:[%s6136_s16 + $0x1] ss:$0 sm:$0xff] }
0x18d3   : > { %v3870_v41 = vmul.f32 %v4714_v35, %v3869_v54  ;;  %v3798_v45 = vpop.f32.mrf.mxu3 }
0x18d4   : > { %4482 = vmatmul.msk.f32.gmra.mxu0 %vm1113_vm1, %v3798_v45 }
0x18d5   : > { %v3874_v11 = vsel %vm3873_vm6, %v4714_v35, %v3870_v41  ;;  %v4548_v41 = vld [vmem:[%s6137_s17 + $0x1] ss:$0 sm:$0xff] }
0x18d6   : > { %v3885_v8 = vmul.f32 %v3874_v11, %v3851_v3 }
0x18d8   : > { %v3890_v16 = vmul.f32 %v6042_v23, %v3885_v8 }
0x18da   : > { %v3895_v52 = vadd.f32 %v6048_v53, %v3890_v16 }
0x18dc   : > { %3897 = vst.msk [vmem:[%s6055_s2] sm:$0xff] %vm844_vm0, %v3895_v52 }
0x1941   : > { %v3715_v46 = vpop.f32.mrf.mxu1 }
0x1942   : > { %v3721_v24 = vadd.f32 %v3715_v46, %v5985_v10 }
0x1948   : > { %v3824_v4 = vpop.f32.mrf.mxu0 }
0x1949   : > { %v3830_v49 = vadd.f32 %v3824_v4, %v3721_v24 }
0x194a   : > { %v3718_v19 = vpop.f32.mrf.mxu1 }
0x194b   : > { %v3935_v48 = vadd.f32 %v5755_v61, %v3830_v49  ;;  %v3722_v56 = vadd.f32 %v3718_v19, %v5988_v13 }
0x194d   : > { %v3941_v58 = vsel %vm844_vm0, %v3935_v48, 0.0 }
0x194e   : > { %3942 = vadd.xlane.f32.xlu2 %v3941_v58  ;;  %v4549_v58 = vld [vmem:[%s6136_s16 + $0x2] ss:$0 sm:$0xff] }
0x1951   : > { %v3827_v30 = vpop.f32.mrf.mxu0 }
0x1952   : > { %v3831_v63 = vadd.f32 %v3827_v30, %v3722_v56 }
0x1954   : > { %v3936_v10 = vadd.f32 %v5768_v60, %v3831_v63 }
0x1956   : > { %3859 = vadd.xlane.f32.xlu2 %v3858_v39  ;;  %v3944_v61 = vsel %vm1003_vm5, %v3936_v10, 0.0 }
0x1957   : > { %3945 = vadd.xlane.f32.xlu1 %v3944_v61 }
0x195f   : > { %3911 = vadd.xlane.f32.xlu1 %v3910_v15 }
0x19c1   : > { %v3943_v13 = vpop.xlane.xlu2 %3942 }
0x19c2   : > { %v3947_v51 = vmul.f32 %v3943_v13, %v6021_v0 }
0x19c4   : > { %v6073_v34 = vsub.f32 %v3935_v48, %v3947_v51 }
0x19c6   : > { %v3951_v60 = vmul.f32 %v6073_v34, %v6073_v34 }
0x19c8   : > { %v3953_v28 = vsel %vm844_vm0, %v3951_v60, 0.0 }
0x19c9   : > { %v3860_v44 = vpop.xlane.xlu2 %3859  ;;  %3954 = vadd.xlane.f32.xlu0 %v3953_v28 }
0x19ca   : > { %v3862_v17 = vmul.f32 %v3860_v44, %v6021_v0  ;;  %v3946_v20 = vpop.xlane.xlu1 %3945 }
0x19cb   : > { %v3948_v62 = vmul.f32 %v3946_v20, %v6021_v0 }
0x19cc   : > { %v3864_v33 = vadd.f32 1e-05, %v3862_v17 }
0x19cd   : > { %v6080_v31 = vsub.f32 %v3936_v10, %v3948_v62 }
0x19ce   : > { %4715 = vrsqrt.f32 %v3864_v33  ;;  %vm3881_vm7 = vweird.f32 %v3864_v33 }
0x19cf   : > { %v3952_v27 = vmul.f32 %v6080_v31, %v6080_v31 }
0x19d1   : > { %v3956_v29 = vsel %vm1003_vm5, %v3952_v27, 0.0 }
0x19d2   : > { %3957 = vadd.xlane.f32.xlu2 %v3956_v29  ;;  %v3912_v3 = vpop.xlane.xlu1 %3911 }
0x19d3   : > { %v3913_v40 = vmul.f32 %v3912_v3, %v6021_v0 }
0x19d4   : > { %v4716_v5 = vpop.eup %4715 }
0x19d5   : > { %v3876_v26 = vmul.f32 %v4716_v5, %v3864_v33  ;;  %v3914_v59 = vadd.f32 1e-05, %v3913_v40  ;;  %vm3882_vm1 = vweird.f32 %v4716_v5 }
0x19d6   : > { %vm3883_vm8 = vmor %vm3881_vm7, %vm3882_vm1 }
0x19d7   : > { %v3877_v38 = vmul.f32 %v4716_v5, %v3876_v26  ;;  %4717 = vrsqrt.f32 %v3914_v59  ;;  %vm3921_vm10 = vweird.f32 %v3914_v59 }
0x19d9   : > { %v3878_v57 = vmul.f32 0.5, %v3877_v38 }
0x19db   : > { %v3879_v47 = vsub.f32 1.5, %v3878_v57 }
0x19dd   : > { %v4718_v36 = vpop.eup %4717  ;;  %v3880_v18 = vmul.f32 %v4716_v5, %v3879_v47 }
0x19de   : > { %v3916_v14 = vmul.f32 %v4718_v36, %v3914_v59  ;;  %vm3922_vm9 = vweird.f32 %v4718_v36 }
0x19df   : > { %v3884_v2 = vsel %vm3883_vm8, %v4716_v5, %v3880_v18  ;;  %vm3923_vm11 = vmor %vm3921_vm10, %vm3922_vm9 }
0x19e0   : > { %v3886_v43 = vmul.f32 %v3884_v2, %v3852_v12  ;;  %v3917_v22 = vmul.f32 %v4718_v36, %v3916_v14 }
0x19e2   : > { %v3891_v35 = vmul.f32 %v6042_v23, %v3886_v43  ;;  %v3918_v6 = vmul.f32 0.5, %v3917_v22 }
0x19e4   : > { %v3896_v1 = vadd.f32 %v6048_v53, %v3891_v35  ;;  %v3919_v7 = vsub.f32 1.5, %v3918_v6 }
0x19e6   : > { %3898 = vst.msk [vmem:[%s6055_s2 + $0x8] sm:$0xff] %vm844_vm0, %v3896_v1  ;;  %v3920_v21 = vmul.f32 %v4718_v36, %v3919_v7 }
0x19e8   : > { %v3924_v54 = vsel %vm3923_vm11, %v4718_v36, %v3920_v21 }
0x19e9   : > { %v3925_v45 = vmul.f32 %v3924_v54, %v3908_v25 }
0x19eb   : > { %v3929_v23 = vmul.f32 %v4547_v42, %v3925_v45 }
0x19ed   : > { %v3933_v11 = vadd.f32 %v4548_v41, %v3929_v23 }
0x19ef   : > { %3934 = vst.msk [vmem:[%s823_s30] sm:$0xff] %vm844_vm0, %v3933_v11 }
0x1a3c   : > { %v3955_v53 = vpop.xlane.xlu0 %3954 }
0x1a3d   : > { %v3959_v8 = vmul.f32 %v3955_v53, %v6021_v0 }
0x1a3f   : > { %v3961_v16 = vadd.f32 1e-05, %v3959_v8 }
0x1a41   : > { %4719 = vrsqrt.f32 %v3961_v16  ;;  %vm3969_vm13 = vweird.f32 %v3961_v16 }
0x1a45   : > { %v3958_v52 = vpop.xlane.xlu2 %3957 }
0x1a46   : > { %v3960_v46 = vmul.f32 %v3958_v52, %v6021_v0  ;;  %v4550_v0 = vld [vmem:[%s6137_s17 + $0x2] ss:$0 sm:$0xff] }
0x1a47   : > { %v4720_v55 = vpop.eup %4719 }
0x1a48   : > { %v3964_v24 = vmul.f32 %v4720_v55, %v3961_v16  ;;  %v3962_v4 = vadd.f32 1e-05, %v3960_v46  ;;  %vm3970_vm12 = vweird.f32 %v4720_v55 }
0x1a49   : > { %vm3971_vm14 = vmor %vm3969_vm13, %vm3970_vm12 }
0x1a4a   : > { %v3965_v37 = vmul.f32 %v4720_v55, %v3964_v24  ;;  %4721 = vrsqrt.f32 %v3962_v4  ;;  %vm3979_vm2 = vweird.f32 %v3962_v4 }
0x1a4c   : > { %v3966_v49 = vmul.f32 0.5, %v3965_v37 }
0x1a4e   : > { %v3967_v48 = vsub.f32 1.5, %v3966_v49 }
0x1a50   : > { %v4722_v12 = vpop.eup %4721  ;;  %v3968_v19 = vmul.f32 %v4720_v55, %v3967_v48 }
0x1a51   : > { %v3974_v56 = vmul.f32 %v4722_v12, %v3962_v4  ;;  %vm3980_vm15 = vweird.f32 %v4722_v12 }
0x1a52   : > { %v3972_v30 = vsel %vm3971_vm14, %v4720_v55, %v3968_v19  ;;  %vm3981_vm3 = vmor %vm3979_vm2, %vm3980_vm15 }
0x1a53   : > { %v3983_v9 = vmul.f32 %v3972_v30, %v6073_v34  ;;  %v3975_v32 = vmul.f32 %v4722_v12, %v3974_v56 }
0x1a55   : > { %v3988_v63 = vmul.f32 %v4549_v58, %v3983_v9  ;;  %v3976_v10 = vmul.f32 0.5, %v3975_v32 }
0x1a57   : > { %v3993_v39 = vadd.f32 %v4550_v0, %v3988_v63  ;;  %v3977_v25 = vsub.f32 1.5, %v3976_v10 }
0x1a59   : > { %3995 = vst.msk [vmem:[%s828_s1] sm:$0xff] %vm844_vm0, %v3993_v39  ;;  %v3978_v61 = vmul.f32 %v4722_v12, %v3977_v25 }
0x1a5b   : > { %v3982_v50 = vsel %vm3981_vm3, %v4722_v12, %v3978_v61 }
0x1a5c   : > { %v3984_v15 = vmul.f32 %v3982_v50, %v6080_v31 }
0x1a5e   : > { %v3989_v13 = vmul.f32 %v4549_v58, %v3984_v15 }
0x1a60   : > { %v3994_v51 = vadd.f32 %v4550_v0, %v3989_v13 }
0x1a62   : > { %3996 = vst.msk [vmem:[%s828_s1 + $0x8] sm:$0xf] %vm1003_vm5, %v3994_v51 }
0x1a63 PF: > { %s6186_s2 = sld [smem:[#allocation6_spill]] }
0x1a69   : > { %s31_s1 = sadd.s32 1, %s6186_s2  }
0x1a6a   : > { %p28_p4 = scmp.ge.s32.totalorder %s31_s1, 4  }
0x1a6c   :  { %30 = sbr.rel (!%p28_p4) target bundleno = 9 (0x9), region = 191 }

</bundles_post_ra>
